<compile_context>
chip_gen: v7x
topology: tpu7x:2x2x1
jax: 0.10.0
libtpu: 0.0.40
codegen_flags: <defaults>
</compile_context>

<pallas_src>
import math
import functools

import jax
import jax.numpy as jnp
from jax.experimental import pallas as pl
from jax.experimental.pallas import tpu as pltpu


# ----------------------------------------------------------------------------
# Math helpers (shared by the Pallas kernel and the pure-JAX reference)
# ----------------------------------------------------------------------------
_SQRT_2_OVER_PI = math.sqrt(2.0 / math.pi)


def _gelu(x):
    # TODO(synk): PyTorch F.gelu / nn.GELU default is exact erf; tanh formulation is
    # used here (EUP tanh) since Mosaic has no guaranteed erf lowering.
    return 0.5 * x * (1.0 + jnp.tanh(_SQRT_2_OVER_PI * (x + 0.044715 * x * x * x)))


def _layernorm(x, g, b, eps=1e-5):
    mu = jnp.mean(x, axis=-1, keepdims=True)
    var = jnp.mean(jnp.square(x - mu), axis=-1, keepdims=True)
    return (x - mu) * jax.lax.rsqrt(var + eps) * g + b


def _softmax_rows(e):
    m = jnp.max(e, axis=-1, keepdims=True)
    p = jnp.exp(e - m)
    return p * pl.reciprocal(jnp.sum(p, axis=-1, keepdims=True), approx=True)


def _mm(a, b):
    return jnp.dot(a, b, preferred_element_type=jnp.float32)


def _qk(a, b):
    # a @ b^T without materializing b^T (contract last axes of both operands).
    return jax.lax.dot_general(a, b, (((1,), (1,)), ((), ())),
                               preferred_element_type=jnp.float32)


# ----------------------------------------------------------------------------
# Fused sub-blocks (pure functions on 2-D VMEM-resident tiles, traced in-kernel)
# ----------------------------------------------------------------------------
def _self_attention(x, wqkv, wo, bo, share, heads, dim_head):
    """TransformerBlock SelfAttention on one (n, dim) tile.

    Returns (output (n, dim), [energy_h (n, n)]*heads); returned energies already
    include the added `share` (as in the reference)."""
    inner = heads * dim_head
    scale = dim_head ** -0.5
    qkv = _mm(x, wqkv)                                    # fused to_qkv: (n, 3*inner)
    energies, outs = [], []
    for h in range(heads):                                # heads=2: tiny static loop
        q = qkv[:, h * dim_head:(h + 1) * dim_head]
        k = qkv[:, inner + h * dim_head:inner + (h + 1) * dim_head]
        v = qkv[:, 2 * inner + h * dim_head:2 * inner + (h + 1) * dim_head]
        eh = _qk(q, k) * scale
        if share is not None:
            eh = eh + share[h]
        energies.append(eh)
        outs.append(_mm(_softmax_rows(eh), v))
    o = jnp.concatenate(outs, axis=-1)                    # b h n d -> b n (h d)
    return _mm(o, wo) + bo, energies


def _geglu_ff(x, w1, b1, w2, b2):
    u = _mm(x, w1) + b1                                   # fused fc1: (n, 2*mult*dim)
    half = u.shape[-1] // 2
    return _mm(u[:, :half] * _gelu(u[:, half:]), w2) + b2


def _transformer_block(x, p, share1, share2, heads, dim_head):
    attn, e1 = _self_attention(x, p["qkv1"], p["out1_w"], p["out1_b"], share1,
                               heads, dim_head)
    x = _layernorm(attn + x, p["n1g"], p["n1b"])
    x = _layernorm(_geglu_ff(x, p["ff1_w1"], p["ff1_b1"], p["ff1_w2"], p["ff1_b2"]) + x,
                   p["n2g"], p["n2b"])
    xt = x.T                                              # in-VMEM transpose (XLU has slack)
    attn, e2 = _self_attention(xt, p["qkv2"], p["out2_w"], p["out2_b"], share2,
                               heads, dim_head)
    xt = _layernorm(attn + xt, p["n3g"], p["n3b"])
    xt = _layernorm(_geglu_ff(xt, p["ff2_w1"], p["ff2_b1"], p["ff2_w2"], p["ff2_b2"]) + xt,
                    p["n4g"], p["n4b"])
    return xt.T, e1, e2


def _linear_layer(x, p, conv_ref, conv_row0, share, heads, dim_head):
    """One Linear_Layer (Attention with head-shared qk + gated gMLP branch)."""
    scale = dim_head ** -0.5
    qkv = _mm(x, p["qkv_w"])                              # (n, 3*Dh)
    q = qkv[:, :dim_head]
    k = qkv[:, dim_head:2 * dim_head]
    v = qkv[:, 2 * dim_head:3 * dim_head]
    e0 = _qk(q, k) * scale                                # shared across heads
    energies, attn_heads = [], []
    if share is None:
        to = _mm(_mm(_softmax_rows(e0), v), p["out_w"]) + p["out_b"]
        energies = [e0] * heads
        attn_heads = [to] * heads
    else:
        for h in range(heads):
            eh = e0 + share[h]
            energies.append(eh)
            attn_heads.append(_mm(_mm(_softmax_rows(eh), v), p["out_w"]) + p["out_b"])

    # gMLP branch: LN -> proj_in -> GELU -> per-head (res | gate) -> gating
    nx = _layernorm(x, p["n_g"], p["n_b"])
    u = _gelu(_mm(nx, p["pin_w"]) + p["pin_b"])           # (n, 2*H*Dh)
    ress, gates = [], []
    for h in range(heads):
        base = 2 * dim_head * h
        ress.append(u[:, base:base + dim_head])
        gates.append(_layernorm(u[:, base + dim_head:base + 2 * dim_head],
                                p["gn_g"], p["gn_b"]))
    # 1x1 Conv2d over heads == per-output-head broadcast FMAs (SMEM scalars, pure VPU)
    gated = []
    for ho in range(heads):
        mix = gates[0] * conv_ref[conv_row0 + ho, 0]
        for hi in range(1, heads):
            mix = mix + gates[hi] * conv_ref[conv_row0 + ho, hi]
        mix = mix + conv_ref[conv_row0 + ho, heads]       # conv bias
        gated.append((mix + attn_heads[ho]) * ress[ho])   # gate_act=None -> identity
    merged = jnp.concatenate(gated, axis=-1)              # b h n d -> b n (h d)
    return _mm(merged, p["pout_w"]) + p["pout_b"] + x, energies


def _linear_block(x, pf, pd, conv_ref, conv_base, share1, share2, heads, dim_head):
    x, e1 = _linear_layer(x, pf, conv_ref, conv_base, share1, heads, dim_head)
    xt = x.T
    xt, e2 = _linear_layer(xt, pd, conv_ref, conv_base + heads, share2, heads, dim_head)
    return xt.T, e1, e2


# ----------------------------------------------------------------------------
# Packed-weight layout (leading axis of every slab = depth)
# ----------------------------------------------------------------------------
_WEIGHT_NAMES = (
    # TransformerBlock stacks
    "t_qkv1_w", "t_out1_w", "t_ff1_w1", "t_ff1_w2", "t_ff1_b1", "t_vec_e",
    "t_qkv2_w", "t_out2_w", "t_ff2_w1", "t_ff2_w2", "t_ff2_b1", "t_vec_n",
    # LinearBlock feature_wise stacks
    "lf_qkv_w", "lf_out_w", "lf_pin_w", "lf_pin_b", "lf_pout_w", "lf_vec_d", "lf_vec_h",
    # LinearBlock dimension_wise stacks
    "ld_qkv_w", "ld_out_w", "ld_pin_w", "ld_pin_b", "ld_pout_w", "ld_vec_d", "ld_vec_h",
    # gating 1x1-conv weights/biases of all layers, row-packed (SMEM scalars)
    "l_conv",
)


def _tb_views(R, l):
    """Static per-layer views of the packed TransformerBlock weights."""
    ve = R["t_vec_e"][l]                                  # (6, emb_dim)
    vn = R["t_vec_n"][l]                                  # (6, input_size)
    return dict(
        qkv1=R["t_qkv1_w"][l], out1_w=R["t_out1_w"][l], out1_b=ve[0:1],
        n1g=ve[1:2], n1b=ve[2:3],
        ff1_w1=R["t_ff1_w1"][l], ff1_b1=R["t_ff1_b1"][l],
        ff1_w2=R["t_ff1_w2"][l], ff1_b2=ve[3:4],
        n2g=ve[4:5], n2b=ve[5:6],
        qkv2=R["t_qkv2_w"][l], out2_w=R["t_out2_w"][l], out2_b=vn[0:1],
        n3g=vn[1:2], n3b=vn[2:3],
        ff2_w1=R["t_ff2_w1"][l], ff2_b1=R["t_ff2_b1"][l],
        ff2_w2=R["t_ff2_w2"][l], ff2_b2=vn[3:4],
        n4g=vn[4:5], n4b=vn[5:6],
    )


def _ll_views(R, pref, l):
    """Static per-layer views of one Linear_Layer's packed weights."""
    vd = R[pref + "_vec_d"][l]                            # (3, dim)
    vh = R[pref + "_vec_h"][l]                            # (3, dim_head)
    return dict(
        qkv_w=R[pref + "_qkv_w"][l], out_w=R[pref + "_out_w"][l], out_b=vh[0:1],
        n_g=vd[0:1], n_b=vd[1:2], pout_b=vd[2:3],
        pin_w=R[pref + "_pin_w"][l], pin_b=R[pref + "_pin_b"][l],
        gn_g=vh[1:2], gn_b=vh[2:3],
        pout_w=R[pref + "_pout_w"][l],
    )


# ----------------------------------------------------------------------------
# The single fused SALT kernel (one grid step = one batch element, all layers)
# ----------------------------------------------------------------------------
def _salt_kernel(*refs, depth, heads, dim_head, names):
    x_ref, o_ref = refs[0], refs[-1]
    R = dict(zip(names, refs[1:-1]))
    conv_ref = R["l_conv"]

    x = x_ref[0]                                          # (N, E)
    x_att = x
    x_mlp = x
    share1 = None                                         # list of heads x (N, N)
    share2 = None                                         # list of heads x (E, E)
    for l in range(depth):                                # static depth loop, all in VMEM
        tp = _tb_views(R, l)
        pf = _ll_views(R, "lf", l)
        pd = _ll_views(R, "ld", l)
        x_att_n, te1, te2 = _transformer_block(x_att, tp, share1, share2,
                                               heads, dim_head)
        x_mlp_n, le1, le2 = _linear_block(x_mlp, pf, pd, conv_ref, l * 2 * heads,
                                          share1, share2, heads, dim_head)
        share1 = [(te1[h] + le1[h]) * 0.5 for h in range(heads)]   # share_mode='avg'
        share2 = [(te2[h] + le2[h]) * 0.5 for h in range(heads)]
        x_att, x_mlp = x_att_n, x_mlp_n
    o_ref[0] = x_att * x_mlp                              # output_mode='mul' fused in


def _rep_spec(shape):
    nd = len(shape)
    return pl.BlockSpec(tuple(shape), lambda b: (0,) * nd)


def salt_fwd(packed, x_categ, x_cont=None, *, heads, dim_head):
    x = x_categ if x_cont is None else jnp.concatenate([x_categ, x_cont], axis=1)
    x = x.astype(jnp.float32)
    B, N, E = x.shape
    depth = packed["t_qkv1_w"].shape[0]

    inputs = [x] + [packed[name] for name in _WEIGHT_NAMES]
    in_specs = [pl.BlockSpec((1, N, E), lambda b: (b, 0, 0))]
    for name in _WEIGHT_NAMES:
        if name == "l_conv":
            in_specs.append(pl.BlockSpec(memory_space=pltpu.MemorySpace.SMEM))
        else:
            in_specs.append(_rep_spec(packed[name].shape))

    # NOTE: weights + activations + energies total a few hundred KiB here, far under
    # even v7x's 64 MiB VMEM; if N/E are scaled up, the quadratic (H,E,E) energies are
    # the first thing to tile.
    return pl.pallas_call(
        functools.partial(_salt_kernel, depth=depth, heads=heads,
                          dim_head=dim_head, names=_WEIGHT_NAMES),
        grid=(B,),
        in_specs=in_specs,
        out_specs=pl.BlockSpec((1, N, E), lambda b: (b, 0, 0)),
        out_shape=jax.ShapeDtypeStruct((B, N, E), jnp.float32),
        compiler_params=pltpu.CompilerParams(dimension_semantics=("parallel",)),
    )(*inputs)


# ----------------------------------------------------------------------------
# Parameter init (PyTorch-like U(-1/sqrt(fan_in), 1/sqrt(fan_in)); weights (in, out))
# ----------------------------------------------------------------------------
def _uniform(key, shape, bound):
    return jax.random.uniform(key, shape, jnp.float32, -bound, bound)


def _init_layernorm(d):
    return {"g": jnp.ones((d,), jnp.float32), "b": jnp.zeros((d,), jnp.float32)}


def _init_self_attention(key, dim, heads, dim_head):
    inner = heads * dim_head
    kqkv, kw, kb = jax.random.split(key, 3)
    bi, bo = 1.0 / math.sqrt(dim), 1.0 / math.sqrt(inner)
    return {"wqkv": _uniform(kqkv, (dim, 3 * inner), bi),     # to_qkv (bias=False)
            "wo": _uniform(kw, (inner, dim), bo),             # to_out
            "bo": _uniform(kb, (dim,), bo)}


def _init_feed_forward(key, dim, mult=4):
    k1, k1b, k2, k2b = jax.random.split(key, 4)
    h = dim * mult
    b1, b2 = 1.0 / math.sqrt(dim), 1.0 / math.sqrt(h)
    return {"w1": _uniform(k1, (dim, 2 * h), b1), "b1": _uniform(k1b, (2 * h,), b1),
            "w2": _uniform(k2, (h, dim), b2), "b2": _uniform(k2b, (dim,), b2)}


def _init_transformer_block(key, input_size, emb_dim, heads, dim_head):
    k = jax.random.split(key, 4)
    return {"attn1": _init_self_attention(k[0], emb_dim, heads, dim_head),
            "ff1": _init_feed_forward(k[1], emb_dim),
            "attn2": _init_self_attention(k[2], input_size, heads, dim_head),
            "ff2": _init_feed_forward(k[3], input_size),
            "norm1": _init_layernorm(emb_dim), "norm2": _init_layernorm(emb_dim),
            "norm3": _init_layernorm(input_size), "norm4": _init_layernorm(input_size)}


def _init_linear_layer(key, dim, dim_head, heads):
    kqkv, kow, kob, kpi, kpib, kpo, kpob = jax.random.split(key, 7)
    b_in, b_dh, b_po = (1.0 / math.sqrt(dim), 1.0 / math.sqrt(dim_head),
                        1.0 / math.sqrt(dim_head * heads))
    return {
        "norm": _init_layernorm(dim),
        "attn": {"wqkv": _uniform(kqkv, (dim, 3 * dim_head), b_in),
                 "wo": _uniform(kow, (dim_head, dim_head), b_dh),
                 "bo": _uniform(kob, (dim_head,), b_dh)},
        "pin_w": _uniform(kpi, (dim, dim_head * heads * 2), b_in),
        "pin_b": _uniform(kpib, (dim_head * heads * 2,), b_in),
        "gating": {"norm": _init_layernorm(dim_head),
                   "conv_w": jnp.zeros((heads, heads), jnp.float32),  # constant_(w, 0.)
                   "conv_b": jnp.ones((heads,), jnp.float32)},        # constant_(b, 1.)
        "pout_w": _uniform(kpo, (dim_head * heads, dim), b_po),
        "pout_b": _uniform(kpob, (dim,), b_po),
    }


def _init_linear_block(key, input_size, emb_dim, heads, dim_head):
    k1, k2 = jax.random.split(key)
    return {"feature_wise": _init_linear_layer(k1, emb_dim, dim_head, heads),
            "dimension_wise": _init_linear_layer(k2, input_size, dim_head, heads)}


def init_salt(key, input_size, emb_dim, depth, heads, dim_head):
    keys = jax.random.split(key, 2 * depth)
    return {
        "transformers": [_init_transformer_block(keys[2 * i], input_size, emb_dim,
                                                 heads, dim_head) for i in range(depth)],
        "linears": [_init_linear_block(keys[2 * i + 1], input_size, emb_dim,
                                       heads, dim_head) for i in range(depth)],
    }
    # share1_layer / share2_layer / output_layer are unused for share_mode='avg' +
    # output_mode='mul' and are not instantiated.


def pack_salt_params(params):
    """Pack per-layer params into the depth-stacked slabs consumed by the kernel."""
    T, L = params["transformers"], params["linears"]
    depth = len(T)

    def stack(fn):
        return jnp.stack([fn(l) for l in range(depth)], axis=0)

    packed = {
        "t_qkv1_w": stack(lambda l: T[l]["attn1"]["wqkv"]),
        "t_out1_w": stack(lambda l: T[l]["attn1"]["wo"]),
        "t_ff1_w1": stack(lambda l: T[l]["ff1"]["w1"]),
        "t_ff1_w2": stack(lambda l: T[l]["ff1"]["w2"]),
        "t_ff1_b1": stack(lambda l: T[l]["ff1"]["b1"][None, :]),
        "t_vec_e": stack(lambda l: jnp.stack([
            T[l]["attn1"]["bo"], T[l]["norm1"]["g"], T[l]["norm1"]["b"],
            T[l]["ff1"]["b2"], T[l]["norm2"]["g"], T[l]["norm2"]["b"]])),
        "t_qkv2_w": stack(lambda l: T[l]["attn2"]["wqkv"]),
        "t_out2_w": stack(lambda l: T[l]["attn2"]["wo"]),
        "t_ff2_w1": stack(lambda l: T[l]["ff2"]["w1"]),
        "t_ff2_w2": stack(lambda l: T[l]["ff2"]["w2"]),
        "t_ff2_b1": stack(lambda l: T[l]["ff2"]["b1"][None, :]),
        "t_vec_n": stack(lambda l: jnp.stack([
            T[l]["attn2"]["bo"], T[l]["norm3"]["g"], T[l]["norm3"]["b"],
            T[l]["ff2"]["b2"], T[l]["norm4"]["g"], T[l]["norm4"]["b"]])),
    }
    for pref, which in (("lf", "feature_wise"), ("ld", "dimension_wise")):
        packed[pref + "_qkv_w"] = stack(lambda l, w=which: L[l][w]["attn"]["wqkv"])
        packed[pref + "_out_w"] = stack(lambda l, w=which: L[l][w]["attn"]["wo"])
        packed[pref + "_pin_w"] = stack(lambda l, w=which: L[l][w]["pin_w"])
        packed[pref + "_pin_b"] = stack(lambda l, w=which: L[l][w]["pin_b"][None, :])
        packed[pref + "_pout_w"] = stack(lambda l, w=which: L[l][w]["pout_w"])
        packed[pref + "_vec_d"] = stack(lambda l, w=which: jnp.stack([
            L[l][w]["norm"]["g"], L[l][w]["norm"]["b"], L[l][w]["pout_b"]]))
        packed[pref + "_vec_h"] = stack(lambda l, w=which: jnp.stack([
            L[l][w]["attn"]["bo"], L[l][w]["gating"]["norm"]["g"],
            L[l][w]["gating"]["norm"]["b"]]))
    # 1x1 conv over heads, all layers/branches row-packed:
    #   row = (l*2 + {0:feature_wise, 1:dimension_wise}) * heads + h_out
    #   cols = [w[h_out, 0..H-1], b[h_out]]
    rows = []
    for l in range(depth):
        for which in ("feature_wise", "dimension_wise"):
            cw = L[l][which]["gating"]["conv_w"]
            cb = L[l][which]["gating"]["conv_b"]
            rows.append(jnp.concatenate([cw, cb[:, None]], axis=1))
    packed["l_conv"] = jnp.concatenate(rows, axis=0)
    return packed


# ----------------------------------------------------------------------------
# Pure-JAX reference (mirrors the PyTorch module; used for the in-script check)
# ----------------------------------------------------------------------------
def _ref_layernorm(x, g, b, eps=1e-5):
    mu = jnp.mean(x, axis=-1, keepdims=True)
    var = jnp.mean(jnp.square(x - mu), axis=-1, keepdims=True)
    return (x - mu) / jnp.sqrt(var + eps) * g + b


def _ref_self_attention(p, x, share, heads, dim_head):
    inner = heads * dim_head
    qkv = x @ p["wqkv"]
    q, k, v = qkv[..., :inner], qkv[..., inner:2 * inner], qkv[..., 2 * inner:]

    def split_heads(t):
        b, n, _ = t.shape
        return t.reshape(b, n, heads, dim_head).transpose(0, 2, 1, 3)

    qh, kh, vh = split_heads(q), split_heads(k), split_heads(v)
    energy = jnp.einsum("bhid,bhjd->bhij", qh, kh) * dim_head ** -0.5
    if share is not None:
        energy = energy + share
    attn = jax.nn.softmax(energy, axis=-1)
    out = jnp.einsum("bhij,bhjd->bhid", attn, vh)
    b, h, n, d = out.shape
    out = out.transpose(0, 2, 1, 3).reshape(b, n, h * d)
    return out @ p["wo"] + p["bo"], energy


def _ref_ff(p, x):
    u = x @ p["w1"] + p["b1"]
    half = u.shape[-1] // 2
    return (u[..., :half] * _gelu(u[..., half:])) @ p["w2"] + p["b2"]


def _ref_transformer_block(p, x, share, share2, heads, dim_head):
    a, share = _ref_self_attention(p["attn1"], x, share, heads, dim_head)
    x = _ref_layernorm(a + x, p["norm1"]["g"], p["norm1"]["b"])
    x = _ref_layernorm(_ref_ff(p["ff1"], x) + x, p["norm2"]["g"], p["norm2"]["b"])
    x = jnp.swapaxes(x, -1, -2)
    a, share2 = _ref_self_attention(p["attn2"], x, share2, heads, dim_head)
    x = _ref_layernorm(a + x, p["norm3"]["g"], p["norm3"]["b"])
    x = _ref_layernorm(_ref_ff(p["ff2"], x) + x, p["norm4"]["g"], p["norm4"]["b"])
    return jnp.swapaxes(x, -1, -2), share, share2


def _ref_attention(p, x, share, heads, dim_head):
    qkv = x @ p["wqkv"]
    q = qkv[..., :dim_head]
    k = qkv[..., dim_head:2 * dim_head]
    v = qkv[..., 2 * dim_head:]
    energy = jnp.einsum("bid,bjd->bij", q, k) * dim_head ** -0.5
    energy = jnp.repeat(energy[:, None], heads, axis=1)
    if share is not None:
        energy = energy + share
    attn = jax.nn.softmax(energy, axis=-1)
    out = jnp.einsum("bhij,bjd->bhid", attn, v)
    return out @ p["wo"] + p["bo"], energy


def _ref_linear_layer(p, x, share, heads, dim_head):
    attn, share = _ref_attention(p["attn"], x, share, heads, dim_head)
    nx = _ref_layernorm(x, p["norm"]["g"], p["norm"]["b"])
    u = _gelu(nx @ p["pin_w"] + p["pin_b"])
    b, n, _ = u.shape
    u = u.reshape(b, n, heads, 2 * dim_head).transpose(0, 2, 1, 3)
    res, gate = u[..., :dim_head], u[..., dim_head:]
    gate = _ref_layernorm(gate, p["gating"]["norm"]["g"], p["gating"]["norm"]["b"])
    gate = jnp.einsum("oi,bind->bond", p["gating"]["conv_w"], gate)
    gate = gate + p["gating"]["conv_b"][None, :, None, None]
    out = (gate + attn) * res
    out = out.transpose(0, 2, 1, 3).reshape(b, n, heads * dim_head)
    return out @ p["pout_w"] + p["pout_b"] + x, share


def _ref_linear_block(p, x, share, share2, heads, dim_head):
    x, share = _ref_linear_layer(p["feature_wise"], x, share, heads, dim_head)
    xt = jnp.swapaxes(x, -1, -2)
    xt, share2 = _ref_linear_layer(p["dimension_wise"], xt, share2, heads, dim_head)
    return jnp.swapaxes(xt, -1, -2), share, share2


def salt_ref(params, x, *, heads, dim_head):
    x = x.astype(jnp.float32)
    x_att, x_mlp = x, x
    share = share2 = None
    for tb, lb in zip(params["transformers"], params["linears"]):
        x_att, s_mlp, s_mlp2 = _ref_transformer_block(tb, x_att, share, share2,
                                                      heads, dim_head)
        x_mlp, s_att, s_att2 = _ref_linear_block(lb, x_mlp, share, share2,
                                                 heads, dim_head)
        share = (s_att + s_mlp) * 0.5
        share2 = (s_att2 + s_mlp2) * 0.5
    return x_att * x_mlp


# ----------------------------------------------------------------------------
if __name__ == "__main__":
    INPUT_SIZE, EMB_DIM, DEPTH, HEADS, DIM_HEAD, BATCH = 8, 32, 2, 2, 8, 2

    key = jax.random.PRNGKey(0)
    kp, kx = jax.random.split(key)
    params = init_salt(kp, INPUT_SIZE, EMB_DIM, DEPTH, HEADS, DIM_HEAD)
    packed = pack_salt_params(params)
    x_categ = jax.random.normal(kx, (BATCH, INPUT_SIZE, EMB_DIM), jnp.float32)

    fwd = jax.jit(functools.partial(salt_fwd, heads=HEADS, dim_head=DIM_HEAD))
    out = fwd(packed, x_categ)
    jax.block_until_ready(out)

    assert out.shape == (BATCH, INPUT_SIZE, EMB_DIM), out.shape
    assert bool(jnp.all(jnp.isfinite(out)))

    # Check against the pure-JAX reference (same tanh GELU; exact softmax / f32 matmul).
    with jax.default_matmul_precision("highest"):
        ref = salt_ref(params, x_categ, heads=HEADS, dim_head=DIM_HEAD)
    ref = jax.block_until_ready(ref)
    max_err = float(jnp.max(jnp.abs(out - ref)))
    assert max_err < 5e-2, f"kernel deviates from reference: max_err={max_err}"

    print("KERNEL_OK")
</pallas_src>

<mosaic_0001>
module attributes {stable_mosaic.version = 11 : i64} {
  func.func @_salt_kernel(%arg0: i32, %arg1: memref<1x8x32xf32, #tpu.memory_space<vmem>>, %arg2: memref<2x32x48xf32, #tpu.memory_space<vmem>>, %arg3: memref<2x16x32xf32, #tpu.memory_space<vmem>>, %arg4: memref<2x32x256xf32, #tpu.memory_space<vmem>>, %arg5: memref<2x128x32xf32, #tpu.memory_space<vmem>>, %arg6: memref<2x1x256xf32, #tpu.memory_space<vmem>>, %arg7: memref<2x6x32xf32, #tpu.memory_space<vmem>>, %arg8: memref<2x8x48xf32, #tpu.memory_space<vmem>>, %arg9: memref<2x16x8xf32, #tpu.memory_space<vmem>>, %arg10: memref<2x8x64xf32, #tpu.memory_space<vmem>>, %arg11: memref<2x32x8xf32, #tpu.memory_space<vmem>>, %arg12: memref<2x1x64xf32, #tpu.memory_space<vmem>>, %arg13: memref<2x6x8xf32, #tpu.memory_space<vmem>>, %arg14: memref<2x32x24xf32, #tpu.memory_space<vmem>>, %arg15: memref<2x8x8xf32, #tpu.memory_space<vmem>>, %arg16: memref<2x32x32xf32, #tpu.memory_space<vmem>>, %arg17: memref<2x1x32xf32, #tpu.memory_space<vmem>>, %arg18: memref<2x16x32xf32, #tpu.memory_space<vmem>>, %arg19: memref<2x3x32xf32, #tpu.memory_space<vmem>>, %arg20: memref<2x3x8xf32, #tpu.memory_space<vmem>>, %arg21: memref<2x8x24xf32, #tpu.memory_space<vmem>>, %arg22: memref<2x8x8xf32, #tpu.memory_space<vmem>>, %arg23: memref<2x8x32xf32, #tpu.memory_space<vmem>>, %arg24: memref<2x1x32xf32, #tpu.memory_space<vmem>>, %arg25: memref<2x16x8xf32, #tpu.memory_space<vmem>>, %arg26: memref<2x3x8xf32, #tpu.memory_space<vmem>>, %arg27: memref<2x3x8xf32, #tpu.memory_space<vmem>>, %arg28: memref<8x3xf32, #tpu.memory_space<smem>>, %arg29: memref<1x8x32xf32, #tpu.memory_space<vmem>>) attributes {dimension_semantics = [#tpu.dimension_semantics<parallel>], iteration_bounds = array<i64: 2>, scalar_prefetch = 0 : i64, scratch_operands = 0 : i64, tpu.core_type = #tpu.core_type<tc>, window_params = [{transform_indices = @transform_0, window_bounds = array<i64: 1, 8, 32>}, {pipeline_mode = #tpu.pipeline_mode<synchronous>, transform_indices = @transform_1, window_bounds = array<i64: 2, 32, 48>}, {pipeline_mode = #tpu.pipeline_mode<synchronous>, transform_indices = @transform_2, window_bounds = array<i64: 2, 16, 32>}, {pipeline_mode = #tpu.pipeline_mode<synchronous>, transform_indices = @transform_3, window_bounds = array<i64: 2, 32, 256>}, {pipeline_mode = #tpu.pipeline_mode<synchronous>, transform_indices = @transform_4, window_bounds = array<i64: 2, 128, 32>}, {pipeline_mode = #tpu.pipeline_mode<synchronous>, transform_indices = @transform_5, window_bounds = array<i64: 2, 1, 256>}, {pipeline_mode = #tpu.pipeline_mode<synchronous>, transform_indices = @transform_6, window_bounds = array<i64: 2, 6, 32>}, {pipeline_mode = #tpu.pipeline_mode<synchronous>, transform_indices = @transform_7, window_bounds = array<i64: 2, 8, 48>}, {pipeline_mode = #tpu.pipeline_mode<synchronous>, transform_indices = @transform_8, window_bounds = array<i64: 2, 16, 8>}, {pipeline_mode = #tpu.pipeline_mode<synchronous>, transform_indices = @transform_9, window_bounds = array<i64: 2, 8, 64>}, {pipeline_mode = #tpu.pipeline_mode<synchronous>, transform_indices = @transform_10, window_bounds = array<i64: 2, 32, 8>}, {pipeline_mode = #tpu.pipeline_mode<synchronous>, transform_indices = @transform_11, window_bounds = array<i64: 2, 1, 64>}, {pipeline_mode = #tpu.pipeline_mode<synchronous>, transform_indices = @transform_12, window_bounds = array<i64: 2, 6, 8>}, {pipeline_mode = #tpu.pipeline_mode<synchronous>, transform_indices = @transform_13, window_bounds = array<i64: 2, 32, 24>}, {pipeline_mode = #tpu.pipeline_mode<synchronous>, transform_indices = @transform_14, window_bounds = array<i64: 2, 8, 8>}, {pipeline_mode = #tpu.pipeline_mode<synchronous>, transform_indices = @transform_15, window_bounds = array<i64: 2, 32, 32>}, {pipeline_mode = #tpu.pipeline_mode<synchronous>, transform_indices = @transform_16, window_bounds = array<i64: 2, 1, 32>}, {pipeline_mode = #tpu.pipeline_mode<synchronous>, transform_indices = @transform_17, window_bounds = array<i64: 2, 16, 32>}, {pipeline_mode = #tpu.pipeline_mode<synchronous>, transform_indices = @transform_18, window_bounds = array<i64: 2, 3, 32>}, {pipeline_mode = #tpu.pipeline_mode<synchronous>, transform_indices = @transform_19, window_bounds = array<i64: 2, 3, 8>}, {pipeline_mode = #tpu.pipeline_mode<synchronous>, transform_indices = @transform_20, window_bounds = array<i64: 2, 8, 24>}, {pipeline_mode = #tpu.pipeline_mode<synchronous>, transform_indices = @transform_21, window_bounds = array<i64: 2, 8, 8>}, {pipeline_mode = #tpu.pipeline_mode<synchronous>, transform_indices = @transform_22, window_bounds = array<i64: 2, 8, 32>}, {pipeline_mode = #tpu.pipeline_mode<synchronous>, transform_indices = @transform_23, window_bounds = array<i64: 2, 1, 32>}, {pipeline_mode = #tpu.pipeline_mode<synchronous>, transform_indices = @transform_24, window_bounds = array<i64: 2, 16, 8>}, {pipeline_mode = #tpu.pipeline_mode<synchronous>, transform_indices = @transform_25, window_bounds = array<i64: 2, 3, 8>}, {pipeline_mode = #tpu.pipeline_mode<synchronous>, transform_indices = @transform_26, window_bounds = array<i64: 2, 3, 8>}, {transform_indices = @transform_27, window_bounds = array<i64: 8, 3>}, {transform_indices = @transform_28, window_bounds = array<i64: 1, 8, 32>}]} {
    %c0 = arith.constant 0 : index
    %c0_0 = arith.constant 0 : index
    %c0_1 = arith.constant 0 : index
    %0 = vector.load %arg1[%c0, %c0_0, %c0_1] : memref<1x8x32xf32, #tpu.memory_space<vmem>>, vector<1x8x32xf32>
    %1 = vector.shape_cast %0 : vector<1x8x32xf32> to vector<8x32xf32>
    %c0_2 = arith.constant 0 : index
    %c0_3 = arith.constant 0 : index
    %c0_4 = arith.constant 0 : index
    %2 = vector.load %arg7[%c0_2, %c0_3, %c0_4] : memref<2x6x32xf32, #tpu.memory_space<vmem>>, vector<1x6x32xf32>
    %3 = vector.shape_cast %2 : vector<1x6x32xf32> to vector<6x32xf32>
    %c0_5 = arith.constant 0 : index
    %c0_6 = arith.constant 0 : index
    %c0_7 = arith.constant 0 : index
    %4 = vector.load %arg13[%c0_5, %c0_6, %c0_7] : memref<2x6x8xf32, #tpu.memory_space<vmem>>, vector<1x6x8xf32>
    %5 = vector.shape_cast %4 : vector<1x6x8xf32> to vector<6x8xf32>
    %c0_8 = arith.constant 0 : index
    %c0_9 = arith.constant 0 : index
    %c0_10 = arith.constant 0 : index
    %6 = vector.load %arg2[%c0_8, %c0_9, %c0_10] : memref<2x32x48xf32, #tpu.memory_space<vmem>>, vector<1x32x48xf32>
    %7 = vector.shape_cast %6 : vector<1x32x48xf32> to vector<32x48xf32>
    %c0_11 = arith.constant 0 : index
    %c0_12 = arith.constant 0 : index
    %c0_13 = arith.constant 0 : index
    %8 = vector.load %arg3[%c0_11, %c0_12, %c0_13] : memref<2x16x32xf32, #tpu.memory_space<vmem>>, vector<1x16x32xf32>
    %9 = vector.shape_cast %8 : vector<1x16x32xf32> to vector<16x32xf32>
    %10 = vector.extract_strided_slice %3 {offsets = [0, 0], sizes = [1, 32], strides = [1, 1]} : vector<6x32xf32> to vector<1x32xf32>
    %11 = vector.extract_strided_slice %3 {offsets = [1, 0], sizes = [1, 32], strides = [1, 1]} : vector<6x32xf32> to vector<1x32xf32>
    %12 = vector.extract_strided_slice %3 {offsets = [2, 0], sizes = [1, 32], strides = [1, 1]} : vector<6x32xf32> to vector<1x32xf32>
    %c0_14 = arith.constant 0 : index
    %c0_15 = arith.constant 0 : index
    %c0_16 = arith.constant 0 : index
    %13 = vector.load %arg4[%c0_14, %c0_15, %c0_16] : memref<2x32x256xf32, #tpu.memory_space<vmem>>, vector<1x32x256xf32>
    %14 = vector.shape_cast %13 : vector<1x32x256xf32> to vector<32x256xf32>
    %c0_17 = arith.constant 0 : index
    %c0_18 = arith.constant 0 : index
    %c0_19 = arith.constant 0 : index
    %15 = vector.load %arg6[%c0_17, %c0_18, %c0_19] : memref<2x1x256xf32, #tpu.memory_space<vmem>>, vector<1x1x256xf32>
    %16 = vector.shape_cast %15 : vector<1x1x256xf32> to vector<1x256xf32>
    %c0_20 = arith.constant 0 : index
    %c0_21 = arith.constant 0 : index
    %c0_22 = arith.constant 0 : index
    %17 = vector.load %arg5[%c0_20, %c0_21, %c0_22] : memref<2x128x32xf32, #tpu.memory_space<vmem>>, vector<1x128x32xf32>
    %18 = vector.shape_cast %17 : vector<1x128x32xf32> to vector<128x32xf32>
    %19 = vector.extract_strided_slice %3 {offsets = [3, 0], sizes = [1, 32], strides = [1, 1]} : vector<6x32xf32> to vector<1x32xf32>
    %20 = vector.extract_strided_slice %3 {offsets = [4, 0], sizes = [1, 32], strides = [1, 1]} : vector<6x32xf32> to vector<1x32xf32>
    %21 = vector.extract_strided_slice %3 {offsets = [5, 0], sizes = [1, 32], strides = [1, 1]} : vector<6x32xf32> to vector<1x32xf32>
    %c0_23 = arith.constant 0 : index
    %c0_24 = arith.constant 0 : index
    %c0_25 = arith.constant 0 : index
    %22 = vector.load %arg8[%c0_23, %c0_24, %c0_25] : memref<2x8x48xf32, #tpu.memory_space<vmem>>, vector<1x8x48xf32>
    %23 = vector.shape_cast %22 : vector<1x8x48xf32> to vector<8x48xf32>
    %c0_26 = arith.constant 0 : index
    %c0_27 = arith.constant 0 : index
    %c0_28 = arith.constant 0 : index
    %24 = vector.load %arg9[%c0_26, %c0_27, %c0_28] : memref<2x16x8xf32, #tpu.memory_space<vmem>>, vector<1x16x8xf32>
    %25 = vector.shape_cast %24 : vector<1x16x8xf32> to vector<16x8xf32>
    %26 = vector.extract_strided_slice %5 {offsets = [0, 0], sizes = [1, 8], strides = [1, 1]} : vector<6x8xf32> to vector<1x8xf32>
    %27 = vector.extract_strided_slice %5 {offsets = [1, 0], sizes = [1, 8], strides = [1, 1]} : vector<6x8xf32> to vector<1x8xf32>
    %28 = vector.extract_strided_slice %5 {offsets = [2, 0], sizes = [1, 8], strides = [1, 1]} : vector<6x8xf32> to vector<1x8xf32>
    %c0_29 = arith.constant 0 : index
    %c0_30 = arith.constant 0 : index
    %c0_31 = arith.constant 0 : index
    %29 = vector.load %arg10[%c0_29, %c0_30, %c0_31] : memref<2x8x64xf32, #tpu.memory_space<vmem>>, vector<1x8x64xf32>
    %30 = vector.shape_cast %29 : vector<1x8x64xf32> to vector<8x64xf32>
    %c0_32 = arith.constant 0 : index
    %c0_33 = arith.constant 0 : index
    %c0_34 = arith.constant 0 : index
    %31 = vector.load %arg12[%c0_32, %c0_33, %c0_34] : memref<2x1x64xf32, #tpu.memory_space<vmem>>, vector<1x1x64xf32>
    %32 = vector.shape_cast %31 : vector<1x1x64xf32> to vector<1x64xf32>
    %c0_35 = arith.constant 0 : index
    %c0_36 = arith.constant 0 : index
    %c0_37 = arith.constant 0 : index
    %33 = vector.load %arg11[%c0_35, %c0_36, %c0_37] : memref<2x32x8xf32, #tpu.memory_space<vmem>>, vector<1x32x8xf32>
    %34 = vector.shape_cast %33 : vector<1x32x8xf32> to vector<32x8xf32>
    %35 = vector.extract_strided_slice %5 {offsets = [3, 0], sizes = [1, 8], strides = [1, 1]} : vector<6x8xf32> to vector<1x8xf32>
    %36 = vector.extract_strided_slice %5 {offsets = [4, 0], sizes = [1, 8], strides = [1, 1]} : vector<6x8xf32> to vector<1x8xf32>
    %37 = vector.extract_strided_slice %5 {offsets = [5, 0], sizes = [1, 8], strides = [1, 1]} : vector<6x8xf32> to vector<1x8xf32>
    %c0_38 = arith.constant 0 : index
    %c0_39 = arith.constant 0 : index
    %c0_40 = arith.constant 0 : index
    %38 = vector.load %arg19[%c0_38, %c0_39, %c0_40] : memref<2x3x32xf32, #tpu.memory_space<vmem>>, vector<1x3x32xf32>
    %39 = vector.shape_cast %38 : vector<1x3x32xf32> to vector<3x32xf32>
    %c0_41 = arith.constant 0 : index
    %c0_42 = arith.constant 0 : index
    %c0_43 = arith.constant 0 : index
    %40 = vector.load %arg20[%c0_41, %c0_42, %c0_43] : memref<2x3x8xf32, #tpu.memory_space<vmem>>, vector<1x3x8xf32>
    %41 = vector.shape_cast %40 : vector<1x3x8xf32> to vector<3x8xf32>
    %c0_44 = arith.constant 0 : index
    %c0_45 = arith.constant 0 : index
    %c0_46 = arith.constant 0 : index
    %42 = vector.load %arg14[%c0_44, %c0_45, %c0_46] : memref<2x32x24xf32, #tpu.memory_space<vmem>>, vector<1x32x24xf32>
    %43 = vector.shape_cast %42 : vector<1x32x24xf32> to vector<32x24xf32>
    %c0_47 = arith.constant 0 : index
    %c0_48 = arith.constant 0 : index
    %c0_49 = arith.constant 0 : index
    %44 = vector.load %arg15[%c0_47, %c0_48, %c0_49] : memref<2x8x8xf32, #tpu.memory_space<vmem>>, vector<1x8x8xf32>
    %45 = vector.shape_cast %44 : vector<1x8x8xf32> to vector<8x8xf32>
    %46 = vector.extract_strided_slice %41 {offsets = [0, 0], sizes = [1, 8], strides = [1, 1]} : vector<3x8xf32> to vector<1x8xf32>
    %47 = vector.extract_strided_slice %39 {offsets = [0, 0], sizes = [1, 32], strides = [1, 1]} : vector<3x32xf32> to vector<1x32xf32>
    %48 = vector.extract_strided_slice %39 {offsets = [1, 0], sizes = [1, 32], strides = [1, 1]} : vector<3x32xf32> to vector<1x32xf32>
    %49 = vector.extract_strided_slice %39 {offsets = [2, 0], sizes = [1, 32], strides = [1, 1]} : vector<3x32xf32> to vector<1x32xf32>
    %c0_50 = arith.constant 0 : index
    %c0_51 = arith.constant 0 : index
    %c0_52 = arith.constant 0 : index
    %50 = vector.load %arg16[%c0_50, %c0_51, %c0_52] : memref<2x32x32xf32, #tpu.memory_space<vmem>>, vector<1x32x32xf32>
    %51 = vector.shape_cast %50 : vector<1x32x32xf32> to vector<32x32xf32>
    %c0_53 = arith.constant 0 : index
    %c0_54 = arith.constant 0 : index
    %c0_55 = arith.constant 0 : index
    %52 = vector.load %arg17[%c0_53, %c0_54, %c0_55] : memref<2x1x32xf32, #tpu.memory_space<vmem>>, vector<1x1x32xf32>
    %53 = vector.shape_cast %52 : vector<1x1x32xf32> to vector<1x32xf32>
    %54 = vector.extract_strided_slice %41 {offsets = [1, 0], sizes = [1, 8], strides = [1, 1]} : vector<3x8xf32> to vector<1x8xf32>
    %55 = vector.extract_strided_slice %41 {offsets = [2, 0], sizes = [1, 8], strides = [1, 1]} : vector<3x8xf32> to vector<1x8xf32>
    %c0_56 = arith.constant 0 : index
    %c0_57 = arith.constant 0 : index
    %c0_58 = arith.constant 0 : index
    %56 = vector.load %arg18[%c0_56, %c0_57, %c0_58] : memref<2x16x32xf32, #tpu.memory_space<vmem>>, vector<1x16x32xf32>
    %57 = vector.shape_cast %56 : vector<1x16x32xf32> to vector<16x32xf32>
    %c0_59 = arith.constant 0 : index
    %c0_60 = arith.constant 0 : index
    %c0_61 = arith.constant 0 : index
    %58 = vector.load %arg26[%c0_59, %c0_60, %c0_61] : memref<2x3x8xf32, #tpu.memory_space<vmem>>, vector<1x3x8xf32>
    %59 = vector.shape_cast %58 : vector<1x3x8xf32> to vector<3x8xf32>
    %c0_62 = arith.constant 0 : index
    %c0_63 = arith.constant 0 : index
    %c0_64 = arith.constant 0 : index
    %60 = vector.load %arg27[%c0_62, %c0_63, %c0_64] : memref<2x3x8xf32, #tpu.memory_space<vmem>>, vector<1x3x8xf32>
    %61 = vector.shape_cast %60 : vector<1x3x8xf32> to vector<3x8xf32>
    %c0_65 = arith.constant 0 : index
    %c0_66 = arith.constant 0 : index
    %c0_67 = arith.constant 0 : index
    %62 = vector.load %arg21[%c0_65, %c0_66, %c0_67] : memref<2x8x24xf32, #tpu.memory_space<vmem>>, vector<1x8x24xf32>
    %63 = vector.shape_cast %62 : vector<1x8x24xf32> to vector<8x24xf32>
    %c0_68 = arith.constant 0 : index
    %c0_69 = arith.constant 0 : index
    %c0_70 = arith.constant 0 : index
    %64 = vector.load %arg22[%c0_68, %c0_69, %c0_70] : memref<2x8x8xf32, #tpu.memory_space<vmem>>, vector<1x8x8xf32>
    %65 = vector.shape_cast %64 : vector<1x8x8xf32> to vector<8x8xf32>
    %66 = vector.extract_strided_slice %61 {offsets = [0, 0], sizes = [1, 8], strides = [1, 1]} : vector<3x8xf32> to vector<1x8xf32>
    %67 = vector.extract_strided_slice %59 {offsets = [0, 0], sizes = [1, 8], strides = [1, 1]} : vector<3x8xf32> to vector<1x8xf32>
    %68 = vector.extract_strided_slice %59 {offsets = [1, 0], sizes = [1, 8], strides = [1, 1]} : vector<3x8xf32> to vector<1x8xf32>
    %69 = vector.extract_strided_slice %59 {offsets = [2, 0], sizes = [1, 8], strides = [1, 1]} : vector<3x8xf32> to vector<1x8xf32>
    %c0_71 = arith.constant 0 : index
    %c0_72 = arith.constant 0 : index
    %c0_73 = arith.constant 0 : index
    %70 = vector.load %arg23[%c0_71, %c0_72, %c0_73] : memref<2x8x32xf32, #tpu.memory_space<vmem>>, vector<1x8x32xf32>
    %71 = vector.shape_cast %70 : vector<1x8x32xf32> to vector<8x32xf32>
    %c0_74 = arith.constant 0 : index
    %c0_75 = arith.constant 0 : index
    %c0_76 = arith.constant 0 : index
    %72 = vector.load %arg24[%c0_74, %c0_75, %c0_76] : memref<2x1x32xf32, #tpu.memory_space<vmem>>, vector<1x1x32xf32>
    %73 = vector.shape_cast %72 : vector<1x1x32xf32> to vector<1x32xf32>
    %74 = vector.extract_strided_slice %61 {offsets = [1, 0], sizes = [1, 8], strides = [1, 1]} : vector<3x8xf32> to vector<1x8xf32>
    %75 = vector.extract_strided_slice %61 {offsets = [2, 0], sizes = [1, 8], strides = [1, 1]} : vector<3x8xf32> to vector<1x8xf32>
    %c0_77 = arith.constant 0 : index
    %c0_78 = arith.constant 0 : index
    %c0_79 = arith.constant 0 : index
    %76 = vector.load %arg25[%c0_77, %c0_78, %c0_79] : memref<2x16x8xf32, #tpu.memory_space<vmem>>, vector<1x16x8xf32>
    %77 = vector.shape_cast %76 : vector<1x16x8xf32> to vector<16x8xf32>
    %cst = arith.constant dense<0.000000e+00> : vector<8x48xf32>
    %78 = tpu.matmul %1, %7, %cst {dimension_numbers = #tpu.dot_dimension_numbers<[1], [0], [0], [1], [0, 0, 1, 1], [], []>} : vector<8x32xf32>, vector<32x48xf32>, vector<8x48xf32> -> vector<8x48xf32>
    %79 = vector.extract_strided_slice %78 {offsets = [0, 0], sizes = [8, 8], strides = [1, 1]} : vector<8x48xf32> to vector<8x8xf32>
    %80 = vector.extract_strided_slice %78 {offsets = [0, 16], sizes = [8, 8], strides = [1, 1]} : vector<8x48xf32> to vector<8x8xf32>
    %81 = vector.extract_strided_slice %78 {offsets = [0, 32], sizes = [8, 8], strides = [1, 1]} : vector<8x48xf32> to vector<8x8xf32>
    %cst_80 = arith.constant dense<0.000000e+00> : vector<8x8xf32>
    %82 = tpu.matmul %79, %80, %cst_80 {dimension_numbers = #tpu.dot_dimension_numbers<[1], [1], [0], [0], [0, 0, 1, 0], [], []>} : vector<8x8xf32>, vector<8x8xf32>, vector<8x8xf32> -> vector<8x8xf32>
    %cst_81 = arith.constant 0.353553385 : f32
    %83 = vector.broadcast %cst_81 : f32 to vector<8x8xf32>
    %84 = arith.mulf %82, %83 : vector<8x8xf32>
    %cst_82 = arith.constant dense<0xFF800000> : vector<8xf32>
    %85 = vector.multi_reduction <maximumf>, %84, %cst_82 [1] : vector<8x8xf32> to vector<8xf32>
    %86 = vector.shape_cast %85 : vector<8xf32> to vector<8x1xf32>
    %87 = vector.broadcast %86 : vector<8x1xf32> to vector<8x8xf32>
    %88 = arith.subf %84, %87 : vector<8x8xf32>
    %89 = math.exp %88 : vector<8x8xf32>
    %cst_83 = arith.constant dense<0.000000e+00> : vector<8xf32>
    %90 = vector.multi_reduction <add>, %89, %cst_83 [1] : vector<8x8xf32> to vector<8xf32>
    %91 = vector.shape_cast %90 : vector<8xf32> to vector<8x1xf32>
    %92 = tpu.reciprocal %91 {approx = true} : vector<8x1xf32> -> vector<8x1xf32>
    %93 = vector.broadcast %92 : vector<8x1xf32> to vector<8x8xf32>
    %94 = arith.mulf %89, %93 : vector<8x8xf32>
    %cst_84 = arith.constant dense<0.000000e+00> : vector<8x8xf32>
    %95 = tpu.matmul %94, %81, %cst_84 {dimension_numbers = #tpu.dot_dimension_numbers<[1], [0], [0], [1], [0, 0, 1, 1], [], []>} : vector<8x8xf32>, vector<8x8xf32>, vector<8x8xf32> -> vector<8x8xf32>
    %96 = vector.extract_strided_slice %78 {offsets = [0, 8], sizes = [8, 8], strides = [1, 1]} : vector<8x48xf32> to vector<8x8xf32>
    %97 = vector.extract_strided_slice %78 {offsets = [0, 24], sizes = [8, 8], strides = [1, 1]} : vector<8x48xf32> to vector<8x8xf32>
    %98 = vector.extract_strided_slice %78 {offsets = [0, 40], sizes = [8, 8], strides = [1, 1]} : vector<8x48xf32> to vector<8x8xf32>
    %cst_85 = arith.constant dense<0.000000e+00> : vector<8x8xf32>
    %99 = tpu.matmul %96, %97, %cst_85 {dimension_numbers = #tpu.dot_dimension_numbers<[1], [1], [0], [0], [0, 0, 1, 0], [], []>} : vector<8x8xf32>, vector<8x8xf32>, vector<8x8xf32> -> vector<8x8xf32>
    %cst_86 = arith.constant 0.353553385 : f32
    %100 = vector.broadcast %cst_86 : f32 to vector<8x8xf32>
    %101 = arith.mulf %99, %100 : vector<8x8xf32>
    %cst_87 = arith.constant dense<0xFF800000> : vector<8xf32>
    %102 = vector.multi_reduction <maximumf>, %101, %cst_87 [1] : vector<8x8xf32> to vector<8xf32>
    %103 = vector.shape_cast %102 : vector<8xf32> to vector<8x1xf32>
    %104 = vector.broadcast %103 : vector<8x1xf32> to vector<8x8xf32>
    %105 = arith.subf %101, %104 : vector<8x8xf32>
    %106 = math.exp %105 : vector<8x8xf32>
    %cst_88 = arith.constant dense<0.000000e+00> : vector<8xf32>
    %107 = vector.multi_reduction <add>, %106, %cst_88 [1] : vector<8x8xf32> to vector<8xf32>
    %108 = vector.shape_cast %107 : vector<8xf32> to vector<8x1xf32>
    %109 = tpu.reciprocal %108 {approx = true} : vector<8x1xf32> -> vector<8x1xf32>
    %110 = vector.broadcast %109 : vector<8x1xf32> to vector<8x8xf32>
    %111 = arith.mulf %106, %110 : vector<8x8xf32>
    %cst_89 = arith.constant dense<0.000000e+00> : vector<8x8xf32>
    %112 = tpu.matmul %111, %98, %cst_89 {dimension_numbers = #tpu.dot_dimension_numbers<[1], [0], [0], [1], [0, 0, 1, 1], [], []>} : vector<8x8xf32>, vector<8x8xf32>, vector<8x8xf32> -> vector<8x8xf32>
    %113 = tpu.concatenate %95, %112 in 1 : vector<8x8xf32>, vector<8x8xf32> -> vector<8x16xf32>
    %cst_90 = arith.constant dense<0.000000e+00> : vector<8x32xf32>
    %114 = tpu.matmul %113, %9, %cst_90 {dimension_numbers = #tpu.dot_dimension_numbers<[1], [0], [0], [1], [0, 0, 1, 1], [], []>} : vector<8x16xf32>, vector<16x32xf32>, vector<8x32xf32> -> vector<8x32xf32>
    %115 = vector.broadcast %10 : vector<1x32xf32> to vector<8x32xf32>
    %116 = arith.addf %114, %115 : vector<8x32xf32>
    %117 = arith.addf %116, %1 : vector<8x32xf32>
    %cst_91 = arith.constant dense<0.000000e+00> : vector<8xf32>
    %118 = vector.multi_reduction <add>, %117, %cst_91 [1] : vector<8x32xf32> to vector<8xf32>
    %119 = vector.shape_cast %118 : vector<8xf32> to vector<8x1xf32>
    %cst_92 = arith.constant 3.200000e+01 : f32
    %120 = vector.broadcast %cst_92 : f32 to vector<8x1xf32>
    %121 = arith.divf %119, %120 : vector<8x1xf32>
    %122 = vector.broadcast %121 : vector<8x1xf32> to vector<8x32xf32>
    %123 = arith.subf %117, %122 : vector<8x32xf32>
    %124 = arith.mulf %123, %123 : vector<8x32xf32>
    %cst_93 = arith.constant dense<0.000000e+00> : vector<8xf32>
    %125 = vector.multi_reduction <add>, %124, %cst_93 [1] : vector<8x32xf32> to vector<8xf32>
    %126 = vector.shape_cast %125 : vector<8xf32> to vector<8x1xf32>
    %cst_94 = arith.constant 3.200000e+01 : f32
    %127 = vector.broadcast %cst_94 : f32 to vector<8x1xf32>
    %128 = arith.divf %126, %127 : vector<8x1xf32>
    %129 = vector.broadcast %121 : vector<8x1xf32> to vector<8x32xf32>
    %130 = arith.subf %117, %129 : vector<8x32xf32>
    %cst_95 = arith.constant 9.99999974E-6 : f32
    %131 = vector.broadcast %cst_95 : f32 to vector<8x1xf32>
    %132 = arith.addf %128, %131 : vector<8x1xf32>
    %133 = math.rsqrt %132 : vector<8x1xf32>
    %134 = vector.broadcast %133 : vector<8x1xf32> to vector<8x32xf32>
    %135 = arith.mulf %130, %134 : vector<8x32xf32>
    %136 = vector.broadcast %11 : vector<1x32xf32> to vector<8x32xf32>
    %137 = arith.mulf %135, %136 : vector<8x32xf32>
    %138 = vector.broadcast %12 : vector<1x32xf32> to vector<8x32xf32>
    %139 = arith.addf %137, %138 : vector<8x32xf32>
    %cst_96 = arith.constant dense<0.000000e+00> : vector<8x256xf32>
    %140 = tpu.matmul %139, %14, %cst_96 {dimension_numbers = #tpu.dot_dimension_numbers<[1], [0], [0], [1], [0, 0, 1, 1], [], []>} : vector<8x32xf32>, vector<32x256xf32>, vector<8x256xf32> -> vector<8x256xf32>
    %141 = vector.broadcast %16 : vector<1x256xf32> to vector<8x256xf32>
    %142 = arith.addf %140, %141 : vector<8x256xf32>
    %143 = vector.extract_strided_slice %142 {offsets = [0, 0], sizes = [8, 128], strides = [1, 1]} : vector<8x256xf32> to vector<8x128xf32>
    %144 = vector.extract_strided_slice %142 {offsets = [0, 128], sizes = [8, 128], strides = [1, 1]} : vector<8x256xf32> to vector<8x128xf32>
    %cst_97 = arith.constant 5.000000e-01 : f32
    %145 = vector.broadcast %cst_97 : f32 to vector<8x128xf32>
    %146 = arith.mulf %145, %144 : vector<8x128xf32>
    %cst_98 = arith.constant 4.471500e-02 : f32
    %147 = vector.broadcast %cst_98 : f32 to vector<8x128xf32>
    %148 = arith.mulf %147, %144 : vector<8x128xf32>
    %149 = arith.mulf %148, %144 : vector<8x128xf32>
    %150 = arith.mulf %149, %144 : vector<8x128xf32>
    %151 = arith.addf %144, %150 : vector<8x128xf32>
    %cst_99 = arith.constant 0.797884583 : f32
    %152 = vector.broadcast %cst_99 : f32 to vector<8x128xf32>
    %153 = arith.mulf %152, %151 : vector<8x128xf32>
    %154 = math.tanh %153 : vector<8x128xf32>
    %cst_100 = arith.constant 1.000000e+00 : f32
    %155 = vector.broadcast %cst_100 : f32 to vector<8x128xf32>
    %156 = arith.addf %155, %154 : vector<8x128xf32>
    %157 = arith.mulf %146, %156 : vector<8x128xf32>
    %158 = arith.mulf %143, %157 : vector<8x128xf32>
    %cst_101 = arith.constant dense<0.000000e+00> : vector<8x32xf32>
    %159 = tpu.matmul %158, %18, %cst_101 {dimension_numbers = #tpu.dot_dimension_numbers<[1], [0], [0], [1], [0, 0, 1, 1], [], []>} : vector<8x128xf32>, vector<128x32xf32>, vector<8x32xf32> -> vector<8x32xf32>
    %160 = vector.broadcast %19 : vector<1x32xf32> to vector<8x32xf32>
    %161 = arith.addf %159, %160 : vector<8x32xf32>
    %162 = arith.addf %161, %139 : vector<8x32xf32>
    %cst_102 = arith.constant dense<0.000000e+00> : vector<8xf32>
    %163 = vector.multi_reduction <add>, %162, %cst_102 [1] : vector<8x32xf32> to vector<8xf32>
    %164 = vector.shape_cast %163 : vector<8xf32> to vector<8x1xf32>
    %cst_103 = arith.constant 3.200000e+01 : f32
    %165 = vector.broadcast %cst_103 : f32 to vector<8x1xf32>
    %166 = arith.divf %164, %165 : vector<8x1xf32>
    %167 = vector.broadcast %166 : vector<8x1xf32> to vector<8x32xf32>
    %168 = arith.subf %162, %167 : vector<8x32xf32>
    %169 = arith.mulf %168, %168 : vector<8x32xf32>
    %cst_104 = arith.constant dense<0.000000e+00> : vector<8xf32>
    %170 = vector.multi_reduction <add>, %169, %cst_104 [1] : vector<8x32xf32> to vector<8xf32>
    %171 = vector.shape_cast %170 : vector<8xf32> to vector<8x1xf32>
    %cst_105 = arith.constant 3.200000e+01 : f32
    %172 = vector.broadcast %cst_105 : f32 to vector<8x1xf32>
    %173 = arith.divf %171, %172 : vector<8x1xf32>
    %174 = vector.broadcast %166 : vector<8x1xf32> to vector<8x32xf32>
    %175 = arith.subf %162, %174 : vector<8x32xf32>
    %cst_106 = arith.constant 9.99999974E-6 : f32
    %176 = vector.broadcast %cst_106 : f32 to vector<8x1xf32>
    %177 = arith.addf %173, %176 : vector<8x1xf32>
    %178 = math.rsqrt %177 : vector<8x1xf32>
    %179 = vector.broadcast %178 : vector<8x1xf32> to vector<8x32xf32>
    %180 = arith.mulf %175, %179 : vector<8x32xf32>
    %181 = vector.broadcast %20 : vector<1x32xf32> to vector<8x32xf32>
    %182 = arith.mulf %180, %181 : vector<8x32xf32>
    %183 = vector.broadcast %21 : vector<1x32xf32> to vector<8x32xf32>
    %184 = arith.addf %182, %183 : vector<8x32xf32>
    %185 = tpu.transpose %184, [1, 0] : vector<8x32xf32> -> vector<32x8xf32>
    %cst_107 = arith.constant dense<0.000000e+00> : vector<32x48xf32>
    %186 = tpu.matmul %185, %23, %cst_107 {dimension_numbers = #tpu.dot_dimension_numbers<[1], [0], [0], [1], [0, 0, 1, 1], [], []>} : vector<32x8xf32>, vector<8x48xf32>, vector<32x48xf32> -> vector<32x48xf32>
    %187 = vector.extract_strided_slice %186 {offsets = [0, 0], sizes = [32, 8], strides = [1, 1]} : vector<32x48xf32> to vector<32x8xf32>
    %188 = vector.extract_strided_slice %186 {offsets = [0, 16], sizes = [32, 8], strides = [1, 1]} : vector<32x48xf32> to vector<32x8xf32>
    %189 = vector.extract_strided_slice %186 {offsets = [0, 32], sizes = [32, 8], strides = [1, 1]} : vector<32x48xf32> to vector<32x8xf32>
    %cst_108 = arith.constant dense<0.000000e+00> : vector<32x32xf32>
    %190 = tpu.matmul %187, %188, %cst_108 {dimension_numbers = #tpu.dot_dimension_numbers<[1], [1], [0], [0], [0, 0, 1, 0], [], []>} : vector<32x8xf32>, vector<32x8xf32>, vector<32x32xf32> -> vector<32x32xf32>
    %cst_109 = arith.constant 0.353553385 : f32
    %191 = vector.broadcast %cst_109 : f32 to vector<32x32xf32>
    %192 = arith.mulf %190, %191 : vector<32x32xf32>
    %cst_110 = arith.constant dense<0xFF800000> : vector<32xf32>
    %193 = vector.multi_reduction <maximumf>, %192, %cst_110 [1] : vector<32x32xf32> to vector<32xf32>
    %194 = vector.shape_cast %193 : vector<32xf32> to vector<32x1xf32>
    %195 = vector.broadcast %194 : vector<32x1xf32> to vector<32x32xf32>
    %196 = arith.subf %192, %195 : vector<32x32xf32>
    %197 = math.exp %196 : vector<32x32xf32>
    %cst_111 = arith.constant dense<0.000000e+00> : vector<32xf32>
    %198 = vector.multi_reduction <add>, %197, %cst_111 [1] : vector<32x32xf32> to vector<32xf32>
    %199 = vector.shape_cast %198 : vector<32xf32> to vector<32x1xf32>
    %200 = tpu.reciprocal %199 {approx = true} : vector<32x1xf32> -> vector<32x1xf32>
    %201 = vector.broadcast %200 : vector<32x1xf32> to vector<32x32xf32>
    %202 = arith.mulf %197, %201 : vector<32x32xf32>
    %cst_112 = arith.constant dense<0.000000e+00> : vector<32x8xf32>
    %203 = tpu.matmul %202, %189, %cst_112 {dimension_numbers = #tpu.dot_dimension_numbers<[1], [0], [0], [1], [0, 0, 1, 1], [], []>} : vector<32x32xf32>, vector<32x8xf32>, vector<32x8xf32> -> vector<32x8xf32>
    %204 = vector.extract_strided_slice %186 {offsets = [0, 8], sizes = [32, 8], strides = [1, 1]} : vector<32x48xf32> to vector<32x8xf32>
    %205 = vector.extract_strided_slice %186 {offsets = [0, 24], sizes = [32, 8], strides = [1, 1]} : vector<32x48xf32> to vector<32x8xf32>
    %206 = vector.extract_strided_slice %186 {offsets = [0, 40], sizes = [32, 8], strides = [1, 1]} : vector<32x48xf32> to vector<32x8xf32>
    %cst_113 = arith.constant dense<0.000000e+00> : vector<32x32xf32>
    %207 = tpu.matmul %204, %205, %cst_113 {dimension_numbers = #tpu.dot_dimension_numbers<[1], [1], [0], [0], [0, 0, 1, 0], [], []>} : vector<32x8xf32>, vector<32x8xf32>, vector<32x32xf32> -> vector<32x32xf32>
    %cst_114 = arith.constant 0.353553385 : f32
    %208 = vector.broadcast %cst_114 : f32 to vector<32x32xf32>
    %209 = arith.mulf %207, %208 : vector<32x32xf32>
    %cst_115 = arith.constant dense<0xFF800000> : vector<32xf32>
    %210 = vector.multi_reduction <maximumf>, %209, %cst_115 [1] : vector<32x32xf32> to vector<32xf32>
    %211 = vector.shape_cast %210 : vector<32xf32> to vector<32x1xf32>
    %212 = vector.broadcast %211 : vector<32x1xf32> to vector<32x32xf32>
    %213 = arith.subf %209, %212 : vector<32x32xf32>
    %214 = math.exp %213 : vector<32x32xf32>
    %cst_116 = arith.constant dense<0.000000e+00> : vector<32xf32>
    %215 = vector.multi_reduction <add>, %214, %cst_116 [1] : vector<32x32xf32> to vector<32xf32>
    %216 = vector.shape_cast %215 : vector<32xf32> to vector<32x1xf32>
    %217 = tpu.reciprocal %216 {approx = true} : vector<32x1xf32> -> vector<32x1xf32>
    %218 = vector.broadcast %217 : vector<32x1xf32> to vector<32x32xf32>
    %219 = arith.mulf %214, %218 : vector<32x32xf32>
    %cst_117 = arith.constant dense<0.000000e+00> : vector<32x8xf32>
    %220 = tpu.matmul %219, %206, %cst_117 {dimension_numbers = #tpu.dot_dimension_numbers<[1], [0], [0], [1], [0, 0, 1, 1], [], []>} : vector<32x32xf32>, vector<32x8xf32>, vector<32x8xf32> -> vector<32x8xf32>
    %221 = tpu.concatenate %203, %220 in 1 : vector<32x8xf32>, vector<32x8xf32> -> vector<32x16xf32>
    %cst_118 = arith.constant dense<0.000000e+00> : vector<32x8xf32>
    %222 = tpu.matmul %221, %25, %cst_118 {dimension_numbers = #tpu.dot_dimension_numbers<[1], [0], [0], [1], [0, 0, 1, 1], [], []>} : vector<32x16xf32>, vector<16x8xf32>, vector<32x8xf32> -> vector<32x8xf32>
    %223 = vector.broadcast %26 : vector<1x8xf32> to vector<32x8xf32>
    %224 = arith.addf %222, %223 : vector<32x8xf32>
    %225 = arith.addf %224, %185 : vector<32x8xf32>
    %cst_119 = arith.constant dense<0.000000e+00> : vector<32xf32>
    %226 = vector.multi_reduction <add>, %225, %cst_119 [1] : vector<32x8xf32> to vector<32xf32>
    %227 = vector.shape_cast %226 : vector<32xf32> to vector<32x1xf32>
    %cst_120 = arith.constant 8.000000e+00 : f32
    %228 = vector.broadcast %cst_120 : f32 to vector<32x1xf32>
    %229 = arith.divf %227, %228 : vector<32x1xf32>
    %230 = vector.broadcast %229 : vector<32x1xf32> to vector<32x8xf32>
    %231 = arith.subf %225, %230 : vector<32x8xf32>
    %232 = arith.mulf %231, %231 : vector<32x8xf32>
    %cst_121 = arith.constant dense<0.000000e+00> : vector<32xf32>
    %233 = vector.multi_reduction <add>, %232, %cst_121 [1] : vector<32x8xf32> to vector<32xf32>
    %234 = vector.shape_cast %233 : vector<32xf32> to vector<32x1xf32>
    %cst_122 = arith.constant 8.000000e+00 : f32
    %235 = vector.broadcast %cst_122 : f32 to vector<32x1xf32>
    %236 = arith.divf %234, %235 : vector<32x1xf32>
    %237 = vector.broadcast %229 : vector<32x1xf32> to vector<32x8xf32>
    %238 = arith.subf %225, %237 : vector<32x8xf32>
    %cst_123 = arith.constant 9.99999974E-6 : f32
    %239 = vector.broadcast %cst_123 : f32 to vector<32x1xf32>
    %240 = arith.addf %236, %239 : vector<32x1xf32>
    %241 = math.rsqrt %240 : vector<32x1xf32>
    %242 = vector.broadcast %241 : vector<32x1xf32> to vector<32x8xf32>
    %243 = arith.mulf %238, %242 : vector<32x8xf32>
    %244 = vector.broadcast %27 : vector<1x8xf32> to vector<32x8xf32>
    %245 = arith.mulf %243, %244 : vector<32x8xf32>
    %246 = vector.broadcast %28 : vector<1x8xf32> to vector<32x8xf32>
    %247 = arith.addf %245, %246 : vector<32x8xf32>
    %cst_124 = arith.constant dense<0.000000e+00> : vector<32x64xf32>
    %248 = tpu.matmul %247, %30, %cst_124 {dimension_numbers = #tpu.dot_dimension_numbers<[1], [0], [0], [1], [0, 0, 1, 1], [], []>} : vector<32x8xf32>, vector<8x64xf32>, vector<32x64xf32> -> vector<32x64xf32>
    %249 = vector.broadcast %32 : vector<1x64xf32> to vector<32x64xf32>
    %250 = arith.addf %248, %249 : vector<32x64xf32>
    %251 = vector.extract_strided_slice %250 {offsets = [0, 0], sizes = [32, 32], strides = [1, 1]} : vector<32x64xf32> to vector<32x32xf32>
    %252 = vector.extract_strided_slice %250 {offsets = [0, 32], sizes = [32, 32], strides = [1, 1]} : vector<32x64xf32> to vector<32x32xf32>
    %cst_125 = arith.constant 5.000000e-01 : f32
    %253 = vector.broadcast %cst_125 : f32 to vector<32x32xf32>
    %254 = arith.mulf %253, %252 : vector<32x32xf32>
    %cst_126 = arith.constant 4.471500e-02 : f32
    %255 = vector.broadcast %cst_126 : f32 to vector<32x32xf32>
    %256 = arith.mulf %255, %252 : vector<32x32xf32>
    %257 = arith.mulf %256, %252 : vector<32x32xf32>
    %258 = arith.mulf %257, %252 : vector<32x32xf32>
    %259 = arith.addf %252, %258 : vector<32x32xf32>
    %cst_127 = arith.constant 0.797884583 : f32
    %260 = vector.broadcast %cst_127 : f32 to vector<32x32xf32>
    %261 = arith.mulf %260, %259 : vector<32x32xf32>
    %262 = math.tanh %261 : vector<32x32xf32>
    %cst_128 = arith.constant 1.000000e+00 : f32
    %263 = vector.broadcast %cst_128 : f32 to vector<32x32xf32>
    %264 = arith.addf %263, %262 : vector<32x32xf32>
    %265 = arith.mulf %254, %264 : vector<32x32xf32>
    %266 = arith.mulf %251, %265 : vector<32x32xf32>
    %cst_129 = arith.constant dense<0.000000e+00> : vector<32x8xf32>
    %267 = tpu.matmul %266, %34, %cst_129 {dimension_numbers = #tpu.dot_dimension_numbers<[1], [0], [0], [1], [0, 0, 1, 1], [], []>} : vector<32x32xf32>, vector<32x8xf32>, vector<32x8xf32> -> vector<32x8xf32>
    %268 = vector.broadcast %35 : vector<1x8xf32> to vector<32x8xf32>
    %269 = arith.addf %267, %268 : vector<32x8xf32>
    %270 = arith.addf %269, %247 : vector<32x8xf32>
    %cst_130 = arith.constant dense<0.000000e+00> : vector<32xf32>
    %271 = vector.multi_reduction <add>, %270, %cst_130 [1] : vector<32x8xf32> to vector<32xf32>
    %272 = vector.shape_cast %271 : vector<32xf32> to vector<32x1xf32>
    %cst_131 = arith.constant 8.000000e+00 : f32
    %273 = vector.broadcast %cst_131 : f32 to vector<32x1xf32>
    %274 = arith.divf %272, %273 : vector<32x1xf32>
    %275 = vector.broadcast %274 : vector<32x1xf32> to vector<32x8xf32>
    %276 = arith.subf %270, %275 : vector<32x8xf32>
    %277 = arith.mulf %276, %276 : vector<32x8xf32>
    %cst_132 = arith.constant dense<0.000000e+00> : vector<32xf32>
    %278 = vector.multi_reduction <add>, %277, %cst_132 [1] : vector<32x8xf32> to vector<32xf32>
    %279 = vector.shape_cast %278 : vector<32xf32> to vector<32x1xf32>
    %cst_133 = arith.constant 8.000000e+00 : f32
    %280 = vector.broadcast %cst_133 : f32 to vector<32x1xf32>
    %281 = arith.divf %279, %280 : vector<32x1xf32>
    %282 = vector.broadcast %274 : vector<32x1xf32> to vector<32x8xf32>
    %283 = arith.subf %270, %282 : vector<32x8xf32>
    %cst_134 = arith.constant 9.99999974E-6 : f32
    %284 = vector.broadcast %cst_134 : f32 to vector<32x1xf32>
    %285 = arith.addf %281, %284 : vector<32x1xf32>
    %286 = math.rsqrt %285 : vector<32x1xf32>
    %287 = vector.broadcast %286 : vector<32x1xf32> to vector<32x8xf32>
    %288 = arith.mulf %283, %287 : vector<32x8xf32>
    %289 = vector.broadcast %36 : vector<1x8xf32> to vector<32x8xf32>
    %290 = arith.mulf %288, %289 : vector<32x8xf32>
    %291 = vector.broadcast %37 : vector<1x8xf32> to vector<32x8xf32>
    %292 = arith.addf %290, %291 : vector<32x8xf32>
    %293 = tpu.transpose %292, [1, 0] : vector<32x8xf32> -> vector<8x32xf32>
    %cst_135 = arith.constant dense<0.000000e+00> : vector<8x24xf32>
    %294 = tpu.matmul %1, %43, %cst_135 {dimension_numbers = #tpu.dot_dimension_numbers<[1], [0], [0], [1], [0, 0, 1, 1], [], []>} : vector<8x32xf32>, vector<32x24xf32>, vector<8x24xf32> -> vector<8x24xf32>
    %295 = vector.extract_strided_slice %294 {offsets = [0, 0], sizes = [8, 8], strides = [1, 1]} : vector<8x24xf32> to vector<8x8xf32>
    %296 = vector.extract_strided_slice %294 {offsets = [0, 8], sizes = [8, 8], strides = [1, 1]} : vector<8x24xf32> to vector<8x8xf32>
    %297 = vector.extract_strided_slice %294 {offsets = [0, 16], sizes = [8, 8], strides = [1, 1]} : vector<8x24xf32> to vector<8x8xf32>
    %cst_136 = arith.constant dense<0.000000e+00> : vector<8x8xf32>
    %298 = tpu.matmul %295, %296, %cst_136 {dimension_numbers = #tpu.dot_dimension_numbers<[1], [1], [0], [0], [0, 0, 1, 0], [], []>} : vector<8x8xf32>, vector<8x8xf32>, vector<8x8xf32> -> vector<8x8xf32>
    %cst_137 = arith.constant 0.353553385 : f32
    %299 = vector.broadcast %cst_137 : f32 to vector<8x8xf32>
    %300 = arith.mulf %298, %299 : vector<8x8xf32>
    %cst_138 = arith.constant dense<0xFF800000> : vector<8xf32>
    %301 = vector.multi_reduction <maximumf>, %300, %cst_138 [1] : vector<8x8xf32> to vector<8xf32>
    %302 = vector.shape_cast %301 : vector<8xf32> to vector<8x1xf32>
    %303 = vector.broadcast %302 : vector<8x1xf32> to vector<8x8xf32>
    %304 = arith.subf %300, %303 : vector<8x8xf32>
    %305 = math.exp %304 : vector<8x8xf32>
    %cst_139 = arith.constant dense<0.000000e+00> : vector<8xf32>
    %306 = vector.multi_reduction <add>, %305, %cst_139 [1] : vector<8x8xf32> to vector<8xf32>
    %307 = vector.shape_cast %306 : vector<8xf32> to vector<8x1xf32>
    %308 = tpu.reciprocal %307 {approx = true} : vector<8x1xf32> -> vector<8x1xf32>
    %309 = vector.broadcast %308 : vector<8x1xf32> to vector<8x8xf32>
    %310 = arith.mulf %305, %309 : vector<8x8xf32>
    %cst_140 = arith.constant dense<0.000000e+00> : vector<8x8xf32>
    %311 = tpu.matmul %310, %297, %cst_140 {dimension_numbers = #tpu.dot_dimension_numbers<[1], [0], [0], [1], [0, 0, 1, 1], [], []>} : vector<8x8xf32>, vector<8x8xf32>, vector<8x8xf32> -> vector<8x8xf32>
    %cst_141 = arith.constant dense<0.000000e+00> : vector<8x8xf32>
    %312 = tpu.matmul %311, %45, %cst_141 {dimension_numbers = #tpu.dot_dimension_numbers<[1], [0], [0], [1], [0, 0, 1, 1], [], []>} : vector<8x8xf32>, vector<8x8xf32>, vector<8x8xf32> -> vector<8x8xf32>
    %313 = vector.broadcast %46 : vector<1x8xf32> to vector<8x8xf32>
    %314 = arith.addf %312, %313 : vector<8x8xf32>
    %cst_142 = arith.constant dense<0.000000e+00> : vector<8xf32>
    %315 = vector.multi_reduction <add>, %1, %cst_142 [1] : vector<8x32xf32> to vector<8xf32>
    %316 = vector.shape_cast %315 : vector<8xf32> to vector<8x1xf32>
    %cst_143 = arith.constant 3.200000e+01 : f32
    %317 = vector.broadcast %cst_143 : f32 to vector<8x1xf32>
    %318 = arith.divf %316, %317 : vector<8x1xf32>
    %319 = vector.broadcast %318 : vector<8x1xf32> to vector<8x32xf32>
    %320 = arith.subf %1, %319 : vector<8x32xf32>
    %321 = arith.mulf %320, %320 : vector<8x32xf32>
    %cst_144 = arith.constant dense<0.000000e+00> : vector<8xf32>
    %322 = vector.multi_reduction <add>, %321, %cst_144 [1] : vector<8x32xf32> to vector<8xf32>
    %323 = vector.shape_cast %322 : vector<8xf32> to vector<8x1xf32>
    %cst_145 = arith.constant 3.200000e+01 : f32
    %324 = vector.broadcast %cst_145 : f32 to vector<8x1xf32>
    %325 = arith.divf %323, %324 : vector<8x1xf32>
    %326 = vector.broadcast %318 : vector<8x1xf32> to vector<8x32xf32>
    %327 = arith.subf %1, %326 : vector<8x32xf32>
    %cst_146 = arith.constant 9.99999974E-6 : f32
    %328 = vector.broadcast %cst_146 : f32 to vector<8x1xf32>
    %329 = arith.addf %325, %328 : vector<8x1xf32>
    %330 = math.rsqrt %329 : vector<8x1xf32>
    %331 = vector.broadcast %330 : vector<8x1xf32> to vector<8x32xf32>
    %332 = arith.mulf %327, %331 : vector<8x32xf32>
    %333 = vector.broadcast %47 : vector<1x32xf32> to vector<8x32xf32>
    %334 = arith.mulf %332, %333 : vector<8x32xf32>
    %335 = vector.broadcast %48 : vector<1x32xf32> to vector<8x32xf32>
    %336 = arith.addf %334, %335 : vector<8x32xf32>
    %cst_147 = arith.constant dense<0.000000e+00> : vector<8x32xf32>
    %337 = tpu.matmul %336, %51, %cst_147 {dimension_numbers = #tpu.dot_dimension_numbers<[1], [0], [0], [1], [0, 0, 1, 1], [], []>} : vector<8x32xf32>, vector<32x32xf32>, vector<8x32xf32> -> vector<8x32xf32>
    %338 = vector.broadcast %53 : vector<1x32xf32> to vector<8x32xf32>
    %339 = arith.addf %337, %338 : vector<8x32xf32>
    %cst_148 = arith.constant 5.000000e-01 : f32
    %340 = vector.broadcast %cst_148 : f32 to vector<8x32xf32>
    %341 = arith.mulf %340, %339 : vector<8x32xf32>
    %cst_149 = arith.constant 4.471500e-02 : f32
    %342 = vector.broadcast %cst_149 : f32 to vector<8x32xf32>
    %343 = arith.mulf %342, %339 : vector<8x32xf32>
    %344 = arith.mulf %343, %339 : vector<8x32xf32>
    %345 = arith.mulf %344, %339 : vector<8x32xf32>
    %346 = arith.addf %339, %345 : vector<8x32xf32>
    %cst_150 = arith.constant 0.797884583 : f32
    %347 = vector.broadcast %cst_150 : f32 to vector<8x32xf32>
    %348 = arith.mulf %347, %346 : vector<8x32xf32>
    %349 = math.tanh %348 : vector<8x32xf32>
    %cst_151 = arith.constant 1.000000e+00 : f32
    %350 = vector.broadcast %cst_151 : f32 to vector<8x32xf32>
    %351 = arith.addf %350, %349 : vector<8x32xf32>
    %352 = arith.mulf %341, %351 : vector<8x32xf32>
    %353 = vector.extract_strided_slice %352 {offsets = [0, 0], sizes = [8, 8], strides = [1, 1]} : vector<8x32xf32> to vector<8x8xf32>
    %354 = vector.extract_strided_slice %352 {offsets = [0, 8], sizes = [8, 8], strides = [1, 1]} : vector<8x32xf32> to vector<8x8xf32>
    %cst_152 = arith.constant dense<0.000000e+00> : vector<8xf32>
    %355 = vector.multi_reduction <add>, %354, %cst_152 [1] : vector<8x8xf32> to vector<8xf32>
    %356 = vector.shape_cast %355 : vector<8xf32> to vector<8x1xf32>
    %cst_153 = arith.constant 8.000000e+00 : f32
    %357 = vector.broadcast %cst_153 : f32 to vector<8x1xf32>
    %358 = arith.divf %356, %357 : vector<8x1xf32>
    %359 = vector.broadcast %358 : vector<8x1xf32> to vector<8x8xf32>
    %360 = arith.subf %354, %359 : vector<8x8xf32>
    %361 = arith.mulf %360, %360 : vector<8x8xf32>
    %cst_154 = arith.constant dense<0.000000e+00> : vector<8xf32>
    %362 = vector.multi_reduction <add>, %361, %cst_154 [1] : vector<8x8xf32> to vector<8xf32>
    %363 = vector.shape_cast %362 : vector<8xf32> to vector<8x1xf32>
    %cst_155 = arith.constant 8.000000e+00 : f32
    %364 = vector.broadcast %cst_155 : f32 to vector<8x1xf32>
    %365 = arith.divf %363, %364 : vector<8x1xf32>
    %366 = vector.broadcast %358 : vector<8x1xf32> to vector<8x8xf32>
    %367 = arith.subf %354, %366 : vector<8x8xf32>
    %cst_156 = arith.constant 9.99999974E-6 : f32
    %368 = vector.broadcast %cst_156 : f32 to vector<8x1xf32>
    %369 = arith.addf %365, %368 : vector<8x1xf32>
    %370 = math.rsqrt %369 : vector<8x1xf32>
    %371 = vector.broadcast %370 : vector<8x1xf32> to vector<8x8xf32>
    %372 = arith.mulf %367, %371 : vector<8x8xf32>
    %373 = vector.broadcast %54 : vector<1x8xf32> to vector<8x8xf32>
    %374 = arith.mulf %372, %373 : vector<8x8xf32>
    %375 = vector.broadcast %55 : vector<1x8xf32> to vector<8x8xf32>
    %376 = arith.addf %374, %375 : vector<8x8xf32>
    %377 = vector.extract_strided_slice %352 {offsets = [0, 16], sizes = [8, 8], strides = [1, 1]} : vector<8x32xf32> to vector<8x8xf32>
    %378 = vector.extract_strided_slice %352 {offsets = [0, 24], sizes = [8, 8], strides = [1, 1]} : vector<8x32xf32> to vector<8x8xf32>
    %cst_157 = arith.constant dense<0.000000e+00> : vector<8xf32>
    %379 = vector.multi_reduction <add>, %378, %cst_157 [1] : vector<8x8xf32> to vector<8xf32>
    %380 = vector.shape_cast %379 : vector<8xf32> to vector<8x1xf32>
    %cst_158 = arith.constant 8.000000e+00 : f32
    %381 = vector.broadcast %cst_158 : f32 to vector<8x1xf32>
    %382 = arith.divf %380, %381 : vector<8x1xf32>
    %383 = vector.broadcast %382 : vector<8x1xf32> to vector<8x8xf32>
    %384 = arith.subf %378, %383 : vector<8x8xf32>
    %385 = arith.mulf %384, %384 : vector<8x8xf32>
    %cst_159 = arith.constant dense<0.000000e+00> : vector<8xf32>
    %386 = vector.multi_reduction <add>, %385, %cst_159 [1] : vector<8x8xf32> to vector<8xf32>
    %387 = vector.shape_cast %386 : vector<8xf32> to vector<8x1xf32>
    %cst_160 = arith.constant 8.000000e+00 : f32
    %388 = vector.broadcast %cst_160 : f32 to vector<8x1xf32>
    %389 = arith.divf %387, %388 : vector<8x1xf32>
    %390 = vector.broadcast %382 : vector<8x1xf32> to vector<8x8xf32>
    %391 = arith.subf %378, %390 : vector<8x8xf32>
    %cst_161 = arith.constant 9.99999974E-6 : f32
    %392 = vector.broadcast %cst_161 : f32 to vector<8x1xf32>
    %393 = arith.addf %389, %392 : vector<8x1xf32>
    %394 = math.rsqrt %393 : vector<8x1xf32>
    %395 = vector.broadcast %394 : vector<8x1xf32> to vector<8x8xf32>
    %396 = arith.mulf %391, %395 : vector<8x8xf32>
    %397 = vector.broadcast %54 : vector<1x8xf32> to vector<8x8xf32>
    %398 = arith.mulf %396, %397 : vector<8x8xf32>
    %399 = vector.broadcast %55 : vector<1x8xf32> to vector<8x8xf32>
    %400 = arith.addf %398, %399 : vector<8x8xf32>
    %c0_162 = arith.constant 0 : index
    %c0_163 = arith.constant 0 : index
    %401 = memref.load %arg28[%c0_162, %c0_163] : memref<8x3xf32, #tpu.memory_space<smem>>
    %402 = vector.broadcast %401 : f32 to vector<8x8xf32>
    %403 = arith.mulf %376, %402 : vector<8x8xf32>
    %c0_164 = arith.constant 0 : index
    %c1 = arith.constant 1 : index
    %404 = memref.load %arg28[%c0_164, %c1] : memref<8x3xf32, #tpu.memory_space<smem>>
    %405 = vector.broadcast %404 : f32 to vector<8x8xf32>
    %406 = arith.mulf %400, %405 : vector<8x8xf32>
    %407 = arith.addf %403, %406 : vector<8x8xf32>
    %c0_165 = arith.constant 0 : index
    %c2 = arith.constant 2 : index
    %408 = memref.load %arg28[%c0_165, %c2] : memref<8x3xf32, #tpu.memory_space<smem>>
    %409 = vector.broadcast %408 : f32 to vector<8x8xf32>
    %410 = arith.addf %407, %409 : vector<8x8xf32>
    %411 = arith.addf %410, %314 : vector<8x8xf32>
    %412 = arith.mulf %411, %353 : vector<8x8xf32>
    %c1_166 = arith.constant 1 : index
    %c0_167 = arith.constant 0 : index
    %413 = memref.load %arg28[%c1_166, %c0_167] : memref<8x3xf32, #tpu.memory_space<smem>>
    %414 = vector.broadcast %413 : f32 to vector<8x8xf32>
    %415 = arith.mulf %376, %414 : vector<8x8xf32>
    %c1_168 = arith.constant 1 : index
    %c1_169 = arith.constant 1 : index
    %416 = memref.load %arg28[%c1_168, %c1_169] : memref<8x3xf32, #tpu.memory_space<smem>>
    %417 = vector.broadcast %416 : f32 to vector<8x8xf32>
    %418 = arith.mulf %400, %417 : vector<8x8xf32>
    %419 = arith.addf %415, %418 : vector<8x8xf32>
    %c1_170 = arith.constant 1 : index
    %c2_171 = arith.constant 2 : index
    %420 = memref.load %arg28[%c1_170, %c2_171] : memref<8x3xf32, #tpu.memory_space<smem>>
    %421 = vector.broadcast %420 : f32 to vector<8x8xf32>
    %422 = arith.addf %419, %421 : vector<8x8xf32>
    %423 = arith.addf %422, %314 : vector<8x8xf32>
    %424 = arith.mulf %423, %377 : vector<8x8xf32>
    %425 = tpu.concatenate %412, %424 in 1 : vector<8x8xf32>, vector<8x8xf32> -> vector<8x16xf32>
    %cst_172 = arith.constant dense<0.000000e+00> : vector<8x32xf32>
    %426 = tpu.matmul %425, %57, %cst_172 {dimension_numbers = #tpu.dot_dimension_numbers<[1], [0], [0], [1], [0, 0, 1, 1], [], []>} : vector<8x16xf32>, vector<16x32xf32>, vector<8x32xf32> -> vector<8x32xf32>
    %427 = vector.broadcast %49 : vector<1x32xf32> to vector<8x32xf32>
    %428 = arith.addf %426, %427 : vector<8x32xf32>
    %429 = arith.addf %428, %1 : vector<8x32xf32>
    %430 = tpu.transpose %429, [1, 0] : vector<8x32xf32> -> vector<32x8xf32>
    %cst_173 = arith.constant dense<0.000000e+00> : vector<32x24xf32>
    %431 = tpu.matmul %430, %63, %cst_173 {dimension_numbers = #tpu.dot_dimension_numbers<[1], [0], [0], [1], [0, 0, 1, 1], [], []>} : vector<32x8xf32>, vector<8x24xf32>, vector<32x24xf32> -> vector<32x24xf32>
    %432 = vector.extract_strided_slice %431 {offsets = [0, 0], sizes = [32, 8], strides = [1, 1]} : vector<32x24xf32> to vector<32x8xf32>
    %433 = vector.extract_strided_slice %431 {offsets = [0, 8], sizes = [32, 8], strides = [1, 1]} : vector<32x24xf32> to vector<32x8xf32>
    %434 = vector.extract_strided_slice %431 {offsets = [0, 16], sizes = [32, 8], strides = [1, 1]} : vector<32x24xf32> to vector<32x8xf32>
    %cst_174 = arith.constant dense<0.000000e+00> : vector<32x32xf32>
    %435 = tpu.matmul %432, %433, %cst_174 {dimension_numbers = #tpu.dot_dimension_numbers<[1], [1], [0], [0], [0, 0, 1, 0], [], []>} : vector<32x8xf32>, vector<32x8xf32>, vector<32x32xf32> -> vector<32x32xf32>
    %cst_175 = arith.constant 0.353553385 : f32
    %436 = vector.broadcast %cst_175 : f32 to vector<32x32xf32>
    %437 = arith.mulf %435, %436 : vector<32x32xf32>
    %cst_176 = arith.constant dense<0xFF800000> : vector<32xf32>
    %438 = vector.multi_reduction <maximumf>, %437, %cst_176 [1] : vector<32x32xf32> to vector<32xf32>
    %439 = vector.shape_cast %438 : vector<32xf32> to vector<32x1xf32>
    %440 = vector.broadcast %439 : vector<32x1xf32> to vector<32x32xf32>
    %441 = arith.subf %437, %440 : vector<32x32xf32>
    %442 = math.exp %441 : vector<32x32xf32>
    %cst_177 = arith.constant dense<0.000000e+00> : vector<32xf32>
    %443 = vector.multi_reduction <add>, %442, %cst_177 [1] : vector<32x32xf32> to vector<32xf32>
    %444 = vector.shape_cast %443 : vector<32xf32> to vector<32x1xf32>
    %445 = tpu.reciprocal %444 {approx = true} : vector<32x1xf32> -> vector<32x1xf32>
    %446 = vector.broadcast %445 : vector<32x1xf32> to vector<32x32xf32>
    %447 = arith.mulf %442, %446 : vector<32x32xf32>
    %cst_178 = arith.constant dense<0.000000e+00> : vector<32x8xf32>
    %448 = tpu.matmul %447, %434, %cst_178 {dimension_numbers = #tpu.dot_dimension_numbers<[1], [0], [0], [1], [0, 0, 1, 1], [], []>} : vector<32x32xf32>, vector<32x8xf32>, vector<32x8xf32> -> vector<32x8xf32>
    %cst_179 = arith.constant dense<0.000000e+00> : vector<32x8xf32>
    %449 = tpu.matmul %448, %65, %cst_179 {dimension_numbers = #tpu.dot_dimension_numbers<[1], [0], [0], [1], [0, 0, 1, 1], [], []>} : vector<32x8xf32>, vector<8x8xf32>, vector<32x8xf32> -> vector<32x8xf32>
    %450 = vector.broadcast %66 : vector<1x8xf32> to vector<32x8xf32>
    %451 = arith.addf %449, %450 : vector<32x8xf32>
    %cst_180 = arith.constant dense<0.000000e+00> : vector<32xf32>
    %452 = vector.multi_reduction <add>, %430, %cst_180 [1] : vector<32x8xf32> to vector<32xf32>
    %453 = vector.shape_cast %452 : vector<32xf32> to vector<32x1xf32>
    %cst_181 = arith.constant 8.000000e+00 : f32
    %454 = vector.broadcast %cst_181 : f32 to vector<32x1xf32>
    %455 = arith.divf %453, %454 : vector<32x1xf32>
    %456 = vector.broadcast %455 : vector<32x1xf32> to vector<32x8xf32>
    %457 = arith.subf %430, %456 : vector<32x8xf32>
    %458 = arith.mulf %457, %457 : vector<32x8xf32>
    %cst_182 = arith.constant dense<0.000000e+00> : vector<32xf32>
    %459 = vector.multi_reduction <add>, %458, %cst_182 [1] : vector<32x8xf32> to vector<32xf32>
    %460 = vector.shape_cast %459 : vector<32xf32> to vector<32x1xf32>
    %cst_183 = arith.constant 8.000000e+00 : f32
    %461 = vector.broadcast %cst_183 : f32 to vector<32x1xf32>
    %462 = arith.divf %460, %461 : vector<32x1xf32>
    %463 = vector.broadcast %455 : vector<32x1xf32> to vector<32x8xf32>
    %464 = arith.subf %430, %463 : vector<32x8xf32>
    %cst_184 = arith.constant 9.99999974E-6 : f32
    %465 = vector.broadcast %cst_184 : f32 to vector<32x1xf32>
    %466 = arith.addf %462, %465 : vector<32x1xf32>
    %467 = math.rsqrt %466 : vector<32x1xf32>
    %468 = vector.broadcast %467 : vector<32x1xf32> to vector<32x8xf32>
    %469 = arith.mulf %464, %468 : vector<32x8xf32>
    %470 = vector.broadcast %67 : vector<1x8xf32> to vector<32x8xf32>
    %471 = arith.mulf %469, %470 : vector<32x8xf32>
    %472 = vector.broadcast %68 : vector<1x8xf32> to vector<32x8xf32>
    %473 = arith.addf %471, %472 : vector<32x8xf32>
    %cst_185 = arith.constant dense<0.000000e+00> : vector<32x32xf32>
    %474 = tpu.matmul %473, %71, %cst_185 {dimension_numbers = #tpu.dot_dimension_numbers<[1], [0], [0], [1], [0, 0, 1, 1], [], []>} : vector<32x8xf32>, vector<8x32xf32>, vector<32x32xf32> -> vector<32x32xf32>
    %475 = vector.broadcast %73 : vector<1x32xf32> to vector<32x32xf32>
    %476 = arith.addf %474, %475 : vector<32x32xf32>
    %cst_186 = arith.constant 5.000000e-01 : f32
    %477 = vector.broadcast %cst_186 : f32 to vector<32x32xf32>
    %478 = arith.mulf %477, %476 : vector<32x32xf32>
    %cst_187 = arith.constant 4.471500e-02 : f32
    %479 = vector.broadcast %cst_187 : f32 to vector<32x32xf32>
    %480 = arith.mulf %479, %476 : vector<32x32xf32>
    %481 = arith.mulf %480, %476 : vector<32x32xf32>
    %482 = arith.mulf %481, %476 : vector<32x32xf32>
    %483 = arith.addf %476, %482 : vector<32x32xf32>
    %cst_188 = arith.constant 0.797884583 : f32
    %484 = vector.broadcast %cst_188 : f32 to vector<32x32xf32>
    %485 = arith.mulf %484, %483 : vector<32x32xf32>
    %486 = math.tanh %485 : vector<32x32xf32>
    %cst_189 = arith.constant 1.000000e+00 : f32
    %487 = vector.broadcast %cst_189 : f32 to vector<32x32xf32>
    %488 = arith.addf %487, %486 : vector<32x32xf32>
    %489 = arith.mulf %478, %488 : vector<32x32xf32>
    %490 = vector.extract_strided_slice %489 {offsets = [0, 0], sizes = [32, 8], strides = [1, 1]} : vector<32x32xf32> to vector<32x8xf32>
    %491 = vector.extract_strided_slice %489 {offsets = [0, 8], sizes = [32, 8], strides = [1, 1]} : vector<32x32xf32> to vector<32x8xf32>
    %cst_190 = arith.constant dense<0.000000e+00> : vector<32xf32>
    %492 = vector.multi_reduction <add>, %491, %cst_190 [1] : vector<32x8xf32> to vector<32xf32>
    %493 = vector.shape_cast %492 : vector<32xf32> to vector<32x1xf32>
    %cst_191 = arith.constant 8.000000e+00 : f32
    %494 = vector.broadcast %cst_191 : f32 to vector<32x1xf32>
    %495 = arith.divf %493, %494 : vector<32x1xf32>
    %496 = vector.broadcast %495 : vector<32x1xf32> to vector<32x8xf32>
    %497 = arith.subf %491, %496 : vector<32x8xf32>
    %498 = arith.mulf %497, %497 : vector<32x8xf32>
    %cst_192 = arith.constant dense<0.000000e+00> : vector<32xf32>
    %499 = vector.multi_reduction <add>, %498, %cst_192 [1] : vector<32x8xf32> to vector<32xf32>
    %500 = vector.shape_cast %499 : vector<32xf32> to vector<32x1xf32>
    %cst_193 = arith.constant 8.000000e+00 : f32
    %501 = vector.broadcast %cst_193 : f32 to vector<32x1xf32>
    %502 = arith.divf %500, %501 : vector<32x1xf32>
    %503 = vector.broadcast %495 : vector<32x1xf32> to vector<32x8xf32>
    %504 = arith.subf %491, %503 : vector<32x8xf32>
    %cst_194 = arith.constant 9.99999974E-6 : f32
    %505 = vector.broadcast %cst_194 : f32 to vector<32x1xf32>
    %506 = arith.addf %502, %505 : vector<32x1xf32>
    %507 = math.rsqrt %506 : vector<32x1xf32>
    %508 = vector.broadcast %507 : vector<32x1xf32> to vector<32x8xf32>
    %509 = arith.mulf %504, %508 : vector<32x8xf32>
    %510 = vector.broadcast %74 : vector<1x8xf32> to vector<32x8xf32>
    %511 = arith.mulf %509, %510 : vector<32x8xf32>
    %512 = vector.broadcast %75 : vector<1x8xf32> to vector<32x8xf32>
    %513 = arith.addf %511, %512 : vector<32x8xf32>
    %514 = vector.extract_strided_slice %489 {offsets = [0, 16], sizes = [32, 8], strides = [1, 1]} : vector<32x32xf32> to vector<32x8xf32>
    %515 = vector.extract_strided_slice %489 {offsets = [0, 24], sizes = [32, 8], strides = [1, 1]} : vector<32x32xf32> to vector<32x8xf32>
    %cst_195 = arith.constant dense<0.000000e+00> : vector<32xf32>
    %516 = vector.multi_reduction <add>, %515, %cst_195 [1] : vector<32x8xf32> to vector<32xf32>
    %517 = vector.shape_cast %516 : vector<32xf32> to vector<32x1xf32>
    %cst_196 = arith.constant 8.000000e+00 : f32
    %518 = vector.broadcast %cst_196 : f32 to vector<32x1xf32>
    %519 = arith.divf %517, %518 : vector<32x1xf32>
    %520 = vector.broadcast %519 : vector<32x1xf32> to vector<32x8xf32>
    %521 = arith.subf %515, %520 : vector<32x8xf32>
    %522 = arith.mulf %521, %521 : vector<32x8xf32>
    %cst_197 = arith.constant dense<0.000000e+00> : vector<32xf32>
    %523 = vector.multi_reduction <add>, %522, %cst_197 [1] : vector<32x8xf32> to vector<32xf32>
    %524 = vector.shape_cast %523 : vector<32xf32> to vector<32x1xf32>
    %cst_198 = arith.constant 8.000000e+00 : f32
    %525 = vector.broadcast %cst_198 : f32 to vector<32x1xf32>
    %526 = arith.divf %524, %525 : vector<32x1xf32>
    %527 = vector.broadcast %519 : vector<32x1xf32> to vector<32x8xf32>
    %528 = arith.subf %515, %527 : vector<32x8xf32>
    %cst_199 = arith.constant 9.99999974E-6 : f32
    %529 = vector.broadcast %cst_199 : f32 to vector<32x1xf32>
    %530 = arith.addf %526, %529 : vector<32x1xf32>
    %531 = math.rsqrt %530 : vector<32x1xf32>
    %532 = vector.broadcast %531 : vector<32x1xf32> to vector<32x8xf32>
    %533 = arith.mulf %528, %532 : vector<32x8xf32>
    %534 = vector.broadcast %74 : vector<1x8xf32> to vector<32x8xf32>
    %535 = arith.mulf %533, %534 : vector<32x8xf32>
    %536 = vector.broadcast %75 : vector<1x8xf32> to vector<32x8xf32>
    %537 = arith.addf %535, %536 : vector<32x8xf32>
    %c2_200 = arith.constant 2 : index
    %c0_201 = arith.constant 0 : index
    %538 = memref.load %arg28[%c2_200, %c0_201] : memref<8x3xf32, #tpu.memory_space<smem>>
    %539 = vector.broadcast %538 : f32 to vector<32x8xf32>
    %540 = arith.mulf %513, %539 : vector<32x8xf32>
    %c2_202 = arith.constant 2 : index
    %c1_203 = arith.constant 1 : index
    %541 = memref.load %arg28[%c2_202, %c1_203] : memref<8x3xf32, #tpu.memory_space<smem>>
    %542 = vector.broadcast %541 : f32 to vector<32x8xf32>
    %543 = arith.mulf %537, %542 : vector<32x8xf32>
    %544 = arith.addf %540, %543 : vector<32x8xf32>
    %c2_204 = arith.constant 2 : index
    %c2_205 = arith.constant 2 : index
    %545 = memref.load %arg28[%c2_204, %c2_205] : memref<8x3xf32, #tpu.memory_space<smem>>
    %546 = vector.broadcast %545 : f32 to vector<32x8xf32>
    %547 = arith.addf %544, %546 : vector<32x8xf32>
    %548 = arith.addf %547, %451 : vector<32x8xf32>
    %549 = arith.mulf %548, %490 : vector<32x8xf32>
    %c3 = arith.constant 3 : index
    %c0_206 = arith.constant 0 : index
    %550 = memref.load %arg28[%c3, %c0_206] : memref<8x3xf32, #tpu.memory_space<smem>>
    %551 = vector.broadcast %550 : f32 to vector<32x8xf32>
    %552 = arith.mulf %513, %551 : vector<32x8xf32>
    %c3_207 = arith.constant 3 : index
    %c1_208 = arith.constant 1 : index
    %553 = memref.load %arg28[%c3_207, %c1_208] : memref<8x3xf32, #tpu.memory_space<smem>>
    %554 = vector.broadcast %553 : f32 to vector<32x8xf32>
    %555 = arith.mulf %537, %554 : vector<32x8xf32>
    %556 = arith.addf %552, %555 : vector<32x8xf32>
    %c3_209 = arith.constant 3 : index
    %c2_210 = arith.constant 2 : index
    %557 = memref.load %arg28[%c3_209, %c2_210] : memref<8x3xf32, #tpu.memory_space<smem>>
    %558 = vector.broadcast %557 : f32 to vector<32x8xf32>
    %559 = arith.addf %556, %558 : vector<32x8xf32>
    %560 = arith.addf %559, %451 : vector<32x8xf32>
    %561 = arith.mulf %560, %514 : vector<32x8xf32>
    %562 = tpu.concatenate %549, %561 in 1 : vector<32x8xf32>, vector<32x8xf32> -> vector<32x16xf32>
    %cst_211 = arith.constant dense<0.000000e+00> : vector<32x8xf32>
    %563 = tpu.matmul %562, %77, %cst_211 {dimension_numbers = #tpu.dot_dimension_numbers<[1], [0], [0], [1], [0, 0, 1, 1], [], []>} : vector<32x16xf32>, vector<16x8xf32>, vector<32x8xf32> -> vector<32x8xf32>
    %564 = vector.broadcast %69 : vector<1x8xf32> to vector<32x8xf32>
    %565 = arith.addf %563, %564 : vector<32x8xf32>
    %566 = arith.addf %565, %430 : vector<32x8xf32>
    %567 = tpu.transpose %566, [1, 0] : vector<32x8xf32> -> vector<8x32xf32>
    %568 = arith.addf %84, %300 : vector<8x8xf32>
    %cst_212 = arith.constant 5.000000e-01 : f32
    %569 = vector.broadcast %cst_212 : f32 to vector<8x8xf32>
    %570 = arith.mulf %568, %569 : vector<8x8xf32>
    %571 = arith.addf %101, %300 : vector<8x8xf32>
    %cst_213 = arith.constant 5.000000e-01 : f32
    %572 = vector.broadcast %cst_213 : f32 to vector<8x8xf32>
    %573 = arith.mulf %571, %572 : vector<8x8xf32>
    %574 = arith.addf %192, %437 : vector<32x32xf32>
    %cst_214 = arith.constant 5.000000e-01 : f32
    %575 = vector.broadcast %cst_214 : f32 to vector<32x32xf32>
    %576 = arith.mulf %574, %575 : vector<32x32xf32>
    %577 = arith.addf %209, %437 : vector<32x32xf32>
    %cst_215 = arith.constant 5.000000e-01 : f32
    %578 = vector.broadcast %cst_215 : f32 to vector<32x32xf32>
    %579 = arith.mulf %577, %578 : vector<32x32xf32>
    %c1_216 = arith.constant 1 : index
    %c0_217 = arith.constant 0 : index
    %c0_218 = arith.constant 0 : index
    %580 = vector.load %arg7[%c1_216, %c0_217, %c0_218] : memref<2x6x32xf32, #tpu.memory_space<vmem>>, vector<1x6x32xf32>
    %581 = vector.shape_cast %580 : vector<1x6x32xf32> to vector<6x32xf32>
    %c1_219 = arith.constant 1 : index
    %c0_220 = arith.constant 0 : index
    %c0_221 = arith.constant 0 : index
    %582 = vector.load %arg13[%c1_219, %c0_220, %c0_221] : memref<2x6x8xf32, #tpu.memory_space<vmem>>, vector<1x6x8xf32>
    %583 = vector.shape_cast %582 : vector<1x6x8xf32> to vector<6x8xf32>
    %c1_222 = arith.constant 1 : index
    %c0_223 = arith.constant 0 : index
    %c0_224 = arith.constant 0 : index
    %584 = vector.load %arg2[%c1_222, %c0_223, %c0_224] : memref<2x32x48xf32, #tpu.memory_space<vmem>>, vector<1x32x48xf32>
    %585 = vector.shape_cast %584 : vector<1x32x48xf32> to vector<32x48xf32>
    %c1_225 = arith.constant 1 : index
    %c0_226 = arith.constant 0 : index
    %c0_227 = arith.constant 0 : index
    %586 = vector.load %arg3[%c1_225, %c0_226, %c0_227] : memref<2x16x32xf32, #tpu.memory_space<vmem>>, vector<1x16x32xf32>
    %587 = vector.shape_cast %586 : vector<1x16x32xf32> to vector<16x32xf32>
    %588 = vector.extract_strided_slice %581 {offsets = [0, 0], sizes = [1, 32], strides = [1, 1]} : vector<6x32xf32> to vector<1x32xf32>
    %589 = vector.extract_strided_slice %581 {offsets = [1, 0], sizes = [1, 32], strides = [1, 1]} : vector<6x32xf32> to vector<1x32xf32>
    %590 = vector.extract_strided_slice %581 {offsets = [2, 0], sizes = [1, 32], strides = [1, 1]} : vector<6x32xf32> to vector<1x32xf32>
    %c1_228 = arith.constant 1 : index
    %c0_229 = arith.constant 0 : index
    %c0_230 = arith.constant 0 : index
    %591 = vector.load %arg4[%c1_228, %c0_229, %c0_230] : memref<2x32x256xf32, #tpu.memory_space<vmem>>, vector<1x32x256xf32>
    %592 = vector.shape_cast %591 : vector<1x32x256xf32> to vector<32x256xf32>
    %c1_231 = arith.constant 1 : index
    %c0_232 = arith.constant 0 : index
    %c0_233 = arith.constant 0 : index
    %593 = vector.load %arg6[%c1_231, %c0_232, %c0_233] : memref<2x1x256xf32, #tpu.memory_space<vmem>>, vector<1x1x256xf32>
    %594 = vector.shape_cast %593 : vector<1x1x256xf32> to vector<1x256xf32>
    %c1_234 = arith.constant 1 : index
    %c0_235 = arith.constant 0 : index
    %c0_236 = arith.constant 0 : index
    %595 = vector.load %arg5[%c1_234, %c0_235, %c0_236] : memref<2x128x32xf32, #tpu.memory_space<vmem>>, vector<1x128x32xf32>
    %596 = vector.shape_cast %595 : vector<1x128x32xf32> to vector<128x32xf32>
    %597 = vector.extract_strided_slice %581 {offsets = [3, 0], sizes = [1, 32], strides = [1, 1]} : vector<6x32xf32> to vector<1x32xf32>
    %598 = vector.extract_strided_slice %581 {offsets = [4, 0], sizes = [1, 32], strides = [1, 1]} : vector<6x32xf32> to vector<1x32xf32>
    %599 = vector.extract_strided_slice %581 {offsets = [5, 0], sizes = [1, 32], strides = [1, 1]} : vector<6x32xf32> to vector<1x32xf32>
    %c1_237 = arith.constant 1 : index
    %c0_238 = arith.constant 0 : index
    %c0_239 = arith.constant 0 : index
    %600 = vector.load %arg8[%c1_237, %c0_238, %c0_239] : memref<2x8x48xf32, #tpu.memory_space<vmem>>, vector<1x8x48xf32>
    %601 = vector.shape_cast %600 : vector<1x8x48xf32> to vector<8x48xf32>
    %c1_240 = arith.constant 1 : index
    %c0_241 = arith.constant 0 : index
    %c0_242 = arith.constant 0 : index
    %602 = vector.load %arg9[%c1_240, %c0_241, %c0_242] : memref<2x16x8xf32, #tpu.memory_space<vmem>>, vector<1x16x8xf32>
    %603 = vector.shape_cast %602 : vector<1x16x8xf32> to vector<16x8xf32>
    %604 = vector.extract_strided_slice %583 {offsets = [0, 0], sizes = [1, 8], strides = [1, 1]} : vector<6x8xf32> to vector<1x8xf32>
    %605 = vector.extract_strided_slice %583 {offsets = [1, 0], sizes = [1, 8], strides = [1, 1]} : vector<6x8xf32> to vector<1x8xf32>
    %606 = vector.extract_strided_slice %583 {offsets = [2, 0], sizes = [1, 8], strides = [1, 1]} : vector<6x8xf32> to vector<1x8xf32>
    %c1_243 = arith.constant 1 : index
    %c0_244 = arith.constant 0 : index
    %c0_245 = arith.constant 0 : index
    %607 = vector.load %arg10[%c1_243, %c0_244, %c0_245] : memref<2x8x64xf32, #tpu.memory_space<vmem>>, vector<1x8x64xf32>
    %608 = vector.shape_cast %607 : vector<1x8x64xf32> to vector<8x64xf32>
    %c1_246 = arith.constant 1 : index
    %c0_247 = arith.constant 0 : index
    %c0_248 = arith.constant 0 : index
    %609 = vector.load %arg12[%c1_246, %c0_247, %c0_248] : memref<2x1x64xf32, #tpu.memory_space<vmem>>, vector<1x1x64xf32>
    %610 = vector.shape_cast %609 : vector<1x1x64xf32> to vector<1x64xf32>
    %c1_249 = arith.constant 1 : index
    %c0_250 = arith.constant 0 : index
    %c0_251 = arith.constant 0 : index
    %611 = vector.load %arg11[%c1_249, %c0_250, %c0_251] : memref<2x32x8xf32, #tpu.memory_space<vmem>>, vector<1x32x8xf32>
    %612 = vector.shape_cast %611 : vector<1x32x8xf32> to vector<32x8xf32>
    %613 = vector.extract_strided_slice %583 {offsets = [3, 0], sizes = [1, 8], strides = [1, 1]} : vector<6x8xf32> to vector<1x8xf32>
    %614 = vector.extract_strided_slice %583 {offsets = [4, 0], sizes = [1, 8], strides = [1, 1]} : vector<6x8xf32> to vector<1x8xf32>
    %615 = vector.extract_strided_slice %583 {offsets = [5, 0], sizes = [1, 8], strides = [1, 1]} : vector<6x8xf32> to vector<1x8xf32>
    %c1_252 = arith.constant 1 : index
    %c0_253 = arith.constant 0 : index
    %c0_254 = arith.constant 0 : index
    %616 = vector.load %arg19[%c1_252, %c0_253, %c0_254] : memref<2x3x32xf32, #tpu.memory_space<vmem>>, vector<1x3x32xf32>
    %617 = vector.shape_cast %616 : vector<1x3x32xf32> to vector<3x32xf32>
    %c1_255 = arith.constant 1 : index
    %c0_256 = arith.constant 0 : index
    %c0_257 = arith.constant 0 : index
    %618 = vector.load %arg20[%c1_255, %c0_256, %c0_257] : memref<2x3x8xf32, #tpu.memory_space<vmem>>, vector<1x3x8xf32>
    %619 = vector.shape_cast %618 : vector<1x3x8xf32> to vector<3x8xf32>
    %c1_258 = arith.constant 1 : index
    %c0_259 = arith.constant 0 : index
    %c0_260 = arith.constant 0 : index
    %620 = vector.load %arg14[%c1_258, %c0_259, %c0_260] : memref<2x32x24xf32, #tpu.memory_space<vmem>>, vector<1x32x24xf32>
    %621 = vector.shape_cast %620 : vector<1x32x24xf32> to vector<32x24xf32>
    %c1_261 = arith.constant 1 : index
    %c0_262 = arith.constant 0 : index
    %c0_263 = arith.constant 0 : index
    %622 = vector.load %arg15[%c1_261, %c0_262, %c0_263] : memref<2x8x8xf32, #tpu.memory_space<vmem>>, vector<1x8x8xf32>
    %623 = vector.shape_cast %622 : vector<1x8x8xf32> to vector<8x8xf32>
    %624 = vector.extract_strided_slice %619 {offsets = [0, 0], sizes = [1, 8], strides = [1, 1]} : vector<3x8xf32> to vector<1x8xf32>
    %625 = vector.extract_strided_slice %617 {offsets = [0, 0], sizes = [1, 32], strides = [1, 1]} : vector<3x32xf32> to vector<1x32xf32>
    %626 = vector.extract_strided_slice %617 {offsets = [1, 0], sizes = [1, 32], strides = [1, 1]} : vector<3x32xf32> to vector<1x32xf32>
    %627 = vector.extract_strided_slice %617 {offsets = [2, 0], sizes = [1, 32], strides = [1, 1]} : vector<3x32xf32> to vector<1x32xf32>
    %c1_264 = arith.constant 1 : index
    %c0_265 = arith.constant 0 : index
    %c0_266 = arith.constant 0 : index
    %628 = vector.load %arg16[%c1_264, %c0_265, %c0_266] : memref<2x32x32xf32, #tpu.memory_space<vmem>>, vector<1x32x32xf32>
    %629 = vector.shape_cast %628 : vector<1x32x32xf32> to vector<32x32xf32>
    %c1_267 = arith.constant 1 : index
    %c0_268 = arith.constant 0 : index
    %c0_269 = arith.constant 0 : index
    %630 = vector.load %arg17[%c1_267, %c0_268, %c0_269] : memref<2x1x32xf32, #tpu.memory_space<vmem>>, vector<1x1x32xf32>
    %631 = vector.shape_cast %630 : vector<1x1x32xf32> to vector<1x32xf32>
    %632 = vector.extract_strided_slice %619 {offsets = [1, 0], sizes = [1, 8], strides = [1, 1]} : vector<3x8xf32> to vector<1x8xf32>
    %633 = vector.extract_strided_slice %619 {offsets = [2, 0], sizes = [1, 8], strides = [1, 1]} : vector<3x8xf32> to vector<1x8xf32>
    %c1_270 = arith.constant 1 : index
    %c0_271 = arith.constant 0 : index
    %c0_272 = arith.constant 0 : index
    %634 = vector.load %arg18[%c1_270, %c0_271, %c0_272] : memref<2x16x32xf32, #tpu.memory_space<vmem>>, vector<1x16x32xf32>
    %635 = vector.shape_cast %634 : vector<1x16x32xf32> to vector<16x32xf32>
    %c1_273 = arith.constant 1 : index
    %c0_274 = arith.constant 0 : index
    %c0_275 = arith.constant 0 : index
    %636 = vector.load %arg26[%c1_273, %c0_274, %c0_275] : memref<2x3x8xf32, #tpu.memory_space<vmem>>, vector<1x3x8xf32>
    %637 = vector.shape_cast %636 : vector<1x3x8xf32> to vector<3x8xf32>
    %c1_276 = arith.constant 1 : index
    %c0_277 = arith.constant 0 : index
    %c0_278 = arith.constant 0 : index
    %638 = vector.load %arg27[%c1_276, %c0_277, %c0_278] : memref<2x3x8xf32, #tpu.memory_space<vmem>>, vector<1x3x8xf32>
    %639 = vector.shape_cast %638 : vector<1x3x8xf32> to vector<3x8xf32>
    %c1_279 = arith.constant 1 : index
    %c0_280 = arith.constant 0 : index
    %c0_281 = arith.constant 0 : index
    %640 = vector.load %arg21[%c1_279, %c0_280, %c0_281] : memref<2x8x24xf32, #tpu.memory_space<vmem>>, vector<1x8x24xf32>
    %641 = vector.shape_cast %640 : vector<1x8x24xf32> to vector<8x24xf32>
    %c1_282 = arith.constant 1 : index
    %c0_283 = arith.constant 0 : index
    %c0_284 = arith.constant 0 : index
    %642 = vector.load %arg22[%c1_282, %c0_283, %c0_284] : memref<2x8x8xf32, #tpu.memory_space<vmem>>, vector<1x8x8xf32>
    %643 = vector.shape_cast %642 : vector<1x8x8xf32> to vector<8x8xf32>
    %644 = vector.extract_strided_slice %639 {offsets = [0, 0], sizes = [1, 8], strides = [1, 1]} : vector<3x8xf32> to vector<1x8xf32>
    %645 = vector.extract_strided_slice %637 {offsets = [0, 0], sizes = [1, 8], strides = [1, 1]} : vector<3x8xf32> to vector<1x8xf32>
    %646 = vector.extract_strided_slice %637 {offsets = [1, 0], sizes = [1, 8], strides = [1, 1]} : vector<3x8xf32> to vector<1x8xf32>
    %647 = vector.extract_strided_slice %637 {offsets = [2, 0], sizes = [1, 8], strides = [1, 1]} : vector<3x8xf32> to vector<1x8xf32>
    %c1_285 = arith.constant 1 : index
    %c0_286 = arith.constant 0 : index
    %c0_287 = arith.constant 0 : index
    %648 = vector.load %arg23[%c1_285, %c0_286, %c0_287] : memref<2x8x32xf32, #tpu.memory_space<vmem>>, vector<1x8x32xf32>
    %649 = vector.shape_cast %648 : vector<1x8x32xf32> to vector<8x32xf32>
    %c1_288 = arith.constant 1 : index
    %c0_289 = arith.constant 0 : index
    %c0_290 = arith.constant 0 : index
    %650 = vector.load %arg24[%c1_288, %c0_289, %c0_290] : memref<2x1x32xf32, #tpu.memory_space<vmem>>, vector<1x1x32xf32>
    %651 = vector.shape_cast %650 : vector<1x1x32xf32> to vector<1x32xf32>
    %652 = vector.extract_strided_slice %639 {offsets = [1, 0], sizes = [1, 8], strides = [1, 1]} : vector<3x8xf32> to vector<1x8xf32>
    %653 = vector.extract_strided_slice %639 {offsets = [2, 0], sizes = [1, 8], strides = [1, 1]} : vector<3x8xf32> to vector<1x8xf32>
    %c1_291 = arith.constant 1 : index
    %c0_292 = arith.constant 0 : index
    %c0_293 = arith.constant 0 : index
    %654 = vector.load %arg25[%c1_291, %c0_292, %c0_293] : memref<2x16x8xf32, #tpu.memory_space<vmem>>, vector<1x16x8xf32>
    %655 = vector.shape_cast %654 : vector<1x16x8xf32> to vector<16x8xf32>
    %cst_294 = arith.constant dense<0.000000e+00> : vector<8x48xf32>
    %656 = tpu.matmul %293, %585, %cst_294 {dimension_numbers = #tpu.dot_dimension_numbers<[1], [0], [0], [1], [0, 0, 1, 1], [], []>} : vector<8x32xf32>, vector<32x48xf32>, vector<8x48xf32> -> vector<8x48xf32>
    %657 = vector.extract_strided_slice %656 {offsets = [0, 0], sizes = [8, 8], strides = [1, 1]} : vector<8x48xf32> to vector<8x8xf32>
    %658 = vector.extract_strided_slice %656 {offsets = [0, 16], sizes = [8, 8], strides = [1, 1]} : vector<8x48xf32> to vector<8x8xf32>
    %659 = vector.extract_strided_slice %656 {offsets = [0, 32], sizes = [8, 8], strides = [1, 1]} : vector<8x48xf32> to vector<8x8xf32>
    %cst_295 = arith.constant dense<0.000000e+00> : vector<8x8xf32>
    %660 = tpu.matmul %657, %658, %cst_295 {dimension_numbers = #tpu.dot_dimension_numbers<[1], [1], [0], [0], [0, 0, 1, 0], [], []>} : vector<8x8xf32>, vector<8x8xf32>, vector<8x8xf32> -> vector<8x8xf32>
    %cst_296 = arith.constant 0.353553385 : f32
    %661 = vector.broadcast %cst_296 : f32 to vector<8x8xf32>
    %662 = arith.mulf %660, %661 : vector<8x8xf32>
    %663 = arith.addf %662, %570 : vector<8x8xf32>
    %cst_297 = arith.constant dense<0xFF800000> : vector<8xf32>
    %664 = vector.multi_reduction <maximumf>, %663, %cst_297 [1] : vector<8x8xf32> to vector<8xf32>
    %665 = vector.shape_cast %664 : vector<8xf32> to vector<8x1xf32>
    %666 = vector.broadcast %665 : vector<8x1xf32> to vector<8x8xf32>
    %667 = arith.subf %663, %666 : vector<8x8xf32>
    %668 = math.exp %667 : vector<8x8xf32>
    %cst_298 = arith.constant dense<0.000000e+00> : vector<8xf32>
    %669 = vector.multi_reduction <add>, %668, %cst_298 [1] : vector<8x8xf32> to vector<8xf32>
    %670 = vector.shape_cast %669 : vector<8xf32> to vector<8x1xf32>
    %671 = tpu.reciprocal %670 {approx = true} : vector<8x1xf32> -> vector<8x1xf32>
    %672 = vector.broadcast %671 : vector<8x1xf32> to vector<8x8xf32>
    %673 = arith.mulf %668, %672 : vector<8x8xf32>
    %cst_299 = arith.constant dense<0.000000e+00> : vector<8x8xf32>
    %674 = tpu.matmul %673, %659, %cst_299 {dimension_numbers = #tpu.dot_dimension_numbers<[1], [0], [0], [1], [0, 0, 1, 1], [], []>} : vector<8x8xf32>, vector<8x8xf32>, vector<8x8xf32> -> vector<8x8xf32>
    %675 = vector.extract_strided_slice %656 {offsets = [0, 8], sizes = [8, 8], strides = [1, 1]} : vector<8x48xf32> to vector<8x8xf32>
    %676 = vector.extract_strided_slice %656 {offsets = [0, 24], sizes = [8, 8], strides = [1, 1]} : vector<8x48xf32> to vector<8x8xf32>
    %677 = vector.extract_strided_slice %656 {offsets = [0, 40], sizes = [8, 8], strides = [1, 1]} : vector<8x48xf32> to vector<8x8xf32>
    %cst_300 = arith.constant dense<0.000000e+00> : vector<8x8xf32>
    %678 = tpu.matmul %675, %676, %cst_300 {dimension_numbers = #tpu.dot_dimension_numbers<[1], [1], [0], [0], [0, 0, 1, 0], [], []>} : vector<8x8xf32>, vector<8x8xf32>, vector<8x8xf32> -> vector<8x8xf32>
    %cst_301 = arith.constant 0.353553385 : f32
    %679 = vector.broadcast %cst_301 : f32 to vector<8x8xf32>
    %680 = arith.mulf %678, %679 : vector<8x8xf32>
    %681 = arith.addf %680, %573 : vector<8x8xf32>
    %cst_302 = arith.constant dense<0xFF800000> : vector<8xf32>
    %682 = vector.multi_reduction <maximumf>, %681, %cst_302 [1] : vector<8x8xf32> to vector<8xf32>
    %683 = vector.shape_cast %682 : vector<8xf32> to vector<8x1xf32>
    %684 = vector.broadcast %683 : vector<8x1xf32> to vector<8x8xf32>
    %685 = arith.subf %681, %684 : vector<8x8xf32>
    %686 = math.exp %685 : vector<8x8xf32>
    %cst_303 = arith.constant dense<0.000000e+00> : vector<8xf32>
    %687 = vector.multi_reduction <add>, %686, %cst_303 [1] : vector<8x8xf32> to vector<8xf32>
    %688 = vector.shape_cast %687 : vector<8xf32> to vector<8x1xf32>
    %689 = tpu.reciprocal %688 {approx = true} : vector<8x1xf32> -> vector<8x1xf32>
    %690 = vector.broadcast %689 : vector<8x1xf32> to vector<8x8xf32>
    %691 = arith.mulf %686, %690 : vector<8x8xf32>
    %cst_304 = arith.constant dense<0.000000e+00> : vector<8x8xf32>
    %692 = tpu.matmul %691, %677, %cst_304 {dimension_numbers = #tpu.dot_dimension_numbers<[1], [0], [0], [1], [0, 0, 1, 1], [], []>} : vector<8x8xf32>, vector<8x8xf32>, vector<8x8xf32> -> vector<8x8xf32>
    %693 = tpu.concatenate %674, %692 in 1 : vector<8x8xf32>, vector<8x8xf32> -> vector<8x16xf32>
    %cst_305 = arith.constant dense<0.000000e+00> : vector<8x32xf32>
    %694 = tpu.matmul %693, %587, %cst_305 {dimension_numbers = #tpu.dot_dimension_numbers<[1], [0], [0], [1], [0, 0, 1, 1], [], []>} : vector<8x16xf32>, vector<16x32xf32>, vector<8x32xf32> -> vector<8x32xf32>
    %695 = vector.broadcast %588 : vector<1x32xf32> to vector<8x32xf32>
    %696 = arith.addf %694, %695 : vector<8x32xf32>
    %697 = arith.addf %696, %293 : vector<8x32xf32>
    %cst_306 = arith.constant dense<0.000000e+00> : vector<8xf32>
    %698 = vector.multi_reduction <add>, %697, %cst_306 [1] : vector<8x32xf32> to vector<8xf32>
    %699 = vector.shape_cast %698 : vector<8xf32> to vector<8x1xf32>
    %cst_307 = arith.constant 3.200000e+01 : f32
    %700 = vector.broadcast %cst_307 : f32 to vector<8x1xf32>
    %701 = arith.divf %699, %700 : vector<8x1xf32>
    %702 = vector.broadcast %701 : vector<8x1xf32> to vector<8x32xf32>
    %703 = arith.subf %697, %702 : vector<8x32xf32>
    %704 = arith.mulf %703, %703 : vector<8x32xf32>
    %cst_308 = arith.constant dense<0.000000e+00> : vector<8xf32>
    %705 = vector.multi_reduction <add>, %704, %cst_308 [1] : vector<8x32xf32> to vector<8xf32>
    %706 = vector.shape_cast %705 : vector<8xf32> to vector<8x1xf32>
    %cst_309 = arith.constant 3.200000e+01 : f32
    %707 = vector.broadcast %cst_309 : f32 to vector<8x1xf32>
    %708 = arith.divf %706, %707 : vector<8x1xf32>
    %709 = vector.broadcast %701 : vector<8x1xf32> to vector<8x32xf32>
    %710 = arith.subf %697, %709 : vector<8x32xf32>
    %cst_310 = arith.constant 9.99999974E-6 : f32
    %711 = vector.broadcast %cst_310 : f32 to vector<8x1xf32>
    %712 = arith.addf %708, %711 : vector<8x1xf32>
    %713 = math.rsqrt %712 : vector<8x1xf32>
    %714 = vector.broadcast %713 : vector<8x1xf32> to vector<8x32xf32>
    %715 = arith.mulf %710, %714 : vector<8x32xf32>
    %716 = vector.broadcast %589 : vector<1x32xf32> to vector<8x32xf32>
    %717 = arith.mulf %715, %716 : vector<8x32xf32>
    %718 = vector.broadcast %590 : vector<1x32xf32> to vector<8x32xf32>
    %719 = arith.addf %717, %718 : vector<8x32xf32>
    %cst_311 = arith.constant dense<0.000000e+00> : vector<8x256xf32>
    %720 = tpu.matmul %719, %592, %cst_311 {dimension_numbers = #tpu.dot_dimension_numbers<[1], [0], [0], [1], [0, 0, 1, 1], [], []>} : vector<8x32xf32>, vector<32x256xf32>, vector<8x256xf32> -> vector<8x256xf32>
    %721 = vector.broadcast %594 : vector<1x256xf32> to vector<8x256xf32>
    %722 = arith.addf %720, %721 : vector<8x256xf32>
    %723 = vector.extract_strided_slice %722 {offsets = [0, 0], sizes = [8, 128], strides = [1, 1]} : vector<8x256xf32> to vector<8x128xf32>
    %724 = vector.extract_strided_slice %722 {offsets = [0, 128], sizes = [8, 128], strides = [1, 1]} : vector<8x256xf32> to vector<8x128xf32>
    %cst_312 = arith.constant 5.000000e-01 : f32
    %725 = vector.broadcast %cst_312 : f32 to vector<8x128xf32>
    %726 = arith.mulf %725, %724 : vector<8x128xf32>
    %cst_313 = arith.constant 4.471500e-02 : f32
    %727 = vector.broadcast %cst_313 : f32 to vector<8x128xf32>
    %728 = arith.mulf %727, %724 : vector<8x128xf32>
    %729 = arith.mulf %728, %724 : vector<8x128xf32>
    %730 = arith.mulf %729, %724 : vector<8x128xf32>
    %731 = arith.addf %724, %730 : vector<8x128xf32>
    %cst_314 = arith.constant 0.797884583 : f32
    %732 = vector.broadcast %cst_314 : f32 to vector<8x128xf32>
    %733 = arith.mulf %732, %731 : vector<8x128xf32>
    %734 = math.tanh %733 : vector<8x128xf32>
    %cst_315 = arith.constant 1.000000e+00 : f32
    %735 = vector.broadcast %cst_315 : f32 to vector<8x128xf32>
    %736 = arith.addf %735, %734 : vector<8x128xf32>
    %737 = arith.mulf %726, %736 : vector<8x128xf32>
    %738 = arith.mulf %723, %737 : vector<8x128xf32>
    %cst_316 = arith.constant dense<0.000000e+00> : vector<8x32xf32>
    %739 = tpu.matmul %738, %596, %cst_316 {dimension_numbers = #tpu.dot_dimension_numbers<[1], [0], [0], [1], [0, 0, 1, 1], [], []>} : vector<8x128xf32>, vector<128x32xf32>, vector<8x32xf32> -> vector<8x32xf32>
    %740 = vector.broadcast %597 : vector<1x32xf32> to vector<8x32xf32>
    %741 = arith.addf %739, %740 : vector<8x32xf32>
    %742 = arith.addf %741, %719 : vector<8x32xf32>
    %cst_317 = arith.constant dense<0.000000e+00> : vector<8xf32>
    %743 = vector.multi_reduction <add>, %742, %cst_317 [1] : vector<8x32xf32> to vector<8xf32>
    %744 = vector.shape_cast %743 : vector<8xf32> to vector<8x1xf32>
    %cst_318 = arith.constant 3.200000e+01 : f32
    %745 = vector.broadcast %cst_318 : f32 to vector<8x1xf32>
    %746 = arith.divf %744, %745 : vector<8x1xf32>
    %747 = vector.broadcast %746 : vector<8x1xf32> to vector<8x32xf32>
    %748 = arith.subf %742, %747 : vector<8x32xf32>
    %749 = arith.mulf %748, %748 : vector<8x32xf32>
    %cst_319 = arith.constant dense<0.000000e+00> : vector<8xf32>
    %750 = vector.multi_reduction <add>, %749, %cst_319 [1] : vector<8x32xf32> to vector<8xf32>
    %751 = vector.shape_cast %750 : vector<8xf32> to vector<8x1xf32>
    %cst_320 = arith.constant 3.200000e+01 : f32
    %752 = vector.broadcast %cst_320 : f32 to vector<8x1xf32>
    %753 = arith.divf %751, %752 : vector<8x1xf32>
    %754 = vector.broadcast %746 : vector<8x1xf32> to vector<8x32xf32>
    %755 = arith.subf %742, %754 : vector<8x32xf32>
    %cst_321 = arith.constant 9.99999974E-6 : f32
    %756 = vector.broadcast %cst_321 : f32 to vector<8x1xf32>
    %757 = arith.addf %753, %756 : vector<8x1xf32>
    %758 = math.rsqrt %757 : vector<8x1xf32>
    %759 = vector.broadcast %758 : vector<8x1xf32> to vector<8x32xf32>
    %760 = arith.mulf %755, %759 : vector<8x32xf32>
    %761 = vector.broadcast %598 : vector<1x32xf32> to vector<8x32xf32>
    %762 = arith.mulf %760, %761 : vector<8x32xf32>
    %763 = vector.broadcast %599 : vector<1x32xf32> to vector<8x32xf32>
    %764 = arith.addf %762, %763 : vector<8x32xf32>
    %765 = tpu.transpose %764, [1, 0] : vector<8x32xf32> -> vector<32x8xf32>
    %cst_322 = arith.constant dense<0.000000e+00> : vector<32x48xf32>
    %766 = tpu.matmul %765, %601, %cst_322 {dimension_numbers = #tpu.dot_dimension_numbers<[1], [0], [0], [1], [0, 0, 1, 1], [], []>} : vector<32x8xf32>, vector<8x48xf32>, vector<32x48xf32> -> vector<32x48xf32>
    %767 = vector.extract_strided_slice %766 {offsets = [0, 0], sizes = [32, 8], strides = [1, 1]} : vector<32x48xf32> to vector<32x8xf32>
    %768 = vector.extract_strided_slice %766 {offsets = [0, 16], sizes = [32, 8], strides = [1, 1]} : vector<32x48xf32> to vector<32x8xf32>
    %769 = vector.extract_strided_slice %766 {offsets = [0, 32], sizes = [32, 8], strides = [1, 1]} : vector<32x48xf32> to vector<32x8xf32>
    %cst_323 = arith.constant dense<0.000000e+00> : vector<32x32xf32>
    %770 = tpu.matmul %767, %768, %cst_323 {dimension_numbers = #tpu.dot_dimension_numbers<[1], [1], [0], [0], [0, 0, 1, 0], [], []>} : vector<32x8xf32>, vector<32x8xf32>, vector<32x32xf32> -> vector<32x32xf32>
    %cst_324 = arith.constant 0.353553385 : f32
    %771 = vector.broadcast %cst_324 : f32 to vector<32x32xf32>
    %772 = arith.mulf %770, %771 : vector<32x32xf32>
    %773 = arith.addf %772, %576 : vector<32x32xf32>
    %cst_325 = arith.constant dense<0xFF800000> : vector<32xf32>
    %774 = vector.multi_reduction <maximumf>, %773, %cst_325 [1] : vector<32x32xf32> to vector<32xf32>
    %775 = vector.shape_cast %774 : vector<32xf32> to vector<32x1xf32>
    %776 = vector.broadcast %775 : vector<32x1xf32> to vector<32x32xf32>
    %777 = arith.subf %773, %776 : vector<32x32xf32>
    %778 = math.exp %777 : vector<32x32xf32>
    %cst_326 = arith.constant dense<0.000000e+00> : vector<32xf32>
    %779 = vector.multi_reduction <add>, %778, %cst_326 [1] : vector<32x32xf32> to vector<32xf32>
    %780 = vector.shape_cast %779 : vector<32xf32> to vector<32x1xf32>
    %781 = tpu.reciprocal %780 {approx = true} : vector<32x1xf32> -> vector<32x1xf32>
    %782 = vector.broadcast %781 : vector<32x1xf32> to vector<32x32xf32>
    %783 = arith.mulf %778, %782 : vector<32x32xf32>
    %cst_327 = arith.constant dense<0.000000e+00> : vector<32x8xf32>
    %784 = tpu.matmul %783, %769, %cst_327 {dimension_numbers = #tpu.dot_dimension_numbers<[1], [0], [0], [1], [0, 0, 1, 1], [], []>} : vector<32x32xf32>, vector<32x8xf32>, vector<32x8xf32> -> vector<32x8xf32>
    %785 = vector.extract_strided_slice %766 {offsets = [0, 8], sizes = [32, 8], strides = [1, 1]} : vector<32x48xf32> to vector<32x8xf32>
    %786 = vector.extract_strided_slice %766 {offsets = [0, 24], sizes = [32, 8], strides = [1, 1]} : vector<32x48xf32> to vector<32x8xf32>
    %787 = vector.extract_strided_slice %766 {offsets = [0, 40], sizes = [32, 8], strides = [1, 1]} : vector<32x48xf32> to vector<32x8xf32>
    %cst_328 = arith.constant dense<0.000000e+00> : vector<32x32xf32>
    %788 = tpu.matmul %785, %786, %cst_328 {dimension_numbers = #tpu.dot_dimension_numbers<[1], [1], [0], [0], [0, 0, 1, 0], [], []>} : vector<32x8xf32>, vector<32x8xf32>, vector<32x32xf32> -> vector<32x32xf32>
    %cst_329 = arith.constant 0.353553385 : f32
    %789 = vector.broadcast %cst_329 : f32 to vector<32x32xf32>
    %790 = arith.mulf %788, %789 : vector<32x32xf32>
    %791 = arith.addf %790, %579 : vector<32x32xf32>
    %cst_330 = arith.constant dense<0xFF800000> : vector<32xf32>
    %792 = vector.multi_reduction <maximumf>, %791, %cst_330 [1] : vector<32x32xf32> to vector<32xf32>
    %793 = vector.shape_cast %792 : vector<32xf32> to vector<32x1xf32>
    %794 = vector.broadcast %793 : vector<32x1xf32> to vector<32x32xf32>
    %795 = arith.subf %791, %794 : vector<32x32xf32>
    %796 = math.exp %795 : vector<32x32xf32>
    %cst_331 = arith.constant dense<0.000000e+00> : vector<32xf32>
    %797 = vector.multi_reduction <add>, %796, %cst_331 [1] : vector<32x32xf32> to vector<32xf32>
    %798 = vector.shape_cast %797 : vector<32xf32> to vector<32x1xf32>
    %799 = tpu.reciprocal %798 {approx = true} : vector<32x1xf32> -> vector<32x1xf32>
    %800 = vector.broadcast %799 : vector<32x1xf32> to vector<32x32xf32>
    %801 = arith.mulf %796, %800 : vector<32x32xf32>
    %cst_332 = arith.constant dense<0.000000e+00> : vector<32x8xf32>
    %802 = tpu.matmul %801, %787, %cst_332 {dimension_numbers = #tpu.dot_dimension_numbers<[1], [0], [0], [1], [0, 0, 1, 1], [], []>} : vector<32x32xf32>, vector<32x8xf32>, vector<32x8xf32> -> vector<32x8xf32>
    %803 = tpu.concatenate %784, %802 in 1 : vector<32x8xf32>, vector<32x8xf32> -> vector<32x16xf32>
    %cst_333 = arith.constant dense<0.000000e+00> : vector<32x8xf32>
    %804 = tpu.matmul %803, %603, %cst_333 {dimension_numbers = #tpu.dot_dimension_numbers<[1], [0], [0], [1], [0, 0, 1, 1], [], []>} : vector<32x16xf32>, vector<16x8xf32>, vector<32x8xf32> -> vector<32x8xf32>
    %805 = vector.broadcast %604 : vector<1x8xf32> to vector<32x8xf32>
    %806 = arith.addf %804, %805 : vector<32x8xf32>
    %807 = arith.addf %806, %765 : vector<32x8xf32>
    %cst_334 = arith.constant dense<0.000000e+00> : vector<32xf32>
    %808 = vector.multi_reduction <add>, %807, %cst_334 [1] : vector<32x8xf32> to vector<32xf32>
    %809 = vector.shape_cast %808 : vector<32xf32> to vector<32x1xf32>
    %cst_335 = arith.constant 8.000000e+00 : f32
    %810 = vector.broadcast %cst_335 : f32 to vector<32x1xf32>
    %811 = arith.divf %809, %810 : vector<32x1xf32>
    %812 = vector.broadcast %811 : vector<32x1xf32> to vector<32x8xf32>
    %813 = arith.subf %807, %812 : vector<32x8xf32>
    %814 = arith.mulf %813, %813 : vector<32x8xf32>
    %cst_336 = arith.constant dense<0.000000e+00> : vector<32xf32>
    %815 = vector.multi_reduction <add>, %814, %cst_336 [1] : vector<32x8xf32> to vector<32xf32>
    %816 = vector.shape_cast %815 : vector<32xf32> to vector<32x1xf32>
    %cst_337 = arith.constant 8.000000e+00 : f32
    %817 = vector.broadcast %cst_337 : f32 to vector<32x1xf32>
    %818 = arith.divf %816, %817 : vector<32x1xf32>
    %819 = vector.broadcast %811 : vector<32x1xf32> to vector<32x8xf32>
    %820 = arith.subf %807, %819 : vector<32x8xf32>
    %cst_338 = arith.constant 9.99999974E-6 : f32
    %821 = vector.broadcast %cst_338 : f32 to vector<32x1xf32>
    %822 = arith.addf %818, %821 : vector<32x1xf32>
    %823 = math.rsqrt %822 : vector<32x1xf32>
    %824 = vector.broadcast %823 : vector<32x1xf32> to vector<32x8xf32>
    %825 = arith.mulf %820, %824 : vector<32x8xf32>
    %826 = vector.broadcast %605 : vector<1x8xf32> to vector<32x8xf32>
    %827 = arith.mulf %825, %826 : vector<32x8xf32>
    %828 = vector.broadcast %606 : vector<1x8xf32> to vector<32x8xf32>
    %829 = arith.addf %827, %828 : vector<32x8xf32>
    %cst_339 = arith.constant dense<0.000000e+00> : vector<32x64xf32>
    %830 = tpu.matmul %829, %608, %cst_339 {dimension_numbers = #tpu.dot_dimension_numbers<[1], [0], [0], [1], [0, 0, 1, 1], [], []>} : vector<32x8xf32>, vector<8x64xf32>, vector<32x64xf32> -> vector<32x64xf32>
    %831 = vector.broadcast %610 : vector<1x64xf32> to vector<32x64xf32>
    %832 = arith.addf %830, %831 : vector<32x64xf32>
    %833 = vector.extract_strided_slice %832 {offsets = [0, 0], sizes = [32, 32], strides = [1, 1]} : vector<32x64xf32> to vector<32x32xf32>
    %834 = vector.extract_strided_slice %832 {offsets = [0, 32], sizes = [32, 32], strides = [1, 1]} : vector<32x64xf32> to vector<32x32xf32>
    %cst_340 = arith.constant 5.000000e-01 : f32
    %835 = vector.broadcast %cst_340 : f32 to vector<32x32xf32>
    %836 = arith.mulf %835, %834 : vector<32x32xf32>
    %cst_341 = arith.constant 4.471500e-02 : f32
    %837 = vector.broadcast %cst_341 : f32 to vector<32x32xf32>
    %838 = arith.mulf %837, %834 : vector<32x32xf32>
    %839 = arith.mulf %838, %834 : vector<32x32xf32>
    %840 = arith.mulf %839, %834 : vector<32x32xf32>
    %841 = arith.addf %834, %840 : vector<32x32xf32>
    %cst_342 = arith.constant 0.797884583 : f32
    %842 = vector.broadcast %cst_342 : f32 to vector<32x32xf32>
    %843 = arith.mulf %842, %841 : vector<32x32xf32>
    %844 = math.tanh %843 : vector<32x32xf32>
    %cst_343 = arith.constant 1.000000e+00 : f32
    %845 = vector.broadcast %cst_343 : f32 to vector<32x32xf32>
    %846 = arith.addf %845, %844 : vector<32x32xf32>
    %847 = arith.mulf %836, %846 : vector<32x32xf32>
    %848 = arith.mulf %833, %847 : vector<32x32xf32>
    %cst_344 = arith.constant dense<0.000000e+00> : vector<32x8xf32>
    %849 = tpu.matmul %848, %612, %cst_344 {dimension_numbers = #tpu.dot_dimension_numbers<[1], [0], [0], [1], [0, 0, 1, 1], [], []>} : vector<32x32xf32>, vector<32x8xf32>, vector<32x8xf32> -> vector<32x8xf32>
    %850 = vector.broadcast %613 : vector<1x8xf32> to vector<32x8xf32>
    %851 = arith.addf %849, %850 : vector<32x8xf32>
    %852 = arith.addf %851, %829 : vector<32x8xf32>
    %cst_345 = arith.constant dense<0.000000e+00> : vector<32xf32>
    %853 = vector.multi_reduction <add>, %852, %cst_345 [1] : vector<32x8xf32> to vector<32xf32>
    %854 = vector.shape_cast %853 : vector<32xf32> to vector<32x1xf32>
    %cst_346 = arith.constant 8.000000e+00 : f32
    %855 = vector.broadcast %cst_346 : f32 to vector<32x1xf32>
    %856 = arith.divf %854, %855 : vector<32x1xf32>
    %857 = vector.broadcast %856 : vector<32x1xf32> to vector<32x8xf32>
    %858 = arith.subf %852, %857 : vector<32x8xf32>
    %859 = arith.mulf %858, %858 : vector<32x8xf32>
    %cst_347 = arith.constant dense<0.000000e+00> : vector<32xf32>
    %860 = vector.multi_reduction <add>, %859, %cst_347 [1] : vector<32x8xf32> to vector<32xf32>
    %861 = vector.shape_cast %860 : vector<32xf32> to vector<32x1xf32>
    %cst_348 = arith.constant 8.000000e+00 : f32
    %862 = vector.broadcast %cst_348 : f32 to vector<32x1xf32>
    %863 = arith.divf %861, %862 : vector<32x1xf32>
    %864 = vector.broadcast %856 : vector<32x1xf32> to vector<32x8xf32>
    %865 = arith.subf %852, %864 : vector<32x8xf32>
    %cst_349 = arith.constant 9.99999974E-6 : f32
    %866 = vector.broadcast %cst_349 : f32 to vector<32x1xf32>
    %867 = arith.addf %863, %866 : vector<32x1xf32>
    %868 = math.rsqrt %867 : vector<32x1xf32>
    %869 = vector.broadcast %868 : vector<32x1xf32> to vector<32x8xf32>
    %870 = arith.mulf %865, %869 : vector<32x8xf32>
    %871 = vector.broadcast %614 : vector<1x8xf32> to vector<32x8xf32>
    %872 = arith.mulf %870, %871 : vector<32x8xf32>
    %873 = vector.broadcast %615 : vector<1x8xf32> to vector<32x8xf32>
    %874 = arith.addf %872, %873 : vector<32x8xf32>
    %875 = tpu.transpose %874, [1, 0] : vector<32x8xf32> -> vector<8x32xf32>
    %cst_350 = arith.constant dense<0.000000e+00> : vector<8x24xf32>
    %876 = tpu.matmul %567, %621, %cst_350 {dimension_numbers = #tpu.dot_dimension_numbers<[1], [0], [0], [1], [0, 0, 1, 1], [], []>} : vector<8x32xf32>, vector<32x24xf32>, vector<8x24xf32> -> vector<8x24xf32>
    %877 = vector.extract_strided_slice %876 {offsets = [0, 0], sizes = [8, 8], strides = [1, 1]} : vector<8x24xf32> to vector<8x8xf32>
    %878 = vector.extract_strided_slice %876 {offsets = [0, 8], sizes = [8, 8], strides = [1, 1]} : vector<8x24xf32> to vector<8x8xf32>
    %879 = vector.extract_strided_slice %876 {offsets = [0, 16], sizes = [8, 8], strides = [1, 1]} : vector<8x24xf32> to vector<8x8xf32>
    %cst_351 = arith.constant dense<0.000000e+00> : vector<8x8xf32>
    %880 = tpu.matmul %877, %878, %cst_351 {dimension_numbers = #tpu.dot_dimension_numbers<[1], [1], [0], [0], [0, 0, 1, 0], [], []>} : vector<8x8xf32>, vector<8x8xf32>, vector<8x8xf32> -> vector<8x8xf32>
    %cst_352 = arith.constant 0.353553385 : f32
    %881 = vector.broadcast %cst_352 : f32 to vector<8x8xf32>
    %882 = arith.mulf %880, %881 : vector<8x8xf32>
    %883 = arith.addf %882, %570 : vector<8x8xf32>
    %cst_353 = arith.constant dense<0xFF800000> : vector<8xf32>
    %884 = vector.multi_reduction <maximumf>, %883, %cst_353 [1] : vector<8x8xf32> to vector<8xf32>
    %885 = vector.shape_cast %884 : vector<8xf32> to vector<8x1xf32>
    %886 = vector.broadcast %885 : vector<8x1xf32> to vector<8x8xf32>
    %887 = arith.subf %883, %886 : vector<8x8xf32>
    %888 = math.exp %887 : vector<8x8xf32>
    %cst_354 = arith.constant dense<0.000000e+00> : vector<8xf32>
    %889 = vector.multi_reduction <add>, %888, %cst_354 [1] : vector<8x8xf32> to vector<8xf32>
    %890 = vector.shape_cast %889 : vector<8xf32> to vector<8x1xf32>
    %891 = tpu.reciprocal %890 {approx = true} : vector<8x1xf32> -> vector<8x1xf32>
    %892 = vector.broadcast %891 : vector<8x1xf32> to vector<8x8xf32>
    %893 = arith.mulf %888, %892 : vector<8x8xf32>
    %cst_355 = arith.constant dense<0.000000e+00> : vector<8x8xf32>
    %894 = tpu.matmul %893, %879, %cst_355 {dimension_numbers = #tpu.dot_dimension_numbers<[1], [0], [0], [1], [0, 0, 1, 1], [], []>} : vector<8x8xf32>, vector<8x8xf32>, vector<8x8xf32> -> vector<8x8xf32>
    %cst_356 = arith.constant dense<0.000000e+00> : vector<8x8xf32>
    %895 = tpu.matmul %894, %623, %cst_356 {dimension_numbers = #tpu.dot_dimension_numbers<[1], [0], [0], [1], [0, 0, 1, 1], [], []>} : vector<8x8xf32>, vector<8x8xf32>, vector<8x8xf32> -> vector<8x8xf32>
    %896 = vector.broadcast %624 : vector<1x8xf32> to vector<8x8xf32>
    %897 = arith.addf %895, %896 : vector<8x8xf32>
    %898 = arith.addf %882, %573 : vector<8x8xf32>
    %cst_357 = arith.constant dense<0xFF800000> : vector<8xf32>
    %899 = vector.multi_reduction <maximumf>, %898, %cst_357 [1] : vector<8x8xf32> to vector<8xf32>
    %900 = vector.shape_cast %899 : vector<8xf32> to vector<8x1xf32>
    %901 = vector.broadcast %900 : vector<8x1xf32> to vector<8x8xf32>
    %902 = arith.subf %898, %901 : vector<8x8xf32>
    %903 = math.exp %902 : vector<8x8xf32>
    %cst_358 = arith.constant dense<0.000000e+00> : vector<8xf32>
    %904 = vector.multi_reduction <add>, %903, %cst_358 [1] : vector<8x8xf32> to vector<8xf32>
    %905 = vector.shape_cast %904 : vector<8xf32> to vector<8x1xf32>
    %906 = tpu.reciprocal %905 {approx = true} : vector<8x1xf32> -> vector<8x1xf32>
    %907 = vector.broadcast %906 : vector<8x1xf32> to vector<8x8xf32>
    %908 = arith.mulf %903, %907 : vector<8x8xf32>
    %cst_359 = arith.constant dense<0.000000e+00> : vector<8x8xf32>
    %909 = tpu.matmul %908, %879, %cst_359 {dimension_numbers = #tpu.dot_dimension_numbers<[1], [0], [0], [1], [0, 0, 1, 1], [], []>} : vector<8x8xf32>, vector<8x8xf32>, vector<8x8xf32> -> vector<8x8xf32>
    %cst_360 = arith.constant dense<0.000000e+00> : vector<8x8xf32>
    %910 = tpu.matmul %909, %623, %cst_360 {dimension_numbers = #tpu.dot_dimension_numbers<[1], [0], [0], [1], [0, 0, 1, 1], [], []>} : vector<8x8xf32>, vector<8x8xf32>, vector<8x8xf32> -> vector<8x8xf32>
    %911 = vector.broadcast %624 : vector<1x8xf32> to vector<8x8xf32>
    %912 = arith.addf %910, %911 : vector<8x8xf32>
    %cst_361 = arith.constant dense<0.000000e+00> : vector<8xf32>
    %913 = vector.multi_reduction <add>, %567, %cst_361 [1] : vector<8x32xf32> to vector<8xf32>
    %914 = vector.shape_cast %913 : vector<8xf32> to vector<8x1xf32>
    %cst_362 = arith.constant 3.200000e+01 : f32
    %915 = vector.broadcast %cst_362 : f32 to vector<8x1xf32>
    %916 = arith.divf %914, %915 : vector<8x1xf32>
    %917 = vector.broadcast %916 : vector<8x1xf32> to vector<8x32xf32>
    %918 = arith.subf %567, %917 : vector<8x32xf32>
    %919 = arith.mulf %918, %918 : vector<8x32xf32>
    %cst_363 = arith.constant dense<0.000000e+00> : vector<8xf32>
    %920 = vector.multi_reduction <add>, %919, %cst_363 [1] : vector<8x32xf32> to vector<8xf32>
    %921 = vector.shape_cast %920 : vector<8xf32> to vector<8x1xf32>
    %cst_364 = arith.constant 3.200000e+01 : f32
    %922 = vector.broadcast %cst_364 : f32 to vector<8x1xf32>
    %923 = arith.divf %921, %922 : vector<8x1xf32>
    %924 = vector.broadcast %916 : vector<8x1xf32> to vector<8x32xf32>
    %925 = arith.subf %567, %924 : vector<8x32xf32>
    %cst_365 = arith.constant 9.99999974E-6 : f32
    %926 = vector.broadcast %cst_365 : f32 to vector<8x1xf32>
    %927 = arith.addf %923, %926 : vector<8x1xf32>
    %928 = math.rsqrt %927 : vector<8x1xf32>
    %929 = vector.broadcast %928 : vector<8x1xf32> to vector<8x32xf32>
    %930 = arith.mulf %925, %929 : vector<8x32xf32>
    %931 = vector.broadcast %625 : vector<1x32xf32> to vector<8x32xf32>
    %932 = arith.mulf %930, %931 : vector<8x32xf32>
    %933 = vector.broadcast %626 : vector<1x32xf32> to vector<8x32xf32>
    %934 = arith.addf %932, %933 : vector<8x32xf32>
    %cst_366 = arith.constant dense<0.000000e+00> : vector<8x32xf32>
    %935 = tpu.matmul %934, %629, %cst_366 {dimension_numbers = #tpu.dot_dimension_numbers<[1], [0], [0], [1], [0, 0, 1, 1], [], []>} : vector<8x32xf32>, vector<32x32xf32>, vector<8x32xf32> -> vector<8x32xf32>
    %936 = vector.broadcast %631 : vector<1x32xf32> to vector<8x32xf32>
    %937 = arith.addf %935, %936 : vector<8x32xf32>
    %cst_367 = arith.constant 5.000000e-01 : f32
    %938 = vector.broadcast %cst_367 : f32 to vector<8x32xf32>
    %939 = arith.mulf %938, %937 : vector<8x32xf32>
    %cst_368 = arith.constant 4.471500e-02 : f32
    %940 = vector.broadcast %cst_368 : f32 to vector<8x32xf32>
    %941 = arith.mulf %940, %937 : vector<8x32xf32>
    %942 = arith.mulf %941, %937 : vector<8x32xf32>
    %943 = arith.mulf %942, %937 : vector<8x32xf32>
    %944 = arith.addf %937, %943 : vector<8x32xf32>
    %cst_369 = arith.constant 0.797884583 : f32
    %945 = vector.broadcast %cst_369 : f32 to vector<8x32xf32>
    %946 = arith.mulf %945, %944 : vector<8x32xf32>
    %947 = math.tanh %946 : vector<8x32xf32>
    %cst_370 = arith.constant 1.000000e+00 : f32
    %948 = vector.broadcast %cst_370 : f32 to vector<8x32xf32>
    %949 = arith.addf %948, %947 : vector<8x32xf32>
    %950 = arith.mulf %939, %949 : vector<8x32xf32>
    %951 = vector.extract_strided_slice %950 {offsets = [0, 0], sizes = [8, 8], strides = [1, 1]} : vector<8x32xf32> to vector<8x8xf32>
    %952 = vector.extract_strided_slice %950 {offsets = [0, 8], sizes = [8, 8], strides = [1, 1]} : vector<8x32xf32> to vector<8x8xf32>
    %cst_371 = arith.constant dense<0.000000e+00> : vector<8xf32>
    %953 = vector.multi_reduction <add>, %952, %cst_371 [1] : vector<8x8xf32> to vector<8xf32>
    %954 = vector.shape_cast %953 : vector<8xf32> to vector<8x1xf32>
    %cst_372 = arith.constant 8.000000e+00 : f32
    %955 = vector.broadcast %cst_372 : f32 to vector<8x1xf32>
    %956 = arith.divf %954, %955 : vector<8x1xf32>
    %957 = vector.broadcast %956 : vector<8x1xf32> to vector<8x8xf32>
    %958 = arith.subf %952, %957 : vector<8x8xf32>
    %959 = arith.mulf %958, %958 : vector<8x8xf32>
    %cst_373 = arith.constant dense<0.000000e+00> : vector<8xf32>
    %960 = vector.multi_reduction <add>, %959, %cst_373 [1] : vector<8x8xf32> to vector<8xf32>
    %961 = vector.shape_cast %960 : vector<8xf32> to vector<8x1xf32>
    %cst_374 = arith.constant 8.000000e+00 : f32
    %962 = vector.broadcast %cst_374 : f32 to vector<8x1xf32>
    %963 = arith.divf %961, %962 : vector<8x1xf32>
    %964 = vector.broadcast %956 : vector<8x1xf32> to vector<8x8xf32>
    %965 = arith.subf %952, %964 : vector<8x8xf32>
    %cst_375 = arith.constant 9.99999974E-6 : f32
    %966 = vector.broadcast %cst_375 : f32 to vector<8x1xf32>
    %967 = arith.addf %963, %966 : vector<8x1xf32>
    %968 = math.rsqrt %967 : vector<8x1xf32>
    %969 = vector.broadcast %968 : vector<8x1xf32> to vector<8x8xf32>
    %970 = arith.mulf %965, %969 : vector<8x8xf32>
    %971 = vector.broadcast %632 : vector<1x8xf32> to vector<8x8xf32>
    %972 = arith.mulf %970, %971 : vector<8x8xf32>
    %973 = vector.broadcast %633 : vector<1x8xf32> to vector<8x8xf32>
    %974 = arith.addf %972, %973 : vector<8x8xf32>
    %975 = vector.extract_strided_slice %950 {offsets = [0, 16], sizes = [8, 8], strides = [1, 1]} : vector<8x32xf32> to vector<8x8xf32>
    %976 = vector.extract_strided_slice %950 {offsets = [0, 24], sizes = [8, 8], strides = [1, 1]} : vector<8x32xf32> to vector<8x8xf32>
    %cst_376 = arith.constant dense<0.000000e+00> : vector<8xf32>
    %977 = vector.multi_reduction <add>, %976, %cst_376 [1] : vector<8x8xf32> to vector<8xf32>
    %978 = vector.shape_cast %977 : vector<8xf32> to vector<8x1xf32>
    %cst_377 = arith.constant 8.000000e+00 : f32
    %979 = vector.broadcast %cst_377 : f32 to vector<8x1xf32>
    %980 = arith.divf %978, %979 : vector<8x1xf32>
    %981 = vector.broadcast %980 : vector<8x1xf32> to vector<8x8xf32>
    %982 = arith.subf %976, %981 : vector<8x8xf32>
    %983 = arith.mulf %982, %982 : vector<8x8xf32>
    %cst_378 = arith.constant dense<0.000000e+00> : vector<8xf32>
    %984 = vector.multi_reduction <add>, %983, %cst_378 [1] : vector<8x8xf32> to vector<8xf32>
    %985 = vector.shape_cast %984 : vector<8xf32> to vector<8x1xf32>
    %cst_379 = arith.constant 8.000000e+00 : f32
    %986 = vector.broadcast %cst_379 : f32 to vector<8x1xf32>
    %987 = arith.divf %985, %986 : vector<8x1xf32>
    %988 = vector.broadcast %980 : vector<8x1xf32> to vector<8x8xf32>
    %989 = arith.subf %976, %988 : vector<8x8xf32>
    %cst_380 = arith.constant 9.99999974E-6 : f32
    %990 = vector.broadcast %cst_380 : f32 to vector<8x1xf32>
    %991 = arith.addf %987, %990 : vector<8x1xf32>
    %992 = math.rsqrt %991 : vector<8x1xf32>
    %993 = vector.broadcast %992 : vector<8x1xf32> to vector<8x8xf32>
    %994 = arith.mulf %989, %993 : vector<8x8xf32>
    %995 = vector.broadcast %632 : vector<1x8xf32> to vector<8x8xf32>
    %996 = arith.mulf %994, %995 : vector<8x8xf32>
    %997 = vector.broadcast %633 : vector<1x8xf32> to vector<8x8xf32>
    %998 = arith.addf %996, %997 : vector<8x8xf32>
    %c4 = arith.constant 4 : index
    %c0_381 = arith.constant 0 : index
    %999 = memref.load %arg28[%c4, %c0_381] : memref<8x3xf32, #tpu.memory_space<smem>>
    %1000 = vector.broadcast %999 : f32 to vector<8x8xf32>
    %1001 = arith.mulf %974, %1000 : vector<8x8xf32>
    %c4_382 = arith.constant 4 : index
    %c1_383 = arith.constant 1 : index
    %1002 = memref.load %arg28[%c4_382, %c1_383] : memref<8x3xf32, #tpu.memory_space<smem>>
    %1003 = vector.broadcast %1002 : f32 to vector<8x8xf32>
    %1004 = arith.mulf %998, %1003 : vector<8x8xf32>
    %1005 = arith.addf %1001, %1004 : vector<8x8xf32>
    %c4_384 = arith.constant 4 : index
    %c2_385 = arith.constant 2 : index
    %1006 = memref.load %arg28[%c4_384, %c2_385] : memref<8x3xf32, #tpu.memory_space<smem>>
    %1007 = vector.broadcast %1006 : f32 to vector<8x8xf32>
    %1008 = arith.addf %1005, %1007 : vector<8x8xf32>
    %1009 = arith.addf %1008, %897 : vector<8x8xf32>
    %1010 = arith.mulf %1009, %951 : vector<8x8xf32>
    %c5 = arith.constant 5 : index
    %c0_386 = arith.constant 0 : index
    %1011 = memref.load %arg28[%c5, %c0_386] : memref<8x3xf32, #tpu.memory_space<smem>>
    %1012 = vector.broadcast %1011 : f32 to vector<8x8xf32>
    %1013 = arith.mulf %974, %1012 : vector<8x8xf32>
    %c5_387 = arith.constant 5 : index
    %c1_388 = arith.constant 1 : index
    %1014 = memref.load %arg28[%c5_387, %c1_388] : memref<8x3xf32, #tpu.memory_space<smem>>
    %1015 = vector.broadcast %1014 : f32 to vector<8x8xf32>
    %1016 = arith.mulf %998, %1015 : vector<8x8xf32>
    %1017 = arith.addf %1013, %1016 : vector<8x8xf32>
    %c5_389 = arith.constant 5 : index
    %c2_390 = arith.constant 2 : index
    %1018 = memref.load %arg28[%c5_389, %c2_390] : memref<8x3xf32, #tpu.memory_space<smem>>
    %1019 = vector.broadcast %1018 : f32 to vector<8x8xf32>
    %1020 = arith.addf %1017, %1019 : vector<8x8xf32>
    %1021 = arith.addf %1020, %912 : vector<8x8xf32>
    %1022 = arith.mulf %1021, %975 : vector<8x8xf32>
    %1023 = tpu.concatenate %1010, %1022 in 1 : vector<8x8xf32>, vector<8x8xf32> -> vector<8x16xf32>
    %cst_391 = arith.constant dense<0.000000e+00> : vector<8x32xf32>
    %1024 = tpu.matmul %1023, %635, %cst_391 {dimension_numbers = #tpu.dot_dimension_numbers<[1], [0], [0], [1], [0, 0, 1, 1], [], []>} : vector<8x16xf32>, vector<16x32xf32>, vector<8x32xf32> -> vector<8x32xf32>
    %1025 = vector.broadcast %627 : vector<1x32xf32> to vector<8x32xf32>
    %1026 = arith.addf %1024, %1025 : vector<8x32xf32>
    %1027 = arith.addf %1026, %567 : vector<8x32xf32>
    %1028 = tpu.transpose %1027, [1, 0] : vector<8x32xf32> -> vector<32x8xf32>
    %cst_392 = arith.constant dense<0.000000e+00> : vector<32x24xf32>
    %1029 = tpu.matmul %1028, %641, %cst_392 {dimension_numbers = #tpu.dot_dimension_numbers<[1], [0], [0], [1], [0, 0, 1, 1], [], []>} : vector<32x8xf32>, vector<8x24xf32>, vector<32x24xf32> -> vector<32x24xf32>
    %1030 = vector.extract_strided_slice %1029 {offsets = [0, 0], sizes = [32, 8], strides = [1, 1]} : vector<32x24xf32> to vector<32x8xf32>
    %1031 = vector.extract_strided_slice %1029 {offsets = [0, 8], sizes = [32, 8], strides = [1, 1]} : vector<32x24xf32> to vector<32x8xf32>
    %1032 = vector.extract_strided_slice %1029 {offsets = [0, 16], sizes = [32, 8], strides = [1, 1]} : vector<32x24xf32> to vector<32x8xf32>
    %cst_393 = arith.constant dense<0.000000e+00> : vector<32x32xf32>
    %1033 = tpu.matmul %1030, %1031, %cst_393 {dimension_numbers = #tpu.dot_dimension_numbers<[1], [1], [0], [0], [0, 0, 1, 0], [], []>} : vector<32x8xf32>, vector<32x8xf32>, vector<32x32xf32> -> vector<32x32xf32>
    %cst_394 = arith.constant 0.353553385 : f32
    %1034 = vector.broadcast %cst_394 : f32 to vector<32x32xf32>
    %1035 = arith.mulf %1033, %1034 : vector<32x32xf32>
    %1036 = arith.addf %1035, %576 : vector<32x32xf32>
    %cst_395 = arith.constant dense<0xFF800000> : vector<32xf32>
    %1037 = vector.multi_reduction <maximumf>, %1036, %cst_395 [1] : vector<32x32xf32> to vector<32xf32>
    %1038 = vector.shape_cast %1037 : vector<32xf32> to vector<32x1xf32>
    %1039 = vector.broadcast %1038 : vector<32x1xf32> to vector<32x32xf32>
    %1040 = arith.subf %1036, %1039 : vector<32x32xf32>
    %1041 = math.exp %1040 : vector<32x32xf32>
    %cst_396 = arith.constant dense<0.000000e+00> : vector<32xf32>
    %1042 = vector.multi_reduction <add>, %1041, %cst_396 [1] : vector<32x32xf32> to vector<32xf32>
    %1043 = vector.shape_cast %1042 : vector<32xf32> to vector<32x1xf32>
    %1044 = tpu.reciprocal %1043 {approx = true} : vector<32x1xf32> -> vector<32x1xf32>
    %1045 = vector.broadcast %1044 : vector<32x1xf32> to vector<32x32xf32>
    %1046 = arith.mulf %1041, %1045 : vector<32x32xf32>
    %cst_397 = arith.constant dense<0.000000e+00> : vector<32x8xf32>
    %1047 = tpu.matmul %1046, %1032, %cst_397 {dimension_numbers = #tpu.dot_dimension_numbers<[1], [0], [0], [1], [0, 0, 1, 1], [], []>} : vector<32x32xf32>, vector<32x8xf32>, vector<32x8xf32> -> vector<32x8xf32>
    %cst_398 = arith.constant dense<0.000000e+00> : vector<32x8xf32>
    %1048 = tpu.matmul %1047, %643, %cst_398 {dimension_numbers = #tpu.dot_dimension_numbers<[1], [0], [0], [1], [0, 0, 1, 1], [], []>} : vector<32x8xf32>, vector<8x8xf32>, vector<32x8xf32> -> vector<32x8xf32>
    %1049 = vector.broadcast %644 : vector<1x8xf32> to vector<32x8xf32>
    %1050 = arith.addf %1048, %1049 : vector<32x8xf32>
    %1051 = arith.addf %1035, %579 : vector<32x32xf32>
    %cst_399 = arith.constant dense<0xFF800000> : vector<32xf32>
    %1052 = vector.multi_reduction <maximumf>, %1051, %cst_399 [1] : vector<32x32xf32> to vector<32xf32>
    %1053 = vector.shape_cast %1052 : vector<32xf32> to vector<32x1xf32>
    %1054 = vector.broadcast %1053 : vector<32x1xf32> to vector<32x32xf32>
    %1055 = arith.subf %1051, %1054 : vector<32x32xf32>
    %1056 = math.exp %1055 : vector<32x32xf32>
    %cst_400 = arith.constant dense<0.000000e+00> : vector<32xf32>
    %1057 = vector.multi_reduction <add>, %1056, %cst_400 [1] : vector<32x32xf32> to vector<32xf32>
    %1058 = vector.shape_cast %1057 : vector<32xf32> to vector<32x1xf32>
    %1059 = tpu.reciprocal %1058 {approx = true} : vector<32x1xf32> -> vector<32x1xf32>
    %1060 = vector.broadcast %1059 : vector<32x1xf32> to vector<32x32xf32>
    %1061 = arith.mulf %1056, %1060 : vector<32x32xf32>
    %cst_401 = arith.constant dense<0.000000e+00> : vector<32x8xf32>
    %1062 = tpu.matmul %1061, %1032, %cst_401 {dimension_numbers = #tpu.dot_dimension_numbers<[1], [0], [0], [1], [0, 0, 1, 1], [], []>} : vector<32x32xf32>, vector<32x8xf32>, vector<32x8xf32> -> vector<32x8xf32>
    %cst_402 = arith.constant dense<0.000000e+00> : vector<32x8xf32>
    %1063 = tpu.matmul %1062, %643, %cst_402 {dimension_numbers = #tpu.dot_dimension_numbers<[1], [0], [0], [1], [0, 0, 1, 1], [], []>} : vector<32x8xf32>, vector<8x8xf32>, vector<32x8xf32> -> vector<32x8xf32>
    %1064 = vector.broadcast %644 : vector<1x8xf32> to vector<32x8xf32>
    %1065 = arith.addf %1063, %1064 : vector<32x8xf32>
    %cst_403 = arith.constant dense<0.000000e+00> : vector<32xf32>
    %1066 = vector.multi_reduction <add>, %1028, %cst_403 [1] : vector<32x8xf32> to vector<32xf32>
    %1067 = vector.shape_cast %1066 : vector<32xf32> to vector<32x1xf32>
    %cst_404 = arith.constant 8.000000e+00 : f32
    %1068 = vector.broadcast %cst_404 : f32 to vector<32x1xf32>
    %1069 = arith.divf %1067, %1068 : vector<32x1xf32>
    %1070 = vector.broadcast %1069 : vector<32x1xf32> to vector<32x8xf32>
    %1071 = arith.subf %1028, %1070 : vector<32x8xf32>
    %1072 = arith.mulf %1071, %1071 : vector<32x8xf32>
    %cst_405 = arith.constant dense<0.000000e+00> : vector<32xf32>
    %1073 = vector.multi_reduction <add>, %1072, %cst_405 [1] : vector<32x8xf32> to vector<32xf32>
    %1074 = vector.shape_cast %1073 : vector<32xf32> to vector<32x1xf32>
    %cst_406 = arith.constant 8.000000e+00 : f32
    %1075 = vector.broadcast %cst_406 : f32 to vector<32x1xf32>
    %1076 = arith.divf %1074, %1075 : vector<32x1xf32>
    %1077 = vector.broadcast %1069 : vector<32x1xf32> to vector<32x8xf32>
    %1078 = arith.subf %1028, %1077 : vector<32x8xf32>
    %cst_407 = arith.constant 9.99999974E-6 : f32
    %1079 = vector.broadcast %cst_407 : f32 to vector<32x1xf32>
    %1080 = arith.addf %1076, %1079 : vector<32x1xf32>
    %1081 = math.rsqrt %1080 : vector<32x1xf32>
    %1082 = vector.broadcast %1081 : vector<32x1xf32> to vector<32x8xf32>
    %1083 = arith.mulf %1078, %1082 : vector<32x8xf32>
    %1084 = vector.broadcast %645 : vector<1x8xf32> to vector<32x8xf32>
    %1085 = arith.mulf %1083, %1084 : vector<32x8xf32>
    %1086 = vector.broadcast %646 : vector<1x8xf32> to vector<32x8xf32>
    %1087 = arith.addf %1085, %1086 : vector<32x8xf32>
    %cst_408 = arith.constant dense<0.000000e+00> : vector<32x32xf32>
    %1088 = tpu.matmul %1087, %649, %cst_408 {dimension_numbers = #tpu.dot_dimension_numbers<[1], [0], [0], [1], [0, 0, 1, 1], [], []>} : vector<32x8xf32>, vector<8x32xf32>, vector<32x32xf32> -> vector<32x32xf32>
    %1089 = vector.broadcast %651 : vector<1x32xf32> to vector<32x32xf32>
    %1090 = arith.addf %1088, %1089 : vector<32x32xf32>
    %cst_409 = arith.constant 5.000000e-01 : f32
    %1091 = vector.broadcast %cst_409 : f32 to vector<32x32xf32>
    %1092 = arith.mulf %1091, %1090 : vector<32x32xf32>
    %cst_410 = arith.constant 4.471500e-02 : f32
    %1093 = vector.broadcast %cst_410 : f32 to vector<32x32xf32>
    %1094 = arith.mulf %1093, %1090 : vector<32x32xf32>
    %1095 = arith.mulf %1094, %1090 : vector<32x32xf32>
    %1096 = arith.mulf %1095, %1090 : vector<32x32xf32>
    %1097 = arith.addf %1090, %1096 : vector<32x32xf32>
    %cst_411 = arith.constant 0.797884583 : f32
    %1098 = vector.broadcast %cst_411 : f32 to vector<32x32xf32>
    %1099 = arith.mulf %1098, %1097 : vector<32x32xf32>
    %1100 = math.tanh %1099 : vector<32x32xf32>
    %cst_412 = arith.constant 1.000000e+00 : f32
    %1101 = vector.broadcast %cst_412 : f32 to vector<32x32xf32>
    %1102 = arith.addf %1101, %1100 : vector<32x32xf32>
    %1103 = arith.mulf %1092, %1102 : vector<32x32xf32>
    %1104 = vector.extract_strided_slice %1103 {offsets = [0, 0], sizes = [32, 8], strides = [1, 1]} : vector<32x32xf32> to vector<32x8xf32>
    %1105 = vector.extract_strided_slice %1103 {offsets = [0, 8], sizes = [32, 8], strides = [1, 1]} : vector<32x32xf32> to vector<32x8xf32>
    %cst_413 = arith.constant dense<0.000000e+00> : vector<32xf32>
    %1106 = vector.multi_reduction <add>, %1105, %cst_413 [1] : vector<32x8xf32> to vector<32xf32>
    %1107 = vector.shape_cast %1106 : vector<32xf32> to vector<32x1xf32>
    %cst_414 = arith.constant 8.000000e+00 : f32
    %1108 = vector.broadcast %cst_414 : f32 to vector<32x1xf32>
    %1109 = arith.divf %1107, %1108 : vector<32x1xf32>
    %1110 = vector.broadcast %1109 : vector<32x1xf32> to vector<32x8xf32>
    %1111 = arith.subf %1105, %1110 : vector<32x8xf32>
    %1112 = arith.mulf %1111, %1111 : vector<32x8xf32>
    %cst_415 = arith.constant dense<0.000000e+00> : vector<32xf32>
    %1113 = vector.multi_reduction <add>, %1112, %cst_415 [1] : vector<32x8xf32> to vector<32xf32>
    %1114 = vector.shape_cast %1113 : vector<32xf32> to vector<32x1xf32>
    %cst_416 = arith.constant 8.000000e+00 : f32
    %1115 = vector.broadcast %cst_416 : f32 to vector<32x1xf32>
    %1116 = arith.divf %1114, %1115 : vector<32x1xf32>
    %1117 = vector.broadcast %1109 : vector<32x1xf32> to vector<32x8xf32>
    %1118 = arith.subf %1105, %1117 : vector<32x8xf32>
    %cst_417 = arith.constant 9.99999974E-6 : f32
    %1119 = vector.broadcast %cst_417 : f32 to vector<32x1xf32>
    %1120 = arith.addf %1116, %1119 : vector<32x1xf32>
    %1121 = math.rsqrt %1120 : vector<32x1xf32>
    %1122 = vector.broadcast %1121 : vector<32x1xf32> to vector<32x8xf32>
    %1123 = arith.mulf %1118, %1122 : vector<32x8xf32>
    %1124 = vector.broadcast %652 : vector<1x8xf32> to vector<32x8xf32>
    %1125 = arith.mulf %1123, %1124 : vector<32x8xf32>
    %1126 = vector.broadcast %653 : vector<1x8xf32> to vector<32x8xf32>
    %1127 = arith.addf %1125, %1126 : vector<32x8xf32>
    %1128 = vector.extract_strided_slice %1103 {offsets = [0, 16], sizes = [32, 8], strides = [1, 1]} : vector<32x32xf32> to vector<32x8xf32>
    %1129 = vector.extract_strided_slice %1103 {offsets = [0, 24], sizes = [32, 8], strides = [1, 1]} : vector<32x32xf32> to vector<32x8xf32>
    %cst_418 = arith.constant dense<0.000000e+00> : vector<32xf32>
    %1130 = vector.multi_reduction <add>, %1129, %cst_418 [1] : vector<32x8xf32> to vector<32xf32>
    %1131 = vector.shape_cast %1130 : vector<32xf32> to vector<32x1xf32>
    %cst_419 = arith.constant 8.000000e+00 : f32
    %1132 = vector.broadcast %cst_419 : f32 to vector<32x1xf32>
    %1133 = arith.divf %1131, %1132 : vector<32x1xf32>
    %1134 = vector.broadcast %1133 : vector<32x1xf32> to vector<32x8xf32>
    %1135 = arith.subf %1129, %1134 : vector<32x8xf32>
    %1136 = arith.mulf %1135, %1135 : vector<32x8xf32>
    %cst_420 = arith.constant dense<0.000000e+00> : vector<32xf32>
    %1137 = vector.multi_reduction <add>, %1136, %cst_420 [1] : vector<32x8xf32> to vector<32xf32>
    %1138 = vector.shape_cast %1137 : vector<32xf32> to vector<32x1xf32>
    %cst_421 = arith.constant 8.000000e+00 : f32
    %1139 = vector.broadcast %cst_421 : f32 to vector<32x1xf32>
    %1140 = arith.divf %1138, %1139 : vector<32x1xf32>
    %1141 = vector.broadcast %1133 : vector<32x1xf32> to vector<32x8xf32>
    %1142 = arith.subf %1129, %1141 : vector<32x8xf32>
    %cst_422 = arith.constant 9.99999974E-6 : f32
    %1143 = vector.broadcast %cst_422 : f32 to vector<32x1xf32>
    %1144 = arith.addf %1140, %1143 : vector<32x1xf32>
    %1145 = math.rsqrt %1144 : vector<32x1xf32>
    %1146 = vector.broadcast %1145 : vector<32x1xf32> to vector<32x8xf32>
    %1147 = arith.mulf %1142, %1146 : vector<32x8xf32>
    %1148 = vector.broadcast %652 : vector<1x8xf32> to vector<32x8xf32>
    %1149 = arith.mulf %1147, %1148 : vector<32x8xf32>
    %1150 = vector.broadcast %653 : vector<1x8xf32> to vector<32x8xf32>
    %1151 = arith.addf %1149, %1150 : vector<32x8xf32>
    %c6 = arith.constant 6 : index
    %c0_423 = arith.constant 0 : index
    %1152 = memref.load %arg28[%c6, %c0_423] : memref<8x3xf32, #tpu.memory_space<smem>>
    %1153 = vector.broadcast %1152 : f32 to vector<32x8xf32>
    %1154 = arith.mulf %1127, %1153 : vector<32x8xf32>
    %c6_424 = arith.constant 6 : index
    %c1_425 = arith.constant 1 : index
    %1155 = memref.load %arg28[%c6_424, %c1_425] : memref<8x3xf32, #tpu.memory_space<smem>>
    %1156 = vector.broadcast %1155 : f32 to vector<32x8xf32>
    %1157 = arith.mulf %1151, %1156 : vector<32x8xf32>
    %1158 = arith.addf %1154, %1157 : vector<32x8xf32>
    %c6_426 = arith.constant 6 : index
    %c2_427 = arith.constant 2 : index
    %1159 = memref.load %arg28[%c6_426, %c2_427] : memref<8x3xf32, #tpu.memory_space<smem>>
    %1160 = vector.broadcast %1159 : f32 to vector<32x8xf32>
    %1161 = arith.addf %1158, %1160 : vector<32x8xf32>
    %1162 = arith.addf %1161, %1050 : vector<32x8xf32>
    %1163 = arith.mulf %1162, %1104 : vector<32x8xf32>
    %c7 = arith.constant 7 : index
    %c0_428 = arith.constant 0 : index
    %1164 = memref.load %arg28[%c7, %c0_428] : memref<8x3xf32, #tpu.memory_space<smem>>
    %1165 = vector.broadcast %1164 : f32 to vector<32x8xf32>
    %1166 = arith.mulf %1127, %1165 : vector<32x8xf32>
    %c7_429 = arith.constant 7 : index
    %c1_430 = arith.constant 1 : index
    %1167 = memref.load %arg28[%c7_429, %c1_430] : memref<8x3xf32, #tpu.memory_space<smem>>
    %1168 = vector.broadcast %1167 : f32 to vector<32x8xf32>
    %1169 = arith.mulf %1151, %1168 : vector<32x8xf32>
    %1170 = arith.addf %1166, %1169 : vector<32x8xf32>
    %c7_431 = arith.constant 7 : index
    %c2_432 = arith.constant 2 : index
    %1171 = memref.load %arg28[%c7_431, %c2_432] : memref<8x3xf32, #tpu.memory_space<smem>>
    %1172 = vector.broadcast %1171 : f32 to vector<32x8xf32>
    %1173 = arith.addf %1170, %1172 : vector<32x8xf32>
    %1174 = arith.addf %1173, %1065 : vector<32x8xf32>
    %1175 = arith.mulf %1174, %1128 : vector<32x8xf32>
    %1176 = tpu.concatenate %1163, %1175 in 1 : vector<32x8xf32>, vector<32x8xf32> -> vector<32x16xf32>
    %cst_433 = arith.constant dense<0.000000e+00> : vector<32x8xf32>
    %1177 = tpu.matmul %1176, %655, %cst_433 {dimension_numbers = #tpu.dot_dimension_numbers<[1], [0], [0], [1], [0, 0, 1, 1], [], []>} : vector<32x16xf32>, vector<16x8xf32>, vector<32x8xf32> -> vector<32x8xf32>
    %1178 = vector.broadcast %647 : vector<1x8xf32> to vector<32x8xf32>
    %1179 = arith.addf %1177, %1178 : vector<32x8xf32>
    %1180 = arith.addf %1179, %1028 : vector<32x8xf32>
    %1181 = tpu.transpose %1180, [1, 0] : vector<32x8xf32> -> vector<8x32xf32>
    %1182 = arith.mulf %875, %1181 : vector<8x32xf32>
    %c0_434 = arith.constant 0 : index
    %c0_435 = arith.constant 0 : index
    %c0_436 = arith.constant 0 : index
    %1183 = vector.load %arg29[%c0_434, %c0_435, %c0_436] : memref<1x8x32xf32, #tpu.memory_space<vmem>>, vector<1x8x32xf32>
    %1184 = vector.shape_cast %1183 : vector<1x8x32xf32> to vector<8x32xf32>
    %1185 = vector.shape_cast %1182 : vector<8x32xf32> to vector<1x8x32xf32>
    tpu.vector_store %arg29[%c0_434, %c0_435, %c0_436], %1185 {strides = array<i32>} : memref<1x8x32xf32, #tpu.memory_space<vmem>>, vector<1x8x32xf32>,
    return
  }
  func.func @transform_0(%arg0: i32) -> (i32, i32, i32) {
    %c0_i32 = arith.constant 0 : i32
    %c0_i32_0 = arith.constant 0 : i32
    %c0_i32_1 = arith.constant 0 : i32
    return %arg0, %c0_i32, %c0_i32_0 : i32, i32, i32
  }
  func.func @transform_1(%arg0: i32) -> (i32, i32, i32) {
    %c0_i32 = arith.constant 0 : i32
    %c0_i32_0 = arith.constant 0 : i32
    %c0_i32_1 = arith.constant 0 : i32
    %c0_i32_2 = arith.constant 0 : i32
    return %c0_i32, %c0_i32_0, %c0_i32_1 : i32, i32, i32
  }
  func.func @transform_2(%arg0: i32) -> (i32, i32, i32) {
    %c0_i32 = arith.constant 0 : i32
    %c0_i32_0 = arith.constant 0 : i32
    %c0_i32_1 = arith.constant 0 : i32
    %c0_i32_2 = arith.constant 0 : i32
    return %c0_i32, %c0_i32_0, %c0_i32_1 : i32, i32, i32
  }
  func.func @transform_3(%arg0: i32) -> (i32, i32, i32) {
    %c0_i32 = arith.constant 0 : i32
    %c0_i32_0 = arith.constant 0 : i32
    %c0_i32_1 = arith.constant 0 : i32
    %c0_i32_2 = arith.constant 0 : i32
    return %c0_i32, %c0_i32_0, %c0_i32_1 : i32, i32, i32
  }
  func.func @transform_4(%arg0: i32) -> (i32, i32, i32) {
    %c0_i32 = arith.constant 0 : i32
    %c0_i32_0 = arith.constant 0 : i32
    %c0_i32_1 = arith.constant 0 : i32
    %c0_i32_2 = arith.constant 0 : i32
    return %c0_i32, %c0_i32_0, %c0_i32_1 : i32, i32, i32
  }
  func.func @transform_5(%arg0: i32) -> (i32, i32, i32) {
    %c0_i32 = arith.constant 0 : i32
    %c0_i32_0 = arith.constant 0 : i32
    %c0_i32_1 = arith.constant 0 : i32
    %c0_i32_2 = arith.constant 0 : i32
    return %c0_i32, %c0_i32_0, %c0_i32_1 : i32, i32, i32
  }
  func.func @transform_6(%arg0: i32) -> (i32, i32, i32) {
    %c0_i32 = arith.constant 0 : i32
    %c0_i32_0 = arith.constant 0 : i32
    %c0_i32_1 = arith.constant 0 : i32
    %c0_i32_2 = arith.constant 0 : i32
    return %c0_i32, %c0_i32_0, %c0_i32_1 : i32, i32, i32
  }
  func.func @transform_7(%arg0: i32) -> (i32, i32, i32) {
    %c0_i32 = arith.constant 0 : i32
    %c0_i32_0 = arith.constant 0 : i32
    %c0_i32_1 = arith.constant 0 : i32
    %c0_i32_2 = arith.constant 0 : i32
    return %c0_i32, %c0_i32_0, %c0_i32_1 : i32, i32, i32
  }
  func.func @transform_8(%arg0: i32) -> (i32, i32, i32) {
    %c0_i32 = arith.constant 0 : i32
    %c0_i32_0 = arith.constant 0 : i32
    %c0_i32_1 = arith.constant 0 : i32
    %c0_i32_2 = arith.constant 0 : i32
    return %c0_i32, %c0_i32_0, %c0_i32_1 : i32, i32, i32
  }
  func.func @transform_9(%arg0: i32) -> (i32, i32, i32) {
    %c0_i32 = arith.constant 0 : i32
    %c0_i32_0 = arith.constant 0 : i32
    %c0_i32_1 = arith.constant 0 : i32
    %c0_i32_2 = arith.constant 0 : i32
    return %c0_i32, %c0_i32_0, %c0_i32_1 : i32, i32, i32
  }
  func.func @transform_10(%arg0: i32) -> (i32, i32, i32) {
    %c0_i32 = arith.constant 0 : i32
    %c0_i32_0 = arith.constant 0 : i32
    %c0_i32_1 = arith.constant 0 : i32
    %c0_i32_2 = arith.constant 0 : i32
    return %c0_i32, %c0_i32_0, %c0_i32_1 : i32, i32, i32
  }
  func.func @transform_11(%arg0: i32) -> (i32, i32, i32) {
    %c0_i32 = arith.constant 0 : i32
    %c0_i32_0 = arith.constant 0 : i32
    %c0_i32_1 = arith.constant 0 : i32
    %c0_i32_2 = arith.constant 0 : i32
    return %c0_i32, %c0_i32_0, %c0_i32_1 : i32, i32, i32
  }
  func.func @transform_12(%arg0: i32) -> (i32, i32, i32) {
    %c0_i32 = arith.constant 0 : i32
    %c0_i32_0 = arith.constant 0 : i32
    %c0_i32_1 = arith.constant 0 : i32
    %c0_i32_2 = arith.constant 0 : i32
    return %c0_i32, %c0_i32_0, %c0_i32_1 : i32, i32, i32
  }
  func.func @transform_13(%arg0: i32) -> (i32, i32, i32) {
    %c0_i32 = arith.constant 0 : i32
    %c0_i32_0 = arith.constant 0 : i32
    %c0_i32_1 = arith.constant 0 : i32
    %c0_i32_2 = arith.constant 0 : i32
    return %c0_i32, %c0_i32_0, %c0_i32_1 : i32, i32, i32
  }
  func.func @transform_14(%arg0: i32) -> (i32, i32, i32) {
    %c0_i32 = arith.constant 0 : i32
    %c0_i32_0 = arith.constant 0 : i32
    %c0_i32_1 = arith.constant 0 : i32
    %c0_i32_2 = arith.constant 0 : i32
    return %c0_i32, %c0_i32_0, %c0_i32_1 : i32, i32, i32
  }
  func.func @transform_15(%arg0: i32) -> (i32, i32, i32) {
    %c0_i32 = arith.constant 0 : i32
    %c0_i32_0 = arith.constant 0 : i32
    %c0_i32_1 = arith.constant 0 : i32
    %c0_i32_2 = arith.constant 0 : i32
    return %c0_i32, %c0_i32_0, %c0_i32_1 : i32, i32, i32
  }
  func.func @transform_16(%arg0: i32) -> (i32, i32, i32) {
    %c0_i32 = arith.constant 0 : i32
    %c0_i32_0 = arith.constant 0 : i32
    %c0_i32_1 = arith.constant 0 : i32
    %c0_i32_2 = arith.constant 0 : i32
    return %c0_i32, %c0_i32_0, %c0_i32_1 : i32, i32, i32
  }
  func.func @transform_17(%arg0: i32) -> (i32, i32, i32) {
    %c0_i32 = arith.constant 0 : i32
    %c0_i32_0 = arith.constant 0 : i32
    %c0_i32_1 = arith.constant 0 : i32
    %c0_i32_2 = arith.constant 0 : i32
    return %c0_i32, %c0_i32_0, %c0_i32_1 : i32, i32, i32
  }
  func.func @transform_18(%arg0: i32) -> (i32, i32, i32) {
    %c0_i32 = arith.constant 0 : i32
    %c0_i32_0 = arith.constant 0 : i32
    %c0_i32_1 = arith.constant 0 : i32
    %c0_i32_2 = arith.constant 0 : i32
    return %c0_i32, %c0_i32_0, %c0_i32_1 : i32, i32, i32
  }
  func.func @transform_19(%arg0: i32) -> (i32, i32, i32) {
    %c0_i32 = arith.constant 0 : i32
    %c0_i32_0 = arith.constant 0 : i32
    %c0_i32_1 = arith.constant 0 : i32
    %c0_i32_2 = arith.constant 0 : i32
    return %c0_i32, %c0_i32_0, %c0_i32_1 : i32, i32, i32
  }
  func.func @transform_20(%arg0: i32) -> (i32, i32, i32) {
    %c0_i32 = arith.constant 0 : i32
    %c0_i32_0 = arith.constant 0 : i32
    %c0_i32_1 = arith.constant 0 : i32
    %c0_i32_2 = arith.constant 0 : i32
    return %c0_i32, %c0_i32_0, %c0_i32_1 : i32, i32, i32
  }
  func.func @transform_21(%arg0: i32) -> (i32, i32, i32) {
    %c0_i32 = arith.constant 0 : i32
    %c0_i32_0 = arith.constant 0 : i32
    %c0_i32_1 = arith.constant 0 : i32
    %c0_i32_2 = arith.constant 0 : i32
    return %c0_i32, %c0_i32_0, %c0_i32_1 : i32, i32, i32
  }
  func.func @transform_22(%arg0: i32) -> (i32, i32, i32) {
    %c0_i32 = arith.constant 0 : i32
    %c0_i32_0 = arith.constant 0 : i32
    %c0_i32_1 = arith.constant 0 : i32
    %c0_i32_2 = arith.constant 0 : i32
    return %c0_i32, %c0_i32_0, %c0_i32_1 : i32, i32, i32
  }
  func.func @transform_23(%arg0: i32) -> (i32, i32, i32) {
    %c0_i32 = arith.constant 0 : i32
    %c0_i32_0 = arith.constant 0 : i32
    %c0_i32_1 = arith.constant 0 : i32
    %c0_i32_2 = arith.constant 0 : i32
    return %c0_i32, %c0_i32_0, %c0_i32_1 : i32, i32, i32
  }
  func.func @transform_24(%arg0: i32) -> (i32, i32, i32) {
    %c0_i32 = arith.constant 0 : i32
    %c0_i32_0 = arith.constant 0 : i32
    %c0_i32_1 = arith.constant 0 : i32
    %c0_i32_2 = arith.constant 0 : i32
    return %c0_i32, %c0_i32_0, %c0_i32_1 : i32, i32, i32
  }
  func.func @transform_25(%arg0: i32) -> (i32, i32, i32) {
    %c0_i32 = arith.constant 0 : i32
    %c0_i32_0 = arith.constant 0 : i32
    %c0_i32_1 = arith.constant 0 : i32
    %c0_i32_2 = arith.constant 0 : i32
    return %c0_i32, %c0_i32_0, %c0_i32_1 : i32, i32, i32
  }
  func.func @transform_26(%arg0: i32) -> (i32, i32, i32) {
    %c0_i32 = arith.constant 0 : i32
    %c0_i32_0 = arith.constant 0 : i32
    %c0_i32_1 = arith.constant 0 : i32
    %c0_i32_2 = arith.constant 0 : i32
    return %c0_i32, %c0_i32_0, %c0_i32_1 : i32, i32, i32
  }
  func.func @transform_27(%arg0: i32) -> (i32, i32) {
    %c0_i32 = arith.constant 0 : i32
    %c0_i32_0 = arith.constant 0 : i32
    %c0_i32_1 = arith.constant 0 : i32
    return %c0_i32, %c0_i32_0 : i32, i32
  }
  func.func @transform_28(%arg0: i32) -> (i32, i32, i32) {
    %c0_i32 = arith.constant 0 : i32
    %c0_i32_0 = arith.constant 0 : i32
    %c0_i32_1 = arith.constant 0 : i32
    return %arg0, %c0_i32, %c0_i32_0 : i32, i32, i32
  }
}

</mosaic_0001>

<bundles_post_ra>
// kernel: salt_fwd.1
= control target key start
LH: loop header
LB: loop body
LE: loop exit
PB: predicated region body
PF: predicated region fallthrough
CT: control target
= control target key end

     0   :  { %s13255_s0 = inlined_call_operand.vmem [shape: f32[2,8,32], index: 0, kind: input, shape index: {}]   ;;  %s13256_s1 = inlined_call_operand.vmem [shape: f32[2,32,48], index: 1, kind: input, shape index: {}]   ;;  %s13257_s2 = inlined_call_operand.vmem [shape: f32[2,16,32], index: 2, kind: input, shape index: {}]   ;;  %s13258_s3 = inlined_call_operand.vmem [shape: f32[2,32,256], index: 3, kind: input, shape index: {}]   ;;  %s13259_s4 = inlined_call_operand.vmem [shape: f32[2,128,32], index: 4, kind: input, shape index: {}]   ;;  %s13260_s5 = inlined_call_operand.vmem [shape: f32[2,1,256], index: 5, kind: input, shape index: {}]   ;;  %s13261_s6 = inlined_call_operand.vmem [shape: f32[2,6,32], index: 6, kind: input, shape index: {}]   ;;  %s13262_s7 = inlined_call_operand.vmem [shape: f32[2,8,48], index: 7, kind: input, shape index: {}]   ;;  %s13263_s8 = inlined_call_operand.vmem [shape: f32[2,16,8], index: 8, kind: input, shape index: {}]   ;;  %s13264_s9 = inlined_call_operand.vmem [shape: f32[2,8,64], index: 9, kind: input, shape index: {}]   ;;  %s13265_s10 = inlined_call_operand.vmem [shape: f32[2,32,8], index: 10, kind: input, shape index: {}]   ;;  %s13266_s11 = inlined_call_operand.vmem [shape: f32[2,1,64], index: 11, kind: input, shape index: {}]   ;;  %s13267_s12 = inlined_call_operand.vmem [shape: f32[2,6,8], index: 12, kind: input, shape index: {}]   ;;  %s13268_s13 = inlined_call_operand.vmem [shape: f32[2,32,24], index: 13, kind: input, shape index: {}]   ;;  %s13269_s14 = inlined_call_operand.vmem [shape: f32[2,8,8], index: 14, kind: input, shape index: {}]   ;;  %s13270_s15 = inlined_call_operand.vmem [shape: f32[2,32,32], index: 15, kind: input, shape index: {}]   ;;  %s13271_s16 = inlined_call_operand.vmem [shape: f32[2,1,32], index: 16, kind: input, shape index: {}]   ;;  %s13272_s17 = inlined_call_operand.vmem [shape: f32[2,16,32], index: 17, kind: input, shape index: {}]   ;;  %s13273_s18 = inlined_call_operand.vmem [shape: f32[2,3,32], index: 18, kind: input, shape index: {}]   ;;  %s13274_s19 = inlined_call_operand.vmem [shape: f32[2,3,8], index: 19, kind: input, shape index: {}]   ;;  %s13275_s20 = inlined_call_operand.vmem [shape: f32[2,8,24], index: 20, kind: input, shape index: {}]   ;;  %s13276_s21 = inlined_call_operand.vmem [shape: f32[2,8,8], index: 21, kind: input, shape index: {}]   ;;  %s13277_s22 = inlined_call_operand.vmem [shape: f32[2,8,32], index: 22, kind: input, shape index: {}]   ;;  %s13278_s23 = inlined_call_operand.vmem [shape: f32[2,1,32], index: 23, kind: input, shape index: {}]   ;;  %s13279_s24 = inlined_call_operand.vmem [shape: f32[2,16,8], index: 24, kind: input, shape index: {}]   ;;  %s13280_s25 = inlined_call_operand.vmem [shape: f32[2,3,8], index: 25, kind: input, shape index: {}]   ;;  %s13281_s26 = inlined_call_operand.vmem [shape: f32[2,3,8], index: 26, kind: input, shape index: {}]   ;;  %s13282_s27 = inlined_call_operand.vmem [shape: f32[8,3], index: 27, kind: input, shape index: {}]   ;;  %s13283_s28 = inlined_call_operand.hbm [shape: f32[2,8,32], index: 28, kind: output, shape index: {}]  }
   0x1   :  { %13329 = sst [smem:[#allocation17_spill]] %s13255_s0 }
   0x2   :  { %13330 = sst [smem:[#allocation18_spill]] %s13256_s1 }
   0x3   :  { %13331 = sst [smem:[#allocation19_spill]] %s13257_s2 }
   0x4   :  { %13332 = sst [smem:[#allocation20_spill]] %s13258_s3 }
   0x5   :  { %13333 = sst [smem:[#allocation21_spill]] %s13259_s4 }
   0x6   :  { %13334 = sst [smem:[#allocation22_spill]] %s13260_s5 }
   0x7   :  { %13335 = sst [smem:[#allocation23_spill]] %s13261_s6 }
   0x8   :  { %13336 = sst [smem:[#allocation24_spill]] %s13262_s7 }
   0x9   :  { %13337 = sst [smem:[#allocation25_spill]] %s13263_s8 }
   0xa   :  { %13338 = sst [smem:[#allocation26_spill]] %s13264_s9 }
   0xb   :  { %13339 = sst [smem:[#allocation27_spill]] %s13265_s10 }
   0xc   :  { %13340 = sst [smem:[#allocation28_spill]] %s13266_s11 }
   0xd   :  { %13341 = sst [smem:[#allocation29_spill]] %s13267_s12 }
   0xe   :  { %13342 = sst [smem:[#allocation30_spill]] %s13268_s13 }
   0xf   :  { %13343 = sst [smem:[#allocation31_spill]] %s13276_s21 }
  0x10   :  { %13344 = sst [smem:[#allocation32_spill]] %s13279_s24 }
  0x11   :  { %13345 = sst [smem:[#allocation33_spill]] %s13281_s26 }
  0x12   :  { %13346 = sst [smem:[#allocation34_spill]] %s13282_s27 }
  0x13   :  { %13347 = sst [smem:[#allocation35_spill]] %s13283_s28 }
  0x14   :  { %33 = vsyncpa [#allocation4], 0 }
  0x15   :  { %34 = vsyncpa [#allocation3], 0 }
  0x16   :  { %36 = vsyncpa [#allocation3 + $0x1], 0  ;;  %s11171_s8 = smov 0   ;;  %s11173_s5 = smov 0  }
  0x17   :  { %s11175_s9 = smov 0   ;;  %s11177_s30 = smov 0  }
  0x18 LB: > { %13348 = sst [smem:[#allocation8_spill]] %s11000_s8  ;;  %s11192_s3 = sadd.s32 4294967295, %s11012_s30   ;;  %s11012_s30 = sphi %s11177_s30, %s13411_s30   ;;  %s11008_s9 = sphi %s11175_s9, %s13414_s9   ;;  %s11004_s5 = sphi %s11173_s5, %s13413_s5   ;;  %s11000_s8 = sphi %s11171_s8, %s13412_s8  }
  0x19   : > { %13349 = sst [smem:[#allocation9_spill]] %s11004_s5  ;;  %s9022_s6 = sadd.s32 4294967294, %s11012_s30  }
  0x1a   : > { %13350 = sst [smem:[#allocation10_spill]] %s11008_s9  ;;  %s11196_s10 = sadd.s32 1, %s11012_s30  }
  0x1b   : > { %13351 = sst [smem:[#allocation11_spill]] %s11012_s30  ;;  %s642_s0 = sadd.s32 1, %s11008_s9 }
  0x1c   : > { %13352 = sst [smem:[#allocation12_spill]] %s11192_s3  ;;  %s639_s11 = ssub.s32 %s11012_s30, %s11196_s10 }
  0x1d   : > { %13353 = sst [smem:[#allocation13_spill]] %s11196_s10  ;;  %p652_p0 = scmp.ne.s32.totalorder %s11008_s9, %s11004_s5 }
  0x1e   : > { %p640_p1 = scmp.eq.s32.totalorder %s639_s11, 0  ;;  %p653_p2 = scmp.eq.s32.totalorder %s11192_s3, 1 }
  0x1f   : > { %p658_p3 = scmp.ne.s32.totalorder %s11004_s5, %s11000_s8  ;;  %p659_p4 = scmp.eq.s32.totalorder %s9022_s6, 1 }
  0x20   : > { %s11207_s29 = scalar_select %p640_p1, %s11008_s9, %s642_s0  }
  0x21   : > { %p11209_p5 = por %p653_p2, %p652_p0  ;;  %p11213_p6 = por %p659_p4, %p658_p3 }
  0x22   : > { %13354 = sst [smem:[#allocation14_spill]] %s11207_s29  ;;  %p9023_p7 = scmp.ge.s32.totalorder %s11012_s30, 1 }
  0x23   : > { %s13355_s2 = scalar_select %p11209_p5, 1, 0 }
  0x24   : > { %s13357_s7 = scalar_select %p11213_p6, 1, 0 }
  0x25   : > { %13356 = sst [smem:[#allocation15_spill]] %s13355_s2  ;;  %p666_p8 = scmp.lt.s32.totalorder %s11012_s30, 3 }
  0x26   : > { %13358 = sst [smem:[#allocation16_spill]] %s13357_s7  ;;  %p10480_p9 = scmp.eq.s32.totalorder %s11192_s3, 0 }
  0x27   : > { %p11220_p10 = pnand %p9023_p7, %p666_p8  ;;  %s13360_s27 = sld [smem:[#allocation34_spill]] }
  0x29   : > { %p10472_p11 = pneg %p11220_p10 }
  0x2b   : > { %p10473_p12 = pnand %p10480_p9, %p10472_p11 }
  0x2d   : > { %s757_s6 = sshll.u32 %s13360_s27, 4  ;;  %p10933_p0 = pneg %p10473_p12  ;;  %s758_s6 = int_to_ptr.vmem [resolvable:$true] %s757_s6 }
  0x2e   : > { %s10931_s0 = scalar_lea.vmem %s758_s6, 128  ;;  %p10939_p3 = scmp.lt.s32.totalorder %s758_s6, %s758_s6 }
  0x2f   : > { %p10932_p13 = scmp.ne.s32.totalorder %s758_s6, %s10931_s0  ;;  %p10940_p4 = scmp.lt.s32.totalorder %s10931_s0, %s10931_s0 }
  0x31   : > { %p10934_p1 = pnand %p10933_p0, %p10932_p13  ;;  %p10941_p7 = por %p10940_p4, %p10939_p3 }
  0x33   : > { %p10935_p2 = pneg %p10934_p1 }
  0x35   : > { %p10942_p8 = pnand %p10941_p7, %p10935_p2 }
  0x37   : > { %10945 = shalt.err (!%p10942_p8)
}
  0x38   : > { %s11014_s11 = smov [#allocation2]   ;;  %777 = sbr.rel (%p11220_p10) target bundleno = 17307 (0x439b), region = 132 }
  0x39   : > { %10475 = dma.vmem_to_smem (!%p10473_p12), %s758_s6, 128, %s11014_s11, [#allocation4]  }
  0x3f   : > { %10991 = dma.done.wait (%p10480_p9), [#allocation4], 128  }
  0x40   : > { %10993 = vsyncadd (%p10480_p9), [#allocation4], 4294967168 }
  0x41   : > { %783 = sfence }
  0x42   : > { %s13361_s27 = sld [smem:[#allocation18_spill]]  ;;  %v11015_v3 = vmov 0.0|0.0   ;;  %vm11016_vm0 = vmmov 0   ;;  %v11017_v6 = vmov 0.0   ;;  %p851_p9 = scmp.lt.s32.totalorder %s11192_s3, 1  ;;  %vm920_vm1 = vcmask 261120  }
  0x43   : > { %10194 = vmatprep.subr.bf16.mxu0 %v11015_v3  ;;  %9620 = vmatprep.mubr.msk.f32.mxu0 %vm11016_vm0, %v11017_v6  ;;  %s13362_s0 = sld [smem:[#allocation17_spill]]  ;;  %s13301_s12 = smov 120   ;;  %vm997_vm2 = vcmask 64512   ;;  %vm1335_vm3 = vcmask 130048   ;;  %v1331_v49 = vlaneseq }
  0x44   : > { %9623 = vmatprep.subr.mxu1 %v11017_v6  ;;  %9625 = vmatprep.mubr.msk.f32.mxu1 %vm11016_vm0, %v11017_v6  ;;  %s852_s29 = scalar_select %p851_p9, %s11192_s3, 1  ;;  %vm11485_vm4 = vmpackc.low %vm997_vm2, %vm997_vm2 }
  0x45   : > { %s13307_s11 = smov 112   ;;  %s13299_s4 = smov 96   ;;  %v11316_v50 = vshrl.u32 %v1331_v49, 7 }
  0x46   : > { %s9029_s1 = sshll.u32 %s852_s29, 3  ;;  %s13303_s29 = smov 104  }
  0x47   : > { %v11319_v51 = vsub.s32 0, %v11316_v50  ;;  %s13364_s9 = sld [smem:[#allocation23_spill]]  ;;  %s13367_s3 = sld [smem:[#allocation21_spill]] }
  0x48   : > { %v858_v0 = vld [vmem:[%s13361_s27] sm:$0xff]  ;;  %v859_v1 = vld [vmem:[%s13361_s27 + $0x8] sm:$0xff]  ;;  %v860_v2 = vld [vmem:[%s13361_s27 + $0x10] sm:$0xff]  ;;  %s13370_s8 = smov 112   ;;  %s13371_s7 = smov 104  }
  0x49   : > { %v10195_v4 = vpack.c.bf16 %v859_v1, %v858_v0  ;;  %v861_v5 = vld [vmem:[%s13361_s27 + $0x18] sm:$0xff]  ;;  %s11261_s6 = scalar_lea.vmem %s13362_s0, %s9029_s1  ;;  %s13297_s1 = smov 88  }
  0x4a   : > { %v10198_v7 = vpack.c.bf16 %v861_v5, %v860_v2  ;;  %v11264_v8 = vld [vmem:[%s11261_s6] sm:$0xff]  ;;  %s13372_s28 = smov 120   ;;  %s13375_s30 = smov 96  }
  0x4b   : > { %10196 = vmatpush3.bf16.msra.mxu0 %v10195_v4  ;;  %s13376_s2 = smov 88   ;;  %s13377_s10 = sld [smem:[#allocation25_spill]] }
  0x4c   : > { %10197 = vmatprep.subr.bf16.mxu0 %v11015_v3  ;;  %s13382_s13 = sld [smem:[#allocation30_spill]]  ;;  %s9090_s0 = sld [smem:[#allocation2 + $0x81]] }
  0x4d   : > { %v11324_v52 = vld [vmem:[%s13364_s9] sm:$0x3f]  ;;  %s13365_s9 = sld [smem:[#allocation20_spill]]  ;;  %v888_v49 = vld [vmem:[%s13367_s3 + $0x78] sm:$0xff]  ;;  %s9087_s5 = sld [smem:[#allocation2 + $0x1]] }
  0x4e   : > { %v1334_v53 = vrot.slane %v11324_v52, %v11319_v51  ;;  %s13386_s21 = sld [smem:[#allocation31_spill]]  ;;  %s13387_s26 = sld [smem:[#allocation33_spill]] }
  0x4f   : > { %10199 = vmatpush3.bf16.msra.mxu0 %v10198_v7  ;;  %s13388_s24 = sld [smem:[#allocation32_spill]] }
  0x50   : > { %9633 = vmatprep.subr.mxu0 %v11017_v6 }
  0x52   : > { %9621 = vmatmul.mubr.msk.f32.vlgmr.msra.gmra.mrb[0].mxu0 %vm920_vm1, %v11264_v8 }
  0x53   : > { %9635 = vmatprep.mubr.msk.f32.mxu0 %vm11016_vm0, %v11017_v6  ;;  %v865_v0 = vld [vmem:[%s13365_s9 + $0x8] sm:$0xff] }
 0x125   : > { %v990_v9 = vpop.f32.mrb[0].mxu0 }
 0x126   : > { %1160 = vrot.lane.b32.xlu1 %v990_v9, %s13301_s12  ;;  %995 = vrot.lane.b32.xlu0 %v990_v9, %s13307_s11  ;;  %v9622_v10 = vpop.f32.mrb[1].mxu0  ;;  %s13368_s12 = sld [smem:[#allocation22_spill]]  ;;  %s13369_s11 = sld [smem:[#allocation24_spill]] }
 0x12a   : > { %1162 = vrot.lane.b32.xlu0 %v990_v9, %s13303_s29  ;;  %s13305_s29 = smov 8  }
 0x198   : > { %v996_v11 = vpop.permute.xlu0 %995  ;;  %v1161_v13 = vpop.permute.xlu1 %1160 }
 0x199   : > { %9624 = vmatpush3.xpose.msk.msra.mxu1 %vm997_vm2, %v996_v11 }
 0x19a   : > { %9628 = vmatprep.subr.mxu1 %v11017_v6 }
 0x19c   : > { %9626 = vmatmul.mubr.msk.f32.vlgmr.msra.gmra.mrb[0].mxu1 %vm997_vm2, %v990_v9  ;;  %v1163_v12 = vpop.permute.xlu0 %1162 }
 0x19d   : > { %9634 = vmatpush3.xpose.msk.msra.mxu0 %vm997_vm2, %v1163_v12  ;;  %9630 = vmatprep.mubr.msk.f32.mxu1 %vm11016_vm0, %v11017_v6 }
 0x19e   : > { %10200 = vmatprep.subr.bf16.mxu0 %v11015_v3 }
 0x1a0   : > { %9636 = vmatmul.mubr.msk.f32.vlgmr.msra.gmra.mrb[2].mxu0 %vm997_vm2, %v1161_v13 }
 0x1a1   : > { %9647 = vmatprep.mubr.msk.f32.mxu0 %vm11016_vm0, %v11017_v6 }
 0x26f   : > { %v1068_v14 = vpop.f32.mrb[0].mxu1 }
 0x270   : > { %v11284_v15 = vmul.f32 0.35355338, %v1068_v14  ;;  %v9627_v16 = vpop.f32.mrb[1].mxu1 }
 0x272   : > { %v1073_v17 = vsel %vm997_vm2, %v11284_v15, -inf }
 0x273   : > { %1074 = vmax.xlane.f32.xlu1 %v1073_v17  ;;  %v1234_v18 = vpop.f32.mrb[2].mxu0 }
 0x274   : > { %v11288_v19 = vmul.f32 0.35355338, %v1234_v18  ;;  %v9637_v20 = vpop.f32.mrb[3].mxu0  ;;  %v11356_v18 = vsub.s32 1, %v11316_v50 }
 0x275   : > { %v11359_v20 = vsub.s32 2, %v11316_v50 }
 0x276   : > { %v1239_v21 = vsel %vm997_vm2, %v11288_v19, -inf }
 0x277   : > { %1240 = vmax.xlane.f32.xlu0 %v1239_v21  ;;  %v1427_v21 = vrot.slane %v11324_v52, %v11356_v18 }
 0x300   : > { %v1075_v22 = vpop.xlane.xlu1 %1074 }
 0x301   : > { %v1076_v23 = vsub.f32 %v11284_v15, %v1075_v22 }
 0x303   : > { %v1077_v24 = vmul.f32 1.442695, %v1076_v23 }
 0x304   : > { %v1241_v25 = vpop.xlane.xlu0 %1240 }
 0x305   : > { %10646 = vpow2.f32 %v1077_v24  ;;  %v1242_v26 = vsub.f32 %v11288_v19, %v1241_v25  ;;  %v1432_v24 = vrot.slane %v11324_v52, %v11359_v20 }
 0x307   : > { %v1243_v27 = vmul.f32 1.442695, %v1242_v26 }
 0x309   : > { %10648 = vpow2.f32 %v1243_v27  ;;  %v873_v27 = vld [vmem:[%s13367_s3] sm:$0xff] }
 0x30f   : > { %v10647_v28 = vpop.eup %10646 }
 0x310   : > { %v1079_v29 = vsel %vm997_vm2, %v10647_v28, 0.0 }
 0x311   : > { %1080 = vadd.xlane.f32.xlu0 %v1079_v29 }
 0x313   : > { %v10649_v30 = vpop.eup %10648 }
 0x314   : > { %v1245_v31 = vsel %vm997_vm2, %v10649_v30, 0.0 }
 0x315   : > { %1246 = vadd.xlane.f32.xlu1 %v1245_v31  ;;  %v876_v31 = vld [vmem:[%s13367_s3 + $0x18] sm:$0xff] }
 0x326   : > { %1250 = vrot.lane.b32.xlu1 %v990_v9, %s13297_s1  ;;  %s13363_s1 = sld [smem:[#allocation19_spill]] }
 0x327   : > { %1084 = vrot.lane.b32.xlu0 %v990_v9, %s13299_s4 }
 0x32c   : > { %v862_v40 = vld [vmem:[%s13363_s1] sm:$0xff]  ;;  %v863_v41 = vld [vmem:[%s13363_s1 + $0x8] sm:$0xff] }
 0x32d   : > { %v10201_v42 = vpack.c.bf16 %v863_v41, %v862_v40  ;;  %v882_v40 = vld [vmem:[%s13367_s3 + $0x48] sm:$0xff]  ;;  %v883_v41 = vld [vmem:[%s13367_s3 + $0x50] sm:$0xff] }
 0x32f   : > { %10202 = vmatpush3.bf16.msra.mxu0 %v10201_v42 }
 0x330   : > { %10211 = vmatprep.subr.bf16.mxu0 %v11015_v3 }
 0x39e   : > { %v1081_v32 = vpop.xlane.xlu0 %1080 }
 0x39f   : > { %10650 = vrcp.f32 %v1081_v32 }
 0x3a2   : > { %v1247_v33 = vpop.xlane.xlu1 %1246  ;;  %v1085_v34 = vpop.permute.xlu0 %1084 }
 0x3a3   : > { %10652 = vrcp.f32 %v1247_v33  ;;  %9629 = vmatpush3.msra.mxu1 %v1085_v34  ;;  %v877_v33 = vld [vmem:[%s13367_s3 + $0x20] sm:$0xff]  ;;  %v878_v34 = vld [vmem:[%s13367_s3 + $0x28] sm:$0xff] }
 0x3a4   : > { %9638 = vmatprep.subr.mxu1 %v11017_v6 }
 0x3a6   : > { %v1251_v37 = vpop.permute.xlu1 %1250 }
 0x3a9   : > { %v10651_v35 = vpop.eup %10650 }
 0x3aa   : > { %v1083_v36 = vmul.f32 %v10651_v35, %v10647_v28  ;;  %v874_v28 = vld [vmem:[%s13367_s3 + $0x8] sm:$0xff]  ;;  %v10218_v35 = vpack.c.bf16 %v878_v34, %v877_v33 }
 0x3ab   : > { %v10212_v29 = vpack.c.bf16 %v874_v28, %v873_v27 }
 0x3ac   : > { %9631 = vmatmul.mubr.msk.f32.vlgmr.msra.gmra.mrb[2].mxu1 %vm997_vm2, %v1083_v36  ;;  %v879_v36 = vld [vmem:[%s13367_s3 + $0x30] sm:$0xff] }
 0x3ad   : > { %v10653_v38 = vpop.eup %10652  ;;  %9639 = vmatpush3.msra.mxu1 %v1251_v37  ;;  %9640 = vmatprep.mubr.msk.f32.mxu1 %vm11016_vm0, %v11017_v6  ;;  %v880_v37 = vld [vmem:[%s13367_s3 + $0x38] sm:$0xff] }
 0x3ae   : > { %v1249_v39 = vmul.f32 %v10653_v38, %v10649_v30  ;;  %v875_v30 = vld [vmem:[%s13367_s3 + $0x10] sm:$0xff]  ;;  %v10221_v38 = vpack.c.bf16 %v880_v37, %v879_v36  ;;  %v889_v36 = vld [vmem:[%s13369_s11] sm:$0xff]  ;;  %s9091_s11 = sld [smem:[#allocation2 + $0x82]] }
 0x3af   : > { %v10215_v32 = vpack.c.bf16 %v876_v31, %v875_v30  ;;  %v11441_v30 = vsub.s32 5, %v11316_v50 }
 0x3b0   : > { %9641 = vmatmul.mubr.msk.f32.vlgmr.msra.gmra.mrb[4].mxu1 %vm997_vm2, %v1249_v39  ;;  %v881_v39 = vld [vmem:[%s13367_s3 + $0x40] sm:$0xff] }
 0x3b1   : > { %1512 = vmatprep.mubr.f32.mxu1 %v11017_v6  ;;  %v10224_v42 = vpack.c.bf16 %v882_v40, %v881_v39  ;;  %v1625_v33 = vrot.slane %v11324_v52, %v11441_v30 }
 0x47f   : > { %v1156_v43 = vpop.f32.mrb[2].mxu1 }
 0x480   : > { %v9632_v44 = vpop.f32.mrb[3].mxu1 }
 0x483   : > { %v1322_v45 = vpop.f32.mrb[4].mxu1 }
 0x484   : > { %1327 = vrot.lane.b32.xlu1 %v1322_v45, %s13305_s29  ;;  %v9642_v46 = vpop.f32.mrb[5].mxu1  ;;  %s13366_s29 = smov %s13365_s9  ;;  %v885_v45 = vld [vmem:[%s13367_s3 + $0x60] sm:$0xff]  ;;  %s13379_s9 = sld [smem:[#allocation29_spill]] }
 0x485   : > { %v867_v1 = vld [vmem:[%s13366_s29 + $0x18] sm:$0xff]  ;;  %v864_v4 = vld [vmem:[%s13366_s29] sm:$0xff]  ;;  %v866_v5 = vld [vmem:[%s13366_s29 + $0x10] sm:$0xff] }
 0x486   : > { %v10203_v2 = vpack.c.bf16 %v867_v1, %v865_v0  ;;  %v10205_v7 = vpack.c.bf16 %v866_v5, %v864_v4  ;;  %v871_v9 = vld [vmem:[%s13366_s29 + $0x38] sm:$0xff]  ;;  %v868_v10 = vld [vmem:[%s13366_s29 + $0x20] sm:$0xff]  ;;  %v870_v12 = vld [vmem:[%s13366_s29 + $0x30] sm:$0xff] }
 0x487   : > { %v10209_v13 = vpack.c.bf16 %v870_v12, %v868_v10  ;;  %v886_v46 = vld [vmem:[%s13367_s3 + $0x68] sm:$0xff] }
 0x488   : > { %10204 = vmatprep.subr.bf16.mxu1 %v10203_v2 }
 0x489   : > { %10206 = vmatpush1.bf16.msra.mxu1 %v10205_v7 }
 0x48a   : > { %s13380_s4 = smov %s13379_s9 }
 0x4f6   : > { %v1328_v47 = vpop.permute.xlu1 %1327 }
 0x4f7   : > { %v1330_v48 = vsel %vm997_vm2, %v1156_v43, %v1328_v47  ;;  %v884_v43 = vld [vmem:[%s13367_s3 + $0x58] sm:$0xff]  ;;  %v10230_v47 = vpack.c.bf16 %v886_v46, %v885_v45 }
 0x4f8   : > { %9648 = vmatmul.mubr.msk.f32.vlgmr.msra.gmra.mrb[4].mxu0 %vm1335_vm3, %v1330_v48  ;;  %v10227_v44 = vpack.c.bf16 %v884_v43, %v883_v41  ;;  %v887_v48 = vld [vmem:[%s13367_s3 + $0x70] sm:$0xff]  ;;  %s9120_s3 = sld [smem:[#allocation2 + $0x102]] }
 0x4f9   : > { %9682 = vmatprep.mubr.msk.f32.mxu0 %vm11016_vm0, %v11017_v6  ;;  %10213 = vmatpush3.bf16.msra.mxu0 %v10212_v29  ;;  %v11438_v29 = vsub.s32 4, %v11316_v50 }
 0x4fa   : > { %10214 = vmatprep.subr.bf16.mxu0 %v11015_v3 }
 0x4fd   : > { %10216 = vmatpush3.bf16.msra.mxu0 %v10215_v32 }
 0x4fe   : > { %10217 = vmatprep.subr.bf16.mxu0 %v11015_v3 }
 0x501   : > { %10219 = vmatpush3.bf16.msra.mxu0 %v10218_v35 }
 0x502   : > { %10220 = vmatprep.subr.bf16.mxu0 %v11015_v3 }
 0x505   : > { %10222 = vmatpush3.bf16.msra.mxu0 %v10221_v38 }
 0x506   : > { %10223 = vmatprep.subr.bf16.mxu0 %v11015_v3 }
 0x509   : > { %10225 = vmatpush3.bf16.msra.mxu0 %v10224_v42 }
 0x50a   : > { %10226 = vmatprep.subr.bf16.mxu0 %v11015_v3 }
 0x50d   : > { %10228 = vmatpush3.bf16.msra.mxu0 %v10227_v44 }
 0x50e   : > { %10229 = vmatprep.subr.bf16.mxu0 %v11015_v3 }
 0x511   : > { %10231 = vmatpush3.bf16.msra.mxu0 %v10230_v47 }
 0x512   : > { %10232 = vmatprep.subr.bf16.mxu0 %v11015_v3 }
 0x5cb   : > { %v1405_v54 = vpop.f32.mrb[4].mxu0 }
 0x5cc   : > { %v1406_v55 = vadd.f32 %v1405_v54, %v1334_v53  ;;  %v9649_v56 = vpop.f32.mrb[5].mxu0  ;;  %v10233_v53 = vpack.c.bf16 %v888_v49, %v887_v48  ;;  %v872_v54 = vld [vmem:[%s13368_s12] sm:$0x3]  ;;  %s13378_s12 = smov 8  }
 0x5cd   : > { %v1438_v0 = vrot.slane %v872_v54, %v11319_v51 }
 0x5ce   : > { %v1409_v57 = vadd.f32 %v1406_v55, %v11264_v8  ;;  %v869_v8 = vld [vmem:[%s13366_s29 + $0x28] sm:$0xff]  ;;  %10234 = vmatpush3.bf16.msra.mxu0 %v10233_v53  ;;  %v1442_v55 = vrot.slane %v872_v54, %v11356_v18  ;;  %s9118_s29 = sld [smem:[#allocation2 + $0x100]] }
 0x5cf   : > { %v10207_v11 = vpack.c.bf16 %v871_v9, %v869_v8  ;;  %v11430_v9 = vsub.s32 3, %v11316_v50 }
 0x5d0   : > { %v1410_v58 = vsel %vm920_vm1, %v1409_v57, 0.0 }
 0x5d1   : > { %1411 = vadd.xlane.f32.xlu0 %v1410_v58  ;;  %10208 = vmatprep.subr.bf16.mxu1 %v10207_v11  ;;  %v1532_v10 = vrot.slane %v11324_v52, %v11430_v9 }
 0x5d2   : > { %10210 = vmatpush1.bf16.msra.mxu1 %v10209_v13 }
 0x5d3   : > { %9685 = vmatprep.subr.mxu1 %v889_v36 }
 0x65e   : > { %v1412_v59 = vpop.xlane.xlu0 %1411 }
 0x65f   : > { %v1414_v60 = vmul.f32 0.03125, %v1412_v59 }
 0x661   : > { %v1415_v61 = vsub.f32 %v1409_v57, %v1414_v60 }
 0x663   : > { %v1416_v62 = vmul.f32 %v1415_v61, %v1415_v61 }
 0x665   : > { %v1417_v63 = vsel %vm920_vm1, %v1416_v62, 0.0 }
 0x666   : > { %1418 = vadd.xlane.f32.xlu1 %v1417_v63 }
 0x6f3   : > { %v1419_v14 = vpop.xlane.xlu1 %1418 }
 0x6f4   : > { %v1420_v16 = vmul.f32 0.03125, %v1419_v14 }
 0x6f6   : > { %v1421_v17 = vadd.f32 1e-05, %v1420_v16 }
 0x6f8   : > { %10654 = vrsqrt.f32 %v1421_v17 }
 0x702   : > { %v10655_v22 = vpop.eup %10654 }
 0x703   : > { %v1423_v23 = vmul.f32 %v10655_v22, %v1415_v61 }
 0x705   : > { %v1428_v25 = vmul.f32 %v1427_v21, %v1423_v23 }
 0x707   : > { %v11365_v26 = vadd.f32 %v1432_v24, %v1428_v25 }
 0x709   : > { %9038 = vmatmul.mubr.msk.f32.vlgmr.msra.gmra.mrb[6].mxu1 %vm920_vm1, %v11365_v26 }
 0x70a   : > { %9686 = vmatpush3.msra.mxu1 %v889_v36 }
 0x7dc   : > { %v1514_v56 = vpop.f32.mrb[6].mxu1 }
 0x7dd   : > { %v1516_v57 = vpop.f32.mrb[7].mxu1  ;;  %v1515_v5 = vadd.f32 %v1514_v56, %v1438_v0 }
 0x7de   : > { %v1517_v58 = vadd.f32 %v1516_v57, %v1442_v55 }
 0x7e0   : > { %v1520_v59 = vmul.f32 0.044715, %v1517_v58  ;;  %v1519_v2 = vmul.f32 0.5, %v1517_v58 }
 0x7e2   : > { %v1521_v60 = vmul.f32 %v1520_v59, %v1517_v58 }
 0x7e4   : > { %v1522_v61 = vmul.f32 %v1521_v60, %v1517_v58 }
 0x7e6   : > { %v1523_v62 = vadd.f32 %v1522_v61, %v1517_v58 }
 0x7e8   : > { %v1524_v63 = vmul.f32 0.7978846, %v1523_v62 }
 0x7ea   : > { %10656 = vtanh.f32 %v1524_v63 }
 0x7f4   : > { %v10657_v1 = vpop.eup %10656 }
 0x7f5   : > { %v1526_v4 = vadd.f32 1.0, %v10657_v1 }
 0x7f7   : > { %v1527_v7 = vmul.f32 %v1526_v4, %v1519_v2 }
 0x7f9   : > { %v1528_v8 = vmul.f32 %v1527_v7, %v1515_v5 }
 0x7fb   : > { %9683 = vmatmul.mubr.f32.vlgmr.msra.gmra.mrb[6].mxu0 %v1528_v8 }
 0x8ce   : > { %v1599_v11 = vpop.f32.mrb[6].mxu0 }
 0x8cf   : > { %v1600_v12 = vadd.f32 %v1599_v11, %v1532_v10  ;;  %v9684_v13 = vpop.f32.mrb[7].mxu0 }
 0x8d1   : > { %v1603_v14 = vadd.f32 %v1600_v12, %v11365_v26  ;;  %v1620_v26 = vrot.slane %v11324_v52, %v11438_v29 }
 0x8d3   : > { %v1604_v16 = vsel %vm920_vm1, %v1603_v14, 0.0 }
 0x8d4   : > { %1605 = vadd.xlane.f32.xlu0 %v1604_v16 }
 0x961   : > { %v1606_v17 = vpop.xlane.xlu0 %1605 }
 0x962   : > { %v1607_v21 = vmul.f32 0.03125, %v1606_v17 }
 0x964   : > { %v1608_v22 = vsub.f32 %v1603_v14, %v1607_v21 }
 0x966   : > { %v1609_v23 = vmul.f32 %v1608_v22, %v1608_v22 }
 0x968   : > { %v1610_v24 = vsel %vm920_vm1, %v1609_v23, 0.0 }
 0x969   : > { %1611 = vadd.xlane.f32.xlu0 %v1610_v24 }
 0x9f6   : > { %v1612_v25 = vpop.xlane.xlu0 %1611 }
 0x9f7   : > { %v1613_v27 = vmul.f32 0.03125, %v1612_v25 }
 0x9f9   : > { %v1614_v28 = vadd.f32 1e-05, %v1613_v27 }
 0x9fb   : > { %10658 = vrsqrt.f32 %v1614_v28 }
 0xa05   : > { %v10659_v31 = vpop.eup %10658 }
 0xa06   : > { %v1616_v32 = vmul.f32 %v10659_v31, %v1608_v22 }
 0xa08   : > { %v1621_v34 = vmul.f32 %v1620_v26, %v1616_v32 }
 0xa0a   : > { %v1626_v35 = vadd.f32 %v1625_v33, %v1621_v34 }
 0xa0c   : > { %1627 = vxpose.xlu1.b32.start.end [1/1] (short) (narrow) %v1626_v35, 32 }
 0xa8c   : > { %v11450_v37 = vpop.trf.xlu1 }
 0xa8d   : > { %9687 = vmatprep.mubr.msk.f32.mxu1 %vm997_vm2, %v11450_v37 }
 0xa90   : > { %v11454_v50 = vpop.trf.xlu1 }
 0xa91   : > { %9688 = vmatmul.mubr.msk.f32.vlgmr.msra.gmra.mrb[8].mxu1 %vm997_vm2, %v11454_v50 }
 0xa94   : > { %v11458_v52 = vpop.trf.xlu1 }
 0xa95   : > { %9690 = vmatprep.mubr.msk.f32.mxu1 %vm997_vm2, %v11458_v52 }
 0xa98   : > { %v11462_v38 = vpop.trf.xlu1 }
 0xa99   : > { %9691 = vmatmul.mubr.msk.f32.gmra.mrb[10].mxu1 %vm997_vm2, %v11462_v38 }
 0xb64   : > { %v9689_v39 = vpop.f32.mrb[8].mxu1 }
 0xb65   : > { %v1737_v40 = vpop.f32.mrb[9].mxu1 }
 0xb66   : > { %9701 = vmatprep.mubr.msk.f32.mxu1 %vm997_vm2, %v1737_v40  ;;  %v11467_v41 = vpack.i.bf16 %v9689_v39, %v1737_v40 }
 0xb68   : > { %10527 = vrot.lane.b32.xlu0 %v11467_v41, %s13370_s8 }
 0xb6c   : > { %v9692_v42 = vpop.f32.mrb[10].mxu1 }
 0xb6d   : > { %v1747_v43 = vpop.f32.mrb[11].mxu1 }
 0xb6e   : > { %v11471_v44 = vpack.i.bf16 %v9692_v42, %v1747_v43 }
 0xb70   : > { %10532 = vrot.lane.b32.xlu0 %v11471_v44, %s13370_s8 }
 0xb74   : > { %10537 = vrot.lane.b32.xlu0 %v11467_v41, %s13371_s7 }
 0xb78   : > { %10542 = vrot.lane.b32.xlu0 %v11471_v44, %s13371_s7 }
 0xb7c   : > { %2026 = vrot.lane.b32.xlu0 %v1737_v40, %s13372_s28 }
 0xb80   : > { %2028 = vrot.lane.b32.xlu0 %v9689_v39, %s13372_s28 }
 0xb84   : > { %2030 = vrot.lane.b32.xlu0 %v1747_v43, %s13372_s28 }
 0xb88   : > { %2032 = vrot.lane.b32.xlu0 %v9692_v42, %s13372_s28 }
 0xbda   : > { %v10528_v45 = vpop.permute.xlu0 %10527 }
 0xbdb   : > { %v10530_v46 = vunpack.i.h.bf16 %v10528_v45  ;;  %v10529_v47 = vunpack.i.l.bf16 %v10528_v45 }
 0xbdd   : > { %v10235_v49 = vpack.c.bf16 %v10530_v46, %v10529_v47 }
 0xbdf   : > { %10237 = vmatprep.subr.msk.bf16.mxu1 %vm11485_vm4, %v10235_v49 }
 0xbe0   : > { %10240 = vmatpush3.bf16.xpose.msk.msra.mxu1 %vm11485_vm4, %v10235_v49 }
 0xbe2   : > { %v10533_v53 = vpop.permute.xlu0 %10532 }
 0xbe3   : > { %v10535_v54 = vunpack.i.h.bf16 %v10533_v53  ;;  %v10534_v55 = vunpack.i.l.bf16 %v10533_v53 }
 0xbe5   : > { %v10241_v56 = vpack.c.bf16 %v10535_v54, %v10534_v55 }
 0xbe6   : > { %v10538_v57 = vpop.permute.xlu0 %10537 }
 0xbe7   : > { %v10540_v58 = vunpack.i.h.bf16 %v10538_v57  ;;  %v10539_v59 = vunpack.i.l.bf16 %v10538_v57  ;;  %10243 = vmatprep.subr.msk.bf16.mxu1 %vm11485_vm4, %v10241_v56 }
 0xbe8   : > { %10246 = vmatpush3.bf16.xpose.msk.msra.mxu1 %vm11485_vm4, %v10241_v56 }
 0xbe9   : > { %v10255_v60 = vpack.c.bf16 %v10540_v58, %v10539_v59 }
 0xbea   : > { %v10543_v61 = vpop.permute.xlu0 %10542 }
 0xbeb   : > { %v10545_v62 = vunpack.i.h.bf16 %v10543_v61  ;;  %v10544_v63 = vunpack.i.l.bf16 %v10543_v61  ;;  %10257 = vmatprep.subr.msk.bf16.mxu0 %vm11485_vm4, %v10255_v60 }
 0xbec   : > { %10260 = vmatpush3.bf16.xpose.msk.msra.mxu0 %vm11485_vm4, %v10255_v60 }
 0xbed   : > { %v10261_v0 = vpack.c.bf16 %v10545_v62, %v10544_v63 }
 0xbee   : > { %v2027_v1 = vpop.permute.xlu0 %2026 }
 0xbef   : > { %9702 = vmatmul.mubr.msk.f32.vlgmr.msra.gmra.mrb[12].mxu1 %vm997_vm2, %v9689_v39  ;;  %10263 = vmatprep.subr.msk.bf16.mxu0 %vm11485_vm4, %v10261_v0 }
 0xbf0   : > { %9729 = vmatprep.mubr.msk.f32.mxu0 %vm997_vm2, %v2027_v1  ;;  %9704 = vmatprep.mubr.msk.f32.mxu1 %vm997_vm2, %v1747_v43 }
 0xbf2   : > { %v2029_v2 = vpop.permute.xlu0 %2028 }
 0xbf3   : > { %9705 = vmatmul.mubr.msk.f32.gmra.mrb[14].mxu1 %vm997_vm2, %v9692_v42 }
 0xbf4   : > { %10266 = vmatpush3.bf16.xpose.msk.msra.mxu0 %vm11485_vm4, %v10261_v0 }
 0xbf6   : > { %v2031_v4 = vpop.permute.xlu0 %2030 }
 0xbfa   : > { %v2033_v5 = vpop.permute.xlu0 %2032 }
 0xbfb   : > { %9730 = vmatmul.mubr.msk.f32.vlgmr.msra.gmra.mrb[8].mxu0 %vm997_vm2, %v2029_v2 }
 0xbfc   : > { %9732 = vmatprep.mubr.msk.f32.mxu0 %vm997_vm2, %v2031_v4 }
 0xbff   : > { %9733 = vmatmul.mubr.msk.f32.gmra.mrb[10].mxu0 %vm997_vm2, %v2033_v5 }
 0xcc2   : > { %v9703_v7 = vpop.f32.mrb[12].mxu1 }
 0xcc3   : > { %v11512_v8 = vmul.f32 0.35355338, %v9703_v7  ;;  %v1850_v10 = vpop.f32.mrb[13].mxu1 }
 0xcc4   : > { %v11514_v11 = vmul.f32 0.35355338, %v1850_v10 }
 0xcc5   : > { %v1876_v12 = vsel %vm920_vm1, %v11512_v8, -inf }
 0xcc6   : > { %1877 = vmax.xlane.f32.xlu0 %v1876_v12  ;;  %v9706_v13 = vpop.f32.mrb[14].mxu1  ;;  %v1873_v14 = vsel %vm920_vm1, %v11514_v11, -inf }
 0xcc7   : > { %1874 = vmax.xlane.f32.xlu1 %v1873_v14  ;;  %v1860_v16 = vpop.f32.mrb[15].mxu1  ;;  %v11522_v23 = vmul.f32 0.35355338, %v9706_v13 }
 0xcc8   : > { %v11530_v31 = vmul.f32 0.35355338, %v1860_v16 }
 0xcc9   : > { %v1882_v32 = vsel %vm920_vm1, %v11522_v23, -inf }
 0xcca   : > { %v1879_v34 = vsel %vm920_vm1, %v11530_v31, -inf }
 0xcce   : > { %v9731_v17 = vpop.f32.mrb[8].mxu0 }
 0xccf   : > { %v2124_v21 = vpop.f32.mrb[9].mxu0  ;;  %v11534_v33 = vmul.f32 0.35355338, %v9731_v17 }
 0xcd0   : > { %v11520_v22 = vmul.f32 0.35355338, %v2124_v21 }
 0xcd1   : > { %v2150_v36 = vsel %vm920_vm1, %v11534_v33, -inf }
 0xcd2   : > { %v9734_v24 = vpop.f32.mrb[10].mxu0  ;;  %v2147_v25 = vsel %vm920_vm1, %v11520_v22, -inf }
 0xcd3   : > { %v11526_v27 = vmul.f32 0.35355338, %v9734_v24  ;;  %2148 = vmax.xlane.f32.xlu0 %v2147_v25  ;;  %v2134_v28 = vpop.f32.mrb[11].mxu0 }
 0xcd4   : > { %v11538_v35 = vmul.f32 0.35355338, %v2134_v28 }
 0xcd5   : > { %v2156_v26 = vsel %vm920_vm1, %v11526_v27, -inf }
 0xcd6   : > { %2157 = vmax.xlane.f32.xlu1 %v2156_v26  ;;  %v2153_v39 = vsel %vm920_vm1, %v11538_v35, -inf }
 0xcd7   : > { %1883 = vmax.xlane.f32.xlu0 %v1882_v32 }
 0xcdb   : > { %1880 = vmax.xlane.f32.xlu0 %v1879_v34 }
 0xcdf   : > { %2151 = vmax.xlane.f32.xlu0 %v2150_v36 }
 0xce3   : > { %2154 = vmax.xlane.f32.xlu0 %v2153_v39 }
 0xce7   : > { %10552 = vrot.lane.b32.xlu1 %v11471_v44, %s13375_s30 }
 0xcf9   : > { %10547 = vrot.lane.b32.xlu0 %v11467_v41, %s13375_s30 }
 0xd53   : > { %v1878_v40 = vpop.xlane.xlu0 %1877 }
 0xd54   : > { %v1886_v42 = vsub.f32 %v11512_v8, %v1878_v40  ;;  %v1875_v43 = vpop.xlane.xlu1 %1874 }
 0xd55   : > { %v1885_v45 = vsub.f32 %v11514_v11, %v1875_v43 }
 0xd56   : > { %v1891_v46 = vmul.f32 1.442695, %v1886_v42 }
 0xd57   : > { %v1889_v47 = vmul.f32 1.442695, %v1885_v45 }
 0xd58   : > { %10660 = vpow2.f32 %v1891_v46 }
 0xd59   : > { %10662 = vpow2.f32 %v1889_v47 }
 0xd60   : > { %v2149_v49 = vpop.xlane.xlu0 %2148 }
 0xd61   : > { %v2159_v53 = vsub.f32 %v11520_v22, %v2149_v49 }
 0xd62   : > { %v11551_v54 = vpop.eup %10660 }
 0xd63   : > { %v11553_v55 = vpop.eup %10662  ;;  %v2163_v56 = vmul.f32 1.442695, %v2159_v53  ;;  %v1900_v57 = vsel %vm920_vm1, %v11551_v54, 0.0  ;;  %v2158_v62 = vpop.xlane.xlu1 %2157 }
 0xd64   : > { %v1884_v58 = vpop.xlane.xlu0 %1883  ;;  %1901 = vadd.xlane.f32.xlu1 %v1900_v57  ;;  %v1897_v59 = vsel %vm920_vm1, %v11553_v55, 0.0  ;;  %v2162_v5 = vsub.f32 %v11526_v27, %v2158_v62 }
 0xd65   : > { %10664 = vpow2.f32 %v2163_v56  ;;  %1898 = vadd.xlane.f32.xlu0 %v1897_v59  ;;  %v1888_v63 = vsub.f32 %v11522_v23, %v1884_v58 }
 0xd66   : > { %v2169_v17 = vmul.f32 1.442695, %v2162_v5 }
 0xd67   : > { %v1895_v7 = vmul.f32 1.442695, %v1888_v63  ;;  %v10553_v14 = vpop.permute.xlu1 %10552 }
 0xd68   : > { %v1881_v60 = vpop.xlane.xlu0 %1880  ;;  %v10555_v24 = vunpack.i.h.bf16 %v10553_v14  ;;  %v10554_v28 = vunpack.i.l.bf16 %v10553_v14 }
 0xd69   : > { %v1887_v61 = vsub.f32 %v11530_v31, %v1881_v60 }
 0xd6a   : > { %v10251_v40 = vpack.c.bf16 %v10555_v24, %v10554_v28 }
 0xd6b   : > { %v1893_v0 = vmul.f32 1.442695, %v1887_v61 }
 0xd6c   : > { %v2152_v1 = vpop.xlane.xlu0 %2151 }
 0xd6d   : > { %10666 = vpow2.f32 %v1893_v0  ;;  %v2160_v2 = vsub.f32 %v11534_v33, %v2152_v1 }
 0xd6f   : > { %v11562_v4 = vpop.eup %10664  ;;  %v2165_v10 = vmul.f32 1.442695, %v2160_v2 }
 0xd70   : > { %v2155_v12 = vpop.xlane.xlu0 %2154  ;;  %v2171_v13 = vsel %vm920_vm1, %v11562_v4, 0.0 }
 0xd71   : > { %10668 = vpow2.f32 %v2165_v10  ;;  %v2161_v16 = vsub.f32 %v11538_v35, %v2155_v12  ;;  %2172 = vadd.xlane.f32.xlu0 %v2171_v13 }
 0xd72   : > { %10670 = vpow2.f32 %v1895_v7 }
 0xd73   : > { %v2167_v21 = vmul.f32 1.442695, %v2161_v16 }
 0xd74   : > { %v10548_v25 = vpop.permute.xlu0 %10547 }
 0xd75   : > { %10672 = vpow2.f32 %v2167_v21  ;;  %v10550_v26 = vunpack.i.h.bf16 %v10548_v25  ;;  %v10549_v32 = vunpack.i.l.bf16 %v10548_v25 }
 0xd76   : > { %10674 = vpow2.f32 %v2169_v17 }
 0xd77   : > { %v10667_v34 = vpop.eup %10666  ;;  %v10247_v36 = vpack.c.bf16 %v10550_v26, %v10549_v32 }
 0xd78   : > { %v1903_v39 = vsel %vm920_vm1, %v10667_v34, 0.0 }
 0xd79   : > { %1904 = vadd.xlane.f32.xlu0 %v1903_v39  ;;  %10248 = vmatprep.subr.bf16.mxu1 %v10247_v36 }
 0xd7a   : > { %10250 = vmatpush3.bf16.msra.mxu1 %v10247_v36 }
 0xd7b   : > { %v10669_v42 = vpop.eup %10668  ;;  %10252 = vmatprep.subr.bf16.mxu1 %v10251_v40 }
 0xd7c   : > { %v2174_v43 = vsel %vm920_vm1, %v10669_v42, 0.0  ;;  %v10671_v45 = vpop.eup %10670 }
 0xd7d   : > { %2175 = vadd.xlane.f32.xlu1 %v2174_v43  ;;  %v1906_v47 = vsel %vm920_vm1, %v10671_v45, 0.0  ;;  %v891_v43 = vld [vmem:[%s13377_s10 + $0x8] sm:$0xff] }
 0xd7e   : > { %10254 = vmatpush3.bf16.msra.mxu1 %v10251_v40 }
 0xd7f   : > { %v10673_v46 = vpop.eup %10672 }
 0xd80   : > { %v2177_v49 = vsel %vm920_vm1, %v10673_v46, 0.0  ;;  %v10675_v53 = vpop.eup %10674 }
 0xd81   : > { %1907 = vadd.xlane.f32.xlu1 %v1906_v47  ;;  %2178 = vadd.xlane.f32.xlu0 %v2177_v49  ;;  %v2180_v56 = vsel %vm920_vm1, %v10675_v53, 0.0 }
 0xd85   : > { %2181 = vadd.xlane.f32.xlu1 %v2180_v56 }
 0xd96   : > { %10557 = vrot.lane.b32.xlu1 %v11467_v41, %s13376_s2 }
 0xd97   : > { %10562 = vrot.lane.b32.xlu0 %v11471_v44, %s13376_s2 }
 0xdf1   : > { %v1902_v57 = vpop.xlane.xlu1 %1901 }
 0xdf2   : > { %10676 = vrcp.f32 %v1902_v57  ;;  %v1899_v58 = vpop.xlane.xlu0 %1898 }
 0xdf3   : > { %10678 = vrcp.f32 %v1899_v58 }
 0xdfc   : > { %v10677_v59 = vpop.eup %10676 }
 0xdfd   : > { %v10679_v60 = vpop.eup %10678  ;;  %v1914_v62 = vmul.f32 %v10677_v59, %v11551_v54 }
 0xdfe   : > { %v1913_v61 = vmul.f32 %v10679_v60, %v11553_v55  ;;  %v2173_v63 = vpop.xlane.xlu0 %2172 }
 0xe00   : > { %9715 = vmatprep.mubr.msk.f32.mxu1 %vm920_vm1, %v1913_v61 }
 0xe01   : > { %9716 = vmatmul.mubr.msk.f32.vlgmr.msra.gmra.mrb[16].mxu1 %vm920_vm1, %v1914_v62 }
 0xe06   : > { %v1905_v0 = vpop.xlane.xlu0 %1904 }
 0xe07   : > { %10680 = vrcp.f32 %v1905_v0 }
 0xe08   : > { %10682 = vrcp.f32 %v2173_v63 }
 0xe0a   : > { %v2176_v41 = vpop.xlane.xlu1 %2175 }
 0xe0e   : > { %v1908_v44 = vpop.xlane.xlu1 %1907  ;;  %v2179_v1 = vpop.xlane.xlu0 %2178 }
 0xe0f   : > { %10684 = vrcp.f32 %v1908_v44 }
 0xe10   : > { %10686 = vrcp.f32 %v2176_v41 }
 0xe11   : > { %v10681_v2 = vpop.eup %10680  ;;  %10688 = vrcp.f32 %v2179_v1  ;;  %v11609_v1 = vld [vmem:[%s13379_s9] sm:$0x3f]  ;;  %s13381_s9 = sld [smem:[#allocation26_spill]] }
 0xe12   : > { %v2182_v5 = vpop.xlane.xlu1 %2181  ;;  %v1915_v7 = vmul.f32 %v10681_v2, %v10667_v34  ;;  %v10563_v55 = vpop.permute.xlu0 %10562  ;;  %v2323_v2 = vrot.slane %v11609_v1, %v11319_v51 }
 0xe13   : > { %v10683_v13 = vpop.eup %10682  ;;  %v10565_v14 = vunpack.i.h.bf16 %v10563_v55  ;;  %v10564_v16 = vunpack.i.l.bf16 %v10563_v55  ;;  %10690 = vrcp.f32 %v2182_v5 }
 0xe14   : > { %9718 = vmatprep.mubr.msk.f32.mxu1 %vm920_vm1, %v1915_v7  ;;  %v2187_v25 = vmul.f32 %v10683_v13, %v11562_v4  ;;  %v890_v4 = vld [vmem:[%s13377_s10] sm:$0xff]  ;;  %s13383_s10 = sld [smem:[#allocation27_spill]] }
 0xe15   : > { %v10271_v28 = vpack.c.bf16 %v10565_v14, %v10564_v16 }
 0xe16   : > { %v10558_v54 = vpop.permute.xlu1 %10557 }
 0xe17   : > { %v10560_v10 = vunpack.i.h.bf16 %v10558_v54  ;;  %v10559_v12 = vunpack.i.l.bf16 %v10558_v54 }
 0xe19   : > { %v10685_v17 = vpop.eup %10684  ;;  %v10267_v21 = vpack.c.bf16 %v10560_v10, %v10559_v12 }
 0xe1a   : > { %v1916_v24 = vmul.f32 %v10685_v17, %v10671_v45  ;;  %v10687_v26 = vpop.eup %10686  ;;  %v10275_v45 = vpack.c.bf16 %v891_v43, %v890_v4 }
 0xe1b   : > { %10268 = vmatprep.subr.bf16.mxu1 %v10267_v21  ;;  %v10689_v32 = vpop.eup %10688  ;;  %v2188_v34 = vmul.f32 %v10687_v26, %v10669_v42 }
 0xe1c   : > { %9719 = vmatmul.mubr.msk.f32.gmra.mrb[18].mxu1 %vm920_vm1, %v1916_v24  ;;  %v2189_v39 = vmul.f32 %v10689_v32, %v10673_v46 }
 0xe1d   : > { %10270 = vmatpush3.bf16.msra.mxu1 %v10267_v21  ;;  %9743 = vmatprep.mubr.msk.f32.mxu1 %vm920_vm1, %v2187_v25  ;;  %v10691_v36 = vpop.eup %10690 }
 0xe1e   : > { %10272 = vmatprep.subr.bf16.mxu1 %v10271_v28  ;;  %v2190_v40 = vmul.f32 %v10691_v36, %v10675_v53 }
 0xe21   : > { %10274 = vmatpush3.bf16.msra.mxu1 %v10271_v28 }
 0xe22   : > { %10276 = vmatprep.subr.bf16.mxu1 %v10275_v45 }
 0xe24   : > { %9744 = vmatmul.mubr.msk.f32.vlgmr.msra.gmra.mrb[20].mxu1 %vm920_vm1, %v2188_v34 }
 0xe25   : > { %9746 = vmatprep.mubr.msk.f32.mxu1 %vm920_vm1, %v2189_v39  ;;  %10278 = vmatpush3.bf16.msra.mxu1 %v10275_v45 }
 0xe28   : > { %9747 = vmatmul.mubr.msk.f32.gmra.mrb[22].mxu1 %vm920_vm1, %v2190_v40 }
 0xed4   : > { %v9717_v42 = vpop.f32.mrb[16].mxu1 }
 0xed5   : > { %v2007_v46 = vpop.f32.mrb[17].mxu1 }
 0xeef   : > { %v9720_v47 = vpop.f32.mrb[18].mxu1 }
 0xef0   : > { %v2017_v49 = vpop.f32.mrb[19].mxu1 }
 0xef7   : > { %v9745_v56 = vpop.f32.mrb[20].mxu1 }
 0xef8   : > { %2306 = vrot.lane.b32.xlu0 %v9745_v56, %s13378_s12  ;;  %v2281_v53 = vpop.f32.mrb[21].mxu1 }
 0xef9   : > { %2304 = vrot.lane.b32.xlu1 %v2281_v53, %s13378_s12 }
 0xefb   : > { %v9748_v57 = vpop.f32.mrb[22].mxu1 }
 0xefc   : > { %2310 = vrot.lane.b32.xlu0 %v9748_v57, %s13378_s12  ;;  %v2291_v58 = vpop.f32.mrb[23].mxu1 }
 0xefd   : > { %2308 = vrot.lane.b32.xlu1 %v2291_v58, %s13378_s12 }
 0xf6a   : > { %v2307_v59 = vpop.permute.xlu0 %2306 }
 0xf6b   : > { %v2305_v60 = vpop.permute.xlu1 %2304  ;;  %v2317_v62 = vsel %vm997_vm2, %v9717_v42, %v2307_v59 }
 0xf6c   : > { %v2316_v61 = vsel %vm997_vm2, %v2007_v46, %v2305_v60  ;;  %v892_v60 = vld [vmem:[%s13381_s9] sm:$0xff]  ;;  %s13384_s9 = sld [smem:[#allocation28_spill]] }
 0xf6d   : > { %9753 = vmatprep.mubr.msk.f32.mxu1 %vm1335_vm3, %v2316_v61  ;;  %9759 = vmatprep.subr.mxu0 %v892_v60 }
 0xf6e   : > { %9754 = vmatmul.mubr.msk.f32.vlgmr.msra.gmra.mrb[24].mxu1 %vm1335_vm3, %v2317_v62  ;;  %v2311_v63 = vpop.permute.xlu0 %2310  ;;  %9760 = vmatpush3.msra.mxu0 %v892_v60 }
 0xf6f   : > { %v2309_v0 = vpop.permute.xlu1 %2308  ;;  %v2319_v44 = vsel %vm997_vm2, %v9720_v47, %v2311_v63  ;;  %10287 = vmatprep.subr.bf16.mxu0 %v11015_v3 }
 0xf70   : > { %v2318_v41 = vsel %vm997_vm2, %v2017_v49, %v2309_v0 }
 0xf71   : > { %9756 = vmatprep.mubr.msk.f32.mxu1 %vm1335_vm3, %v2318_v41 }
 0xf72   : > { %9757 = vmatmul.mubr.msk.f32.gmra.mrb[26].mxu1 %vm1335_vm3, %v2319_v44  ;;  %s13385_s1 = smov %s13384_s9 }
0x1041   : > { %v9755_v5 = vpop.f32.mrb[24].mxu1 }
0x1042   : > { %v2408_v7 = vadd.f32 %v9755_v5, %v2323_v2  ;;  %v2402_v55 = vpop.f32.mrb[25].mxu1 }
0x1043   : > { %v2403_v54 = vadd.f32 %v2402_v55, %v2323_v2 }
0x1044   : > { %v2422_v10 = vadd.f32 %v2408_v7, %v11454_v50 }
0x1045   : > { %v9758_v12 = vpop.f32.mrb[26].mxu1  ;;  %v2421_v13 = vadd.f32 %v2403_v54, %v11450_v37 }
0x1046   : > { %v2418_v14 = vadd.f32 %v9758_v12, %v2323_v2  ;;  %v2412_v16 = vpop.f32.mrb[27].mxu1  ;;  %v2428_v17 = vsel %vm997_vm2, %v2422_v10, 0.0  ;;  %v2481_v12 = vrot.slane %v11609_v1, %v11356_v18 }
0x1047   : > { %v2413_v21 = vadd.f32 %v2412_v16, %v2323_v2  ;;  %2429 = vadd.xlane.f32.xlu0 %v2428_v17  ;;  %v2425_v24 = vsel %vm997_vm2, %v2421_v13, 0.0 }
0x1048   : > { %2426 = vadd.xlane.f32.xlu1 %v2425_v24  ;;  %v2424_v25 = vadd.f32 %v2418_v14, %v11462_v38 }
0x1049   : > { %v2423_v28 = vadd.f32 %v2413_v21, %v11458_v52  ;;  %v2489_v21 = vrot.slane %v11609_v1, %v11359_v20  ;;  %v902_v1 = vld [vmem:[%s13382_s13 + $0x10] sm:$0xff] }
0x104a   : > { %v2434_v26 = vsel %vm997_vm2, %v2424_v25, 0.0 }
0x104b   : > { %v2431_v50 = vsel %vm997_vm2, %v2423_v28, 0.0 }
0x104c   : > { %2432 = vadd.xlane.f32.xlu0 %v2431_v50  ;;  %2435 = vadd.xlane.f32.xlu1 %v2434_v26 }
0x10d4   : > { %v2430_v37 = vpop.xlane.xlu0 %2429 }
0x10d5   : > { %v2439_v32 = vmul.f32 0.125, %v2430_v37  ;;  %v2427_v34 = vpop.xlane.xlu1 %2426 }
0x10d6   : > { %v2438_v36 = vmul.f32 0.125, %v2427_v34 }
0x10d7   : > { %v2443_v39 = vsub.f32 %v2422_v10, %v2439_v32 }
0x10d8   : > { %v2442_v40 = vsub.f32 %v2421_v13, %v2438_v36 }
0x10d9   : > { %v2433_v4 = vpop.xlane.xlu0 %2432  ;;  %v2436_v43 = vpop.xlane.xlu1 %2435  ;;  %v2447_v45 = vmul.f32 %v2443_v39, %v2443_v39 }
0x10da   : > { %v2440_v42 = vmul.f32 0.125, %v2433_v4  ;;  %v2441_v46 = vmul.f32 0.125, %v2436_v43  ;;  %v2446_v38 = vmul.f32 %v2442_v40, %v2442_v40  ;;  %v903_v4 = vld [vmem:[%s13382_s13 + $0x18] sm:$0xff] }
0x10db   : > { %v2453_v52 = vsel %vm997_vm2, %v2447_v45, 0.0 }
0x10dc   : > { %v2444_v47 = vsub.f32 %v2423_v28, %v2440_v42  ;;  %v2445_v49 = vsub.f32 %v2424_v25, %v2441_v46  ;;  %2454 = vadd.xlane.f32.xlu1 %v2453_v52  ;;  %v2450_v56 = vsel %vm997_vm2, %v2446_v38, 0.0  ;;  %v900_v25 = vld [vmem:[%s13382_s13] sm:$0xff]  ;;  %v901_v28 = vld [vmem:[%s13382_s13 + $0x8] sm:$0xff]  ;;  %v10291_v46 = vpack.c.bf16 %v903_v4, %v902_v1  ;;  %s13324_s13 = smov 24  }
0x10dd   : > { %2451 = vadd.xlane.f32.xlu0 %v2450_v56  ;;  %v10288_v36 = vpack.c.bf16 %v901_v28, %v900_v25  ;;  %v11666_v52 = vld [vmem:[%s11261_s6] sm:$0xff]  ;;  %v896_v56 = vld [vmem:[%s13383_s10 + $0x10] sm:$0xff]  ;;  %s9122_s6 = sld [smem:[#allocation2 + $0x181]] }
0x10de   : > { %v2448_v53 = vmul.f32 %v2444_v47, %v2444_v47  ;;  %v2449_v57 = vmul.f32 %v2445_v49, %v2445_v49 }
0x10e0   : > { %v2456_v58 = vsel %vm997_vm2, %v2448_v53, 0.0  ;;  %v2459_v59 = vsel %vm997_vm2, %v2449_v57, 0.0  ;;  %v897_v57 = vld [vmem:[%s13383_s10 + $0x18] sm:$0xff] }
0x10e1   : > { %2457 = vadd.xlane.f32.xlu0 %v2456_v58  ;;  %2460 = vadd.xlane.f32.xlu1 %v2459_v59  ;;  %v10283_v58 = vpack.c.bf16 %v897_v57, %v896_v56  ;;  %v9071_v59 = vld [vmem:[%s13384_s9] ss:$0 sm:$0xff]  ;;  %s3348_s9 = sld [smem:[#allocation2]] }
0x1169   : > { %v2455_v61 = vpop.xlane.xlu1 %2454 }
0x116a   : > { %v2463_v62 = vmul.f32 0.125, %v2455_v61  ;;  %v2452_v63 = vpop.xlane.xlu0 %2451 }
0x116b   : > { %v2462_v0 = vmul.f32 0.125, %v2452_v63 }
0x116c   : > { %v2467_v41 = vadd.f32 1e-05, %v2463_v62 }
0x116d   : > { %v2466_v44 = vadd.f32 1e-05, %v2462_v0 }
0x116e   : > { %10692 = vrsqrt.f32 %v2467_v41  ;;  %v2458_v2 = vpop.xlane.xlu0 %2457  ;;  %v2461_v5 = vpop.xlane.xlu1 %2460 }
0x116f   : > { %10694 = vrsqrt.f32 %v2466_v44  ;;  %v2464_v7 = vmul.f32 0.125, %v2458_v2  ;;  %v2465_v55 = vmul.f32 0.125, %v2461_v5 }
0x1171   : > { %v2468_v54 = vadd.f32 1e-05, %v2464_v7  ;;  %v2469_v10 = vadd.f32 1e-05, %v2465_v55 }
0x1173   : > { %10696 = vrsqrt.f32 %v2468_v54 }
0x1174   : > { %10698 = vrsqrt.f32 %v2469_v10 }
0x1178   : > { %v10693_v13 = vpop.eup %10692 }
0x1179   : > { %v10695_v14 = vpop.eup %10694  ;;  %v2475_v16 = vmul.f32 %v10693_v13, %v2443_v39 }
0x117a   : > { %v2474_v17 = vmul.f32 %v10695_v14, %v2442_v40 }
0x117b   : > { %v2483_v24 = vmul.f32 %v2481_v12, %v2475_v16 }
0x117c   : > { %v2482_v26 = vmul.f32 %v2481_v12, %v2474_v17 }
0x117d   : > { %v10697_v50 = vpop.eup %10696  ;;  %v11641_v39 = vadd.f32 %v2489_v21, %v2483_v24 }
0x117e   : > { %v10699_v37 = vpop.eup %10698  ;;  %v11639_v32 = vadd.f32 %v2489_v21, %v2482_v26  ;;  %v2476_v34 = vmul.f32 %v10697_v50, %v2444_v47  ;;  %v894_v47 = vld [vmem:[%s13383_s10] sm:$0xff] }
0x117f   : > { %v2477_v40 = vmul.f32 %v10699_v37, %v2445_v49  ;;  %v895_v49 = vld [vmem:[%s13383_s10 + $0x8] sm:$0xff] }
0x1180   : > { %9761 = vmatprep.mubr.msk.f32.mxu0 %vm997_vm2, %v11639_v32  ;;  %v2484_v43 = vmul.f32 %v2481_v12, %v2476_v34  ;;  %v10279_v53 = vpack.c.bf16 %v895_v49, %v894_v47 }
0x1181   : > { %9762 = vmatmul.mubr.msk.f32.vlgmr.msra.gmra.mrb[12].mxu0 %vm997_vm2, %v11641_v39  ;;  %v2485_v45 = vmul.f32 %v2481_v12, %v2477_v40 }
0x1182   : > { %v11653_v42 = vadd.f32 %v2489_v21, %v2484_v43  ;;  %10289 = vmatpush3.bf16.msra.mxu0 %v10288_v36  ;;  %10280 = vmatprep.subr.bf16.mxu1 %v10279_v53 }
0x1183   : > { %v11655_v38 = vadd.f32 %v2489_v21, %v2485_v45  ;;  %10290 = vmatprep.subr.bf16.mxu0 %v11015_v3  ;;  %10282 = vmatpush3.bf16.msra.mxu1 %v10279_v53 }
0x1184   : > { %9764 = vmatprep.mubr.msk.f32.mxu0 %vm997_vm2, %v11653_v42  ;;  %10284 = vmatprep.subr.bf16.mxu1 %v10283_v58 }
0x1185   : > { %9765 = vmatmul.mubr.msk.f32.gmra.mrb[14].mxu0 %vm997_vm2, %v11655_v38 }
0x1186   : > { %10292 = vmatpush3.bf16.msra.mxu0 %v10291_v46  ;;  %9789 = vmatprep.mubr.msk.f32.mxu0 %vm11016_vm0, %v11017_v6 }
0x1187   : > { %9797 = vmatprep.subr.mxu0 %v11017_v6  ;;  %10286 = vmatpush3.bf16.msra.mxu1 %v10283_v58 }
0x1188   : > { %9792 = vmatprep.subr.mxu1 %v11017_v6 }
0x1189   : > { %9790 = vmatmul.mubr.msk.f32.vlgmr.msra.gmra.mrb[16].mxu0 %vm920_vm1, %v11666_v52 }
0x118a   : > { %9799 = vmatprep.mubr.msk.f32.mxu0 %vm11016_vm0, %v11017_v6 }
0x1254   : > { %v9763_v60 = vpop.f32.mrb[12].mxu0 }
0x1255   : > { %v2584_v61 = vadd.f32 %v9763_v60, %v9071_v59  ;;  %v2578_v62 = vpop.f32.mrb[13].mxu0 }
0x1256   : > { %v2579_v63 = vadd.f32 %v9071_v59, %v2578_v62 }
0x1257   : > { %v2602_v0 = vmul.f32 0.044715, %v2584_v61  ;;  %v2598_v46 = vmul.f32 0.5, %v2584_v61 }
0x1258   : > { %v9766_v41 = vpop.f32.mrb[14].mxu0  ;;  %v2601_v44 = vmul.f32 0.044715, %v2579_v63  ;;  %v2597_v49 = vmul.f32 0.5, %v2579_v63 }
0x1259   : > { %v2594_v2 = vadd.f32 %v9766_v41, %v9071_v59  ;;  %v2588_v5 = vpop.f32.mrb[15].mxu0  ;;  %v2606_v7 = vmul.f32 %v2602_v0, %v2584_v61 }
0x125a   : > { %v2589_v55 = vadd.f32 %v9071_v59, %v2588_v5  ;;  %v2605_v54 = vmul.f32 %v2601_v44, %v2579_v63 }
0x125b   : > { %v2610_v10 = vmul.f32 %v2606_v7, %v2584_v61  ;;  %v2604_v12 = vmul.f32 0.044715, %v2594_v2  ;;  %v2600_v60 = vmul.f32 0.5, %v2594_v2  ;;  %v3170_v7 = vsel %vm920_vm1, %v11666_v52, 0.0 }
0x125c   : > { %v2609_v13 = vmul.f32 %v2605_v54, %v2579_v63  ;;  %v2603_v14 = vmul.f32 0.044715, %v2589_v55  ;;  %v2924_v16 = vpop.f32.mrb[16].mxu0  ;;  %v2599_v0 = vmul.f32 0.5, %v2589_v55 }
0x125d   : > { %v2614_v17 = vadd.f32 %v2610_v10, %v2584_v61  ;;  %v2608_v21 = vmul.f32 %v2604_v12, %v2594_v2  ;;  %v9791_v24 = vpop.f32.mrb[17].mxu0 }
0x125e   : > { %v2613_v25 = vadd.f32 %v2609_v13, %v2579_v63  ;;  %v2607_v28 = vmul.f32 %v2603_v14, %v2589_v55 }
0x125f   : > { %v2618_v26 = vmul.f32 0.7978846, %v2614_v17  ;;  %v2612_v50 = vmul.f32 %v2608_v21, %v2594_v2 }
0x1260   : > { %v2617_v37 = vmul.f32 0.7978846, %v2613_v25  ;;  %v2611_v34 = vmul.f32 %v2607_v28, %v2589_v55 }
0x1261   : > { %10700 = vtanh.f32 %v2618_v26  ;;  %v2616_v36 = vadd.f32 %v2612_v50, %v2594_v2 }
0x1262   : > { %10702 = vtanh.f32 %v2617_v37  ;;  %v2615_v40 = vadd.f32 %v2611_v34, %v2589_v55 }
0x1263   : > { %v2620_v1 = vmul.f32 0.7978846, %v2616_v36 }
0x1264   : > { %v2619_v4 = vmul.f32 0.7978846, %v2615_v40 }
0x1265   : > { %10704 = vtanh.f32 %v2620_v1 }
0x1266   : > { %10706 = vtanh.f32 %v2619_v4 }
0x126b   : > { %v10701_v43 = vpop.eup %10700 }
0x126c   : > { %v10703_v45 = vpop.eup %10702  ;;  %v2626_v47 = vadd.f32 1.0, %v10701_v43 }
0x126d   : > { %v2625_v56 = vadd.f32 1.0, %v10703_v45 }
0x126e   : > { %v2630_v53 = vmul.f32 %v2626_v47, %v2598_v46 }
0x126f   : > { %v10705_v57 = vpop.eup %10704  ;;  %v2629_v58 = vmul.f32 %v2625_v56, %v2597_v49 }
0x1270   : > { %v10707_v59 = vpop.eup %10706  ;;  %2639 = vrot.lane.b32.xlu1 %v2630_v53, %s13375_s30  ;;  %v2628_v62 = vadd.f32 1.0, %v10705_v57 }
0x1271   : > { %2637 = vrot.lane.b32.xlu0 %v2629_v58, %s13375_s30  ;;  %v2627_v41 = vadd.f32 1.0, %v10707_v59  ;;  %v905_v59 = vld [vmem:[%s13270_s15] sm:$0xff] }
0x1272   : > { %v2632_v44 = vmul.f32 %v2628_v62, %v2600_v60  ;;  %v906_v60 = vld [vmem:[%s13270_s15 + $0x8] sm:$0xff] }
0x1273   : > { %v2631_v5 = vmul.f32 %v2627_v41, %v2599_v0  ;;  %v11733_v0 = vld [vmem:[%s13273_s18] sm:$0x7] }
0x1275   : > { %2643 = vrot.lane.b32.xlu0 %v2632_v44, %s13375_s30  ;;  %2641 = vrot.lane.b32.xlu1 %v2631_v5, %s13375_s30  ;;  %v10294_v44 = vpack.c.bf16 %v906_v60, %v905_v59 }
0x1279   : > { %2929 = vrot.lane.b32.xlu1 %v2924_v16, %s13372_s28 }
0x129d   : > { %3171 = vadd.xlane.f32.xlu1 %v3170_v7 }
0x12ae   : > { %3017 = vrot.lane.b32.xlu1 %v2924_v16, %s13370_s8 }
0x12e2   : > { %v2640_v54 = vpop.permute.xlu1 %2639 }
0x12e3   : > { %v2638_v10 = vpop.permute.xlu0 %2637  ;;  %v2650_v13 = vmul.f32 %v2640_v54, %v2584_v61  ;;  %v907_v54 = vld [vmem:[%s13270_s15 + $0x10] sm:$0xff] }
0x12e4   : > { %v2649_v12 = vmul.f32 %v2638_v10, %v2579_v63  ;;  %v908_v10 = vld [vmem:[%s13270_s15 + $0x18] sm:$0xff] }
0x12e6   : > { %9775 = vmatprep.mubr.msk.f32.mxu1 %vm920_vm1, %v2649_v12  ;;  %v3186_v12 = vrot.slane %v11733_v0, %v11319_v51 }
0x12e7   : > { %v2644_v14 = vpop.permute.xlu0 %2643  ;;  %9776 = vmatmul.mubr.msk.f32.vlgmr.msra.gmra.mrb[28].mxu1 %vm920_vm1, %v2650_v13  ;;  %v2642_v17 = vpop.permute.xlu1 %2641  ;;  %v10297_v13 = vpack.c.bf16 %v908_v10, %v907_v54 }
0x12e8   : > { %v2652_v21 = vmul.f32 %v2644_v14, %v2594_v2  ;;  %v2651_v24 = vmul.f32 %v2642_v17, %v2589_v55  ;;  %v3191_v17 = vrot.slane %v11733_v0, %v11356_v18 }
0x12ea   : > { %9778 = vmatprep.mubr.msk.f32.mxu1 %vm920_vm1, %v2651_v24  ;;  %v904_v24 = vld [vmem:[%s13269_s14] sm:$0xff] }
0x12eb   : > { %9779 = vmatmul.mubr.msk.f32.gmra.mrb[30].mxu1 %vm920_vm1, %v2652_v21  ;;  %v2930_v25 = vpop.permute.xlu1 %2929 }
0x12ec   : > { %9793 = vmatpush3.xpose.msk.msra.mxu1 %vm997_vm2, %v2930_v25  ;;  %9794 = vmatprep.mubr.msk.f32.mxu1 %vm11016_vm0, %v11017_v6 }
0x12ed   : > { %9802 = vmatprep.subr.mxu1 %v11017_v6 }
0x12ef   : > { %9795 = vmatmul.mubr.msk.f32.vlgmr.msra.gmra.mrb[32].mxu1 %vm997_vm2, %v2924_v16 }
0x12f0   : > { %9804 = vmatprep.mubr.msk.f32.mxu1 %vm11016_vm0, %v11017_v6  ;;  %9803 = vmatpush3.msra.mxu1 %v904_v24 }
0x12f1   : > { %10299 = vmatprep.subr.bf16.mxu1 %v11015_v3 }
0x132a   : > { %v3172_v61 = vpop.xlane.xlu1 %3171 }
0x132b   : > { %v3173_v55 = vmul.f32 0.03125, %v3172_v61 }
0x132d   : > { %v3174_v50 = vsub.f32 %v11666_v52, %v3173_v55 }
0x132e   : > { %v3018_v63 = vpop.permute.xlu1 %3017 }
0x132f   : > { %9798 = vmatpush3.msra.mxu0 %v3018_v63  ;;  %v3175_v40 = vmul.f32 %v3174_v50, %v3174_v50  ;;  %v9085_v63 = vld [vmem:[%s13271_s16] ss:$0 sm:$0xff] }
0x1330   : > { %10293 = vmatprep.subr.bf16.mxu0 %v11015_v3 }
0x1331   : > { %v3176_v4 = vsel %vm920_vm1, %v3175_v40, 0.0 }
0x13ba   : > { %v11708_v2 = vpop.f32.mrb[28].mxu1 }
0x13bb   : > { %v11710_v28 = vpop.f32.mrb[29].mxu1 }
0x13be   : > { %v11712_v26 = vpop.f32.mrb[30].mxu1 }
0x13bf   : > { %v11715_v37 = vpop.f32.mrb[31].mxu1 }
0x13c2   : > { %v3001_v16 = vpop.f32.mrb[32].mxu1 }
0x13c3   : > { %v11717_v34 = vmul.f32 0.35355338, %v3001_v16  ;;  %v9796_v36 = vpop.f32.mrb[33].mxu1 }
0x13c5   : > { %v3006_v1 = vsel %vm997_vm2, %v11717_v34, -inf }
0x13c6   : > { %3007 = vmax.xlane.f32.xlu0 %v3006_v1 }
0x13ca   : > { %3177 = vadd.xlane.f32.xlu0 %v3176_v4 }
0x1453   : > { %v3008_v43 = vpop.xlane.xlu0 %3007 }
0x1454   : > { %v3009_v45 = vsub.f32 %v11717_v34, %v3008_v43 }
0x1456   : > { %v3010_v46 = vmul.f32 1.442695, %v3009_v45 }
0x1457   : > { %v3178_v56 = vpop.xlane.xlu0 %3177 }
0x1458   : > { %10708 = vpow2.f32 %v3010_v46  ;;  %v3179_v53 = vmul.f32 0.03125, %v3178_v56 }
0x145a   : > { %v3180_v57 = vadd.f32 1e-05, %v3179_v53 }
0x145c   : > { %10710 = vrsqrt.f32 %v3180_v57 }
0x1462   : > { %v10709_v47 = vpop.eup %10708 }
0x1463   : > { %v3012_v49 = vsel %vm997_vm2, %v10709_v47, 0.0 }
0x1464   : > { %3013 = vadd.xlane.f32.xlu0 %v3012_v49 }
0x1466   : > { %v10711_v62 = vpop.eup %10710 }
0x1467   : > { %v3182_v5 = vmul.f32 %v10711_v62, %v3174_v50 }
0x1469   : > { %v3187_v14 = vmul.f32 %v3186_v12, %v3182_v5 }
0x146b   : > { %v3192_v21 = vadd.f32 %v3191_v17, %v3187_v14 }
0x14f1   : > { %v3014_v58 = vpop.xlane.xlu0 %3013 }
0x14f2   : > { %10712 = vrcp.f32 %v3014_v58 }
0x14fc   : > { %v10713_v41 = vpop.eup %10712 }
0x14fd   : > { %v3016_v7 = vmul.f32 %v10713_v41, %v10709_v47 }
0x14ff   : > { %9800 = vmatmul.mubr.msk.f32.vlgmr.msra.gmra.mrb[18].mxu0 %vm997_vm2, %v3016_v7 }
0x1500   : > { %10295 = vmatpush3.bf16.msra.mxu0 %v10294_v44  ;;  %9815 = vmatprep.mubr.msk.f32.mxu0 %vm11016_vm0, %v11017_v6 }
0x1501   : > { %10296 = vmatprep.subr.bf16.mxu0 %v11015_v3 }
0x1504   : > { %10298 = vmatpush3.bf16.msra.mxu0 %v10297_v13  ;;  %v899_v13 = vld [vmem:[%s13274_s19] sm:$0x7] }
0x1505   : > { %v3305_v14 = vrot.slane %v899_v13, %v11356_v18  ;;  %v3314_v17 = vrot.slane %v899_v13, %v11359_v20 }
0x1507   : > { %9816 = vmatmul.mubr.msk.f32.vlgmr.msra.gmra.mrb[20].mxu0 %vm920_vm1, %v3192_v21 }
0x15d2   : > { %v3089_v25 = vpop.f32.mrb[18].mxu0 }
0x15d3   : > { %v9801_v61 = vpop.f32.mrb[19].mxu0  ;;  %9805 = vmatmul.mubr.msk.f32.vlgmr.msra.gmra.mrb[34].mxu1 %vm997_vm2, %v3089_v25 }
0x15d4   : > { %9822 = vmatprep.mubr.msk.f32.mxu1 %vm11016_vm0, %v11017_v6 }
0x15da   : > { %v3268_v55 = vpop.f32.mrb[20].mxu0 }
0x15db   : > { %v3269_v50 = vadd.f32 %v9085_v63, %v3268_v55  ;;  %v9817_v16 = vpop.f32.mrb[21].mxu0 }
0x15dd   : > { %v3273_v36 = vmul.f32 0.044715, %v3269_v50  ;;  %v3272_v46 = vmul.f32 0.5, %v3269_v50 }
0x15df   : > { %v3274_v40 = vmul.f32 %v3273_v36, %v3269_v50 }
0x15e1   : > { %v3275_v1 = vmul.f32 %v3274_v40, %v3269_v50 }
0x15e3   : > { %v3276_v4 = vadd.f32 %v3275_v1, %v3269_v50 }
0x15e5   : > { %v3277_v43 = vmul.f32 0.7978846, %v3276_v4 }
0x15e7   : > { %10714 = vtanh.f32 %v3277_v43  ;;  %v3375_v43 = vstv %s9090_s0  ;;  %s9088_s0 = sld [smem:[#allocation2 + $0x2]] }
0x15f1   : > { %v10715_v45 = vpop.eup %10714 }
0x15f2   : > { %v3279_v47 = vadd.f32 1.0, %v10715_v45  ;;  %v3352_v45 = vstv %s9087_s5  ;;  %s9089_s5 = sld [smem:[#allocation2 + $0x80]] }
0x15f4   : > { %v3280_v49 = vmul.f32 %v3279_v47, %v3272_v46  ;;  %v910_v47 = vld [vmem:[%s13272_s17] sm:$0xff] }
0x15f6   : > { %3282 = vrot.lane.b32.xlu1 %v3280_v49, %s13372_s28  ;;  %3320 = vrot.lane.b32.xlu0 %v3280_v49, %s13371_s7 }
0x1668   : > { %v11762_v56 = vpop.permute.xlu1 %3282  ;;  %v3321_v53 = vpop.permute.xlu0 %3320 }
0x1669   : > { %v3285_v57 = vsel %vm997_vm2, %v11762_v56, 0.0  ;;  %v3323_v58 = vsel %vm997_vm2, %v3321_v53, 0.0  ;;  %v911_v53 = vld [vmem:[%s13272_s17 + $0x8] sm:$0xff] }
0x166a   : > { %3286 = vadd.xlane.f32.xlu0 %v3285_v57  ;;  %3324 = vadd.xlane.f32.xlu1 %v3323_v58  ;;  %v3096_v57 = vrot.slane %v899_v13, %v11319_v51 }
0x16a6   : > { %v3166_v59 = vpop.f32.mrb[34].mxu1 }
0x16a7   : > { %v9806_v60 = vpop.f32.mrb[35].mxu1 }
0x16f7   : > { %v3325_v62 = vpop.xlane.xlu1 %3324  ;;  %v3287_v41 = vpop.xlane.xlu0 %3286 }
0x16f8   : > { %v3326_v44 = vmul.f32 0.125, %v3325_v62  ;;  %v3288_v5 = vmul.f32 0.125, %v3287_v41  ;;  %v10300_v62 = vpack.c.bf16 %v911_v53, %v910_v47  ;;  %v3167_v41 = vadd.f32 %v3166_v59, %v3096_v57 }
0x16fa   : > { %v3327_v7 = vsub.f32 %v3280_v49, %v3326_v44  ;;  %v3289_v54 = vsub.f32 %v3280_v49, %v3288_v5  ;;  %10301 = vmatpush3.bf16.msra.mxu1 %v10300_v62 }
0x16fc   : > { %v3328_v10 = vmul.f32 %v3327_v7, %v3327_v7  ;;  %v3290_v12 = vmul.f32 %v3289_v54, %v3289_v54 }
0x16fe   : > { %3330 = vrot.lane.b32.xlu0 %v3328_v10, %s13371_s7  ;;  %3292 = vrot.lane.b32.xlu1 %v3290_v12, %s13372_s28 }
0x1702   : > { %3340 = vrot.lane.b32.xlu0 %v3305_v14, %s13324_s13 }
0x1706   : > { %3344 = vrot.lane.b32.xlu0 %v3314_v17, %s13324_s13 }
0x1770   : > { %v3293_v21 = vpop.permute.xlu1 %3292  ;;  %v3331_v24 = vpop.permute.xlu0 %3330 }
0x1771   : > { %v3295_v25 = vsel %vm997_vm2, %v3293_v21, 0.0  ;;  %v3333_v61 = vsel %vm997_vm2, %v3331_v24, 0.0  ;;  %v3349_v24 = vstv %s3348_s9  ;;  %s13389_s9 = sld [smem:[#allocation19_spill]] }
0x1772   : > { %3296 = vadd.xlane.f32.xlu0 %v3295_v25  ;;  %3334 = vadd.xlane.f32.xlu1 %v3333_v61  ;;  %v3360_v61 = vstv %s9088_s0 }
0x1774   : > { %v3341_v16 = vpop.permute.xlu0 %3340 }
0x1777   : > { %s13390_s0 = smov %s13389_s9 }
0x1778   : > { %v3345_v4 = vpop.permute.xlu0 %3344 }
0x1783   : > { %3307 = vrot.lane.b32.xlu1 %v3305_v14, %s13378_s12 }
0x1788   : > { %3316 = vrot.lane.b32.xlu0 %v3314_v17, %s13378_s12 }
0x17ff   : > { %v3335_v63 = vpop.xlane.xlu1 %3334  ;;  %v3297_v44 = vpop.xlane.xlu0 %3296 }
0x1800   : > { %v3336_v55 = vmul.f32 0.125, %v3335_v63  ;;  %v3298_v5 = vmul.f32 0.125, %v3297_v44 }
0x1802   : > { %v3337_v50 = vadd.f32 1e-05, %v3336_v55 }
0x1803   : > { %v3308_v13 = vpop.permute.xlu1 %3307  ;;  %v3317_v17 = vpop.permute.xlu0 %3316 }
0x1804   : > { %10716 = vrsqrt.f32 %v3337_v50 }
0x180e   : > { %v10717_v36 = vpop.eup %10716 }
0x180f   : > { %v3339_v40 = vmul.f32 %v10717_v36, %v3327_v7  ;;  %v3299_v7 = vadd.f32 1e-05, %v3298_v5  ;;  %v914_v5 = vld [vmem:[%s13275_s20] sm:$0xff] }
0x1810   : > { %9825 = vmatprep.subr.mxu1 %v914_v5 }
0x1811   : > { %v3343_v1 = vmul.f32 %v3341_v16, %v3339_v40  ;;  %10718 = vrsqrt.f32 %v3299_v7 }
0x1813   : > { %v3347_v46 = vadd.f32 %v3345_v4, %v3343_v1 }
0x1815   : > { %v3376_v58 = vmul.f32 %v3375_v43, %v3347_v46  ;;  %v3353_v60 = vmul.f32 %v3352_v45, %v3347_v46  ;;  %v3383_v43 = vstv %s9091_s11 }
0x1817   : > { %3378 = vrot.lane.b32.xlu0 %v3376_v58, %s13370_s8  ;;  %3355 = vrot.lane.b32.xlu1 %v3353_v60, %s13370_s8  ;;  %v3395_v58 = vrot.slane %v11733_v0, %v11359_v20 }
0x181b   : > { %3363 = vrot.lane.b32.xlu1 %v3167_v41, %s13378_s12  ;;  %v10719_v10 = vpop.eup %10718 }
0x181c   : > { %v3301_v12 = vmul.f32 %v10719_v10, %v3289_v54  ;;  %v3372_v54 = vstv %s9089_s5  ;;  %s13392_s5 = sld [smem:[#allocation20_spill]] }
0x181e   : > { %v3310_v14 = vmul.f32 %v3308_v13, %v3301_v12 }
0x181f   : > { %3367 = vrot.lane.b32.xlu1 %v3280_v49, %s13378_s12 }
0x1820   : > { %v3319_v21 = vadd.f32 %v3317_v17, %v3310_v14 }
0x1822   : > { %v3350_v25 = vmul.f32 %v3349_v24, %v3319_v21  ;;  %v3373_v1 = vmul.f32 %v3372_v54, %v3319_v21  ;;  %s13393_s11 = smov %s13392_s5 }
0x1889   : > { %v3356_v59 = vpop.permute.xlu1 %3355  ;;  %v3379_v40 = vpop.permute.xlu0 %3378 }
0x188a   : > { %v3358_v63 = vadd.f32 %v3356_v59, %v3350_v25  ;;  %v3381_v4 = vadd.f32 %v3379_v40, %v3373_v1 }
0x188c   : > { %v3361_v55 = vadd.f32 %v3360_v61, %v3358_v63  ;;  %v3384_v45 = vadd.f32 %v3383_v43, %v3381_v4 }
0x188d   : > { %v3364_v50 = vpop.permute.xlu1 %3363 }
0x188e   : > { %v3366_v49 = vadd.f32 %v3364_v50, %v3361_v55  ;;  %v3385_v46 = vadd.f32 %v3384_v45, %v3364_v50 }
0x1890   : > { %v3386_v47 = vmul.f32 %v3385_v46, %v11762_v56 }
0x1891   : > { %v3368_v16 = vpop.permute.xlu1 %3367 }
0x1892   : > { %v3370_v36 = vmul.f32 %v3368_v16, %v3366_v49 }
0x1894   : > { %3388 = vrot.lane.b32.xlu1 %v3370_v36, %s13372_s28 }
0x1906   : > { %v3389_v53 = vpop.permute.xlu1 %3388 }
0x1907   : > { %v3391_v57 = vsel %vm997_vm2, %v3389_v53, %v3386_v47 }
0x1908   : > { %9823 = vmatmul.mubr.msk.f32.vlgmr.msra.gmra.mrb[36].mxu1 %vm1335_vm3, %v3391_v57 }
0x1909   : > { %9826 = vmatpush3.msra.mxu1 %v914_v5 }
0x19db   : > { %v3465_v60 = vpop.f32.mrb[36].mxu1 }
0x19dc   : > { %v3466_v62 = vadd.f32 %v3465_v60, %v3395_v58  ;;  %v9824_v41 = vpop.f32.mrb[37].mxu1 }
0x19de   : > { %v3469_v44 = vadd.f32 %v11666_v52, %v3466_v62 }
0x19e0   : > { %3470 = vxpose.xlu0.b32.start.end [1/1] (short) (narrow) %v3469_v44, 32 }
0x1a60   : > { %v11801_v56 = vpop.trf.xlu0 }
0x1a61   : > { %9827 = vmatprep.mubr.msk.f32.mxu1 %vm997_vm2, %v11801_v56  ;;  %v3970_v25 = vsel %vm997_vm2, %v11801_v56, 0.0 }
0x1a64   : > { %v11805_v7 = vpop.trf.xlu0 }
0x1a65   : > { %9828 = vmatmul.mubr.msk.f32.vlgmr.msra.gmra.mrb[38].mxu1 %vm997_vm2, %v11805_v7  ;;  %v3973_v52 = vsel %vm997_vm2, %v11805_v7, 0.0 }
0x1a66   : > { %3974 = vadd.xlane.f32.xlu0 %v3973_v52 }
0x1a68   : > { %v11811_v0 = vpop.trf.xlu0 }
0x1a69   : > { %9830 = vmatprep.mubr.msk.f32.mxu1 %vm997_vm2, %v11811_v0  ;;  %v3976_v61 = vsel %vm997_vm2, %v11811_v0, 0.0 }
0x1a6c   : > { %v11815_v10 = vpop.trf.xlu0 }
0x1a6d   : > { %9831 = vmatmul.mubr.msk.f32.gmra.mrb[40].mxu1 %vm997_vm2, %v11815_v10  ;;  %v3979_v59 = vsel %vm997_vm2, %v11815_v10, 0.0 }
0x1af3   : > { %v3975_v1 = vpop.xlane.xlu0 %3974 }
0x1af4   : > { %v3983_v4 = vmul.f32 0.125, %v3975_v1 }
0x1af6   : > { %v3987_v46 = vsub.f32 %v11805_v7, %v3983_v4 }
0x1af8   : > { %v3991_v41 = vmul.f32 %v3987_v46, %v3987_v46 }
0x1b38   : > { %v9829_v12 = vpop.f32.mrb[38].mxu1 }
0x1b39   : > { %v3580_v13 = vpop.f32.mrb[39].mxu1 }
0x1b3a   : > { %v11819_v14 = vpack.i.bf16 %v9829_v12, %v3580_v13  ;;  %9841 = vmatprep.mubr.msk.f32.mxu0 %vm997_vm2, %v3580_v13 }
0x1b3c   : > { %10567 = vrot.lane.b32.xlu1 %v11819_v14, %s13372_s28 }
0x1b40   : > { %v9832_v17 = vpop.f32.mrb[40].mxu1 }
0x1b41   : > { %v3590_v21 = vpop.f32.mrb[41].mxu1 }
0x1b42   : > { %v11824_v24 = vpack.i.bf16 %v9832_v17, %v3590_v21 }
0x1b44   : > { %10572 = vrot.lane.b32.xlu1 %v11824_v24, %s13372_s28 }
0x1b68   : > { %3971 = vadd.xlane.f32.xlu1 %v3970_v25 }
0x1b6c   : > { %3977 = vadd.xlane.f32.xlu1 %v3976_v61  ;;  %v916_v61 = vld [vmem:[%s13277_s22] sm:$0xff] }
0x1b70   : > { %3980 = vadd.xlane.f32.xlu1 %v3979_v59 }
0x1bae   : > { %v10568_v63 = vpop.permute.xlu1 %10567 }
0x1baf   : > { %v10570_v55 = vunpack.i.h.bf16 %v10568_v63  ;;  %v10569_v50 = vunpack.i.l.bf16 %v10568_v63 }
0x1bb1   : > { %v10302_v49 = vpack.c.bf16 %v10570_v55, %v10569_v50 }
0x1bb3   : > { %10304 = vmatprep.subr.msk.bf16.mxu0 %vm11485_vm4, %v10302_v49 }
0x1bb4   : > { %10307 = vmatpush3.bf16.xpose.msk.msra.mxu0 %vm11485_vm4, %v10302_v49 }
0x1bb6   : > { %v10573_v16 = vpop.permute.xlu1 %10572 }
0x1bb7   : > { %v10575_v36 = vunpack.i.h.bf16 %v10573_v16  ;;  %v10574_v54 = vunpack.i.l.bf16 %v10573_v16 }
0x1bb9   : > { %v10308_v40 = vpack.c.bf16 %v10575_v36, %v10574_v54 }
0x1bbb   : > { %10310 = vmatprep.subr.msk.bf16.mxu0 %vm11485_vm4, %v10308_v40 }
0x1bbc   : > { %10313 = vmatpush3.bf16.xpose.msk.msra.mxu0 %vm11485_vm4, %v10308_v40  ;;  %v912_v40 = vld [vmem:[%s13280_s25] sm:$0x7] }
0x1bbd   : > { %9869 = vmatprep.subr.mxu0 %v916_v61 }
0x1bc3   : > { %9842 = vmatmul.mubr.msk.f32.vlgmr.msra.gmra.mrb[22].mxu0 %vm997_vm2, %v9829_v12  ;;  %v3997_v12 = vsel %vm997_vm2, %v3991_v41, 0.0 }
0x1bc4   : > { %9844 = vmatprep.mubr.msk.f32.mxu0 %vm997_vm2, %v3590_v21  ;;  %9870 = vmatpush3.msra.mxu0 %v916_v61 }
0x1bc5   : > { %10326 = vmatprep.subr.bf16.mxu0 %v11015_v3 }
0x1bc7   : > { %9845 = vmatmul.mubr.msk.f32.gmra.mrb[24].mxu0 %vm997_vm2, %v9832_v17 }
0x1bf5   : > { %v3972_v43 = vpop.xlane.xlu1 %3971 }
0x1bf6   : > { %v3982_v45 = vmul.f32 0.125, %v3972_v43 }
0x1bf8   : > { %v3986_v47 = vsub.f32 %v11801_v56, %v3982_v45 }
0x1bf9   : > { %v3978_v53 = vpop.xlane.xlu1 %3977 }
0x1bfa   : > { %v3984_v57 = vmul.f32 0.125, %v3978_v53  ;;  %v3990_v58 = vmul.f32 %v3986_v47, %v3986_v47 }
0x1bfc   : > { %v3988_v60 = vsub.f32 %v11811_v0, %v3984_v57  ;;  %v3994_v62 = vsel %vm997_vm2, %v3990_v58, 0.0  ;;  %v4025_v58 = vrot.slane %v912_v40, %v11319_v51 }
0x1bfd   : > { %3995 = vadd.xlane.f32.xlu1 %v3994_v62  ;;  %v3981_v44 = vpop.xlane.xlu1 %3980 }
0x1bfe   : > { %v3985_v5 = vmul.f32 0.125, %v3981_v44  ;;  %v3992_v13 = vmul.f32 %v3988_v60, %v3988_v60 }
0x1c00   : > { %v11850_v52 = vsub.f32 %v11815_v10, %v3985_v5  ;;  %v4000_v17 = vsel %vm997_vm2, %v3992_v13, 0.0 }
0x1c01   : > { %3998 = vadd.xlane.f32.xlu1 %v3997_v12 }
0x1c02   : > { %v3993_v21 = vmul.f32 %v11850_v52, %v11850_v52 }
0x1c04   : > { %v4003_v25 = vsel %vm997_vm2, %v3993_v21, 0.0 }
0x1c05   : > { %4001 = vadd.xlane.f32.xlu1 %v4000_v17  ;;  %v4033_v17 = vrot.slane %v912_v40, %v11356_v18 }
0x1c09   : > { %4004 = vadd.xlane.f32.xlu1 %v4003_v25 }
0x1c8a   : > { %v3996_v59 = vpop.xlane.xlu1 %3995 }
0x1c8b   : > { %v4006_v63 = vmul.f32 0.125, %v3996_v59 }
0x1c8d   : > { %v4010_v55 = vadd.f32 1e-05, %v4006_v63 }
0x1c8e   : > { %v3999_v50 = vpop.xlane.xlu1 %3998 }
0x1c8f   : > { %10720 = vrsqrt.f32 %v4010_v55  ;;  %v4007_v49 = vmul.f32 0.125, %v3999_v50 }
0x1c91   : > { %v4011_v16 = vadd.f32 1e-05, %v4007_v49 }
0x1c92   : > { %v4002_v36 = vpop.xlane.xlu1 %4001 }
0x1c93   : > { %10722 = vrsqrt.f32 %v4011_v16  ;;  %v4008_v54 = vmul.f32 0.125, %v4002_v36 }
0x1c95   : > { %v4012_v1 = vadd.f32 1e-05, %v4008_v54 }
0x1c96   : > { %v4005_v4 = vpop.xlane.xlu1 %4004  ;;  %v9843_v43 = vpop.f32.mrb[22].mxu0 }
0x1c97   : > { %10724 = vrsqrt.f32 %v4012_v1  ;;  %v4009_v45 = vmul.f32 0.125, %v4005_v4  ;;  %v11864_v53 = vmul.f32 0.35355338, %v9843_v43  ;;  %v3693_v57 = vpop.f32.mrb[23].mxu0 }
0x1c98   : > { %v11867_v44 = vmul.f32 0.35355338, %v3693_v57 }
0x1c99   : > { %v10721_v62 = vpop.eup %10720  ;;  %v4013_v41 = vadd.f32 1e-05, %v4009_v45  ;;  %v3719_v5 = vsel %vm920_vm1, %v11864_v53, -inf }
0x1c9a   : > { %3720 = vmax.xlane.f32.xlu1 %v3719_v5  ;;  %v9846_v12 = vpop.f32.mrb[24].mxu0  ;;  %v4018_v13 = vmul.f32 %v10721_v62, %v3986_v47  ;;  %v3716_v63 = vsel %vm920_vm1, %v11867_v44, -inf }
0x1c9b   : > { %10726 = vrsqrt.f32 %v4013_v41  ;;  %v3703_v21 = vpop.f32.mrb[25].mxu0  ;;  %v11877_v36 = vmul.f32 0.35355338, %v9846_v12 }
0x1c9c   : > { %v4026_v25 = vmul.f32 %v4025_v58, %v4018_v13  ;;  %v11872_v59 = vmul.f32 0.35355338, %v3703_v21 }
0x1c9d   : > { %v10723_v61 = vpop.eup %10722 }
0x1c9e   : > { %v4019_v55 = vmul.f32 %v10723_v61, %v3987_v46  ;;  %3717 = vmax.xlane.f32.xlu1 %v3716_v63  ;;  %v4034_v50 = vadd.f32 %v4033_v17, %v4026_v25  ;;  %v3722_v47 = vsel %vm920_vm1, %v11872_v59, -inf  ;;  %v3725_v46 = vsel %vm920_vm1, %v11877_v36, -inf }
0x1ca0   : > { %v4027_v49 = vmul.f32 %v4025_v58, %v4019_v55  ;;  %9871 = vmatprep.mubr.msk.f32.mxu0 %vm997_vm2, %v4034_v50 }
0x1ca1   : > { %v10725_v16 = vpop.eup %10724 }
0x1ca2   : > { %3723 = vmax.xlane.f32.xlu1 %v3722_v47  ;;  %v4035_v54 = vadd.f32 %v4033_v17, %v4027_v49  ;;  %v4020_v40 = vmul.f32 %v10725_v16, %v3988_v60 }
0x1ca4   : > { %9872 = vmatmul.mubr.msk.f32.vlgmr.msra.gmra.mrb[26].mxu0 %vm997_vm2, %v4035_v54  ;;  %v4028_v1 = vmul.f32 %v4025_v58, %v4020_v40 }
0x1ca5   : > { %v10727_v4 = vpop.eup %10726 }
0x1ca6   : > { %3726 = vmax.xlane.f32.xlu1 %v3725_v46  ;;  %v4036_v43 = vadd.f32 %v4033_v17, %v4028_v1  ;;  %v4021_v45 = vmul.f32 %v10727_v4, %v11850_v52  ;;  %v11916_v4 = vld [vmem:[%s13380_s4] sm:$0x3f] }
0x1ca7   : > { %v2656_v46 = vrot.slane %v11916_v4, %v11430_v9 }
0x1ca8   : > { %9874 = vmatprep.mubr.msk.f32.mxu0 %vm997_vm2, %v4036_v43  ;;  %v4029_v57 = vmul.f32 %v4025_v58, %v4021_v45 }
0x1ca9   : > { %v2736_v43 = vadd.f32 %v11710_v28, %v2656_v46  ;;  %v2741_v45 = vadd.f32 %v11708_v2, %v2656_v46  ;;  %v9113_v2 = vld [vmem:[%s13278_s23] ss:$0 sm:$0xff] }
0x1caa   : > { %v4037_v62 = vadd.f32 %v4033_v17, %v4029_v57 }
0x1cab   : > { %v11923_v57 = vadd.f32 %v2736_v43, %v11639_v32 }
0x1cac   : > { %9875 = vmatmul.mubr.msk.f32.gmra.mrb[28].mxu0 %vm997_vm2, %v4037_v62  ;;  %v11927_v62 = vadd.f32 %v2741_v45, %v11641_v39 }
0x1cad   : > { %9895 = vmatprep.mubr.msk.f32.mxu0 %vm11016_vm0, %v11017_v6 }
0x1d27   : > { %v3721_v60 = vpop.xlane.xlu1 %3720 }
0x1d28   : > { %v3729_v41 = vsub.f32 %v11864_v53, %v3721_v60 }
0x1d2a   : > { %v3734_v5 = vmul.f32 1.442695, %v3729_v41  ;;  %v2758_v41 = vsel %vm997_vm2, %v11923_v57, 0.0 }
0x1d2b   : > { %v3718_v12 = vpop.xlane.xlu1 %3717 }
0x1d2c   : > { %10728 = vpow2.f32 %v3734_v5  ;;  %v3728_v13 = vsub.f32 %v11867_v44, %v3718_v12 }
0x1d2e   : > { %v3732_v21 = vmul.f32 1.442695, %v3728_v13 }
0x1d2f   : > { %v3724_v25 = vpop.xlane.xlu1 %3723 }
0x1d30   : > { %10730 = vpow2.f32 %v3732_v21  ;;  %v3730_v52 = vsub.f32 %v11872_v59, %v3724_v25 }
0x1d32   : > { %v3736_v58 = vmul.f32 1.442695, %v3730_v52 }
0x1d33   : > { %v3727_v17 = vpop.xlane.xlu1 %3726 }
0x1d34   : > { %10732 = vpow2.f32 %v3736_v58  ;;  %v3731_v61 = vsub.f32 %v11877_v36, %v3727_v17 }
0x1d36   : > { %v11893_v63 = vpop.eup %10728  ;;  %v3738_v55 = vmul.f32 1.442695, %v3731_v61 }
0x1d37   : > { %v3743_v50 = vsel %vm920_vm1, %v11893_v63, 0.0 }
0x1d38   : > { %10734 = vpow2.f32 %v3738_v55  ;;  %3744 = vadd.xlane.f32.xlu0 %v3743_v50 }
0x1d3a   : > { %v11897_v49 = vpop.eup %10730 }
0x1d3b   : > { %v3740_v16 = vsel %vm920_vm1, %v11897_v49, 0.0 }
0x1d3c   : > { %3741 = vadd.xlane.f32.xlu1 %v3740_v16 }
0x1d3e   : > { %v11901_v47 = vpop.eup %10732 }
0x1d3f   : > { %v3746_v54 = vsel %vm920_vm1, %v11901_v47, 0.0 }
0x1d40   : > { %3747 = vadd.xlane.f32.xlu1 %v3746_v54 }
0x1d42   : > { %v11905_v40 = vpop.eup %10734 }
0x1d43   : > { %v3749_v1 = vsel %vm920_vm1, %v11905_v40, 0.0 }
0x1d44   : > { %3750 = vadd.xlane.f32.xlu0 %v3749_v1 }
0x1d51   : > { %10577 = vrot.lane.b32.xlu1 %v11819_v14, %s13370_s8  ;;  %v2746_v14 = vadd.f32 %v11715_v37, %v2656_v46 }
0x1d53   : > { %v11931_v60 = vadd.f32 %v2746_v14, %v11653_v42  ;;  %v2761_v42 = vsel %vm997_vm2, %v11927_v62, 0.0 }
0x1d5a   : > { %10582 = vrot.lane.b32.xlu0 %v11824_v24, %s13370_s8  ;;  %v2751_v24 = vadd.f32 %v11712_v26, %v2656_v46  ;;  %v2764_v26 = vsel %vm997_vm2, %v11931_v60, 0.0 }
0x1d5c   : > { %v11939_v28 = vadd.f32 %v2751_v24, %v11655_v38 }
0x1d5e   : > { %v2767_v25 = vsel %vm997_vm2, %v11939_v28, 0.0 }
0x1d75   : > { %2759 = vadd.xlane.f32.xlu1 %v2758_v41 }
0x1d77   : > { %v9873_v32 = vpop.f32.mrb[26].mxu0 }
0x1d78   : > { %v4128_v37 = vadd.f32 %v9873_v32, %v9113_v2  ;;  %v4122_v39 = vpop.f32.mrb[27].mxu0 }
0x1d79   : > { %v4123_v5 = vadd.f32 %v9113_v2, %v4122_v39  ;;  %2765 = vadd.xlane.f32.xlu1 %v2764_v26  ;;  %2762 = vadd.xlane.f32.xlu0 %v2761_v42 }
0x1d7a   : > { %v4146_v12 = vmul.f32 0.044715, %v4128_v37 }
0x1d7b   : > { %v4145_v13 = vmul.f32 0.044715, %v4123_v5 }
0x1d7c   : > { %v4150_v21 = vmul.f32 %v4146_v12, %v4128_v37 }
0x1d7d   : > { %v4149_v52 = vmul.f32 %v4145_v13, %v4123_v5  ;;  %2768 = vadd.xlane.f32.xlu0 %v2767_v25  ;;  %v4142_v25 = vmul.f32 0.5, %v4128_v37 }
0x1d7e   : > { %v4154_v38 = vmul.f32 %v4150_v21, %v4128_v37 }
0x1d7f   : > { %v4153_v58 = vmul.f32 %v4149_v52, %v4123_v5  ;;  %v9876_v17 = vpop.f32.mrb[28].mxu0  ;;  %v4141_v52 = vmul.f32 0.5, %v4123_v5 }
0x1d80   : > { %v4158_v61 = vadd.f32 %v4154_v38, %v4128_v37  ;;  %v4138_v55 = vadd.f32 %v9876_v17, %v9113_v2  ;;  %v4132_v50 = vpop.f32.mrb[29].mxu0 }
0x1d81   : > { %v4157_v16 = vadd.f32 %v4153_v58, %v4123_v5  ;;  %v4133_v54 = vadd.f32 %v9113_v2, %v4132_v50 }
0x1d82   : > { %v4162_v1 = vmul.f32 0.7978846, %v4158_v61  ;;  %v4148_v46 = vmul.f32 0.044715, %v4138_v55 }
0x1d83   : > { %v4161_v43 = vmul.f32 0.7978846, %v4157_v16  ;;  %v4147_v45 = vmul.f32 0.044715, %v4133_v54  ;;  %v4143_v16 = vmul.f32 0.5, %v4133_v54 }
0x1d84   : > { %10736 = vtanh.f32 %v4162_v1  ;;  %v4152_v14 = vmul.f32 %v4148_v46, %v4138_v55 }
0x1d85   : > { %10738 = vtanh.f32 %v4161_v43  ;;  %v4151_v24 = vmul.f32 %v4147_v45, %v4133_v54  ;;  %v4144_v43 = vmul.f32 0.5, %v4138_v55 }
0x1d86   : > { %v4156_v41 = vmul.f32 %v4152_v14, %v4138_v55 }
0x1d87   : > { %v4155_v32 = vmul.f32 %v4151_v24, %v4133_v54 }
0x1d88   : > { %v4160_v39 = vadd.f32 %v4156_v41, %v4138_v55 }
0x1d89   : > { %v4159_v26 = vadd.f32 %v4155_v32, %v4133_v54 }
0x1d8a   : > { %v4164_v42 = vmul.f32 0.7978846, %v4160_v39 }
0x1d8b   : > { %v4163_v12 = vmul.f32 0.7978846, %v4159_v26 }
0x1d8c   : > { %10740 = vtanh.f32 %v4164_v42 }
0x1d8d   : > { %10742 = vtanh.f32 %v4163_v12 }
0x1d8e   : > { %v10737_v13 = vpop.eup %10736 }
0x1d8f   : > { %v10739_v21 = vpop.eup %10738  ;;  %v4170_v2 = vadd.f32 1.0, %v10737_v13 }
0x1d90   : > { %v4169_v38 = vadd.f32 1.0, %v10739_v21 }
0x1d91   : > { %v11947_v58 = vmul.f32 %v4170_v2, %v4142_v25 }
0x1d92   : > { %v11949_v17 = vmul.f32 %v4169_v38, %v4141_v52 }
0x1d93   : > { %4287 = vrot.lane.b32.xlu0 %v11947_v58, %s13371_s7 }
0x1d94   : > { %4285 = vrot.lane.b32.xlu1 %v11949_v17, %s13371_s7 }
0x1d96   : > { %v10741_v61 = vpop.eup %10740 }
0x1d97   : > { %v10743_v50 = vpop.eup %10742  ;;  %v4172_v37 = vadd.f32 1.0, %v10741_v61 }
0x1d98   : > { %v4171_v1 = vadd.f32 1.0, %v10743_v50 }
0x1d99   : > { %v11959_v5 = vmul.f32 %v4172_v37, %v4144_v43 }
0x1d9a   : > { %v11955_v46 = vmul.f32 %v4171_v1, %v4143_v16 }
0x1d9c   : > { %4289 = vrot.lane.b32.xlu1 %v11955_v46, %s13371_s7 }
0x1da0   : > { %4291 = vrot.lane.b32.xlu1 %v11959_v5, %s13371_s7 }
0x1dc5   : > { %v3745_v14 = vpop.xlane.xlu0 %3744 }
0x1dc9   : > { %v3742_v45 = vpop.xlane.xlu1 %3741 }
0x1dca   : > { %10744 = vrcp.f32 %v3742_v45 }
0x1dcb   : > { %10746 = vrcp.f32 %v3745_v14 }
0x1dcd   : > { %v3748_v24 = vpop.xlane.xlu1 %3747 }
0x1dce   : > { %10748 = vrcp.f32 %v3748_v24 }
0x1dd1   : > { %v3751_v54 = vpop.xlane.xlu0 %3750  ;;  %v10578_v41 = vpop.permute.xlu1 %10577 }
0x1dd2   : > { %v10580_v32 = vunpack.i.h.bf16 %v10578_v41  ;;  %v10579_v39 = vunpack.i.l.bf16 %v10578_v41  ;;  %10750 = vrcp.f32 %v3751_v54 }
0x1dd4   : > { %v10745_v55 = vpop.eup %10744  ;;  %v10314_v26 = vpack.c.bf16 %v10580_v32, %v10579_v39 }
0x1dd5   : > { %v10583_v42 = vpop.permute.xlu0 %10582  ;;  %v3756_v12 = vmul.f32 %v10745_v55, %v11897_v49  ;;  %v10747_v2 = vpop.eup %10746 }
0x1dd6   : > { %v10585_v13 = vunpack.i.h.bf16 %v10583_v42  ;;  %v10584_v21 = vunpack.i.l.bf16 %v10583_v42  ;;  %10315 = vmatprep.subr.bf16.mxu1 %v10314_v26  ;;  %v3757_v38 = vmul.f32 %v10747_v2, %v11893_v63 }
0x1dd7   : > { %10317 = vmatpush3.bf16.msra.mxu1 %v10314_v26  ;;  %9855 = vmatprep.mubr.msk.f32.mxu1 %vm920_vm1, %v3756_v12 }
0x1dd8   : > { %v10318_v25 = vpack.c.bf16 %v10585_v13, %v10584_v21  ;;  %v10749_v52 = vpop.eup %10748 }
0x1dd9   : > { %v3758_v50 = vmul.f32 %v10749_v52, %v11901_v47 }
0x1dda   : > { %10319 = vmatprep.subr.bf16.mxu1 %v10318_v25 }
0x1ddb   : > { %10321 = vmatpush3.bf16.msra.mxu1 %v10318_v25 }
0x1ddc   : > { %v10751_v61 = vpop.eup %10750 }
0x1ddd   : > { %v3759_v49 = vmul.f32 %v10751_v61, %v11905_v40 }
0x1dde   : > { %9856 = vmatmul.mubr.msk.f32.vlgmr.msra.gmra.mrb[42].mxu1 %vm920_vm1, %v3757_v38 }
0x1ddf   : > { %9858 = vmatprep.mubr.msk.f32.mxu1 %vm920_vm1, %v3758_v50 }
0x1de2   : > { %9859 = vmatmul.mubr.msk.f32.gmra.mrb[44].mxu1 %vm920_vm1, %v3759_v49 }
0x1e02   : > { %v2760_v16 = vpop.xlane.xlu1 %2759 }
0x1e03   : > { %v2770_v1 = vmul.f32 0.125, %v2760_v16 }
0x1e05   : > { %v11972_v37 = vsub.f32 %v11923_v57, %v2770_v1 }
0x1e06   : > { %v2763_v43 = vpop.xlane.xlu0 %2762  ;;  %v2766_v45 = vpop.xlane.xlu1 %2765 }
0x1e07   : > { %v2771_v14 = vmul.f32 0.125, %v2763_v43  ;;  %v2772_v63 = vmul.f32 0.125, %v2766_v45  ;;  %v2778_v47 = vmul.f32 %v11972_v37, %v11972_v37 }
0x1e09   : > { %v11977_v24 = vsub.f32 %v11927_v62, %v2771_v14  ;;  %v11980_v54 = vsub.f32 %v11931_v60, %v2772_v63  ;;  %v2782_v40 = vsel %vm997_vm2, %v2778_v47, 0.0 }
0x1e0a   : > { %v2769_v41 = vpop.xlane.xlu0 %2768  ;;  %2783 = vadd.xlane.f32.xlu0 %v2782_v40  ;;  %v4286_v12 = vpop.permute.xlu1 %4285 }
0x1e0b   : > { %v2773_v32 = vmul.f32 0.125, %v2769_v41  ;;  %v2779_v57 = vmul.f32 %v11977_v24, %v11977_v24  ;;  %v2780_v39 = vmul.f32 %v11980_v54, %v11980_v54  ;;  %v4297_v13 = vsel %vm997_vm2, %v4286_v12, 0.0 }
0x1e0c   : > { %v2821_v12 = vrot.slane %v11916_v4, %v11441_v30 }
0x1e0d   : > { %v11988_v55 = vsub.f32 %v11939_v28, %v2773_v32  ;;  %v2785_v62 = vsel %vm997_vm2, %v2779_v57, 0.0  ;;  %v2788_v26 = vsel %vm997_vm2, %v2780_v39, 0.0  ;;  %v915_v28 = vld [vmem:[%s13386_s21] sm:$0xff]  ;;  %s9254_s21 = sld [smem:[#allocation2 + $0x280]] }
0x1e0e   : > { %2786 = vadd.xlane.f32.xlu1 %v2785_v62  ;;  %2789 = vadd.xlane.f32.xlu0 %v2788_v26  ;;  %v4288_v21 = vpop.permute.xlu0 %4287  ;;  %v4290_v2 = vpop.permute.xlu1 %4289 }
0x1e0f   : > { %v2781_v60 = vmul.f32 %v11988_v55, %v11988_v55  ;;  %9861 = vmatprep.subr.mxu1 %v915_v28  ;;  %v4300_v25 = vsel %vm997_vm2, %v4288_v21, 0.0  ;;  %v4303_v52 = vsel %vm997_vm2, %v4290_v2, 0.0 }
0x1e10   : > { %9862 = vmatpush3.msra.mxu1 %v915_v28 }
0x1e11   : > { %v2791_v42 = vsel %vm997_vm2, %v2781_v60, 0.0  ;;  %v2813_v60 = vrot.slane %v11916_v4, %v11438_v29 }
0x1e12   : > { %2792 = vadd.xlane.f32.xlu0 %v2791_v42  ;;  %v4292_v38 = vpop.permute.xlu1 %4291 }
0x1e13   : > { %v4306_v61 = vsel %vm997_vm2, %v4292_v38, 0.0 }
0x1e1f   : > { %4181 = vrot.lane.b32.xlu1 %v11949_v17, %s13372_s28 }
0x1e28   : > { %4183 = vrot.lane.b32.xlu0 %v11947_v58, %s13372_s28 }
0x1e43   : > { %4298 = vadd.xlane.f32.xlu1 %v4297_v13 }
0x1e47   : > { %4301 = vadd.xlane.f32.xlu0 %v4300_v25 }
0x1e54   : > { %4185 = vrot.lane.b32.xlu1 %v11955_v46, %s13372_s28 }
0x1e5d   : > { %4187 = vrot.lane.b32.xlu0 %v11959_v5, %s13372_s28 }
0x1e78   : > { %4304 = vadd.xlane.f32.xlu1 %v4303_v52 }
0x1e7c   : > { %4307 = vadd.xlane.f32.xlu0 %v4306_v61 }
0x1e97   : > { %v2784_v50 = vpop.xlane.xlu0 %2783 }
0x1e98   : > { %v2794_v49 = vmul.f32 0.125, %v2784_v50 }
0x1e9a   : > { %v2798_v16 = vadd.f32 1e-05, %v2794_v49 }
0x1e9b   : > { %v2790_v1 = vpop.xlane.xlu0 %2789  ;;  %v2787_v43 = vpop.xlane.xlu1 %2786 }
0x1e9c   : > { %10752 = vrsqrt.f32 %v2798_v16  ;;  %v2796_v45 = vmul.f32 0.125, %v2790_v1  ;;  %v2795_v14 = vmul.f32 0.125, %v2787_v43 }
0x1e9e   : > { %v2800_v63 = vadd.f32 1e-05, %v2796_v45  ;;  %v2799_v47 = vadd.f32 1e-05, %v2795_v14 }
0x1e9f   : > { %v2793_v40 = vpop.xlane.xlu0 %2792  ;;  %v12010_v41 = vpop.permute.xlu1 %4181 }
0x1ea0   : > { %10754 = vrsqrt.f32 %v2800_v63  ;;  %v2797_v32 = vmul.f32 0.125, %v2793_v40  ;;  %v4193_v57 = vsel %vm997_vm2, %v12010_v41, 0.0 }
0x1ea1   : > { %10756 = vrsqrt.f32 %v2799_v47  ;;  %4194 = vadd.xlane.f32.xlu0 %v4193_v57 }
0x1ea2   : > { %v2801_v39 = vadd.f32 1e-05, %v2797_v32 }
0x1ea3   : > { %v12014_v62 = vpop.permute.xlu0 %4183 }
0x1ea4   : > { %10758 = vrsqrt.f32 %v2801_v39  ;;  %v4196_v26 = vsel %vm997_vm2, %v12014_v62, 0.0 }
0x1ea5   : > { %4197 = vadd.xlane.f32.xlu0 %v4196_v26 }
0x1ea6   : > { %v10753_v42 = vpop.eup %10752 }
0x1ea7   : > { %v2806_v28 = vmul.f32 %v10753_v42, %v11972_v37 }
0x1ea9   : > { %v2814_v13 = vmul.f32 %v2813_v60, %v2806_v28 }
0x1eaa   : > { %v10755_v21 = vpop.eup %10754 }
0x1eab   : > { %v10757_v25 = vpop.eup %10756  ;;  %v2822_v2 = vadd.f32 %v2821_v12, %v2814_v13  ;;  %v2808_v38 = vmul.f32 %v10755_v21, %v11980_v54 }
0x1eac   : > { %v2807_v52 = vmul.f32 %v10757_v25, %v11977_v24 }
0x1ead   : > { %2826 = vxpose.xlu1.b32.start [1/4] (short) (narrow) %v2822_v2, 8  ;;  %v2816_v16 = vmul.f32 %v2813_v60, %v2808_v38 }
0x1eae   : > { %v10759_v61 = vpop.eup %10758  ;;  %v2815_v50 = vmul.f32 %v2813_v60, %v2807_v52 }
0x1eaf   : > { %v2809_v1 = vmul.f32 %v10759_v61, %v11988_v55  ;;  %v2824_v4 = vadd.f32 %v2821_v12, %v2816_v16 }
0x1eb0   : > { %v2823_v49 = vadd.f32 %v2821_v12, %v2815_v50 }
0x1eb1   : > { %v9857_v43 = vpop.f32.mrb[42].mxu1  ;;  %v2817_v45 = vmul.f32 %v2813_v60, %v2809_v1 }
0x1eb2   : > { %2827 = vxpose.xlu1.b32.cont [2/4] (short) (narrow) %v2823_v49, 8  ;;  %v3850_v37 = vpop.f32.mrb[43].mxu1 }
0x1eb3   : > { %9863 = vmatprep.mubr.msk.f32.mxu1 %vm997_vm2, %v3850_v37  ;;  %v2825_v54 = vadd.f32 %v2821_v12, %v2817_v45 }
0x1eb4   : > { %9864 = vmatmul.mubr.msk.f32.vlgmr.msra.gmra.mrb[46].mxu1 %vm997_vm2, %v9857_v43 }
0x1eb5   : > { %v9860_v14 = vpop.f32.mrb[44].mxu1 }
0x1eb6   : > { %2828 = vxpose.xlu1.b32.cont [3/4] (short) (narrow) %v2824_v4, 8  ;;  %v3860_v24 = vpop.f32.mrb[45].mxu1 }
0x1eb7   : > { %9866 = vmatprep.mubr.msk.f32.mxu1 %vm997_vm2, %v3860_v24 }
0x1eb8   : > { %9867 = vmatmul.mubr.msk.f32.gmra.mrb[48].mxu1 %vm997_vm2, %v9860_v14  ;;  %v913_v14 = vld [vmem:[%s13387_s26] sm:$0x7]  ;;  %s9119_s26 = sld [smem:[#allocation2 + $0x101]] }
0x1eba   : > { %2829 = vxpose.xlu1.b32.end [4/4] (short) (narrow) %v2825_v54, 8  ;;  %v4264_v54 = vrot.slane %v913_v14, %v11356_v18 }
0x1ed0   : > { %v4299_v63 = vpop.xlane.xlu1 %4298 }
0x1ed1   : > { %v4309_v26 = vmul.f32 0.125, %v4299_v63  ;;  %v9130_v63 = vld [vmem:[%s13361_s27 + $0x20] sm:$0xff] }
0x1ed3   : > { %v12042_v42 = vsub.f32 %v11949_v17, %v4309_v26 }
0x1ed4   : > { %v4302_v55 = vpop.xlane.xlu0 %4301  ;;  %v12030_v47 = vpop.permute.xlu1 %4185 }
0x1ed5   : > { %v4199_v40 = vsel %vm997_vm2, %v12030_v47, 0.0  ;;  %v4310_v39 = vmul.f32 0.125, %v4302_v55  ;;  %v4317_v12 = vmul.f32 %v12042_v42, %v12042_v42  ;;  %v9131_v55 = vld [vmem:[%s13361_s27 + $0x28] sm:$0xff] }
0x1ed6   : > { %4200 = vadd.xlane.f32.xlu0 %v4199_v40  ;;  %v9132_v40 = vld [vmem:[%s13361_s27 + $0x30] sm:$0xff] }
0x1ed7   : > { %v12039_v60 = vsub.f32 %v11947_v58, %v4310_v39  ;;  %v9133_v39 = vld [vmem:[%s13361_s27 + $0x38] sm:$0xff]  ;;  %s13394_s27 = sld [smem:[#allocation21_spill]] }
0x1ed8   : > { %v12034_v32 = vpop.permute.xlu0 %4187  ;;  %v10330_v26 = vpack.c.bf16 %v9133_v39, %v9132_v40 }
0x1ed9   : > { %v4202_v57 = vsel %vm997_vm2, %v12034_v32, 0.0  ;;  %v4318_v28 = vmul.f32 %v12039_v60, %v12039_v60 }
0x1eda   : > { %4203 = vadd.xlane.f32.xlu0 %v4202_v57  ;;  %v10327_v57 = vpack.c.bf16 %v9131_v55, %v9130_v63 }
0x1edc   : > { %10328 = vmatpush3.bf16.msra.mxu0 %v10327_v57 }
0x1edd   : > { %10329 = vmatprep.subr.bf16.mxu0 %v11015_v3 }
0x1ee0   : > { %10331 = vmatpush3.bf16.msra.mxu0 %v10330_v26 }
0x1ee1   : > { %9903 = vmatprep.subr.mxu0 %v11017_v6 }
0x1ef0   : > { %4327 = vrot.lane.b32.xlu0 %v4318_v28, %s13371_s7 }
0x1ef4   : > { %4325 = vrot.lane.b32.xlu0 %v4317_v12, %s13371_s7 }
0x1f05   : > { %v4305_v13 = vpop.xlane.xlu1 %4304 }
0x1f06   : > { %v4311_v21 = vmul.f32 0.125, %v4305_v13 }
0x1f08   : > { %v12051_v25 = vsub.f32 %v11955_v46, %v4311_v21 }
0x1f09   : > { %v4308_v2 = vpop.xlane.xlu0 %4307 }
0x1f0a   : > { %v4319_v52 = vmul.f32 %v12051_v25, %v12051_v25  ;;  %v4312_v38 = vmul.f32 0.125, %v4308_v2 }
0x1f0c   : > { %v12056_v61 = vsub.f32 %v11959_v5, %v4312_v38  ;;  %4329 = vrot.lane.b32.xlu0 %v4319_v52, %s13371_s7 }
0x1f0e   : > { %v4320_v50 = vmul.f32 %v12056_v61, %v12056_v61 }
0x1f10   : > { %4331 = vrot.lane.b32.xlu0 %v4320_v50, %s13371_s7 }
0x1f2e   : > { %v4195_v49 = vpop.xlane.xlu0 %4194  ;;  %v12092_v28 = vpop.trf.xlu1 }
0x1f2f   : > { %v4205_v16 = vmul.f32 0.125, %v4195_v49  ;;  %9896 = vmatmul.mubr.msk.f32.vlgmr.msra.gmra.mrb[30].mxu0 %vm920_vm1, %v12092_v28 }
0x1f30   : > { %9905 = vmatprep.mubr.msk.f32.mxu0 %vm11016_vm0, %v11017_v6 }
0x1f31   : > { %v12063_v1 = vsub.f32 %v11949_v17, %v4205_v16 }
0x1f32   : > { %v4198_v43 = vpop.xlane.xlu0 %4197 }
0x1f33   : > { %v4213_v37 = vmul.f32 %v12063_v1, %v12063_v1  ;;  %v4206_v4 = vmul.f32 0.125, %v4198_v43  ;;  %v3872_v43 = vrot.slane %v913_v14, %v11319_v51 }
0x1f35   : > { %v12068_v45 = vsub.f32 %v11947_v58, %v4206_v4  ;;  %4221 = vrot.lane.b32.xlu0 %v4213_v37, %s13372_s28 }
0x1f37   : > { %v4214_v24 = vmul.f32 %v12068_v45, %v12068_v45 }
0x1f39   : > { %4223 = vrot.lane.b32.xlu0 %v4214_v24, %s13372_s28 }
0x1f3d   : > { %4365 = vrot.lane.b32.xlu0 %v4264_v54, %s13324_s13 }
0x1f63   : > { %v4201_v12 = vpop.xlane.xlu0 %4200 }
0x1f64   : > { %v4207_v13 = vmul.f32 0.125, %v4201_v12 }
0x1f66   : > { %v12100_v21 = vsub.f32 %v11955_v46, %v4207_v13 }
0x1f67   : > { %v4204_v2 = vpop.xlane.xlu0 %4203 }
0x1f68   : > { %v4215_v52 = vmul.f32 %v12100_v21, %v12100_v21  ;;  %v4208_v38 = vmul.f32 0.125, %v4204_v2 }
0x1f6a   : > { %v12105_v50 = vsub.f32 %v11959_v5, %v4208_v38  ;;  %4225 = vrot.lane.b32.xlu0 %v4215_v52, %s13372_s28 }
0x1f6b   : > { %v4328_v16 = vpop.permute.xlu0 %4327 }
0x1f6c   : > { %v4216_v49 = vmul.f32 %v12105_v50, %v12105_v50  ;;  %v4340_v2 = vsel %vm997_vm2, %v4328_v16, 0.0 }
0x1f6e   : > { %4227 = vrot.lane.b32.xlu1 %v4216_v49, %s13372_s28  ;;  %v4276_v49 = vrot.slane %v913_v14, %v11359_v20 }
0x1f6f   : > { %v4326_v37 = vpop.permute.xlu0 %4325 }
0x1f70   : > { %v4337_v55 = vsel %vm997_vm2, %v4326_v37, 0.0 }
0x1f7e   : > { %v4330_v39 = vpop.permute.xlu0 %4329 }
0x1f7f   : > { %v4343_v14 = vsel %vm997_vm2, %v4330_v39, 0.0 }
0x1f82   : > { %v4332_v52 = vpop.permute.xlu0 %4331 }
0x1f83   : > { %v4346_v38 = vsel %vm997_vm2, %v4332_v52, 0.0 }
0x1f87   : > { %v9865_v4 = vpop.f32.mrb[46].mxu1 }
0x1f88   : > { %v12112_v24 = vadd.f32 %v9865_v4, %v3872_v43  ;;  %v3951_v63 = vpop.f32.mrb[47].mxu1 }
0x1f89   : > { %v12115_v40 = vadd.f32 %v3951_v63, %v3872_v43  ;;  %4338 = vadd.xlane.f32.xlu0 %v4337_v55 }
0x1f8b   : > { %v9868_v57 = vpop.f32.mrb[48].mxu1 }
0x1f8c   : > { %v12117_v26 = vadd.f32 %v9868_v57, %v3872_v43  ;;  %v3961_v12 = vpop.f32.mrb[49].mxu1 }
0x1f8d   : > { %v12119_v13 = vadd.f32 %v3961_v12, %v3872_v43 }
0x1f92   : > { %4341 = vadd.xlane.f32.xlu1 %v4340_v2 }
0x1f96   : > { %4347 = vadd.xlane.f32.xlu1 %v4346_v38 }
0x1fa7   : > { %4372 = vrot.lane.b32.xlu1 %v4276_v49, %s13324_s13  ;;  %v4222_v37 = vpop.permute.xlu0 %4221  ;;  %s9253_s13 = sld [smem:[#allocation2 + $0x202]] }
0x1fa8   : > { %v4233_v4 = vsel %vm997_vm2, %v4222_v37, 0.0 }
0x1fa9   : > { %4234 = vadd.xlane.f32.xlu0 %v4233_v4 }
0x1fab   : > { %v4224_v63 = vpop.permute.xlu0 %4223 }
0x1fac   : > { %v4236_v55 = vsel %vm997_vm2, %v4224_v63, 0.0 }
0x1faf   : > { %v4366_v57 = vpop.permute.xlu0 %4365 }
0x1fcb   : > { %4237 = vadd.xlane.f32.xlu1 %v4236_v55 }
0x1fdc   : > { %4278 = vrot.lane.b32.xlu1 %v4276_v49, %s13378_s12  ;;  %v4226_v12 = vpop.permute.xlu0 %4225 }
0x1fe0   : > { %4437 = vrot.lane.b32.xlu1 %v11949_v17, %s13378_s12  ;;  %v4228_v16 = vpop.permute.xlu1 %4227  ;;  %v4239_v17 = vsel %vm997_vm2, %v4226_v12, 0.0 }
0x1fe1   : > { %v4242_v43 = vsel %vm997_vm2, %v4228_v16, 0.0 }
0x1fe2   : > { %4243 = vadd.xlane.f32.xlu0 %v4242_v43 }
0x1fe6   : > { %4344 = vadd.xlane.f32.xlu0 %v4343_v14  ;;  %v4386_v14 = vstv %s9119_s26  ;;  %s9121_s26 = sld [smem:[#allocation2 + $0x180]] }
0x1ffc   : > { %4266 = vrot.lane.b32.xlu0 %v4264_v54, %s13378_s12 }
0x2000   : > { %4439 = vrot.lane.b32.xlu0 %v11947_v58, %s13378_s12 }
0x2016   : > { %v4339_v2 = vpop.xlane.xlu0 %4338 }
0x2017   : > { %v4349_v52 = vmul.f32 0.125, %v4339_v2 }
0x2019   : > { %v4353_v38 = vadd.f32 1e-05, %v4349_v52 }
0x201b   : > { %10760 = vrsqrt.f32 %v4353_v38 }
0x201f   : > { %4240 = vadd.xlane.f32.xlu0 %v4239_v17  ;;  %v4342_v49 = vpop.xlane.xlu1 %4341  ;;  %v12139_v17 = vpop.f32.mrb[30].mxu0 }
0x2020   : > { %v4350_v37 = vmul.f32 0.125, %v4342_v49 }
0x2022   : > { %v4354_v4 = vadd.f32 1e-05, %v4350_v37  ;;  %v9897_v37 = vpop.f32.mrb[31].mxu0 }
0x2023   : > { %v4348_v39 = vpop.xlane.xlu1 %4347 }
0x2024   : > { %10762 = vrsqrt.f32 %v4354_v4  ;;  %v4352_v63 = vmul.f32 0.125, %v4348_v39 }
0x2025   : > { %v10761_v54 = vpop.eup %10760 }
0x2026   : > { %v4356_v55 = vadd.f32 1e-05, %v4352_v63  ;;  %v4361_v58 = vmul.f32 %v10761_v54, %v12042_v42 }
0x2027   : > { %v4373_v16 = vpop.permute.xlu1 %4372 }
0x2028   : > { %10764 = vrsqrt.f32 %v4356_v55  ;;  %v4368_v43 = vmul.f32 %v4366_v57, %v4361_v58 }
0x202a   : > { %v4375_v2 = vadd.f32 %v4373_v16, %v4368_v43 }
0x202c   : > { %v4387_v52 = vmul.f32 %v4386_v14, %v4375_v2 }
0x202e   : > { %v10763_v38 = vpop.eup %10762  ;;  %4395 = vrot.lane.b32.xlu1 %v4387_v52, %s13370_s8 }
0x202f   : > { %v4362_v12 = vmul.f32 %v10763_v38, %v12039_v60  ;;  %v4460_v60 = vstv %s9122_s6  ;;  %s9123_s6 = sld [smem:[#allocation2 + $0x182]] }
0x2031   : > { %v4369_v49 = vmul.f32 %v4366_v57, %v4362_v12 }
0x2032   : > { %v10765_v4 = vpop.eup %10764 }
0x2033   : > { %v4364_v39 = vmul.f32 %v10765_v4, %v12056_v61  ;;  %v4376_v63 = vadd.f32 %v4373_v16, %v4369_v49 }
0x2035   : > { %v4371_v42 = vmul.f32 %v4366_v57, %v4364_v39  ;;  %v4388_v54 = vmul.f32 %v4386_v14, %v4376_v63  ;;  %v4462_v61 = vmul.f32 %v4460_v60, %v4376_v63 }
0x2036   : > { %v4235_v52 = vpop.xlane.xlu0 %4234 }
0x2037   : > { %v4378_v55 = vadd.f32 %v4373_v16, %v4371_v42  ;;  %4397 = vrot.lane.b32.xlu0 %v4388_v54, %s13370_s8  ;;  %v4245_v42 = vmul.f32 0.125, %v4235_v52 }
0x2039   : > { %v4390_v58 = vmul.f32 %v4386_v14, %v4378_v55  ;;  %v4464_v43 = vmul.f32 %v4460_v60, %v4378_v55  ;;  %v4461_v55 = vmul.f32 %v4460_v60, %v4375_v2 }
0x203b   : > { %4401 = vrot.lane.b32.xlu1 %v4390_v58, %s13370_s8  ;;  %4423 = vrot.lane.b32.xlu0 %v12112_v24, %s13378_s12  ;;  %v4249_v58 = vadd.f32 1e-05, %v4245_v42 }
0x203f   : > { %4421 = vrot.lane.b32.xlu0 %v12115_v40, %s13378_s12 }
0x2043   : > { %4427 = vrot.lane.b32.xlu0 %v12117_v26, %s13378_s12 }
0x2047   : > { %4443 = vrot.lane.b32.xlu0 %v11959_v5, %s13378_s12 }
0x204b   : > { %4471 = vrot.lane.b32.xlu0 %v4462_v61, %s13370_s8 }
0x204f   : > { %4475 = vrot.lane.b32.xlu0 %v4464_v43, %s13370_s8 }
0x2058   : > { %v4238_v5 = vpop.xlane.xlu1 %4237 }
0x2059   : > { %v4246_v63 = vmul.f32 0.125, %v4238_v5 }
0x205b   : > { %v4250_v54 = vadd.f32 1e-05, %v4246_v63 }
0x206f   : > { %v4244_v38 = vpop.xlane.xlu0 %4243 }
0x2070   : > { %v4248_v61 = vmul.f32 0.125, %v4244_v38 }
0x2073   : > { %v4345_v24 = vpop.xlane.xlu0 %4344 }
0x2074   : > { %v4351_v12 = vmul.f32 0.125, %v4345_v24 }
0x2076   : > { %v4355_v49 = vadd.f32 1e-05, %v4351_v12 }
0x2078   : > { %10766 = vrsqrt.f32 %v4355_v49 }
0x2079   : > { %10768 = vrsqrt.f32 %v4250_v54 }
0x207a   : > { %10770 = vrsqrt.f32 %v4249_v58  ;;  %v4412_v58 = vstv %s9120_s3  ;;  %s13395_s3 = sld [smem:[#allocation22_spill]] }
0x2082   : > { %v10767_v40 = vpop.eup %10766 }
0x2083   : > { %v4363_v37 = vmul.f32 %v10767_v40, %v12051_v25 }
0x2085   : > { %v4370_v26 = vmul.f32 %v4366_v57, %v4363_v37  ;;  %v4252_v57 = vadd.f32 1e-05, %v4248_v61  ;;  %v4380_v37 = vstv %s9118_s29  ;;  %s13391_s29 = sld [smem:[#allocation23_spill]] }
0x2087   : > { %v4377_v4 = vadd.f32 %v4373_v16, %v4370_v26  ;;  %10772 = vrsqrt.f32 %v4252_v57  ;;  %v10769_v16 = vpop.eup %10768 }
0x2088   : > { %v4258_v43 = vmul.f32 %v10769_v16, %v12068_v45 }
0x2089   : > { %v4389_v39 = vmul.f32 %v4386_v14, %v4377_v4  ;;  %v4463_v25 = vmul.f32 %v4460_v60, %v4377_v4  ;;  %v10771_v14 = vpop.eup %10770  ;;  %v918_v4 = vld [vmem:[%s13388_s24] sm:$0xff] }
0x208a   : > { %v4257_v2 = vmul.f32 %v10771_v14, %v12063_v1  ;;  %v919_v1 = vld [vmem:[%s13388_s24 + $0x8] sm:$0xff]  ;;  %s13399_s24 = sld [smem:[#allocation30_spill]] }
0x208b   : > { %4399 = vrot.lane.b32.xlu1 %v4389_v39, %s13370_s8  ;;  %v10322_v39 = vpack.c.bf16 %v919_v1, %v918_v4 }
0x208d   : > { %10323 = vmatprep.subr.bf16.mxu1 %v10322_v39 }
0x208e   : > { %10325 = vmatpush3.bf16.msra.mxu1 %v10322_v39 }
0x208f   : > { %4425 = vrot.lane.b32.xlu1 %v12119_v13, %s13378_s12  ;;  %v4267_v13 = vpop.permute.xlu0 %4266  ;;  %9898 = vmatprep.subr.mxu1 %v11017_v6 }
0x2090   : > { %v4270_v52 = vmul.f32 %v4267_v13, %v4258_v43  ;;  %v4269_v12 = vmul.f32 %v4267_v13, %v4257_v2 }
0x2091   : > { %v10773_v38 = vpop.eup %10772 }
0x2092   : > { %v4260_v60 = vmul.f32 %v10773_v38, %v12105_v50 }
0x2093   : > { %4441 = vrot.lane.b32.xlu1 %v11955_v46, %s13378_s12  ;;  %v4279_v46 = vpop.permute.xlu1 %4278  ;;  %v4440_v24 = vpop.permute.xlu0 %4439 }
0x2094   : > { %v12165_v49 = vadd.f32 %v4279_v46, %v4270_v52  ;;  %v12173_v45 = vadd.f32 %v4279_v46, %v4269_v12  ;;  %v4272_v5 = vmul.f32 %v4267_v13, %v4260_v60 }
0x2096   : > { %v4382_v63 = vmul.f32 %v4380_v37, %v12165_v49  ;;  %v4381_v54 = vmul.f32 %v4380_v37, %v12173_v45 }
0x2097   : > { %4469 = vrot.lane.b32.xlu1 %v4461_v55, %s13370_s8  ;;  %v4438_v40 = vpop.permute.xlu1 %4437 }
0x209b   : > { %4473 = vrot.lane.b32.xlu1 %v4463_v25, %s13370_s8  ;;  %v12178_v25 = vadd.f32 %v4279_v46, %v4272_v5 }
0x209d   : > { %v4384_v52 = vmul.f32 %v4380_v37, %v12178_v25 }
0x20a0   : > { %v4396_v50 = vpop.permute.xlu1 %4395 }
0x20a1   : > { %v4407_v61 = vadd.f32 %v4396_v50, %v4381_v54 }
0x20a3   : > { %v4413_v2 = vadd.f32 %v4412_v58, %v4407_v61 }
0x20ac   : > { %v4241_v26 = vpop.xlane.xlu0 %4240 }
0x20ad   : > { %v4402_v43 = vpop.permute.xlu1 %4401  ;;  %v4247_v54 = vmul.f32 0.125, %v4241_v26 }
0x20ae   : > { %v4410_v60 = vadd.f32 %v4402_v43, %v4384_v52 }
0x20b0   : > { %v4398_v42 = vpop.permute.xlu0 %4397 }
0x20b1   : > { %v4408_v55 = vadd.f32 %v4398_v42, %v4382_v63  ;;  %v4416_v63 = vadd.f32 %v4412_v58, %v4410_v60 }
0x20b3   : > { %v4414_v57 = vadd.f32 %v4412_v58, %v4408_v55 }
0x20b4   : > { %v4424_v16 = vpop.permute.xlu0 %4423 }
0x20b5   : > { %v4434_v14 = vadd.f32 %v4424_v16, %v4414_v57 }
0x20b7   : > { %v4450_v38 = vmul.f32 %v4440_v24, %v4434_v14  ;;  %v4251_v24 = vadd.f32 1e-05, %v4247_v54 }
0x20b8   : > { %v4422_v12 = vpop.permute.xlu0 %4421 }
0x20b9   : > { %v4433_v4 = vadd.f32 %v4422_v12, %v4413_v2  ;;  %4505 = vrot.lane.b32.xlu0 %v4450_v38, %s13372_s28  ;;  %10774 = vrsqrt.f32 %v4251_v24 }
0x20bb   : > { %v4449_v1 = vmul.f32 %v4438_v40, %v4433_v4 }
0x20bc   : > { %v4428_v39 = vpop.permute.xlu0 %4427 }
0x20bd   : > { %4503 = vrot.lane.b32.xlu1 %v4449_v1, %s13372_s28  ;;  %v4436_v5 = vadd.f32 %v4428_v39, %v4416_v63  ;;  %v4454_v63 = vstv %s9121_s26  ;;  %s13396_s26 = sld [smem:[#allocation24_spill]] }
0x20be   : > { %v4456_v54 = vmul.f32 %v4454_v63, %v12165_v49  ;;  %v4458_v49 = vmul.f32 %v4454_v63, %v12178_v25 }
0x20c0   : > { %v4444_v50 = vpop.permute.xlu0 %4443 }
0x20c1   : > { %v4452_v42 = vmul.f32 %v4444_v50, %v4436_v5 }
0x20c3   : > { %4509 = vrot.lane.b32.xlu0 %v4452_v42, %s13372_s28  ;;  %v10775_v55 = vpop.eup %10774  ;;  %v4455_v42 = vmul.f32 %v4454_v63, %v12173_v45 }
0x20c4   : > { %v4259_v61 = vmul.f32 %v10775_v55, %v12100_v21  ;;  %v4472_v50 = vpop.permute.xlu0 %4471 }
0x20c5   : > { %v4482_v55 = vadd.f32 %v4472_v50, %v4456_v54 }
0x20c6   : > { %v4271_v57 = vmul.f32 %v4267_v13, %v4259_v61 }
0x20c7   : > { %5007 = vrot.lane.b32.xlu0 %v12139_v17, %s13371_s7 }
0x20c8   : > { %v4283_v40 = vadd.f32 %v4279_v46, %v4271_v57 }
0x20ca   : > { %v4383_v14 = vmul.f32 %v4380_v37, %v4283_v40  ;;  %v4457_v21 = vmul.f32 %v4454_v63, %v4283_v40  ;;  %v4486_v37 = vstv %s9123_s6  ;;  %s13397_s6 = sld [smem:[#allocation25_spill]] }
0x20cb   : > { %v4488_v57 = vadd.f32 %v4486_v37, %v4482_v55  ;;  %v4658_v55 = vadd.f32 %v11717_v34, %v11288_v19 }
0x20cd   : > { %v4492_v40 = vadd.f32 %v4488_v57, %v4424_v16 }
0x20fd   : > { %v4400_v43 = vpop.permute.xlu1 %4399 }
0x20fe   : > { %v4409_v2 = vadd.f32 %v4400_v43, %v4383_v14  ;;  %v4476_v14 = vpop.permute.xlu0 %4475 }
0x20ff   : > { %v4484_v45 = vadd.f32 %v4476_v14, %v4458_v49  ;;  %v12235_v14 = vmul.f32 0.5, %v4658_v55 }
0x2100   : > { %v4415_v52 = vadd.f32 %v4412_v58, %v4409_v2 }
0x2101   : > { %v4426_v38 = vpop.permute.xlu1 %4425 }
0x2102   : > { %v4435_v60 = vadd.f32 %v4426_v38, %v4415_v52 }
0x2105   : > { %v4442_v4 = vpop.permute.xlu1 %4441 }
0x2106   : > { %v4451_v1 = vmul.f32 %v4442_v4, %v4435_v60  ;;  %v4496_v60 = vmul.f32 %v4492_v40, %v12014_v62 }
0x2108   : > { %4507 = vrot.lane.b32.xlu1 %v4451_v1, %s13372_s28 }
0x2109   : > { %v4470_v26 = vpop.permute.xlu1 %4469 }
0x210a   : > { %v4481_v24 = vadd.f32 %v4470_v26, %v4455_v42  ;;  %v4490_v26 = vadd.f32 %v4486_v37, %v4484_v45 }
0x210c   : > { %4840 = vrot.lane.b32.xlu1 %v12139_v17, %s13370_s8  ;;  %v4487_v61 = vadd.f32 %v4486_v37, %v4481_v24 }
0x210d   : > { %v4474_v13 = vpop.permute.xlu1 %4473 }
0x210e   : > { %v4483_v46 = vadd.f32 %v4474_v13, %v4457_v21  ;;  %v4491_v43 = vadd.f32 %v4487_v61, %v4422_v12  ;;  %v4494_v12 = vadd.f32 %v4490_v26, %v4428_v39 }
0x2110   : > { %v4489_v5 = vadd.f32 %v4486_v37, %v4483_v46  ;;  %5005 = vrot.lane.b32.xlu1 %v12139_v17, %s13372_s28  ;;  %v4495_v52 = vmul.f32 %v4491_v43, %v12010_v41  ;;  %v4498_v41 = vmul.f32 %v4494_v12, %v12034_v32 }
0x2112   : > { %v4493_v58 = vadd.f32 %v4489_v5, %v4426_v38 }
0x2114   : > { %v4497_v21 = vmul.f32 %v4493_v58, %v12030_v47  ;;  %v4656_v58 = vadd.f32 %v11717_v34, %v11284_v15 }
0x2116   : > { %v12230_v42 = vmul.f32 0.5, %v4656_v58 }
0x212b   : > { %v4506_v2 = vpop.permute.xlu0 %4505 }
0x212c   : > { %v4516_v1 = vsel %vm997_vm2, %v4506_v2, %v4496_v60 }
0x212f   : > { %v4504_v4 = vpop.permute.xlu1 %4503 }
0x2130   : > { %v4515_v38 = vsel %vm997_vm2, %v4504_v4, %v4495_v52 }
0x2131   : > { %9881 = vmatprep.mubr.msk.f32.mxu1 %vm1335_vm3, %v4515_v38 }
0x2132   : > { %9882 = vmatmul.mubr.msk.f32.vlgmr.msra.gmra.mrb[50].mxu1 %vm1335_vm3, %v4516_v1 }
0x2135   : > { %v4510_v16 = vpop.permute.xlu0 %4509 }
0x2136   : > { %v4518_v46 = vsel %vm997_vm2, %v4510_v16, %v4498_v41 }
0x2139   : > { %v5008_v47 = vpop.permute.xlu0 %5007 }
0x217a   : > { %v4508_v62 = vpop.permute.xlu1 %4507 }
0x217b   : > { %v4517_v13 = vsel %vm997_vm2, %v4508_v62, %v4497_v21 }
0x217c   : > { %9884 = vmatprep.mubr.msk.f32.mxu1 %vm1335_vm3, %v4517_v13 }
0x217d   : > { %9885 = vmatmul.mubr.msk.f32.gmra.mrb[52].mxu1 %vm1335_vm3, %v4518_v46 }
0x217e   : > { %v4841_v5 = vpop.permute.xlu1 %4840  ;;  %9900 = vmatprep.mubr.msk.f32.mxu1 %vm11016_vm0, %v11017_v6 }
0x217f   : > { %9899 = vmatpush3.xpose.msk.msra.mxu1 %vm997_vm2, %v4841_v5 }
0x2180   : > { %9908 = vmatprep.subr.mxu1 %v11017_v6 }
0x2182   : > { %9901 = vmatmul.mubr.msk.f32.vlgmr.msra.gmra.mrb[54].mxu1 %vm997_vm2, %v12139_v17  ;;  %v5006_v32 = vpop.permute.xlu1 %5005 }
0x2183   : > { %9909 = vmatpush3.xpose.msk.msra.mxu1 %vm997_vm2, %v5008_v47  ;;  %9910 = vmatprep.mubr.msk.f32.mxu1 %vm11016_vm0, %v11017_v6 }
0x2184   : > { %10332 = vmatprep.subr.bf16.mxu1 %v11015_v3 }
0x2186   : > { %9911 = vmatmul.mubr.msk.f32.vlgmr.msra.gmra.mrb[56].mxu1 %vm997_vm2, %v5006_v32  ;;  %v9135_v32 = vld [vmem:[%s13390_s0 + $0x18] sm:$0xff]  ;;  %s13400_s0 = smov 24  }
0x2187   : > { %9922 = vmatprep.mubr.msk.f32.mxu1 %vm11016_vm0, %v11017_v6 }
0x2205   : > { %v12220_v25 = vpop.f32.mrb[50].mxu1 }
0x2206   : > { %v12222_v39 = vpop.f32.mrb[51].mxu1 }
0x2250   : > { %v12224_v63 = vpop.f32.mrb[52].mxu1 }
0x2251   : > { %v12226_v37 = vpop.f32.mrb[53].mxu1 }
0x2255   : > { %v4912_v50 = vpop.f32.mrb[54].mxu1 }
0x2256   : > { %v4916_v54 = vmul.f32 0.35355338, %v4912_v50  ;;  %v9902_v24 = vpop.f32.mrb[55].mxu1 }
0x2258   : > { %v4917_v61 = vadd.f32 %v4916_v54, %v12230_v42 }
0x2259   : > { %v5079_v57 = vpop.f32.mrb[56].mxu1 }
0x225a   : > { %v5083_v43 = vmul.f32 0.35355338, %v5079_v57  ;;  %v9912_v40 = vpop.f32.mrb[57].mxu1  ;;  %v4918_v2 = vsel %vm997_vm2, %v4917_v61, -inf }
0x225b   : > { %4919 = vmax.xlane.f32.xlu0 %v4918_v2 }
0x225c   : > { %v5084_v15 = vadd.f32 %v5083_v43, %v12235_v14  ;;  %v12267_v43 = vld [vmem:[%s13391_s29 + $0x8] sm:$0x3f]  ;;  %s9252_s29 = sld [smem:[#allocation2 + $0x201]] }
0x225d   : > { %v5180_v40 = vrot.slane %v12267_v43, %v11319_v51 }
0x225e   : > { %v5085_v52 = vsel %vm997_vm2, %v5084_v15, -inf }
0x225f   : > { %5086 = vmax.xlane.f32.xlu1 %v5085_v52 }
0x2270   : > { %4929 = vrot.lane.b32.xlu1 %v12139_v17, %s13375_s30 }
0x22e8   : > { %v4920_v60 = vpop.xlane.xlu0 %4919 }
0x22e9   : > { %v4921_v19 = vsub.f32 %v4917_v61, %v4920_v60 }
0x22eb   : > { %v4922_v34 = vmul.f32 1.442695, %v4921_v19 }
0x22ec   : > { %v5087_v4 = vpop.xlane.xlu1 %5086 }
0x22ed   : > { %10776 = vpow2.f32 %v4922_v34  ;;  %v5088_v38 = vsub.f32 %v5084_v15, %v5087_v4 }
0x22ef   : > { %v5089_v1 = vmul.f32 1.442695, %v5088_v38 }
0x22f0   : > { %v4930_v49 = vpop.permute.xlu1 %4929 }
0x22f1   : > { %10778 = vpow2.f32 %v5089_v1  ;;  %9904 = vmatpush3.msra.mxu0 %v4930_v49 }
0x22f2   : > { %9913 = vmatprep.subr.mxu0 %v11017_v6 }
0x22f7   : > { %v10777_v45 = vpop.eup %10776 }
0x22f8   : > { %v4924_v26 = vsel %vm997_vm2, %v10777_v45, 0.0 }
0x22f9   : > { %4925 = vadd.xlane.f32.xlu0 %v4924_v26  ;;  %v9139_v26 = vld [vmem:[%s13393_s11 + $0x58] sm:$0xff] }
0x22fb   : > { %v10779_v12 = vpop.eup %10778 }
0x22fc   : > { %v5091_v16 = vsel %vm997_vm2, %v10779_v12, 0.0 }
0x22fd   : > { %5092 = vadd.xlane.f32.xlu0 %v5091_v16  ;;  %v9138_v16 = vld [vmem:[%s13393_s11 + $0x50] sm:$0xff] }
0x2313   : > { %5096 = vrot.lane.b32.xlu0 %v12139_v17, %s13376_s2  ;;  %v9134_v17 = vld [vmem:[%s13389_s9 + $0x10] sm:$0xff] }
0x2314   : > { %v10333_v58 = vpack.c.bf16 %v9135_v32, %v9134_v17 }
0x2316   : > { %10334 = vmatpush3.bf16.msra.mxu1 %v10333_v58 }
0x2317   : > { %10343 = vmatprep.subr.bf16.mxu1 %v11015_v3 }
0x2386   : > { %v4926_v21 = vpop.xlane.xlu0 %4925 }
0x2387   : > { %10780 = vrcp.f32 %v4926_v21 }
0x238a   : > { %v5093_v41 = vpop.xlane.xlu0 %5092 }
0x238b   : > { %10782 = vrcp.f32 %v5093_v41  ;;  %v9141_v41 = vld [vmem:[%s13393_s11 + $0x68] sm:$0xff] }
0x238e   : > { %v5097_v46 = vpop.permute.xlu0 %5096 }
0x2391   : > { %v10781_v62 = vpop.eup %10780 }
0x2392   : > { %v4928_v13 = vmul.f32 %v10781_v62, %v10777_v45  ;;  %v9137_v45 = vld [vmem:[%s13392_s5 + $0x48] sm:$0xff]  ;;  %v9143_v62 = vld [vmem:[%s13393_s11 + $0x78] sm:$0xff]  ;;  %s13398_s5 = sld [smem:[#allocation26_spill]] }
0x2394   : > { %9906 = vmatmul.mubr.msk.f32.vlgmr.msra.gmra.mrb[32].mxu0 %vm997_vm2, %v4928_v13  ;;  %v9140_v13 = vld [vmem:[%s13393_s11 + $0x60] sm:$0xff] }
0x2395   : > { %v10783_v5 = vpop.eup %10782  ;;  %9914 = vmatpush3.msra.mxu0 %v5097_v46  ;;  %9915 = vmatprep.mubr.msk.f32.mxu0 %vm11016_vm0, %v11017_v6  ;;  %v10339_v46 = vpack.c.bf16 %v9143_v62, %v9141_v41  ;;  %v9157_v62 = vld [vmem:[%s13394_s27 + $0xe0] sm:$0xff] }
0x2396   : > { %v5095_v47 = vmul.f32 %v10783_v5, %v10779_v12  ;;  %v10335_v12 = vpack.c.bf16 %v9139_v26, %v9137_v45  ;;  %v9142_v5 = vld [vmem:[%s13393_s11 + $0x70] sm:$0xff]  ;;  %v9153_v26 = vld [vmem:[%s13394_s27 + $0xc0] sm:$0xff] }
0x2398   : > { %9916 = vmatmul.mubr.msk.f32.vlgmr.msra.gmra.mrb[34].mxu0 %vm997_vm2, %v5095_v47  ;;  %10336 = vmatprep.subr.bf16.mxu0 %v10335_v12  ;;  %v10341_v47 = vpack.c.bf16 %v9142_v5, %v9140_v13  ;;  %v9154_v12 = vld [vmem:[%s13394_s27 + $0xc8] sm:$0xff]  ;;  %v9159_v5 = vld [vmem:[%s13394_s27 + $0xf0] sm:$0xff] }
0x2399   : > { %5356 = vmatprep.mubr.f32.mxu0 %v11017_v6  ;;  %v9158_v13 = vld [vmem:[%s13394_s27 + $0xe8] sm:$0xff] }
0x2467   : > { %v5001_v50 = vpop.f32.mrb[32].mxu0 }
0x2468   : > { %v9907_v54 = vpop.f32.mrb[33].mxu0 }
0x246b   : > { %v5168_v24 = vpop.f32.mrb[34].mxu0 }
0x246c   : > { %5173 = vrot.lane.b32.xlu1 %v5168_v24, %s13378_s12  ;;  %v9917_v55 = vpop.f32.mrb[35].mxu0 }
0x246d   : > { %v5276_v55 = vrot.slane %v12267_v43, %v11359_v20 }
0x24de   : > { %v5174_v61 = vpop.permute.xlu1 %5173 }
0x24df   : > { %v5176_v57 = vsel %vm997_vm2, %v5001_v50, %v5174_v61  ;;  %v5271_v50 = vrot.slane %v12267_v43, %v11356_v18 }
0x24e0   : > { %9923 = vmatmul.mubr.msk.f32.vlgmr.msra.gmra.mrb[58].mxu1 %vm1335_vm3, %v5176_v57 }
0x24e1   : > { %9957 = vmatprep.mubr.msk.f32.mxu1 %vm11016_vm0, %v11017_v6 }
0x25b3   : > { %v5250_v2 = vpop.f32.mrb[58].mxu1 }
0x25b4   : > { %v5251_v15 = vadd.f32 %v5250_v2, %v5180_v40  ;;  %v9924_v52 = vpop.f32.mrb[59].mxu1  ;;  %v9145_v40 = vld [vmem:[%s13394_s27 + $0x80] sm:$0xff]  ;;  %v9146_v2 = vld [vmem:[%s13394_s27 + $0x88] sm:$0xff] }
0x25b5   : > { %v9147_v52 = vld [vmem:[%s13394_s27 + $0x90] sm:$0xff] }
0x25b6   : > { %v5254_v60 = vadd.f32 %v5251_v15, %v12092_v28  ;;  %v9136_v28 = vld [vmem:[%s13393_s11 + $0x40] sm:$0xff]  ;;  %v10344_v15 = vpack.c.bf16 %v9146_v2, %v9145_v40 }
0x25b7   : > { %v10337_v21 = vpack.c.bf16 %v9138_v16, %v9136_v28  ;;  %v9155_v28 = vld [vmem:[%s13394_s27 + $0xd0] sm:$0xff]  ;;  %v10356_v16 = vpack.c.bf16 %v9154_v12, %v9153_v26 }
0x25b8   : > { %v5255_v19 = vsel %vm920_vm1, %v5254_v60, 0.0  ;;  %10345 = vmatpush3.bf16.msra.mxu1 %v10344_v15 }
0x25b9   : > { %5256 = vadd.xlane.f32.xlu1 %v5255_v19  ;;  %10338 = vmatpush1.bf16.msra.mxu0 %v10337_v21  ;;  %v9156_v21 = vld [vmem:[%s13394_s27 + $0xd8] sm:$0xff] }
0x25ba   : > { %10340 = vmatprep.subr.bf16.mxu0 %v10339_v46  ;;  %10346 = vmatprep.subr.bf16.mxu1 %v11015_v3  ;;  %v10359_v41 = vpack.c.bf16 %v9156_v21, %v9155_v28  ;;  %v10362_v46 = vpack.c.bf16 %v9158_v13, %v9157_v62 }
0x25bd   : > { %10342 = vmatpush1.bf16.msra.mxu0 %v10341_v47  ;;  %v9160_v47 = vld [vmem:[%s13394_s27 + $0xf8] sm:$0xff] }
0x2646   : > { %v5257_v34 = vpop.xlane.xlu1 %5256 }
0x2647   : > { %v5258_v4 = vmul.f32 0.03125, %v5257_v34  ;;  %v9149_v34 = vld [vmem:[%s13394_s27 + $0xa0] sm:$0xff] }
0x2649   : > { %v5259_v38 = vsub.f32 %v5254_v60, %v5258_v4  ;;  %v9148_v60 = vld [vmem:[%s13394_s27 + $0x98] sm:$0xff]  ;;  %v9150_v4 = vld [vmem:[%s13394_s27 + $0xa8] sm:$0xff] }
0x264a   : > { %v10347_v19 = vpack.c.bf16 %v9148_v60, %v9147_v52 }
0x264b   : > { %v5260_v1 = vmul.f32 %v5259_v38, %v5259_v38 }
0x264c   : > { %10348 = vmatpush3.bf16.msra.mxu1 %v10347_v19 }
0x264d   : > { %v5261_v49 = vsel %vm920_vm1, %v5260_v1, 0.0  ;;  %10349 = vmatprep.subr.bf16.mxu1 %v11015_v3  ;;  %v9151_v1 = vld [vmem:[%s13394_s27 + $0xb0] sm:$0xff] }
0x264e   : > { %5262 = vadd.xlane.f32.xlu0 %v5261_v49  ;;  %v9152_v49 = vld [vmem:[%s13394_s27 + $0xb8] sm:$0xff] }
0x264f   : > { %v10353_v45 = vpack.c.bf16 %v9152_v49, %v9151_v1  ;;  %v5376_v49 = vrot.slane %v12267_v43, %v11430_v9 }
0x26db   : > { %v5263_v17 = vpop.xlane.xlu0 %5262 }
0x26dc   : > { %v5264_v32 = vmul.f32 0.03125, %v5263_v17  ;;  %v10365_v17 = vpack.c.bf16 %v9160_v47, %v9159_v5 }
0x26de   : > { %v5265_v58 = vadd.f32 1e-05, %v5264_v32  ;;  %v9144_v32 = vld [vmem:[%s13395_s3 + $0x2] sm:$0x3]  ;;  %s9255_s3 = sld [smem:[#allocation2 + $0x281]] }
0x26df   : > { %v5282_v52 = vrot.slane %v9144_v32, %v11319_v51 }
0x26e0   : > { %10784 = vrsqrt.f32 %v5265_v58  ;;  %v5286_v58 = vrot.slane %v9144_v32, %v11356_v18  ;;  %v5464_v32 = vrot.slane %v12267_v43, %v11438_v29 }
0x26ea   : > { %v10785_v54 = vpop.eup %10784 }
0x26eb   : > { %v5267_v24 = vmul.f32 %v10785_v54, %v5259_v38  ;;  %v10350_v38 = vpack.c.bf16 %v9150_v4, %v9149_v34 }
0x26ed   : > { %v5272_v61 = vmul.f32 %v5271_v50, %v5267_v24  ;;  %10351 = vmatpush3.bf16.msra.mxu1 %v10350_v38 }
0x26ee   : > { %10352 = vmatprep.subr.bf16.mxu1 %v11015_v3 }
0x26ef   : > { %v12302_v57 = vadd.f32 %v5276_v55, %v5272_v61 }
0x26f1   : > { %9200 = vmatmul.mubr.msk.f32.vlgmr.msra.gmra.mrb[36].mxu0 %vm920_vm1, %v12302_v57  ;;  %10354 = vmatpush3.bf16.msra.mxu1 %v10353_v45 }
0x26f2   : > { %10355 = vmatprep.subr.bf16.mxu1 %v11015_v3 }
0x26f5   : > { %10357 = vmatpush3.bf16.msra.mxu1 %v10356_v16 }
0x26f6   : > { %10358 = vmatprep.subr.bf16.mxu1 %v11015_v3 }
0x26f9   : > { %10360 = vmatpush3.bf16.msra.mxu1 %v10359_v41 }
0x26fa   : > { %10361 = vmatprep.subr.bf16.mxu1 %v11015_v3 }
0x26fd   : > { %10363 = vmatpush3.bf16.msra.mxu1 %v10362_v46 }
0x26fe   : > { %10364 = vmatprep.subr.bf16.mxu1 %v11015_v3 }
0x2701   : > { %10366 = vmatpush3.bf16.msra.mxu1 %v10365_v17 }
0x27c4   : > { %v5358_v50 = vpop.f32.mrb[36].mxu0 }
0x27c5   : > { %v5360_v54 = vpop.f32.mrb[37].mxu0  ;;  %v5359_v4 = vadd.f32 %v5358_v50, %v5282_v52 }
0x27c6   : > { %v5361_v24 = vadd.f32 %v5360_v54, %v5286_v58 }
0x27c8   : > { %v5364_v55 = vmul.f32 0.044715, %v5361_v24  ;;  %v5363_v19 = vmul.f32 0.5, %v5361_v24 }
0x27ca   : > { %v5365_v61 = vmul.f32 %v5364_v55, %v5361_v24  ;;  %v9161_v55 = vld [vmem:[%s13396_s26 + $0x8] sm:$0xff] }
0x27cb   : > { %9960 = vmatprep.subr.mxu0 %v9161_v55 }
0x27cc   : > { %v5366_v40 = vmul.f32 %v5365_v61, %v5361_v24  ;;  %9961 = vmatpush3.msra.mxu0 %v9161_v55 }
0x27ce   : > { %v5367_v2 = vadd.f32 %v5366_v40, %v5361_v24 }
0x27d0   : > { %v5368_v15 = vmul.f32 0.7978846, %v5367_v2 }
0x27d2   : > { %10786 = vtanh.f32 %v5368_v15 }
0x27dc   : > { %v10787_v60 = vpop.eup %10786 }
0x27dd   : > { %v5370_v34 = vadd.f32 1.0, %v10787_v60 }
0x27df   : > { %v5371_v38 = vmul.f32 %v5370_v34, %v5363_v19 }
0x27e1   : > { %v5372_v1 = vmul.f32 %v5371_v38, %v5359_v4 }
0x27e3   : > { %9958 = vmatmul.mubr.f32.vlgmr.msra.gmra.mrb[60].mxu1 %v5372_v1 }
0x28b6   : > { %v5443_v45 = vpop.f32.mrb[60].mxu1 }
0x28b7   : > { %v5444_v26 = vadd.f32 %v5443_v45, %v5376_v49  ;;  %v9959_v12 = vpop.f32.mrb[61].mxu1 }
0x28b9   : > { %v5447_v28 = vadd.f32 %v5444_v26, %v12302_v57  ;;  %v5469_v57 = vrot.slane %v12267_v43, %v11441_v30 }
0x28bb   : > { %v5448_v16 = vsel %vm920_vm1, %v5447_v28, 0.0 }
0x28bc   : > { %5449 = vadd.xlane.f32.xlu0 %v5448_v16 }
0x2949   : > { %v5450_v21 = vpop.xlane.xlu0 %5449 }
0x294a   : > { %v5451_v41 = vmul.f32 0.03125, %v5450_v21 }
0x294c   : > { %v5452_v62 = vsub.f32 %v5447_v28, %v5451_v41 }
0x294e   : > { %v5453_v13 = vmul.f32 %v5452_v62, %v5452_v62 }
0x2950   : > { %v5454_v46 = vsel %vm920_vm1, %v5453_v13, 0.0 }
0x2951   : > { %5455 = vadd.xlane.f32.xlu1 %v5454_v46 }
0x29de   : > { %v5456_v5 = vpop.xlane.xlu1 %5455 }
0x29df   : > { %v5457_v47 = vmul.f32 0.03125, %v5456_v5 }
0x29e1   : > { %v5458_v17 = vadd.f32 1e-05, %v5457_v47 }
0x29e3   : > { %10788 = vrsqrt.f32 %v5458_v17 }
0x29ed   : > { %v10789_v58 = vpop.eup %10788 }
0x29ee   : > { %v5460_v50 = vmul.f32 %v10789_v58, %v5452_v62 }
0x29f0   : > { %v5465_v54 = vmul.f32 %v5464_v32, %v5460_v50 }
0x29f2   : > { %v5470_v24 = vadd.f32 %v5469_v57, %v5465_v54  ;;  %v4661_v54 = vadd.f32 %v11864_v53, %v11512_v8 }
0x29f4   : > { %5471 = vxpose.xlu0.b32.start.end [1/1] (short) (narrow) %v5470_v24, 32  ;;  %v4660_v24 = vadd.f32 %v11867_v44, %v11514_v11  ;;  %v4669_v11 = vadd.f32 %v11864_v53, %v11534_v33 }
0x2a74   : > { %v12378_v61 = vpop.trf.xlu0 }
0x2a75   : > { %9962 = vmatprep.mubr.msk.f32.mxu0 %vm997_vm2, %v12378_v61 }
0x2a78   : > { %v12382_v40 = vpop.trf.xlu0 }
0x2a79   : > { %9963 = vmatmul.mubr.msk.f32.vlgmr.msra.gmra.mrb[38].mxu0 %vm997_vm2, %v12382_v40 }
0x2a7c   : > { %v12386_v43 = vpop.trf.xlu0 }
0x2a7d   : > { %9965 = vmatprep.mubr.msk.f32.mxu0 %vm997_vm2, %v12386_v43 }
0x2a80   : > { %v12390_v2 = vpop.trf.xlu0 }
0x2a81   : > { %9966 = vmatmul.mubr.msk.f32.gmra.mrb[40].mxu0 %vm997_vm2, %v12390_v2 }
0x2b4c   : > { %v9964_v15 = vpop.f32.mrb[38].mxu0 }
0x2b4d   : > { %v5581_v52 = vpop.f32.mrb[39].mxu0 }
0x2b4e   : > { %9976 = vmatprep.mubr.msk.f32.mxu0 %vm997_vm2, %v5581_v52  ;;  %v12395_v60 = vpack.i.bf16 %v9964_v15, %v5581_v52 }
0x2b50   : > { %10587 = vrot.lane.b32.xlu1 %v12395_v60, %s13370_s8 }
0x2b54   : > { %v9967_v19 = vpop.f32.mrb[40].mxu0 }
0x2b55   : > { %v5591_v34 = vpop.f32.mrb[41].mxu0 }
0x2b56   : > { %v12399_v4 = vpack.i.bf16 %v9967_v19, %v5591_v34 }
0x2b58   : > { %10592 = vrot.lane.b32.xlu1 %v12399_v4, %s13370_s8 }
0x2b5c   : > { %10597 = vrot.lane.b32.xlu1 %v12395_v60, %s13371_s7 }
0x2b60   : > { %10602 = vrot.lane.b32.xlu1 %v12399_v4, %s13371_s7 }
0x2b64   : > { %5874 = vrot.lane.b32.xlu1 %v5581_v52, %s13372_s28 }
0x2b68   : > { %5876 = vrot.lane.b32.xlu1 %v9964_v15, %s13372_s28 }
0x2b6c   : > { %5878 = vrot.lane.b32.xlu1 %v5591_v34, %s13372_s28 }
0x2b70   : > { %5880 = vrot.lane.b32.xlu1 %v9967_v19, %s13372_s28 }
0x2bc2   : > { %v10588_v38 = vpop.permute.xlu1 %10587 }
0x2bc3   : > { %v10590_v1 = vunpack.i.h.bf16 %v10588_v38  ;;  %v10589_v49 = vunpack.i.l.bf16 %v10588_v38 }
0x2bc5   : > { %v10367_v45 = vpack.c.bf16 %v10590_v1, %v10589_v49 }
0x2bc7   : > { %10369 = vmatprep.subr.msk.bf16.mxu0 %vm11485_vm4, %v10367_v45 }
0x2bc8   : > { %10372 = vmatpush3.bf16.xpose.msk.msra.mxu0 %vm11485_vm4, %v10367_v45 }
0x2bca   : > { %v10593_v26 = vpop.permute.xlu1 %10592 }
0x2bcb   : > { %v10595_v12 = vunpack.i.h.bf16 %v10593_v26  ;;  %v10594_v28 = vunpack.i.l.bf16 %v10593_v26 }
0x2bcd   : > { %v10373_v16 = vpack.c.bf16 %v10595_v12, %v10594_v28  ;;  %v4668_v28 = vadd.f32 %v11867_v44, %v11520_v22 }
0x2bce   : > { %v10598_v21 = vpop.permute.xlu1 %10597 }
0x2bcf   : > { %v10600_v41 = vunpack.i.h.bf16 %v10598_v21  ;;  %v10599_v62 = vunpack.i.l.bf16 %v10598_v21  ;;  %10375 = vmatprep.subr.msk.bf16.mxu0 %vm11485_vm4, %v10373_v16  ;;  %v4671_v21 = vadd.f32 %v11877_v36, %v11526_v27 }
0x2bd0   : > { %10378 = vmatpush3.bf16.xpose.msk.msra.mxu0 %vm11485_vm4, %v10373_v16 }
0x2bd1   : > { %v10387_v13 = vpack.c.bf16 %v10600_v41, %v10599_v62  ;;  %v12452_v41 = vmul.f32 0.5, %v4669_v11  ;;  %v12459_v33 = vmul.f32 0.5, %v4671_v21 }
0x2bd2   : > { %v10603_v46 = vpop.permute.xlu1 %10602 }
0x2bd3   : > { %v10605_v5 = vunpack.i.h.bf16 %v10603_v46  ;;  %v10604_v47 = vunpack.i.l.bf16 %v10603_v46  ;;  %10389 = vmatprep.subr.msk.bf16.mxu1 %vm11485_vm4, %v10387_v13 }
0x2bd4   : > { %10392 = vmatpush3.bf16.xpose.msk.msra.mxu1 %vm11485_vm4, %v10387_v13 }
0x2bd5   : > { %v10393_v17 = vpack.c.bf16 %v10605_v5, %v10604_v47  ;;  %v4663_v5 = vadd.f32 %v11877_v36, %v11522_v23  ;;  %v4662_v23 = vadd.f32 %v11872_v59, %v11530_v31 }
0x2bd6   : > { %v5875_v32 = vpop.permute.xlu1 %5874 }
0x2bd7   : > { %9977 = vmatmul.mubr.msk.f32.vlgmr.msra.gmra.mrb[42].mxu0 %vm997_vm2, %v9964_v15  ;;  %10395 = vmatprep.subr.msk.bf16.mxu1 %vm11485_vm4, %v10393_v17  ;;  %v12438_v15 = vmul.f32 0.5, %v4661_v54 }
0x2bd8   : > { %10004 = vmatprep.mubr.msk.f32.mxu1 %vm997_vm2, %v5875_v32  ;;  %9979 = vmatprep.mubr.msk.f32.mxu0 %vm997_vm2, %v5591_v34  ;;  %v12440_v34 = vmul.f32 0.5, %v4660_v24 }
0x2bda   : > { %v5877_v58 = vpop.permute.xlu1 %5876 }
0x2bdb   : > { %9980 = vmatmul.mubr.msk.f32.gmra.mrb[44].mxu0 %vm997_vm2, %v9967_v19 }
0x2bdc   : > { %10398 = vmatpush3.bf16.xpose.msk.msra.mxu1 %vm11485_vm4, %v10393_v17  ;;  %v12457_v17 = vmul.f32 0.5, %v4668_v28 }
0x2bde   : > { %v5879_v50 = vpop.permute.xlu1 %5878 }
0x2be2   : > { %v5881_v57 = vpop.permute.xlu1 %5880 }
0x2be3   : > { %10005 = vmatmul.mubr.msk.f32.vlgmr.msra.gmra.mrb[62].mxu1 %vm997_vm2, %v5877_v58 }
0x2be4   : > { %10007 = vmatprep.mubr.msk.f32.mxu1 %vm997_vm2, %v5879_v50  ;;  %v12463_v50 = vmul.f32 0.5, %v4663_v5 }
0x2be7   : > { %10008 = vmatmul.mubr.msk.f32.gmra.mrb[64].mxu1 %vm997_vm2, %v5881_v57 }
0x2caa   : > { %v9978_v55 = vpop.f32.mrb[42].mxu0 }
0x2cab   : > { %v5714_v52 = vmul.f32 0.35355338, %v9978_v55  ;;  %v5694_v19 = vpop.f32.mrb[43].mxu0 }
0x2cac   : > { %v5713_v38 = vmul.f32 0.35355338, %v5694_v19  ;;  %v4670_v19 = vadd.f32 %v11872_v59, %v11538_v35 }
0x2cad   : > { %v5718_v1 = vadd.f32 %v5714_v52, %v12438_v15  ;;  %v12471_v52 = vmul.f32 0.5, %v4662_v23 }
0x2cae   : > { %v5717_v49 = vadd.f32 %v5713_v38, %v12440_v34  ;;  %v9981_v45 = vpop.f32.mrb[44].mxu0 }
0x2caf   : > { %v5704_v26 = vpop.f32.mrb[45].mxu0  ;;  %v5724_v12 = vsel %vm920_vm1, %v5718_v1, -inf  ;;  %v5716_v22 = vmul.f32 0.35355338, %v9981_v45 }
0x2cb0   : > { %5725 = vmax.xlane.f32.xlu1 %v5724_v12  ;;  %v5721_v8 = vsel %vm920_vm1, %v5717_v49, -inf  ;;  %v5715_v54 = vmul.f32 0.35355338, %v5704_v26  ;;  %v12479_v12 = vmul.f32 0.5, %v4670_v19 }
0x2cb1   : > { %5722 = vmax.xlane.f32.xlu0 %v5721_v8  ;;  %v5720_v57 = vadd.f32 %v5716_v22, %v12463_v50 }
0x2cb2   : > { %v12476_v38 = vadd.f32 %v5715_v54, %v12471_v52 }
0x2cb3   : > { %v5730_v45 = vsel %vm920_vm1, %v5720_v57, -inf }
0x2cb4   : > { %v5727_v8 = vsel %vm920_vm1, %v12476_v38, -inf }
0x2cb6   : > { %v10006_v16 = vpop.f32.mrb[62].mxu1 }
0x2cb7   : > { %v5992_v62 = vmul.f32 0.35355338, %v10006_v16  ;;  %v5972_v13 = vpop.f32.mrb[63].mxu1 }
0x2cb8   : > { %v5991_v46 = vmul.f32 0.35355338, %v5972_v13 }
0x2cb9   : > { %v5996_v47 = vadd.f32 %v5992_v62, %v12452_v41 }
0x2cba   : > { %v10009_v53 = vpop.f32.mrb[64].mxu1  ;;  %v5995_v44 = vadd.f32 %v5991_v46, %v12457_v17 }
0x2cbb   : > { %v5994_v32 = vmul.f32 0.35355338, %v10009_v53  ;;  %v5982_v27 = vpop.f32.mrb[65].mxu1  ;;  %v6002_v58 = vsel %vm920_vm1, %v5996_v47, -inf }
0x2cbc   : > { %6003 = vmax.xlane.f32.xlu1 %v6002_v58  ;;  %v5999_v24 = vsel %vm920_vm1, %v5995_v44, -inf  ;;  %v5993_v31 = vmul.f32 0.35355338, %v5982_v27 }
0x2cbd   : > { %v5998_v36 = vadd.f32 %v5994_v32, %v12459_v33 }
0x2cbe   : > { %v5997_v26 = vadd.f32 %v5993_v31, %v12479_v12 }
0x2cbf   : > { %v6008_v55 = vsel %vm920_vm1, %v5998_v36, -inf }
0x2cc0   : > { %6000 = vmax.xlane.f32.xlu1 %v5999_v24  ;;  %6009 = vmax.xlane.f32.xlu0 %v6008_v55  ;;  %v6005_v11 = vsel %vm920_vm1, %v5997_v26, -inf }
0x2cc4   : > { %5731 = vmax.xlane.f32.xlu1 %v5730_v45 }
0x2cc8   : > { %5728 = vmax.xlane.f32.xlu1 %v5727_v8 }
0x2ccc   : > { %6006 = vmax.xlane.f32.xlu1 %v6005_v11 }
0x2cdd   : > { %10607 = vrot.lane.b32.xlu1 %v12395_v60, %s13375_s30 }
0x2d3d   : > { %v5726_v35 = vpop.xlane.xlu1 %5725 }
0x2d3e   : > { %v5734_v59 = vsub.f32 %v5718_v1, %v5726_v35  ;;  %v5723_v28 = vpop.xlane.xlu0 %5722 }
0x2d3f   : > { %v5733_v16 = vsub.f32 %v5717_v49, %v5723_v28 }
0x2d40   : > { %v5739_v21 = vmul.f32 1.442695, %v5734_v59 }
0x2d41   : > { %v5737_v62 = vmul.f32 1.442695, %v5733_v16 }
0x2d42   : > { %10790 = vpow2.f32 %v5739_v21 }
0x2d43   : > { %10792 = vpow2.f32 %v5737_v62 }
0x2d49   : > { %v6004_v13 = vpop.xlane.xlu1 %6003 }
0x2d4a   : > { %v6012_v46 = vsub.f32 %v5996_v47, %v6004_v13 }
0x2d4c   : > { %v12487_v5 = vpop.eup %10790  ;;  %v6017_v53 = vmul.f32 1.442695, %v6012_v46 }
0x2d4d   : > { %v10793_v22 = vpop.eup %10792  ;;  %v6001_v32 = vpop.xlane.xlu1 %6000  ;;  %v5748_v58 = vsel %vm920_vm1, %v12487_v5, 0.0 }
0x2d4e   : > { %v6010_v27 = vpop.xlane.xlu0 %6009  ;;  %10794 = vpow2.f32 %v6017_v53  ;;  %v6011_v23 = vsub.f32 %v5995_v44, %v6001_v32  ;;  %5749 = vadd.xlane.f32.xlu0 %v5748_v58  ;;  %v5745_v1 = vsel %vm920_vm1, %v10793_v22, 0.0 }
0x2d4f   : > { %5746 = vadd.xlane.f32.xlu1 %v5745_v1  ;;  %v6014_v54 = vsub.f32 %v5998_v36, %v6010_v27 }
0x2d50   : > { %v6015_v49 = vmul.f32 1.442695, %v6011_v23 }
0x2d51   : > { %v5732_v24 = vpop.xlane.xlu1 %5731  ;;  %v6021_v55 = vmul.f32 1.442695, %v6014_v54 }
0x2d52   : > { %10796 = vpow2.f32 %v6015_v49  ;;  %v5736_v47 = vsub.f32 %v5720_v57, %v5732_v24 }
0x2d54   : > { %v5743_v19 = vmul.f32 1.442695, %v5736_v47 }
0x2d55   : > { %v5729_v31 = vpop.xlane.xlu1 %5728 }
0x2d56   : > { %10798 = vpow2.f32 %v5743_v19  ;;  %v5735_v46 = vsub.f32 %v12476_v38, %v5729_v31 }
0x2d57   : > { %10800 = vpow2.f32 %v6021_v55 }
0x2d58   : > { %v12492_v45 = vpop.eup %10794  ;;  %v5741_v53 = vmul.f32 1.442695, %v5735_v46 }
0x2d59   : > { %v6007_v8 = vpop.xlane.xlu1 %6006  ;;  %v6026_v44 = vsel %vm920_vm1, %v12492_v45, 0.0 }
0x2d5a   : > { %6027 = vadd.xlane.f32.xlu0 %v6026_v44  ;;  %v6013_v32 = vsub.f32 %v5997_v26, %v6007_v8  ;;  %10802 = vpow2.f32 %v5741_v53 }
0x2d5c   : > { %v12496_v11 = vpop.eup %10796  ;;  %v6019_v27 = vmul.f32 1.442695, %v6013_v32 }
0x2d5d   : > { %v10608_v35 = vpop.permute.xlu1 %10607  ;;  %v6023_v36 = vsel %vm920_vm1, %v12496_v11, 0.0 }
0x2d5e   : > { %v10610_v59 = vunpack.i.h.bf16 %v10608_v35  ;;  %v10609_v57 = vunpack.i.l.bf16 %v10608_v35  ;;  %6024 = vadd.xlane.f32.xlu1 %v6023_v36  ;;  %10804 = vpow2.f32 %v6019_v27 }
0x2d60   : > { %v12500_v28 = vpop.eup %10798  ;;  %v10379_v16 = vpack.c.bf16 %v10610_v59, %v10609_v57 }
0x2d61   : > { %v5754_v21 = vsel %vm920_vm1, %v12500_v28, 0.0  ;;  %v12504_v62 = vpop.eup %10800 }
0x2d62   : > { %5755 = vadd.xlane.f32.xlu0 %v5754_v21  ;;  %10380 = vmatprep.subr.bf16.mxu0 %v10379_v16  ;;  %v6032_v13 = vsel %vm920_vm1, %v12504_v62, 0.0 }
0x2d63   : > { %10382 = vmatpush3.bf16.msra.mxu0 %v10379_v16 }
0x2d64   : > { %v10803_v58 = vpop.eup %10802 }
0x2d65   : > { %v5751_v23 = vsel %vm920_vm1, %v10803_v58, 0.0 }
0x2d66   : > { %6033 = vadd.xlane.f32.xlu0 %v6032_v13 }
0x2d68   : > { %v10805_v1 = vpop.eup %10804 }
0x2d69   : > { %v6029_v49 = vsel %vm920_vm1, %v10805_v1, 0.0 }
0x2d6f   : > { %10617 = vrot.lane.b32.xlu1 %v12395_v60, %s13376_s2 }
0x2d7c   : > { %10612 = vrot.lane.b32.xlu0 %v12399_v4, %s13375_s30 }
0x2d93   : > { %5752 = vadd.xlane.f32.xlu1 %v5751_v23 }
0x2d97   : > { %6030 = vadd.xlane.f32.xlu1 %v6029_v49 }
0x2da8   : > { %10622 = vrot.lane.b32.xlu1 %v12399_v4, %s13376_s2  ;;  %s9251_s2 = sld [smem:[#allocation2 + $0x200]] }
0x2ddb   : > { %v5750_v38 = vpop.xlane.xlu0 %5749 }
0x2ddc   : > { %v5747_v60 = vpop.xlane.xlu1 %5746 }
0x2ddd   : > { %10806 = vrcp.f32 %v5747_v60 }
0x2dde   : > { %10808 = vrcp.f32 %v5750_v38 }
0x2de7   : > { %v10807_v54 = vpop.eup %10806  ;;  %v6028_v26 = vpop.xlane.xlu0 %6027 }
0x2de8   : > { %v5761_v24 = vmul.f32 %v10807_v54, %v10793_v22  ;;  %v10809_v4 = vpop.eup %10808 }
0x2de9   : > { %v5762_v22 = vmul.f32 %v10809_v4, %v12487_v5 }
0x2dea   : > { %9990 = vmatprep.mubr.msk.f32.mxu0 %vm920_vm1, %v5761_v24 }
0x2deb   : > { %v6025_v47 = vpop.xlane.xlu1 %6024 }
0x2dec   : > { %10810 = vrcp.f32 %v6025_v47 }
0x2def   : > { %v5756_v55 = vpop.xlane.xlu0 %5755  ;;  %v10618_v31 = vpop.permute.xlu1 %10617 }
0x2df0   : > { %v10620_v44 = vunpack.i.h.bf16 %v10618_v31  ;;  %v10619_v35 = vunpack.i.l.bf16 %v10618_v31  ;;  %10812 = vrcp.f32 %v5756_v55 }
0x2df2   : > { %v10399_v16 = vpack.c.bf16 %v10620_v44, %v10619_v35 }
0x2df3   : > { %v6034_v19 = vpop.xlane.xlu0 %6033 }
0x2df6   : > { %v10811_v53 = vpop.eup %10810 }
0x2df7   : > { %v10613_v8 = vpop.permute.xlu0 %10612  ;;  %v6039_v24 = vmul.f32 %v10811_v53, %v12496_v11  ;;  %v9162_v11 = vld [vmem:[%s13397_s6 + $0x10] sm:$0xff] }
0x2df8   : > { %v10615_v36 = vunpack.i.h.bf16 %v10613_v8  ;;  %v10614_v59 = vunpack.i.l.bf16 %v10613_v8 }
0x2dfa   : > { %v10383_v57 = vpack.c.bf16 %v10615_v36, %v10614_v59  ;;  %v10813_v23 = vpop.eup %10812 }
0x2dfb   : > { %v5764_v54 = vmul.f32 %v10813_v23, %v12500_v28 }
0x2dfc   : > { %10384 = vmatprep.subr.bf16.mxu0 %v10383_v57 }
0x2dfd   : > { %10386 = vmatpush3.bf16.msra.mxu0 %v10383_v57 }
0x2dfe   : > { %10400 = vmatprep.subr.bf16.mxu0 %v10399_v16 }
0x2e00   : > { %9991 = vmatmul.mubr.msk.f32.vlgmr.msra.gmra.mrb[46].mxu0 %vm920_vm1, %v5762_v22 }
0x2e01   : > { %10402 = vmatpush3.bf16.msra.mxu0 %v10399_v16 }
0x2e20   : > { %v5753_v21 = vpop.xlane.xlu1 %5752 }
0x2e21   : > { %10814 = vrcp.f32 %v5753_v21 }
0x2e22   : > { %10816 = vrcp.f32 %v6028_v26 }
0x2e24   : > { %v6031_v13 = vpop.xlane.xlu1 %6030 }
0x2e25   : > { %10818 = vrcp.f32 %v6031_v13 }
0x2e26   : > { %10820 = vrcp.f32 %v6034_v19 }
0x2e28   : > { %v10623_v46 = vpop.permute.xlu1 %10622 }
0x2e29   : > { %v10625_v32 = vunpack.i.h.bf16 %v10623_v46  ;;  %v10624_v27 = vunpack.i.l.bf16 %v10623_v46 }
0x2e2b   : > { %v10815_v49 = vpop.eup %10814  ;;  %v10403_v60 = vpack.c.bf16 %v10625_v32, %v10624_v27  ;;  %v12551_v32 = vld [vmem:[%s13380_s4 + $0x8] sm:$0x3f] }
0x2e2c   : > { %v5763_v5 = vmul.f32 %v10815_v49, %v10803_v58  ;;  %v10817_v38 = vpop.eup %10816  ;;  %v9163_v58 = vld [vmem:[%s13397_s6 + $0x18] sm:$0xff]  ;;  %v6175_v27 = vrot.slane %v12551_v32, %v11319_v51 }
0x2e2d   : > { %10404 = vmatprep.subr.bf16.mxu0 %v10403_v60  ;;  %v6040_v47 = vmul.f32 %v10817_v38, %v12492_v45  ;;  %v10407_v31 = vpack.c.bf16 %v9163_v58, %v9162_v11 }
0x2e2e   : > { %9993 = vmatprep.mubr.msk.f32.mxu0 %vm920_vm1, %v5763_v5  ;;  %10406 = vmatpush3.bf16.msra.mxu0 %v10403_v60 }
0x2e2f   : > { %v10819_v26 = vpop.eup %10818  ;;  %9994 = vmatmul.mubr.msk.f32.gmra.mrb[48].mxu0 %vm920_vm1, %v5764_v54  ;;  %10408 = vmatprep.subr.bf16.mxu0 %v10407_v31 }
0x2e30   : > { %10018 = vmatprep.mubr.msk.f32.mxu0 %vm920_vm1, %v6039_v24  ;;  %v10821_v55 = vpop.eup %10820  ;;  %v6041_v19 = vmul.f32 %v10819_v26, %v10805_v1 }
0x2e31   : > { %v6042_v28 = vmul.f32 %v10821_v55, %v12504_v62 }
0x2e33   : > { %10019 = vmatmul.mubr.msk.f32.vlgmr.msra.gmra.mrb[50].mxu0 %vm920_vm1, %v6040_v47 }
0x2e34   : > { %10021 = vmatprep.mubr.msk.f32.mxu0 %vm920_vm1, %v6041_v19  ;;  %10410 = vmatpush3.bf16.msra.mxu0 %v10407_v31 }
0x2e37   : > { %10022 = vmatmul.mubr.msk.f32.gmra.mrb[52].mxu0 %vm920_vm1, %v6042_v28 }
0x2ed3   : > { %v9992_v45 = vpop.f32.mrb[46].mxu0 }
0x2ed4   : > { %v5855_v1 = vpop.f32.mrb[47].mxu0 }
0x2f02   : > { %v9995_v8 = vpop.f32.mrb[48].mxu0 }
0x2f03   : > { %v5865_v44 = vpop.f32.mrb[49].mxu0 }
0x2f06   : > { %v10020_v35 = vpop.f32.mrb[50].mxu0 }
0x2f07   : > { %6158 = vrot.lane.b32.xlu1 %v10020_v35, %s13378_s12  ;;  %v6133_v62 = vpop.f32.mrb[51].mxu0 }
0x2f08   : > { %6156 = vrot.lane.b32.xlu0 %v6133_v62, %s13378_s12 }
0x2f0a   : > { %v10023_v36 = vpop.f32.mrb[52].mxu0 }
0x2f0b   : > { %6162 = vrot.lane.b32.xlu1 %v10023_v36, %s13378_s12  ;;  %v6143_v59 = vpop.f32.mrb[53].mxu0 }
0x2f0c   : > { %6160 = vrot.lane.b32.xlu0 %v6143_v59, %s13378_s12 }
0x2f79   : > { %v6159_v57 = vpop.permute.xlu1 %6158 }
0x2f7a   : > { %v6157_v4 = vpop.permute.xlu0 %6156  ;;  %v6169_v22 = vsel %vm997_vm2, %v9992_v45, %v6159_v57 }
0x2f7b   : > { %v6168_v16 = vsel %vm997_vm2, %v5855_v1, %v6157_v4 }
0x2f7c   : > { %10028 = vmatprep.mubr.msk.f32.mxu0 %vm1335_vm3, %v6168_v16 }
0x2f7d   : > { %10029 = vmatmul.mubr.msk.f32.vlgmr.msra.gmra.mrb[54].mxu0 %vm1335_vm3, %v6169_v22  ;;  %v6163_v21 = vpop.permute.xlu1 %6162 }
0x2f7e   : > { %v6161_v13 = vpop.permute.xlu0 %6160  ;;  %v6171_v53 = vsel %vm997_vm2, %v9995_v8, %v6163_v21 }
0x2f7f   : > { %v6170_v46 = vsel %vm997_vm2, %v5865_v44, %v6161_v13 }
0x2f80   : > { %10031 = vmatprep.mubr.msk.f32.mxu0 %vm1335_vm3, %v6170_v46 }
0x2f81   : > { %10032 = vmatmul.mubr.msk.f32.gmra.mrb[56].mxu0 %vm1335_vm3, %v6171_v53 }
0x3050   : > { %v10030_v23 = vpop.f32.mrb[54].mxu0 }
0x3051   : > { %v6260_v49 = vadd.f32 %v10030_v23, %v6175_v27  ;;  %v6254_v60 = vpop.f32.mrb[55].mxu0  ;;  %v9164_v23 = vld [vmem:[%s13398_s5 + $0x8] sm:$0xff]  ;;  %s13402_s5 = sld [smem:[#allocation33_spill]] }
0x3052   : > { %v6255_v5 = vadd.f32 %v6254_v60, %v6175_v27  ;;  %10034 = vmatprep.subr.mxu1 %v9164_v23 }
0x3053   : > { %v6274_v54 = vadd.f32 %v6260_v49, %v12382_v40  ;;  %10035 = vmatpush3.msra.mxu1 %v9164_v23  ;;  %v10928_v49 = vld [vmem:[%s13280_s25] sm:$0x7] }
0x3054   : > { %v6273_v38 = vadd.f32 %v6255_v5, %v12378_v61  ;;  %v10033_v24 = vpop.f32.mrb[56].mxu0  ;;  %10419 = vmatprep.subr.bf16.mxu1 %v11015_v3  ;;  %v4522_v60 = vrot.slane %v10928_v49, %v11359_v20 }
0x3055   : > { %v6264_v26 = vpop.f32.mrb[57].mxu0  ;;  %v6280_v47 = vsel %vm997_vm2, %v6274_v54, 0.0  ;;  %v6270_v55 = vadd.f32 %v10033_v24, %v6175_v27 }
0x3056   : > { %v6265_v19 = vadd.f32 %v6264_v26, %v6175_v27  ;;  %6281 = vadd.xlane.f32.xlu1 %v6280_v47  ;;  %v6277_v28 = vsel %vm997_vm2, %v6273_v38, 0.0  ;;  %v4602_v5 = vadd.f32 %v12222_v39, %v4522_v60  ;;  %v4612_v26 = vadd.f32 %v12226_v37, %v4522_v60 }
0x3057   : > { %6278 = vadd.xlane.f32.xlu0 %v6277_v28  ;;  %v6276_v58 = vadd.f32 %v6270_v55, %v12390_v2  ;;  %v4617_v47 = vadd.f32 %v12224_v63, %v4522_v60 }
0x3058   : > { %v6275_v11 = vadd.f32 %v6265_v19, %v12386_v43  ;;  %v4622_v55 = vadd.f32 %v4612_v26, %v11811_v0  ;;  %v6332_v0 = vrot.slane %v12551_v32, %v11356_v18 }
0x3059   : > { %v6286_v40 = vsel %vm997_vm2, %v6276_v58, 0.0  ;;  %v4623_v19 = vadd.f32 %v4617_v47, %v11815_v10 }
0x305a   : > { %v6283_v31 = vsel %vm997_vm2, %v6275_v11, 0.0 }
0x305b   : > { %6284 = vadd.xlane.f32.xlu0 %v6283_v31 }
0x305f   : > { %6287 = vadd.xlane.f32.xlu0 %v6286_v40 }
0x30e3   : > { %v6282_v61 = vpop.xlane.xlu1 %6281 }
0x30e4   : > { %v6290_v45 = vmul.f32 0.125, %v6282_v61  ;;  %v6279_v1 = vpop.xlane.xlu0 %6278 }
0x30e5   : > { %v6289_v8 = vmul.f32 0.125, %v6279_v1 }
0x30e6   : > { %v6294_v44 = vsub.f32 %v6274_v54, %v6290_v45  ;;  %v4607_v54 = vadd.f32 %v12220_v25, %v4522_v60 }
0x30e7   : > { %v6293_v35 = vsub.f32 %v6273_v38, %v6289_v8  ;;  %v4620_v38 = vadd.f32 %v4602_v5, %v11801_v56  ;;  %v9166_v5 = vld [vmem:[%s13383_s10 + $0x20] sm:$0xff] }
0x30e8   : > { %v6285_v62 = vpop.xlane.xlu0 %6284  ;;  %v6298_v36 = vmul.f32 %v6294_v44, %v6294_v44  ;;  %v4621_v24 = vadd.f32 %v4607_v54, %v11805_v7  ;;  %v9167_v54 = vld [vmem:[%s13383_s10 + $0x28] sm:$0xff] }
0x30e9   : > { %v6291_v59 = vmul.f32 0.125, %v6285_v62  ;;  %v6297_v57 = vmul.f32 %v6293_v35, %v6293_v35  ;;  %v6340_v62 = vrot.slane %v12551_v32, %v11359_v20  ;;  %v9174_v32 = vld [vmem:[%s13399_s24 + $0x30] sm:$0xff] }
0x30ea   : > { %v6304_v43 = vsel %vm997_vm2, %v6298_v36, 0.0 }
0x30eb   : > { %v6295_v4 = vsub.f32 %v6275_v11, %v6291_v59  ;;  %6305 = vadd.xlane.f32.xlu0 %v6304_v43  ;;  %v6301_v2 = vsel %vm997_vm2, %v6297_v57, 0.0  ;;  %v9172_v59 = vld [vmem:[%s13399_s24 + $0x20] sm:$0xff]  ;;  %v9173_v57 = vld [vmem:[%s13399_s24 + $0x28] sm:$0xff] }
0x30ec   : > { %6302 = vadd.xlane.f32.xlu1 %v6301_v2  ;;  %v6288_v16 = vpop.xlane.xlu0 %6287 }
0x30ed   : > { %v6292_v22 = vmul.f32 0.125, %v6288_v16  ;;  %v6299_v21 = vmul.f32 %v6295_v4, %v6295_v4 }
0x30ef   : > { %v6296_v13 = vsub.f32 %v6276_v58, %v6292_v22  ;;  %v6307_v46 = vsel %vm997_vm2, %v6299_v21, 0.0  ;;  %v10420_v21 = vpack.c.bf16 %v9173_v57, %v9172_v59  ;;  %v9168_v57 = vld [vmem:[%s13383_s10 + $0x30] sm:$0xff] }
0x30f0   : > { %6308 = vadd.xlane.f32.xlu1 %v6307_v46 }
0x30f1   : > { %v6300_v53 = vmul.f32 %v6296_v13, %v6296_v13 }
0x30f3   : > { %v6310_v27 = vsel %vm997_vm2, %v6300_v53, 0.0 }
0x30f4   : > { %6311 = vadd.xlane.f32.xlu0 %v6310_v27 }
0x3123   : > { %4624 = vxpose.xlu1.b32.start [1/4] (short) (narrow) %v4620_v38, 8  ;;  %v10411_v38 = vpack.c.bf16 %v9167_v54, %v9166_v5 }
0x3125   : > { %10412 = vmatprep.subr.bf16.mxu0 %v10411_v38 }
0x3126   : > { %10414 = vmatpush3.bf16.msra.mxu0 %v10411_v38 }
0x3127   : > { %4625 = vxpose.xlu1.b32.cont [2/4] (short) (narrow) %v4621_v24, 8  ;;  %v9233_v24 = vld [vmem:[%s13385_s1 + $0x1] ss:$0 sm:$0xff] }
0x312b   : > { %4626 = vxpose.xlu1.b32.cont [3/4] (short) (narrow) %v4622_v55, 8 }
0x312f   : > { %4627 = vxpose.xlu1.b32.end [4/4] (short) (narrow) %v4623_v19, 8 }
0x3178   : > { %v6306_v28 = vpop.xlane.xlu0 %6305 }
0x3179   : > { %v6314_v39 = vmul.f32 0.125, %v6306_v28  ;;  %v6303_v11 = vpop.xlane.xlu1 %6302 }
0x317a   : > { %v6313_v25 = vmul.f32 0.125, %v6303_v11 }
0x317b   : > { %v6318_v58 = vadd.f32 1e-05, %v6314_v39 }
0x317c   : > { %v6317_v56 = vadd.f32 1e-05, %v6313_v25 }
0x317d   : > { %10822 = vrsqrt.f32 %v6318_v58  ;;  %v6309_v31 = vpop.xlane.xlu1 %6308 }
0x317e   : > { %10824 = vrsqrt.f32 %v6317_v56  ;;  %v6315_v7 = vmul.f32 0.125, %v6309_v31 }
0x3180   : > { %v6319_v37 = vadd.f32 1e-05, %v6315_v7 }
0x3181   : > { %v6312_v40 = vpop.xlane.xlu0 %6311 }
0x3182   : > { %10826 = vrsqrt.f32 %v6319_v37  ;;  %v6316_v63 = vmul.f32 0.125, %v6312_v40 }
0x3184   : > { %v6320_v61 = vadd.f32 1e-05, %v6316_v63 }
0x3186   : > { %10828 = vrsqrt.f32 %v6320_v61 }
0x3187   : > { %v10823_v10 = vpop.eup %10822 }
0x3188   : > { %v10825_v45 = vpop.eup %10824  ;;  %v6326_v1 = vmul.f32 %v10823_v10, %v6294_v44 }
0x3189   : > { %v6325_v8 = vmul.f32 %v10825_v45, %v6293_v35  ;;  %v9175_v35 = vld [vmem:[%s13399_s24 + $0x38] sm:$0xff]  ;;  %s9256_s24 = sld [smem:[#allocation2 + $0x282]] }
0x318a   : > { %v6334_v36 = vmul.f32 %v6332_v0, %v6326_v1  ;;  %v10423_v23 = vpack.c.bf16 %v9175_v35, %v9174_v32 }
0x318b   : > { %v6333_v43 = vmul.f32 %v6332_v0, %v6325_v8 }
0x318c   : > { %v10827_v2 = vpop.eup %10826  ;;  %v12595_v44 = vadd.f32 %v6340_v62, %v6334_v36 }
0x318d   : > { %v12593_v16 = vadd.f32 %v6340_v62, %v6333_v43  ;;  %v6327_v22 = vmul.f32 %v10827_v2, %v6295_v4  ;;  %v9169_v43 = vld [vmem:[%s13383_s10 + $0x38] sm:$0xff] }
0x318f   : > { %10036 = vmatprep.mubr.msk.f32.mxu1 %vm997_vm2, %v12593_v16  ;;  %v6335_v46 = vmul.f32 %v6332_v0, %v6327_v22  ;;  %v10415_v22 = vpack.c.bf16 %v9169_v43, %v9168_v57 }
0x3190   : > { %v10829_v53 = vpop.eup %10828  ;;  %10037 = vmatmul.mubr.msk.f32.vlgmr.msra.gmra.mrb[66].mxu1 %vm997_vm2, %v12595_v44 }
0x3191   : > { %v12607_v4 = vadd.f32 %v6340_v62, %v6335_v46  ;;  %v6328_v27 = vmul.f32 %v10829_v53, %v6296_v13  ;;  %10421 = vmatpush3.bf16.msra.mxu1 %v10420_v21  ;;  %10416 = vmatprep.subr.bf16.mxu0 %v10415_v22 }
0x3192   : > { %10422 = vmatprep.subr.bf16.mxu1 %v11015_v3  ;;  %10418 = vmatpush3.bf16.msra.mxu0 %v10415_v22 }
0x3193   : > { %10039 = vmatprep.mubr.msk.f32.mxu1 %vm997_vm2, %v12607_v4  ;;  %v6336_v49 = vmul.f32 %v6332_v0, %v6328_v27  ;;  %10067 = vmatprep.subr.mxu0 %v11017_v6 }
0x3195   : > { %v12612_v60 = vadd.f32 %v6340_v62, %v6336_v49  ;;  %10424 = vmatpush3.bf16.msra.mxu1 %v10423_v23 }
0x3196   : > { %10072 = vmatprep.subr.mxu1 %v11017_v6 }
0x3197   : > { %10040 = vmatmul.mubr.msk.f32.gmra.mrb[68].mxu1 %vm997_vm2, %v12612_v60 }
0x3198   : > { %10064 = vmatprep.mubr.msk.f32.mxu1 %vm11016_vm0, %v11017_v6 }
0x31a3   : > { %v12619_v13 = vpop.trf.xlu1 }
0x31a4   : > { %10065 = vmatmul.mubr.msk.f32.vlgmr.msra.gmra.mrb[70].mxu1 %vm920_vm1, %v12619_v13 }
0x31a5   : > { %10074 = vmatprep.mubr.msk.f32.mxu1 %vm11016_vm0, %v11017_v6 }
0x3263   : > { %v10038_v26 = vpop.f32.mrb[66].mxu1 }
0x3264   : > { %v12634_v47 = vadd.f32 %v10038_v26, %v9233_v24  ;;  %v6429_v55 = vpop.f32.mrb[67].mxu1 }
0x3265   : > { %v6430_v19 = vadd.f32 %v9233_v24, %v6429_v55 }
0x3266   : > { %v6453_v28 = vmul.f32 0.044715, %v12634_v47  ;;  %v6449_v49 = vmul.f32 0.5, %v12634_v47 }
0x3267   : > { %v6452_v39 = vmul.f32 0.044715, %v6430_v19 }
0x3268   : > { %v6457_v11 = vmul.f32 %v6453_v28, %v12634_v47 }
0x3269   : > { %v6456_v25 = vmul.f32 %v6452_v39, %v6430_v19 }
0x326a   : > { %v10041_v58 = vpop.f32.mrb[68].mxu1  ;;  %v6461_v56 = vmul.f32 %v6457_v11, %v12634_v47 }
0x326b   : > { %v6445_v31 = vadd.f32 %v10041_v58, %v9233_v24  ;;  %v6439_v7 = vpop.f32.mrb[69].mxu1  ;;  %v6460_v37 = vmul.f32 %v6456_v25, %v6430_v19 }
0x326c   : > { %v6440_v40 = vadd.f32 %v9233_v24, %v6439_v7  ;;  %v6465_v63 = vadd.f32 %v6461_v56, %v12634_v47  ;;  %v6448_v24 = vmul.f32 0.5, %v6430_v19 }
0x326d   : > { %v6455_v61 = vmul.f32 0.044715, %v6445_v31  ;;  %v6464_v0 = vadd.f32 %v6460_v37, %v6430_v19  ;;  %v6451_v39 = vmul.f32 0.5, %v6445_v31 }
0x326e   : > { %v6454_v10 = vmul.f32 0.044715, %v6440_v40  ;;  %v6469_v45 = vmul.f32 0.7978846, %v6465_v63  ;;  %v6450_v56 = vmul.f32 0.5, %v6440_v40 }
0x326f   : > { %v6468_v1 = vmul.f32 0.7978846, %v6464_v0  ;;  %v6459_v8 = vmul.f32 %v6455_v61, %v6445_v31 }
0x3270   : > { %10830 = vtanh.f32 %v6469_v45  ;;  %v6458_v62 = vmul.f32 %v6454_v10, %v6440_v40 }
0x3271   : > { %10832 = vtanh.f32 %v6468_v1  ;;  %v6463_v36 = vmul.f32 %v6459_v8, %v6445_v31 }
0x3272   : > { %v6462_v59 = vmul.f32 %v6458_v62, %v6440_v40 }
0x3273   : > { %v6467_v2 = vadd.f32 %v6463_v36, %v6445_v31 }
0x3274   : > { %v6466_v21 = vadd.f32 %v6462_v59, %v6440_v40 }
0x3275   : > { %v6471_v32 = vmul.f32 0.7978846, %v6467_v2 }
0x3276   : > { %v6470_v35 = vmul.f32 0.7978846, %v6466_v21 }
0x3277   : > { %10834 = vtanh.f32 %v6471_v32  ;;  %v12646_v46 = vpop.f32.mrb[70].mxu1  ;;  %v7183_v32 = vsel %vm920_vm1, %v12619_v13, 0.0 }
0x3278   : > { %10836 = vtanh.f32 %v6470_v35  ;;  %v10066_v53 = vpop.f32.mrb[71].mxu1 }
0x327a   : > { %v10831_v27 = vpop.eup %10830 }
0x327b   : > { %v10833_v23 = vpop.eup %10832  ;;  %v6477_v5 = vadd.f32 1.0, %v10831_v27 }
0x327c   : > { %v6476_v38 = vadd.f32 1.0, %v10833_v23 }
0x327d   : > { %v6481_v54 = vmul.f32 %v6477_v5, %v6449_v49 }
0x327e   : > { %v6480_v55 = vmul.f32 %v6476_v38, %v6448_v24 }
0x327f   : > { %6490 = vrot.lane.b32.xlu0 %v6481_v54, %s13375_s30 }
0x3281   : > { %v10835_v26 = vpop.eup %10834 }
0x3282   : > { %v10837_v28 = vpop.eup %10836  ;;  %v6479_v11 = vadd.f32 1.0, %v10835_v26 }
0x3283   : > { %6488 = vrot.lane.b32.xlu0 %v6480_v55, %s13375_s30  ;;  %v6478_v58 = vadd.f32 1.0, %v10837_v28 }
0x3284   : > { %v6483_v25 = vmul.f32 %v6479_v11, %v6451_v39 }
0x3285   : > { %v6482_v7 = vmul.f32 %v6478_v58, %v6450_v56 }
0x3287   : > { %6494 = vrot.lane.b32.xlu0 %v6483_v25, %s13375_s30 }
0x328b   : > { %6492 = vrot.lane.b32.xlu0 %v6482_v7, %s13375_s30 }
0x328f   : > { %6783 = vrot.lane.b32.xlu0 %v12646_v46, %s13372_s28 }
0x32f1   : > { %v6491_v37 = vpop.permute.xlu0 %6490 }
0x32f2   : > { %v6501_v0 = vmul.f32 %v6491_v37, %v12634_v47 }
0x32f5   : > { %v6489_v63 = vpop.permute.xlu0 %6488 }
0x32f6   : > { %v6500_v61 = vmul.f32 %v6489_v63, %v6430_v19 }
0x32f8   : > { %10050 = vmatprep.mubr.msk.f32.mxu0 %vm920_vm1, %v6500_v61 }
0x32f9   : > { %10051 = vmatmul.mubr.msk.f32.vlgmr.msra.gmra.mrb[58].mxu0 %vm920_vm1, %v6501_v0  ;;  %v6495_v10 = vpop.permute.xlu0 %6494  ;;  %v9177_v0 = vld [vmem:[%s13270_s15 + $0x20] sm:$0xff] }
0x32fa   : > { %v6503_v8 = vmul.f32 %v6495_v10, %v6445_v31 }
0x32fd   : > { %v6493_v45 = vpop.permute.xlu0 %6492 }
0x32fe   : > { %v6502_v1 = vmul.f32 %v6493_v45, %v6440_v40  ;;  %v12699_v45 = vld [vmem:[%s13273_s18 + $0x4] sm:$0x7] }
0x3300   : > { %10053 = vmatprep.mubr.msk.f32.mxu0 %vm920_vm1, %v6502_v1 }
0x3301   : > { %10054 = vmatmul.mubr.msk.f32.gmra.mrb[60].mxu0 %vm920_vm1, %v6503_v8  ;;  %v6784_v62 = vpop.permute.xlu0 %6783 }
0x3302   : > { %10068 = vmatpush3.xpose.msk.msra.mxu0 %vm997_vm2, %v6784_v62  ;;  %10069 = vmatprep.mubr.msk.f32.mxu0 %vm11016_vm0, %v11017_v6 }
0x3303   : > { %10077 = vmatprep.subr.mxu0 %v11017_v6 }
0x3305   : > { %10070 = vmatmul.mubr.msk.f32.vlgmr.msra.gmra.mrb[62].mxu0 %vm997_vm2, %v12646_v46 }
0x3306   : > { %10079 = vmatprep.mubr.msk.f32.mxu0 %vm11016_vm0, %v11017_v6 }
0x33cc   : > { %v12669_v47 = vpop.f32.mrb[58].mxu0 }
0x33cd   : > { %v12671_v19 = vpop.f32.mrb[59].mxu0 }
0x33d4   : > { %v12673_v31 = vpop.f32.mrb[60].mxu0 }
0x33d5   : > { %v12675_v40 = vpop.f32.mrb[61].mxu0 }
0x33d8   : > { %v6855_v36 = vpop.f32.mrb[62].mxu0 }
0x33d9   : > { %v6859_v59 = vmul.f32 0.35355338, %v6855_v36  ;;  %v10071_v57 = vpop.f32.mrb[63].mxu0 }
0x33da   : > { %v9180_v57 = vld [vmem:[%s13270_s15 + $0x38] sm:$0xff] }
0x33db   : > { %v6860_v43 = vadd.f32 %v6859_v59, %v12230_v42  ;;  %v7025_v2 = vadd.f32 %v6859_v59, %v12235_v14  ;;  %v9179_v59 = vld [vmem:[%s13270_s15 + $0x30] sm:$0xff] }
0x33dd   : > { %v7026_v22 = vsel %vm997_vm2, %v7025_v2, -inf  ;;  %v6861_v21 = vsel %vm997_vm2, %v6860_v43, -inf }
0x33de   : > { %7027 = vmax.xlane.f32.xlu1 %v7026_v22  ;;  %6862 = vmax.xlane.f32.xlu0 %v6861_v21  ;;  %v7204_v21 = vrot.slane %v12699_v45, %v11356_v18 }
0x33e2   : > { %7184 = vadd.xlane.f32.xlu0 %v7183_v32 }
0x346b   : > { %v7028_v35 = vpop.xlane.xlu1 %7027  ;;  %v6863_v53 = vpop.xlane.xlu0 %6862 }
0x346c   : > { %v7029_v27 = vsub.f32 %v7025_v2, %v7028_v35  ;;  %v6864_v23 = vsub.f32 %v6860_v43, %v6863_v53  ;;  %v7199_v43 = vrot.slane %v12699_v45, %v11319_v51  ;;  %v10429_v2 = vpack.c.bf16 %v9180_v57, %v9179_v59  ;;  %v9176_v35 = vld [vmem:[%s13269_s14 + $0x8] sm:$0xff] }
0x346d   : > { %10078 = vmatpush3.msra.mxu0 %v9176_v35 }
0x346e   : > { %v6865_v49 = vmul.f32 1.442695, %v6864_v23  ;;  %v7030_v5 = vmul.f32 1.442695, %v7029_v27  ;;  %10087 = vmatprep.subr.mxu0 %v11017_v6 }
0x346f   : > { %v7185_v54 = vpop.xlane.xlu0 %7184 }
0x3470   : > { %v7186_v42 = vmul.f32 0.03125, %v7185_v54  ;;  %10838 = vpow2.f32 %v6865_v49 }
0x3471   : > { %10840 = vpow2.f32 %v7030_v5  ;;  %v9249_v5 = vld [vmem:[%s13271_s16 + $0x1] ss:$0 sm:$0xff] }
0x3472   : > { %v7187_v14 = vsub.f32 %v12619_v13, %v7186_v42 }
0x3474   : > { %v7188_v38 = vmul.f32 %v7187_v14, %v7187_v14 }
0x3476   : > { %v7189_v24 = vsel %vm920_vm1, %v7188_v38, 0.0 }
0x3477   : > { %7190 = vadd.xlane.f32.xlu0 %v7189_v24 }
0x347a   : > { %v10839_v26 = vpop.eup %10838 }
0x347b   : > { %v6867_v55 = vsel %vm997_vm2, %v10839_v26, 0.0  ;;  %v10841_v28 = vpop.eup %10840 }
0x347c   : > { %6868 = vadd.xlane.f32.xlu0 %v6867_v55  ;;  %v7032_v39 = vsel %vm997_vm2, %v10841_v28, 0.0 }
0x3480   : > { %7033 = vadd.xlane.f32.xlu0 %v7032_v39 }
0x3496   : > { %6872 = vrot.lane.b32.xlu0 %v12646_v46, %s13370_s8  ;;  %v9178_v46 = vld [vmem:[%s13270_s15 + $0x28] sm:$0xff] }
0x3497   : > { %v10426_v8 = vpack.c.bf16 %v9178_v46, %v9177_v0 }
0x3504   : > { %v7191_v11 = vpop.xlane.xlu0 %7190 }
0x3505   : > { %v7192_v25 = vmul.f32 0.03125, %v7191_v11 }
0x3507   : > { %v7193_v58 = vadd.f32 1e-05, %v7192_v25 }
0x3509   : > { %v6869_v56 = vpop.xlane.xlu0 %6868 }
0x350a   : > { %10842 = vrcp.f32 %v6869_v56 }
0x350b   : > { %10844 = vrsqrt.f32 %v7193_v58 }
0x350d   : > { %v7034_v7 = vpop.xlane.xlu0 %7033 }
0x350e   : > { %10846 = vrcp.f32 %v7034_v7 }
0x3511   : > { %v6873_v37 = vpop.permute.xlu0 %6872 }
0x3512   : > { %10073 = vmatpush3.msra.mxu1 %v6873_v37 }
0x3513   : > { %10082 = vmatprep.subr.mxu1 %v11017_v6 }
0x3514   : > { %v10843_v63 = vpop.eup %10842 }
0x3515   : > { %v6871_v61 = vmul.f32 %v10843_v63, %v10839_v26  ;;  %v10845_v10 = vpop.eup %10844 }
0x3516   : > { %v7195_v62 = vmul.f32 %v10845_v10, %v7187_v14 }
0x3517   : > { %10075 = vmatmul.mubr.msk.f32.vlgmr.msra.gmra.mrb[72].mxu1 %vm997_vm2, %v6871_v61 }
0x3518   : > { %v10847_v1 = vpop.eup %10846  ;;  %10083 = vmatpush3.msra.mxu1 %v6873_v37  ;;  %10084 = vmatprep.mubr.msk.f32.mxu1 %vm11016_vm0, %v11017_v6  ;;  %v7200_v22 = vmul.f32 %v7199_v43, %v7195_v62  ;;  %v9171_v37 = vld [vmem:[%s13274_s19 + $0x4] sm:$0x7] }
0x3519   : > { %10425 = vmatprep.subr.bf16.mxu1 %v11015_v3  ;;  %v7036_v36 = vmul.f32 %v10847_v1, %v10841_v28  ;;  %v6951_v63 = vrot.slane %v9171_v37, %v11319_v51 }
0x351a   : > { %v7205_v32 = vadd.f32 %v7204_v21, %v7200_v22 }
0x351b   : > { %10085 = vmatmul.mubr.msk.f32.vlgmr.msra.gmra.mrb[74].mxu1 %vm997_vm2, %v7036_v36 }
0x351c   : > { %10427 = vmatpush3.bf16.msra.mxu1 %v10426_v8  ;;  %10100 = vmatprep.mubr.msk.f32.mxu1 %vm11016_vm0, %v11017_v6 }
0x351d   : > { %10428 = vmatprep.subr.bf16.mxu1 %v11015_v3 }
0x3520   : > { %10430 = vmatpush3.bf16.msra.mxu1 %v10429_v2 }
0x3523   : > { %10101 = vmatmul.mubr.msk.f32.vlgmr.msra.gmra.mrb[76].mxu1 %vm920_vm1, %v7205_v32  ;;  %v7318_v32 = vrot.slane %v9171_v37, %v11356_v18 }
0x35ea   : > { %v6944_v53 = vpop.f32.mrb[72].mxu1 }
0x35eb   : > { %v10076_v27 = vpop.f32.mrb[73].mxu1  ;;  %10080 = vmatmul.mubr.msk.f32.vlgmr.msra.gmra.mrb[64].mxu0 %vm997_vm2, %v6944_v53 }
0x35ec   : > { %10088 = vmatpush3.msra.mxu0 %v9176_v35  ;;  %10089 = vmatprep.mubr.msk.f32.mxu0 %vm11016_vm0, %v11017_v6  ;;  %v7327_v35 = vrot.slane %v9171_v37, %v11359_v20 }
0x35ed   : > { %10431 = vmatprep.subr.bf16.mxu0 %v11015_v3 }
0x35ee   : > { %v7106_v23 = vpop.f32.mrb[74].mxu1 }
0x35ef   : > { %v10086_v49 = vpop.f32.mrb[75].mxu1  ;;  %10090 = vmatmul.mubr.msk.f32.vlgmr.msra.gmra.mrb[66].mxu0 %vm997_vm2, %v7106_v23 }
0x35f0   : > { %10107 = vmatprep.mubr.msk.f32.mxu0 %vm11016_vm0, %v11017_v6 }
0x35f6   : > { %v7281_v54 = vpop.f32.mrb[76].mxu1 }
0x35f7   : > { %v7282_v42 = vadd.f32 %v9249_v5, %v7281_v54  ;;  %v10102_v14 = vpop.f32.mrb[77].mxu1 }
0x35f9   : > { %v7286_v38 = vmul.f32 0.044715, %v7282_v42  ;;  %v7285_v39 = vmul.f32 0.5, %v7282_v42 }
0x35fb   : > { %v7287_v24 = vmul.f32 %v7286_v38, %v7282_v42 }
0x35fd   : > { %v7288_v26 = vmul.f32 %v7287_v24, %v7282_v42 }
0x35ff   : > { %v7289_v55 = vadd.f32 %v7288_v26, %v7282_v42 }
0x3601   : > { %v7290_v28 = vmul.f32 0.7978846, %v7289_v55 }
0x3603   : > { %10848 = vtanh.f32 %v7290_v28  ;;  %v7365_v28 = vstv %s9252_s29  ;;  %s13401_s29 = sld [smem:[#allocation31_spill]] }
0x360d   : > { %v10849_v3 = vpop.eup %10848 }
0x360e   : > { %v7292_v11 = vadd.f32 1.0, %v10849_v3 }
0x3610   : > { %v7293_v25 = vmul.f32 %v7292_v11, %v7285_v39  ;;  %v9182_v11 = vld [vmem:[%s13272_s17 + $0x10] sm:$0xff] }
0x3612   : > { %7295 = vrot.lane.b32.xlu0 %v7293_v25, %s13372_s28  ;;  %7333 = vrot.lane.b32.xlu1 %v7293_v25, %s13371_s7 }
0x3684   : > { %v12736_v6 = vpop.permute.xlu0 %7295  ;;  %v7334_v58 = vpop.permute.xlu1 %7333 }
0x3685   : > { %v7298_v56 = vsel %vm997_vm2, %v12736_v6, 0.0  ;;  %v7336_v7 = vsel %vm997_vm2, %v7334_v58, 0.0  ;;  %v9183_v58 = vld [vmem:[%s13272_s17 + $0x18] sm:$0xff] }
0x3686   : > { %7299 = vadd.xlane.f32.xlu1 %v7298_v56  ;;  %7337 = vadd.xlane.f32.xlu0 %v7336_v7  ;;  %v10432_v56 = vpack.c.bf16 %v9183_v58, %v9182_v11  ;;  %v7388_v7 = vstv %s9255_s3  ;;  %s9296_s3 = sld [smem:[#allocation2 + $0x382]] }
0x3688   : > { %10433 = vmatpush3.bf16.msra.mxu0 %v10432_v56  ;;  %v9186_v56 = vld [vmem:[%s13275_s20 + $0x8] sm:$0xff] }
0x3689   : > { %10110 = vmatprep.subr.mxu0 %v9186_v56 }
0x36be   : > { %v7021_v61 = vpop.f32.mrb[64].mxu0 }
0x36bf   : > { %v7022_v0 = vadd.f32 %v7021_v61, %v6951_v63  ;;  %v10081_v46 = vpop.f32.mrb[65].mxu0 }
0x36c2   : > { %v7179_v10 = vpop.f32.mrb[66].mxu0 }
0x36c3   : > { %v7180_v1 = vadd.f32 %v7179_v10, %v6951_v63  ;;  %v10091_v8 = vpop.f32.mrb[67].mxu0 }
0x3713   : > { %v7338_v62 = vpop.xlane.xlu0 %7337  ;;  %v7300_v36 = vpop.xlane.xlu1 %7299 }
0x3714   : > { %v7339_v59 = vmul.f32 0.125, %v7338_v62  ;;  %v7301_v57 = vmul.f32 0.125, %v7300_v36 }
0x3716   : > { %v7340_v43 = vsub.f32 %v7293_v25, %v7339_v59  ;;  %v7302_v2 = vsub.f32 %v7293_v25, %v7301_v57  ;;  %v7362_v59 = vstv %s9251_s2  ;;  %s13403_s2 = sld [smem:[#allocation32_spill]] }
0x3718   : > { %v7341_v22 = vmul.f32 %v7340_v43, %v7340_v43  ;;  %v7303_v21 = vmul.f32 %v7302_v2, %v7302_v2 }
0x371a   : > { %7343 = vrot.lane.b32.xlu0 %v7341_v22, %s13371_s7  ;;  %7305 = vrot.lane.b32.xlu1 %v7303_v21, %s13372_s28  ;;  %v7373_v22 = vstv %s9253_s13 }
0x371e   : > { %7353 = vrot.lane.b32.xlu1 %v7318_v32, %s13400_s0 }
0x3722   : > { %7357 = vrot.lane.b32.xlu1 %v7327_v35, %s13400_s0 }
0x378c   : > { %v7344_v53 = vpop.permute.xlu0 %7343  ;;  %v7306_v27 = vpop.permute.xlu1 %7305 }
0x378d   : > { %v7346_v23 = vsel %vm997_vm2, %v7344_v53, 0.0  ;;  %v7308_v49 = vsel %vm997_vm2, %v7306_v27, 0.0 }
0x378e   : > { %7347 = vadd.xlane.f32.xlu0 %v7346_v23  ;;  %7309 = vadd.xlane.f32.xlu1 %v7308_v49 }
0x3790   : > { %v7354_v14 = vpop.permute.xlu1 %7353 }
0x3794   : > { %v7358_v55 = vpop.permute.xlu1 %7357 }
0x379f   : > { %7329 = vrot.lane.b32.xlu1 %v7327_v35, %s13378_s12 }
0x37a3   : > { %7399 = vrot.lane.b32.xlu1 %v7180_v1, %s13378_s12 }
0x37a4   : > { %7320 = vrot.lane.b32.xlu0 %v7318_v32, %s13378_s12 }
0x381b   : > { %v7348_v5 = vpop.xlane.xlu0 %7347  ;;  %v7310_v63 = vpop.xlane.xlu1 %7309 }
0x381c   : > { %v7349_v54 = vmul.f32 0.125, %v7348_v5  ;;  %v7311_v61 = vmul.f32 0.125, %v7310_v63 }
0x381e   : > { %v7350_v42 = vadd.f32 1e-05, %v7349_v54  ;;  %v7312_v46 = vadd.f32 1e-05, %v7311_v61  ;;  %v7396_v54 = vstv %s9256_s24 }
0x381f   : > { %v7321_v8 = vpop.permute.xlu0 %7320  ;;  %v7330_v36 = vpop.permute.xlu1 %7329 }
0x3820   : > { %10850 = vrsqrt.f32 %v7350_v42 }
0x3821   : > { %10852 = vrsqrt.f32 %v7312_v46 }
0x382a   : > { %v10851_v38 = vpop.eup %10850 }
0x382b   : > { %v7352_v24 = vmul.f32 %v10851_v38, %v7340_v43  ;;  %v10853_v10 = vpop.eup %10852 }
0x382c   : > { %v7314_v1 = vmul.f32 %v10853_v10, %v7302_v2  ;;  %v7385_v2 = vstv %s9254_s21 }
0x382d   : > { %v7356_v26 = vmul.f32 %v7354_v14, %v7352_v24  ;;  %v7400_v14 = vpop.permute.xlu1 %7399 }
0x382e   : > { %v7323_v62 = vmul.f32 %v7321_v8, %v7314_v1 }
0x382f   : > { %v7360_v3 = vadd.f32 %v7358_v55, %v7356_v26 }
0x3831   : > { %v7366_v39 = vmul.f32 %v7365_v28, %v7360_v3  ;;  %v7389_v37 = vmul.f32 %v7388_v7, %v7360_v3  ;;  %v7412_v28 = vrot.slane %v12699_v45, %v11359_v20 }
0x3833   : > { %7368 = vrot.lane.b32.xlu0 %v7366_v39, %s13370_s8 }
0x3837   : > { %7376 = vrot.lane.b32.xlu0 %v7022_v0, %s13378_s12  ;;  %v7332_v0 = vadd.f32 %v7330_v36, %v7323_v62 }
0x3839   : > { %v7363_v57 = vmul.f32 %v7362_v59, %v7332_v0  ;;  %v7386_v49 = vmul.f32 %v7385_v2, %v7332_v0 }
0x383b   : > { %7380 = vrot.lane.b32.xlu0 %v7293_v25, %s13378_s12 }
0x383f   : > { %7391 = vrot.lane.b32.xlu0 %v7389_v37, %s13370_s8 }
0x38a5   : > { %v7369_v43 = vpop.permute.xlu0 %7368 }
0x38a6   : > { %v7371_v25 = vadd.f32 %v7369_v43, %v7363_v57 }
0x38a8   : > { %v7374_v21 = vadd.f32 %v7373_v22, %v7371_v25 }
0x38a9   : > { %v7377_v32 = vpop.permute.xlu0 %7376 }
0x38aa   : > { %v7379_v35 = vadd.f32 %v7377_v32, %v7374_v21 }
0x38ad   : > { %v7381_v53 = vpop.permute.xlu0 %7380 }
0x38ae   : > { %v7383_v27 = vmul.f32 %v7381_v53, %v7379_v35 }
0x38b0   : > { %7405 = vrot.lane.b32.xlu0 %v7383_v27, %s13372_s28 }
0x38b1   : > { %v7392_v23 = vpop.permute.xlu0 %7391 }
0x38b2   : > { %v7394_v5 = vadd.f32 %v7392_v23, %v7386_v49 }
0x38b4   : > { %v7397_v42 = vadd.f32 %v7396_v54, %v7394_v5 }
0x38b6   : > { %v7402_v38 = vadd.f32 %v7400_v14, %v7397_v42 }
0x38b8   : > { %v7403_v24 = vmul.f32 %v7402_v38, %v12736_v6 }
0x3922   : > { %v7406_v26 = vpop.permute.xlu0 %7405 }
0x3923   : > { %v7408_v55 = vsel %vm997_vm2, %v7406_v26, %v7403_v24 }
0x3924   : > { %10108 = vmatmul.mubr.msk.f32.vlgmr.msra.gmra.mrb[68].mxu0 %vm1335_vm3, %v7408_v55 }
0x3925   : > { %10111 = vmatpush3.msra.mxu0 %v9186_v56 }
0x39f7   : > { %v7482_v3 = vpop.f32.mrb[68].mxu0 }
0x39f8   : > { %v7483_v39 = vadd.f32 %v7482_v3, %v7412_v28  ;;  %v10109_v11 = vpop.f32.mrb[69].mxu0 }
0x39fa   : > { %v7486_v58 = vadd.f32 %v7483_v39, %v12619_v13 }
0x39fc   : > { %7487 = vxpose.xlu1.b32.start.end [1/1] (short) (narrow) %v7486_v58, 32 }
0x3a7c   : > { %v12776_v6 = vpop.trf.xlu1 }
0x3a7d   : > { %10112 = vmatprep.mubr.msk.f32.mxu0 %vm997_vm2, %v12776_v6  ;;  %v8233_v38 = vsel %vm997_vm2, %v12776_v6, 0.0 }
0x3a80   : > { %v12780_v7 = vpop.trf.xlu1 }
0x3a81   : > { %10113 = vmatmul.mubr.msk.f32.vlgmr.msra.gmra.mrb[70].mxu0 %vm997_vm2, %v12780_v7  ;;  %v8236_v24 = vsel %vm997_vm2, %v12780_v7, 0.0 }
0x3a84   : > { %v12784_v45 = vpop.trf.xlu1 }
0x3a85   : > { %10115 = vmatprep.mubr.msk.f32.mxu0 %vm997_vm2, %v12784_v45 }
0x3a88   : > { %v12788_v13 = vpop.trf.xlu1 }
0x3a89   : > { %10116 = vmatmul.mubr.msk.f32.gmra.mrb[72].mxu0 %vm997_vm2, %v12788_v13 }
0x3b54   : > { %v10114_v37 = vpop.f32.mrb[70].mxu0 }
0x3b55   : > { %v7597_v63 = vpop.f32.mrb[71].mxu0 }
0x3b56   : > { %v12792_v61 = vpack.i.bf16 %v10114_v37, %v7597_v63  ;;  %10126 = vmatprep.mubr.msk.f32.mxu1 %vm997_vm2, %v7597_v63 }
0x3b58   : > { %10627 = vrot.lane.b32.xlu0 %v12792_v61, %s13372_s28 }
0x3b5c   : > { %v10117_v46 = vpop.f32.mrb[72].mxu0 }
0x3b5d   : > { %v7607_v10 = vpop.f32.mrb[73].mxu0 }
0x3b5e   : > { %v12797_v1 = vpack.i.bf16 %v10117_v46, %v7607_v10 }
0x3b60   : > { %10632 = vrot.lane.b32.xlu0 %v12797_v1, %s13372_s28 }
0x3bca   : > { %v10628_v8 = vpop.permute.xlu0 %10627 }
0x3bcb   : > { %v10630_v62 = vunpack.i.h.bf16 %v10628_v8  ;;  %v10629_v36 = vunpack.i.l.bf16 %v10628_v8 }
0x3bcd   : > { %v10434_v0 = vpack.c.bf16 %v10630_v62, %v10629_v36 }
0x3bcf   : > { %10436 = vmatprep.subr.msk.bf16.mxu1 %vm11485_vm4, %v10434_v0 }
0x3bd0   : > { %10439 = vmatpush3.bf16.xpose.msk.msra.mxu1 %vm11485_vm4, %v10434_v0 }
0x3bd2   : > { %v10633_v59 = vpop.permute.xlu0 %10632 }
0x3bd3   : > { %v10635_v57 = vunpack.i.h.bf16 %v10633_v59  ;;  %v10634_v43 = vunpack.i.l.bf16 %v10633_v59 }
0x3bd5   : > { %v10440_v22 = vpack.c.bf16 %v10635_v57, %v10634_v43 }
0x3bd7   : > { %10442 = vmatprep.subr.msk.bf16.mxu1 %vm11485_vm4, %v10440_v22 }
0x3bd8   : > { %10445 = vmatpush3.bf16.xpose.msk.msra.mxu1 %vm11485_vm4, %v10440_v22 }
0x3bdf   : > { %10127 = vmatmul.mubr.msk.f32.vlgmr.msra.gmra.mrb[78].mxu1 %vm997_vm2, %v10114_v37 }
0x3be0   : > { %10129 = vmatprep.mubr.msk.f32.mxu1 %vm997_vm2, %v7607_v10 }
0x3be3   : > { %10130 = vmatmul.mubr.msk.f32.gmra.mrb[80].mxu1 %vm997_vm2, %v10117_v46 }
0x3cb2   : > { %v10128_v25 = vpop.f32.mrb[78].mxu1 }
0x3cb3   : > { %v12812_v21 = vmul.f32 0.35355338, %v10128_v25  ;;  %v7710_v32 = vpop.f32.mrb[79].mxu1 }
0x3cb4   : > { %v12814_v35 = vmul.f32 0.35355338, %v7710_v32 }
0x3cb5   : > { %v7992_v53 = vadd.f32 %v12812_v21, %v12452_v41 }
0x3cb6   : > { %v10131_v27 = vpop.f32.mrb[80].mxu1  ;;  %v7991_v48 = vadd.f32 %v12814_v35, %v12457_v17 }
0x3cb7   : > { %v12820_v2 = vmul.f32 0.35355338, %v10131_v27  ;;  %v7720_v23 = vpop.f32.mrb[81].mxu1  ;;  %v7998_v49 = vsel %vm920_vm1, %v7992_v53, -inf }
0x3cb8   : > { %v12823_v5 = vmul.f32 0.35355338, %v7720_v23  ;;  %7999 = vmax.xlane.f32.xlu0 %v7998_v49  ;;  %v7995_v41 = vsel %vm920_vm1, %v7991_v48, -inf }
0x3cb9   : > { %v7994_v42 = vadd.f32 %v12820_v2, %v12459_v33  ;;  %v8239_v33 = vsel %vm997_vm2, %v12784_v45, 0.0 }
0x3cba   : > { %v7993_v54 = vadd.f32 %v12823_v5, %v12479_v12  ;;  %v8242_v12 = vsel %vm997_vm2, %v12788_v13, 0.0 }
0x3cbb   : > { %v8004_v17 = vsel %vm920_vm1, %v7994_v42, -inf }
0x3cbc   : > { %7996 = vmax.xlane.f32.xlu0 %v7995_v41  ;;  %v8001_v14 = vsel %vm920_vm1, %v7993_v54, -inf }
0x3cbd   : > { %8002 = vmax.xlane.f32.xlu1 %v8001_v14 }
0x3cc0   : > { %8005 = vmax.xlane.f32.xlu0 %v8004_v17 }
0x3cc4   : > { %8234 = vadd.xlane.f32.xlu0 %v8233_v38 }
0x3cc8   : > { %8237 = vadd.xlane.f32.xlu0 %v8236_v24 }
0x3ccc   : > { %8240 = vadd.xlane.f32.xlu0 %v8239_v33 }
0x3cd0   : > { %8243 = vadd.xlane.f32.xlu0 %v8242_v12 }
0x3d45   : > { %v8000_v26 = vpop.xlane.xlu0 %7999 }
0x3d46   : > { %v8008_v3 = vsub.f32 %v7992_v53, %v8000_v26 }
0x3d48   : > { %v8013_v58 = vmul.f32 1.442695, %v8008_v3 }
0x3d49   : > { %v7997_v55 = vpop.xlane.xlu0 %7996 }
0x3d4a   : > { %v8007_v56 = vsub.f32 %v7991_v48, %v7997_v55  ;;  %10854 = vpow2.f32 %v8013_v58  ;;  %v8003_v36 = vpop.xlane.xlu1 %8002 }
0x3d4b   : > { %v8009_v25 = vsub.f32 %v7993_v54, %v8003_v36 }
0x3d4c   : > { %v8011_v8 = vmul.f32 1.442695, %v8007_v56 }
0x3d4d   : > { %v8006_v28 = vpop.xlane.xlu0 %8005 }
0x3d4e   : > { %v8010_v62 = vsub.f32 %v7994_v42, %v8006_v28  ;;  %10856 = vpow2.f32 %v8011_v8  ;;  %v8015_v42 = vmul.f32 1.442695, %v8009_v25 }
0x3d50   : > { %v8017_v32 = vmul.f32 1.442695, %v8010_v62 }
0x3d51   : > { %v8235_v39 = vpop.xlane.xlu0 %8234 }
0x3d52   : > { %v8245_v11 = vmul.f32 0.125, %v8235_v39  ;;  %10858 = vpow2.f32 %v8017_v32  ;;  %v12883_v39 = vadd.f32 %v12814_v35, %v12440_v34  ;;  %v12899_v34 = vadd.f32 %v12823_v5, %v12471_v52 }
0x3d53   : > { %10860 = vpow2.f32 %v8015_v42 }
0x3d54   : > { %v12841_v37 = vsub.f32 %v12776_v6, %v8245_v11  ;;  %v12861_v54 = vpop.eup %10854  ;;  %v12887_v11 = vadd.f32 %v12820_v2, %v12463_v50  ;;  %v7737_v58 = vsel %vm920_vm1, %v12883_v39, -inf }
0x3d55   : > { %v8238_v63 = vpop.xlane.xlu0 %8237  ;;  %v8022_v38 = vsel %vm920_vm1, %v12861_v54, 0.0 }
0x3d56   : > { %v8246_v46 = vmul.f32 0.125, %v8238_v63  ;;  %v8253_v10 = vmul.f32 %v12841_v37, %v12841_v37  ;;  %v7746_v56 = vsel %vm920_vm1, %v12887_v11, -inf }
0x3d58   : > { %v12846_v0 = vsub.f32 %v12780_v7, %v8246_v46  ;;  %v8257_v59 = vsel %vm997_vm2, %v8253_v10, 0.0  ;;  %v10857_v33 = vpop.eup %10856 }
0x3d59   : > { %8258 = vadd.xlane.f32.xlu0 %v8257_v59  ;;  %v8241_v57 = vpop.xlane.xlu0 %8240  ;;  %v8019_v12 = vsel %vm920_vm1, %v10857_v33, 0.0 }
0x3d5a   : > { %v8247_v43 = vmul.f32 0.125, %v8241_v57  ;;  %v8254_v22 = vmul.f32 %v12846_v0, %v12846_v0 }
0x3d5c   : > { %v12852_v53 = vsub.f32 %v12784_v45, %v8247_v43  ;;  %v8260_v27 = vsel %vm997_vm2, %v8254_v22, 0.0  ;;  %v12869_v26 = vpop.eup %10858 }
0x3d5d   : > { %8261 = vadd.xlane.f32.xlu0 %v8260_v27  ;;  %v8244_v48 = vpop.xlane.xlu0 %8243  ;;  %v8028_v55 = vsel %vm920_vm1, %v12869_v26, 0.0  ;;  %v12873_v28 = vpop.eup %10860 }
0x3d5e   : > { %v8248_v23 = vmul.f32 0.125, %v8244_v48  ;;  %v8255_v49 = vmul.f32 %v12852_v53, %v12852_v53  ;;  %v8025_v3 = vsel %vm920_vm1, %v12873_v28, 0.0 }
0x3d60   : > { %v12858_v41 = vsub.f32 %v12788_v13, %v8248_v23  ;;  %v8263_v14 = vsel %vm997_vm2, %v8255_v49, 0.0 }
0x3d61   : > { %8264 = vadd.xlane.f32.xlu0 %v8263_v14 }
0x3d62   : > { %v8256_v17 = vmul.f32 %v12858_v41, %v12858_v41 }
0x3d64   : > { %v8266_v24 = vsel %vm997_vm2, %v8256_v17, 0.0 }
0x3d65   : > { %8023 = vadd.xlane.f32.xlu0 %v8022_v38  ;;  %8267 = vadd.xlane.f32.xlu1 %v8266_v24  ;;  %v9184_v24 = vld [vmem:[%s13280_s25 + $0x4] sm:$0x7] }
0x3d69   : > { %8020 = vadd.xlane.f32.xlu0 %v8019_v12 }
0x3d6d   : > { %8029 = vadd.xlane.f32.xlu0 %v8028_v55 }
0x3d71   : > { %8026 = vadd.xlane.f32.xlu0 %v8025_v3 }
0x3d76   : > { %10642 = vrot.lane.b32.xlu1 %v12797_v1, %s13370_s8  ;;  %v12895_v1 = vadd.f32 %v12812_v21, %v12438_v15 }
0x3d78   : > { %v7740_v50 = vsel %vm920_vm1, %v12895_v1, -inf }
0x3d87   : > { %10637 = vrot.lane.b32.xlu0 %v12792_v61, %s13370_s8  ;;  %v7743_v61 = vsel %vm920_vm1, %v12899_v34, -inf }
0x3d9a   : > { %7738 = vmax.xlane.f32.xlu1 %v7737_v58 }
0x3d9e   : > { %7747 = vmax.xlane.f32.xlu1 %v7746_v56  ;;  %v9188_v56 = vld [vmem:[%s13277_s22 + $0x8] sm:$0xff] }
0x3da6   : > { %7741 = vmax.xlane.f32.xlu0 %v7740_v50 }
0x3daa   : > { %7744 = vmax.xlane.f32.xlu0 %v7743_v61 }
0x3de6   : > { %v8259_v35 = vpop.xlane.xlu0 %8258 }
0x3de7   : > { %v8269_v10 = vmul.f32 0.125, %v8259_v35 }
0x3de9   : > { %v8273_v52 = vadd.f32 1e-05, %v8269_v10 }
0x3dea   : > { %v8262_v2 = vpop.xlane.xlu0 %8261 }
0x3deb   : > { %v8270_v8 = vmul.f32 0.125, %v8262_v2 }
0x3ded   : > { %v8274_v5 = vadd.f32 1e-05, %v8270_v8 }
0x3dee   : > { %v8265_v63 = vpop.xlane.xlu0 %8264 }
0x3def   : > { %v8271_v21 = vmul.f32 0.125, %v8265_v63 }
0x3df1   : > { %v8275_v57 = vadd.f32 1e-05, %v8271_v21 }
0x3df2   : > { %v8024_v46 = vpop.xlane.xlu0 %8023  ;;  %v8268_v62 = vpop.xlane.xlu1 %8267 }
0x3df3   : > { %v8272_v36 = vmul.f32 0.125, %v8268_v62 }
0x3df5   : > { %v8276_v43 = vadd.f32 1e-05, %v8272_v36 }
0x3df6   : > { %v8021_v15 = vpop.xlane.xlu0 %8020  ;;  %v10643_v25 = vpop.permute.xlu1 %10642 }
0x3df7   : > { %10862 = vrcp.f32 %v8021_v15  ;;  %v10645_v27 = vunpack.i.h.bf16 %v10643_v25  ;;  %v10644_v23 = vunpack.i.l.bf16 %v10643_v25  ;;  %v8296_v15 = vrot.slane %v9184_v24, %v11356_v18 }
0x3df8   : > { %10864 = vrsqrt.f32 %v8273_v52 }
0x3df9   : > { %10866 = vrsqrt.f32 %v8274_v5  ;;  %v10450_v12 = vpack.c.bf16 %v10645_v27, %v10644_v23 }
0x3dfa   : > { %v8030_v59 = vpop.xlane.xlu0 %8029  ;;  %10868 = vrsqrt.f32 %v8275_v57 }
0x3dfb   : > { %10870 = vrcp.f32 %v8024_v46 }
0x3dfe   : > { %v8027_v22 = vpop.xlane.xlu0 %8026 }
0x3dff   : > { %10872 = vrcp.f32 %v8027_v22 }
0x3e00   : > { %10874 = vrsqrt.f32 %v8276_v43 }
0x3e01   : > { %v10863_v32 = vpop.eup %10862  ;;  %10876 = vrcp.f32 %v8030_v59 }
0x3e02   : > { %v10638_v48 = vpop.permute.xlu0 %10637  ;;  %v8035_v14 = vmul.f32 %v10863_v32, %v10857_v33  ;;  %v10865_v38 = vpop.eup %10864  ;;  %v8288_v33 = vrot.slane %v9184_v24, %v11319_v51 }
0x3e03   : > { %v10640_v49 = vunpack.i.h.bf16 %v10638_v48  ;;  %v10639_v42 = vunpack.i.l.bf16 %v10638_v48  ;;  %v10867_v55 = vpop.eup %10866  ;;  %v8281_v50 = vmul.f32 %v10865_v38, %v12841_v37 }
0x3e04   : > { %10162 = vmatprep.mubr.msk.f32.mxu1 %vm920_vm1, %v8035_v14  ;;  %v10869_v3 = vpop.eup %10868  ;;  %v8282_v2 = vmul.f32 %v10867_v55, %v12846_v0 }
0x3e05   : > { %v10446_v17 = vpack.c.bf16 %v10640_v49, %v10639_v42  ;;  %v10871_v58 = vpop.eup %10870  ;;  %v8289_v8 = vmul.f32 %v8288_v33, %v8281_v50  ;;  %v8283_v21 = vmul.f32 %v10869_v3, %v12852_v53 }
0x3e06   : > { %v8036_v63 = vmul.f32 %v10871_v58, %v12861_v54  ;;  %v8290_v37 = vmul.f32 %v8288_v33, %v8282_v2 }
0x3e07   : > { %10447 = vmatprep.subr.bf16.mxu0 %v10446_v17  ;;  %10455 = vmatprep.subr.bf16.mxu1 %v10446_v17  ;;  %v8297_v54 = vadd.f32 %v8296_v15, %v8289_v8  ;;  %v8291_v52 = vmul.f32 %v8288_v33, %v8283_v21  ;;  %v9286_v21 = vld [vmem:[%s13278_s23 + $0x1] ss:$0 sm:$0xff] }
0x3e08   : > { %10449 = vmatpush3.bf16.msra.mxu0 %v10446_v17  ;;  %10457 = vmatpush3.bf16.msra.mxu1 %v10446_v17 }
0x3e09   : > { %10451 = vmatprep.subr.bf16.mxu0 %v10450_v12  ;;  %10459 = vmatprep.subr.bf16.mxu1 %v10450_v12  ;;  %v10873_v61 = vpop.eup %10872  ;;  %v8299_v36 = vadd.f32 %v8296_v15, %v8291_v52 }
0x3e0a   : > { %v10875_v35 = vpop.eup %10874  ;;  %v8037_v10 = vmul.f32 %v10873_v61, %v12873_v28  ;;  %v8298_v28 = vadd.f32 %v8296_v15, %v8290_v37 }
0x3e0b   : > { %v10877_v46 = vpop.eup %10876  ;;  %v8284_v0 = vmul.f32 %v10875_v35, %v12858_v41 }
0x3e0c   : > { %10453 = vmatpush3.bf16.msra.mxu0 %v10450_v12  ;;  %10461 = vmatpush3.bf16.msra.mxu1 %v10450_v12  ;;  %v8038_v62 = vmul.f32 %v10877_v46, %v12869_v26 }
0x3e0d   : > { %10176 = vmatprep.subr.mxu1 %v9188_v56  ;;  %v8292_v5 = vmul.f32 %v8288_v33, %v8284_v0 }
0x3e0f   : > { %10163 = vmatmul.mubr.msk.f32.vlgmr.msra.gmra.mrb[82].mxu1 %vm920_vm1, %v8036_v63  ;;  %v8300_v53 = vadd.f32 %v8296_v15, %v8292_v5 }
0x3e10   : > { %10165 = vmatprep.mubr.msk.f32.mxu1 %vm920_vm1, %v8037_v10  ;;  %10177 = vmatpush3.msra.mxu1 %v9188_v56 }
0x3e13   : > { %10166 = vmatmul.mubr.msk.f32.gmra.mrb[84].mxu1 %vm920_vm1, %v8038_v62 }
0x3e14   : > { %10178 = vmatprep.mubr.msk.f32.mxu1 %vm997_vm2, %v8297_v54 }
0x3e17   : > { %10179 = vmatmul.mubr.msk.f32.vlgmr.msra.gmra.mrb[86].mxu1 %vm997_vm2, %v8298_v28 }
0x3e18   : > { %10181 = vmatprep.mubr.msk.f32.mxu1 %vm997_vm2, %v8299_v36 }
0x3e1b   : > { %10182 = vmatmul.mubr.msk.f32.gmra.mrb[88].mxu1 %vm997_vm2, %v8300_v53 }
0x3e27   : > { %v7739_v59 = vpop.xlane.xlu1 %7738 }
0x3e28   : > { %v7749_v26 = vsub.f32 %v12883_v39, %v7739_v59 }
0x3e2a   : > { %v7753_v41 = vmul.f32 1.442695, %v7749_v26 }
0x3e2b   : > { %v7748_v57 = vpop.xlane.xlu1 %7747 }
0x3e2c   : > { %10878 = vpow2.f32 %v7753_v41  ;;  %v7752_v43 = vsub.f32 %v12887_v11, %v7748_v57 }
0x3e2e   : > { %v7759_v27 = vmul.f32 1.442695, %v7752_v43 }
0x3e33   : > { %v7742_v22 = vpop.xlane.xlu0 %7741 }
0x3e34   : > { %v7750_v25 = vsub.f32 %v12895_v1, %v7742_v22 }
0x3e36   : > { %v10879_v32 = vpop.eup %10878  ;;  %v7755_v48 = vmul.f32 1.442695, %v7750_v25 }
0x3e37   : > { %v7745_v23 = vpop.xlane.xlu0 %7744  ;;  %v7761_v49 = vsel %vm920_vm1, %v10879_v32, 0.0 }
0x3e38   : > { %10880 = vpow2.f32 %v7755_v48  ;;  %v7751_v42 = vsub.f32 %v12899_v34, %v7745_v23  ;;  %7762 = vadd.xlane.f32.xlu0 %v7761_v49 }
0x3e39   : > { %10882 = vpow2.f32 %v7759_v27 }
0x3e3a   : > { %v7757_v39 = vmul.f32 1.442695, %v7751_v42 }
0x3e3c   : > { %10884 = vpow2.f32 %v7757_v39 }
0x3e42   : > { %v10881_v14 = vpop.eup %10880 }
0x3e43   : > { %v7764_v17 = vsel %vm920_vm1, %v10881_v14, 0.0  ;;  %v10883_v11 = vpop.eup %10882 }
0x3e44   : > { %7765 = vadd.xlane.f32.xlu1 %v7764_v17  ;;  %v7770_v1 = vsel %vm920_vm1, %v10883_v11, 0.0 }
0x3e46   : > { %v10885_v38 = vpop.eup %10884 }
0x3e47   : > { %v7767_v24 = vsel %vm920_vm1, %v10885_v38, 0.0 }
0x3e48   : > { %7771 = vadd.xlane.f32.xlu1 %v7770_v1  ;;  %7768 = vadd.xlane.f32.xlu0 %v7767_v24 }
0x3ec5   : > { %v7763_v12 = vpop.xlane.xlu0 %7762 }
0x3ec6   : > { %10886 = vrcp.f32 %v7763_v12 }
0x3ed0   : > { %v10887_v55 = vpop.eup %10886 }
0x3ed1   : > { %v7766_v34 = vpop.xlane.xlu1 %7765  ;;  %v7777_v3 = vmul.f32 %v10887_v55, %v10879_v32 }
0x3ed2   : > { %10888 = vrcp.f32 %v7766_v34 }
0x3ed3   : > { %10140 = vmatprep.mubr.msk.f32.mxu0 %vm920_vm1, %v7777_v3 }
0x3ed5   : > { %v7772_v58 = vpop.xlane.xlu1 %7771  ;;  %v7769_v33 = vpop.xlane.xlu0 %7768 }
0x3ed6   : > { %10890 = vrcp.f32 %v7772_v58 }
0x3ed7   : > { %10892 = vrcp.f32 %v7769_v33 }
0x3edc   : > { %v10889_v56 = vpop.eup %10888 }
0x3edd   : > { %v7778_v50 = vmul.f32 %v10889_v56, %v10881_v14 }
0x3edf   : > { %10141 = vmatmul.mubr.msk.f32.vlgmr.msra.gmra.mrb[74].mxu0 %vm920_vm1, %v7778_v50 }
0x3ee0   : > { %v10891_v61 = vpop.eup %10890 }
0x3ee1   : > { %v10893_v35 = vpop.eup %10892  ;;  %v7780_v2 = vmul.f32 %v10891_v61, %v10883_v11 }
0x3ee2   : > { %v12938_v63 = vpop.f32.mrb[82].mxu1  ;;  %v7779_v46 = vmul.f32 %v10893_v35, %v10885_v38 }
0x3ee3   : > { %v12940_v10 = vpop.f32.mrb[83].mxu1 }
0x3ee4   : > { %10143 = vmatprep.mubr.msk.f32.mxu0 %vm920_vm1, %v7779_v46 }
0x3ee5   : > { %10144 = vmatmul.mubr.msk.f32.gmra.mrb[76].mxu0 %vm920_vm1, %v7780_v2 }
0x3ee6   : > { %v12944_v8 = vpop.f32.mrb[84].mxu1 }
0x3ee7   : > { %v12946_v15 = vpop.f32.mrb[85].mxu1 }
0x3eea   : > { %v10180_v37 = vpop.f32.mrb[86].mxu1 }
0x3eeb   : > { %v8391_v62 = vadd.f32 %v10180_v37, %v9286_v21  ;;  %v8385_v0 = vpop.f32.mrb[87].mxu1 }
0x3eec   : > { %v8386_v54 = vadd.f32 %v9286_v21, %v8385_v0  ;;  %v9187_v0 = vld [vmem:[%s13401_s29 + $0x8] sm:$0xff]  ;;  %s13407_s29 = sld [smem:[#allocation35_spill]] }
0x3eed   : > { %v8409_v52 = vmul.f32 0.044715, %v8391_v62  ;;  %v8405_v55 = vmul.f32 0.5, %v8391_v62  ;;  %10146 = vmatprep.subr.mxu0 %v9187_v0 }
0x3eee   : > { %v8408_v28 = vmul.f32 0.044715, %v8386_v54  ;;  %v10183_v5 = vpop.f32.mrb[88].mxu1  ;;  %v8404_v3 = vmul.f32 0.5, %v8386_v54  ;;  %10147 = vmatpush3.msra.mxu0 %v9187_v0 }
0x3eef   : > { %v8413_v36 = vmul.f32 %v8409_v52, %v8391_v62  ;;  %v8401_v53 = vadd.f32 %v10183_v5, %v9286_v21  ;;  %v8395_v59 = vpop.f32.mrb[89].mxu1  ;;  %10168 = vmatprep.subr.mxu0 %v9187_v0 }
0x3ef0   : > { %v8412_v26 = vmul.f32 %v8408_v28, %v8386_v54  ;;  %v8396_v41 = vadd.f32 %v9286_v21, %v8395_v59 }
0x3ef1   : > { %v8417_v57 = vmul.f32 %v8413_v36, %v8391_v62  ;;  %v8411_v43 = vmul.f32 0.044715, %v8401_v53  ;;  %v8407_v35 = vmul.f32 0.5, %v8401_v53 }
0x3ef2   : > { %v8416_v22 = vmul.f32 %v8412_v26, %v8386_v54  ;;  %v8410_v25 = vmul.f32 0.044715, %v8396_v41  ;;  %v8406_v46 = vmul.f32 0.5, %v8396_v41 }
0x3ef3   : > { %v8421_v32 = vadd.f32 %v8417_v57, %v8391_v62  ;;  %v8415_v27 = vmul.f32 %v8411_v43, %v8401_v53 }
0x3ef4   : > { %v8420_v48 = vadd.f32 %v8416_v22, %v8386_v54  ;;  %v8414_v23 = vmul.f32 %v8410_v25, %v8396_v41 }
0x3ef5   : > { %v8425_v49 = vmul.f32 0.7978846, %v8421_v32  ;;  %v8419_v42 = vmul.f32 %v8415_v27, %v8401_v53 }
0x3ef6   : > { %v8424_v39 = vmul.f32 0.7978846, %v8420_v48  ;;  %v8418_v14 = vmul.f32 %v8414_v23, %v8396_v41 }
0x3ef7   : > { %10894 = vtanh.f32 %v8425_v49  ;;  %v8423_v17 = vadd.f32 %v8419_v42, %v8401_v53 }
0x3ef8   : > { %10896 = vtanh.f32 %v8424_v39  ;;  %v8422_v11 = vadd.f32 %v8418_v14, %v8396_v41 }
0x3ef9   : > { %v8427_v38 = vmul.f32 0.7978846, %v8423_v17 }
0x3efa   : > { %v8426_v1 = vmul.f32 0.7978846, %v8422_v11 }
0x3efb   : > { %10898 = vtanh.f32 %v8427_v38 }
0x3efc   : > { %10900 = vtanh.f32 %v8426_v1 }
0x3f01   : > { %v10895_v24 = vpop.eup %10894 }
0x3f02   : > { %v10897_v12 = vpop.eup %10896  ;;  %v8433_v34 = vadd.f32 1.0, %v10895_v24 }
0x3f03   : > { %v8432_v58 = vadd.f32 1.0, %v10897_v12 }
0x3f04   : > { %v12951_v33 = vmul.f32 %v8433_v34, %v8405_v55 }
0x3f05   : > { %v10899_v56 = vpop.eup %10898  ;;  %v12953_v50 = vmul.f32 %v8432_v58, %v8404_v3 }
0x3f06   : > { %v10901_v61 = vpop.eup %10900  ;;  %8550 = vrot.lane.b32.xlu1 %v12951_v33, %s13371_s7  ;;  %v8435_v2 = vadd.f32 1.0, %v10899_v56 }
0x3f07   : > { %8548 = vrot.lane.b32.xlu0 %v12953_v50, %s13371_s7  ;;  %v8434_v21 = vadd.f32 1.0, %v10901_v61 }
0x3f08   : > { %v12959_v37 = vmul.f32 %v8435_v2, %v8407_v35 }
0x3f09   : > { %v12961_v62 = vmul.f32 %v8434_v21, %v8406_v46 }
0x3f0b   : > { %8552 = vrot.lane.b32.xlu1 %v12961_v62, %s13371_s7  ;;  %8554 = vrot.lane.b32.xlu0 %v12959_v37, %s13371_s7 }
0x3f0f   : > { %8444 = vrot.lane.b32.xlu1 %v12953_v50, %s13372_s28  ;;  %8446 = vrot.lane.b32.xlu0 %v12951_v33, %s13372_s28 }
0x3f13   : > { %8450 = vrot.lane.b32.xlu1 %v12959_v37, %s13372_s28  ;;  %8448 = vrot.lane.b32.xlu0 %v12961_v62, %s13372_s28 }
0x3f78   : > { %v8551_v54 = vpop.permute.xlu1 %8550 }
0x3f79   : > { %v8563_v52 = vsel %vm997_vm2, %v8551_v54, 0.0  ;;  %v8549_v28 = vpop.permute.xlu0 %8548 }
0x3f7a   : > { %v8560_v5 = vsel %vm997_vm2, %v8549_v28, 0.0  ;;  %8564 = vadd.xlane.f32.xlu0 %v8563_v52  ;;  %v9185_v28 = vld [vmem:[%s13402_s5 + $0x4] sm:$0x7]  ;;  %s11025_s5 = smov [#allocation5]  }
0x3f7b   : > { %8561 = vadd.xlane.f32.xlu1 %v8560_v5 }
0x3f7d   : > { %v8553_v36 = vpop.permute.xlu1 %8552  ;;  %v8555_v53 = vpop.permute.xlu0 %8554 }
0x3f7e   : > { %v8566_v59 = vsel %vm997_vm2, %v8553_v36, 0.0  ;;  %v8569_v26 = vsel %vm997_vm2, %v8555_v53, 0.0 }
0x3f7f   : > { %8567 = vadd.xlane.f32.xlu1 %v8566_v59  ;;  %8570 = vadd.xlane.f32.xlu0 %v8569_v26 }
0x3f81   : > { %v12982_v41 = vpop.permute.xlu1 %8444  ;;  %v12984_v57 = vpop.permute.xlu0 %8446 }
0x3f82   : > { %v8456_v43 = vsel %vm997_vm2, %v12982_v41, 0.0  ;;  %v8459_v22 = vsel %vm997_vm2, %v12984_v57, 0.0 }
0x3f83   : > { %8457 = vadd.xlane.f32.xlu0 %v8456_v43  ;;  %8460 = vadd.xlane.f32.xlu1 %v8459_v22  ;;  %v8527_v43 = vrot.slane %v9185_v28, %v11356_v18 }
0x3f85   : > { %v12990_v25 = vpop.permute.xlu1 %8450  ;;  %v12992_v32 = vpop.permute.xlu0 %8448 }
0x3f86   : > { %v8465_v27 = vsel %vm997_vm2, %v12990_v25, 0.0  ;;  %v8462_v48 = vsel %vm997_vm2, %v12992_v32, 0.0 }
0x3f87   : > { %8466 = vadd.xlane.f32.xlu1 %v8465_v27  ;;  %8463 = vadd.xlane.f32.xlu0 %v8462_v48 }
0x3fb2   : > { %v10142_v23 = vpop.f32.mrb[74].mxu0 }
0x3fb3   : > { %v7871_v49 = vpop.f32.mrb[75].mxu0 }
0x3fb4   : > { %10148 = vmatprep.mubr.msk.f32.mxu0 %vm997_vm2, %v7871_v49 }
0x3fb5   : > { %10149 = vmatmul.mubr.msk.f32.vlgmr.msra.gmra.mrb[78].mxu0 %vm997_vm2, %v10142_v23 }
0x3fb6   : > { %10169 = vmatpush3.msra.mxu0 %v9187_v0 }
0x3fb8   : > { %v10145_v42 = vpop.f32.mrb[76].mxu0 }
0x3fb9   : > { %v7881_v39 = vpop.f32.mrb[77].mxu0 }
0x3fba   : > { %10151 = vmatprep.mubr.msk.f32.mxu0 %vm997_vm2, %v7881_v39 }
0x3fbb   : > { %10152 = vmatmul.mubr.msk.f32.gmra.mrb[80].mxu0 %vm997_vm2, %v10145_v42 }
0x3fbc   : > { %10170 = vmatprep.mubr.msk.f32.mxu0 %vm997_vm2, %v12940_v10 }
0x3fbf   : > { %10171 = vmatmul.mubr.msk.f32.vlgmr.msra.gmra.mrb[82].mxu0 %vm997_vm2, %v12938_v63 }
0x3fc0   : > { %10173 = vmatprep.mubr.msk.f32.mxu0 %vm997_vm2, %v12946_v15 }
0x3fc3   : > { %10174 = vmatmul.mubr.msk.f32.gmra.mrb[84].mxu0 %vm997_vm2, %v12944_v8 }
0x4007   : > { %v8565_v14 = vpop.xlane.xlu0 %8564 }
0x4008   : > { %v8573_v17 = vmul.f32 0.125, %v8565_v14  ;;  %v8562_v11 = vpop.xlane.xlu1 %8561 }
0x4009   : > { %v8572_v38 = vmul.f32 0.125, %v8562_v11 }
0x400a   : > { %v13011_v1 = vsub.f32 %v12951_v33, %v8573_v17 }
0x400b   : > { %v13014_v24 = vsub.f32 %v12953_v50, %v8572_v38 }
0x400c   : > { %v8581_v10 = vmul.f32 %v13011_v1, %v13011_v1  ;;  %v8568_v63 = vpop.xlane.xlu1 %8567  ;;  %v8571_v12 = vpop.xlane.xlu0 %8570 }
0x400d   : > { %v8580_v15 = vmul.f32 %v13014_v24, %v13014_v24  ;;  %v8574_v55 = vmul.f32 0.125, %v8568_v63  ;;  %v8575_v8 = vmul.f32 0.125, %v8571_v12 }
0x400e   : > { %8590 = vrot.lane.b32.xlu1 %v8581_v10, %s13371_s7 }
0x400f   : > { %v13022_v34 = vsub.f32 %v12961_v62, %v8574_v55  ;;  %v13025_v3 = vsub.f32 %v12959_v37, %v8575_v8  ;;  %8588 = vrot.lane.b32.xlu0 %v8580_v15, %s13371_s7  ;;  %v7893_v15 = vrot.slane %v9185_v28, %v11319_v51 }
0x4010   : > { %v8461_v58 = vpop.xlane.xlu1 %8460  ;;  %v8458_v56 = vpop.xlane.xlu0 %8457 }
0x4011   : > { %v8582_v61 = vmul.f32 %v13022_v34, %v13022_v34  ;;  %v8583_v35 = vmul.f32 %v13025_v3, %v13025_v3  ;;  %v8469_v2 = vmul.f32 0.125, %v8461_v58  ;;  %v8468_v46 = vmul.f32 0.125, %v8458_v56 }
0x4013   : > { %v13033_v21 = vsub.f32 %v12951_v33, %v8469_v2  ;;  %v13036_v0 = vsub.f32 %v12953_v50, %v8468_v46  ;;  %8592 = vrot.lane.b32.xlu1 %v8582_v61, %s13371_s7  ;;  %8594 = vrot.lane.b32.xlu0 %v8583_v35, %s13371_s7  ;;  %s9292_s7 = sld [smem:[#allocation2 + $0x301]] }
0x4014   : > { %v8467_v54 = vpop.xlane.xlu1 %8466  ;;  %v8464_v52 = vpop.xlane.xlu0 %8463 }
0x4015   : > { %v8477_v5 = vmul.f32 %v13033_v21, %v13033_v21  ;;  %v8476_v36 = vmul.f32 %v13036_v0, %v13036_v0  ;;  %v8471_v53 = vmul.f32 0.125, %v8467_v54  ;;  %v8470_v59 = vmul.f32 0.125, %v8464_v52 }
0x4016   : > { %v8539_v54 = vrot.slane %v9185_v28, %v11359_v20 }
0x4017   : > { %v13048_v26 = vsub.f32 %v12959_v37, %v8471_v53  ;;  %8486 = vrot.lane.b32.xlu0 %v8477_v5, %s13372_s28  ;;  %8484 = vrot.lane.b32.xlu1 %v8476_v36, %s13372_s28  ;;  %v13056_v27 = vsub.f32 %v12961_v62, %v8470_v59 }
0x4019   : > { %v8479_v22 = vmul.f32 %v13048_v26, %v13048_v26  ;;  %v8478_v48 = vmul.f32 %v13056_v27, %v13056_v27 }
0x401b   : > { %8628 = vrot.lane.b32.xlu0 %v8527_v43, %s13400_s0  ;;  %8490 = vrot.lane.b32.xlu1 %v8479_v22, %s13372_s28 }
0x401f   : > { %8488 = vrot.lane.b32.xlu0 %v8478_v48, %s13372_s28 }
0x4080   : > { %v8591_v23 = vpop.permute.xlu1 %8590 }
0x4081   : > { %v8603_v49 = vsel %vm997_vm2, %v8591_v23, 0.0  ;;  %v8589_v42 = vpop.permute.xlu0 %8588 }
0x4082   : > { %v8600_v18 = vsel %vm997_vm2, %v8589_v42, 0.0  ;;  %8604 = vadd.xlane.f32.xlu0 %v8603_v49 }
0x4083   : > { %8601 = vadd.xlane.f32.xlu1 %v8600_v18 }
0x4085   : > { %v8593_v39 = vpop.permute.xlu1 %8592  ;;  %v8595_v14 = vpop.permute.xlu0 %8594 }
0x4086   : > { %v8606_v17 = vsel %vm997_vm2, %v8593_v39, 0.0  ;;  %v8609_v11 = vsel %vm997_vm2, %v8595_v14, 0.0 }
0x4087   : > { %8607 = vadd.xlane.f32.xlu1 %v8606_v17  ;;  %8610 = vadd.xlane.f32.xlu0 %v8609_v11 }
0x4088   : > { %v10150_v38 = vpop.f32.mrb[78].mxu0 }
0x4089   : > { %v7972_v10 = vpop.f32.mrb[79].mxu0  ;;  %v8487_v63 = vpop.permute.xlu0 %8486 }
0x408a   : > { %v8499_v12 = vsel %vm997_vm2, %v8487_v63, 0.0  ;;  %v7973_v51 = vadd.f32 %v7972_v10, %v7893_v15  ;;  %v8485_v59 = vpop.permute.xlu1 %8484 }
0x408b   : > { %8500 = vadd.xlane.f32.xlu0 %v8499_v12  ;;  %v8496_v22 = vsel %vm997_vm2, %v8485_v59, 0.0  ;;  %v8649_v59 = vstv %s9292_s7  ;;  %s13404_s7 = sld [smem:[#allocation9_spill]] }
0x408d   : > { %v8629_v48 = vpop.permute.xlu0 %8628 }
0x408e   : > { %v10153_v55 = vpop.f32.mrb[80].mxu0  ;;  %v8491_v23 = vpop.permute.xlu1 %8490 }
0x408f   : > { %v13069_v8 = vadd.f32 %v10153_v55, %v7893_v15  ;;  %v7982_v58 = vpop.f32.mrb[81].mxu0  ;;  %v8505_v28 = vsel %vm997_vm2, %v8491_v23, 0.0 }
0x4090   : > { %v13071_v56 = vadd.f32 %v7982_v58, %v7893_v15 }
0x4091   : > { %v8489_v49 = vpop.permute.xlu0 %8488 }
0x4092   : > { %v10172_v61 = vpop.f32.mrb[82].mxu0  ;;  %v8502_v42 = vsel %vm997_vm2, %v8489_v49, 0.0 }
0x4093   : > { %v13073_v35 = vadd.f32 %v10172_v61, %v7893_v15  ;;  %v8214_v2 = vpop.f32.mrb[83].mxu0 }
0x4094   : > { %v13075_v46 = vadd.f32 %v8214_v2, %v7893_v15 }
0x4096   : > { %v10175_v52 = vpop.f32.mrb[84].mxu0 }
0x4097   : > { %v13078_v5 = vadd.f32 %v10175_v52, %v7893_v15  ;;  %v8224_v36 = vpop.f32.mrb[85].mxu0 }
0x4098   : > { %v13080_v53 = vadd.f32 %v8224_v36, %v7893_v15  ;;  %8635 = vrot.lane.b32.xlu1 %v8539_v54, %s13400_s0  ;;  %s9295_s0 = sld [smem:[#allocation2 + $0x381]] }
0x40a1   : > { %8529 = vrot.lane.b32.xlu0 %v8527_v43, %s13378_s12  ;;  %v7978_v43 = vadd.f32 %v10150_v38, %v7893_v15 }
0x40a5   : > { %8684 = vrot.lane.b32.xlu0 %v7973_v51, %s13378_s12 }
0x40bc   : > { %8497 = vadd.xlane.f32.xlu1 %v8496_v22 }
0x40c0   : > { %8506 = vadd.xlane.f32.xlu1 %v8505_v28 }
0x40c4   : > { %8503 = vadd.xlane.f32.xlu0 %v8502_v42 }
0x40d1   : > { %8541 = vrot.lane.b32.xlu1 %v8539_v54, %s13378_s12 }
0x40d5   : > { %8700 = vrot.lane.b32.xlu1 %v12953_v50, %s13378_s12 }
0x40da   : > { %8686 = vrot.lane.b32.xlu0 %v7978_v43, %s13378_s12 }
0x410f   : > { %v8605_v18 = vpop.xlane.xlu0 %8604 }
0x4110   : > { %v8613_v39 = vmul.f32 0.125, %v8605_v18  ;;  %v8602_v14 = vpop.xlane.xlu1 %8601 }
0x4111   : > { %v8612_v17 = vmul.f32 0.125, %v8602_v14 }
0x4112   : > { %v8617_v11 = vadd.f32 1e-05, %v8613_v39 }
0x4113   : > { %v8616_v10 = vadd.f32 1e-05, %v8612_v17 }
0x4114   : > { %10902 = vrsqrt.f32 %v8617_v11  ;;  %v8608_v63 = vpop.xlane.xlu1 %8607  ;;  %v8611_v12 = vpop.xlane.xlu0 %8610 }
0x4115   : > { %10904 = vrsqrt.f32 %v8616_v10  ;;  %v8614_v55 = vmul.f32 0.125, %v8608_v63  ;;  %v8615_v58 = vmul.f32 0.125, %v8611_v12 }
0x4117   : > { %v8618_v61 = vadd.f32 1e-05, %v8614_v55  ;;  %v8619_v2 = vadd.f32 1e-05, %v8615_v58 }
0x4118   : > { %v8636_v52 = vpop.permute.xlu1 %8635 }
0x4119   : > { %10906 = vrsqrt.f32 %v8618_v61 }
0x411a   : > { %10908 = vrsqrt.f32 %v8619_v2 }
0x411e   : > { %v10903_v50 = vpop.eup %10902 }
0x411f   : > { %v10905_v38 = vpop.eup %10904  ;;  %v8625_v15 = vmul.f32 %v10903_v50, %v13011_v1 }
0x4120   : > { %v8624_v54 = vmul.f32 %v10905_v38, %v13014_v24 }
0x4121   : > { %v8632_v36 = vmul.f32 %v8629_v48, %v8625_v15 }
0x4122   : > { %v8631_v51 = vmul.f32 %v8629_v48, %v8624_v54 }
0x4123   : > { %v10907_v22 = vpop.eup %10906  ;;  %v8639_v23 = vadd.f32 %v8636_v52, %v8632_v36 }
0x4124   : > { %v10909_v28 = vpop.eup %10908  ;;  %v8626_v49 = vmul.f32 %v10907_v22, %v13022_v34  ;;  %v8638_v42 = vadd.f32 %v8636_v52, %v8631_v51 }
0x4125   : > { %v8627_v43 = vmul.f32 %v10909_v28, %v13025_v3  ;;  %v8651_v18 = vmul.f32 %v8649_v59, %v8639_v23  ;;  %v8723_v3 = vstv %s9295_s0  ;;  %s13405_s0 = sld [smem:[#allocation12_spill]] }
0x4126   : > { %v8650_v39 = vmul.f32 %v8649_v59, %v8638_v42  ;;  %v8633_v14 = vmul.f32 %v8629_v48, %v8626_v49 }
0x4127   : > { %v8634_v17 = vmul.f32 %v8629_v48, %v8627_v43  ;;  %8660 = vrot.lane.b32.xlu0 %v8651_v18, %s13370_s8  ;;  %v8725_v48 = vmul.f32 %v8723_v3, %v8639_v23 }
0x4128   : > { %8658 = vrot.lane.b32.xlu1 %v8650_v39, %s13370_s8  ;;  %v8640_v24 = vadd.f32 %v8636_v52, %v8633_v14 }
0x4129   : > { %v8641_v1 = vadd.f32 %v8636_v52, %v8634_v17 }
0x412a   : > { %v8652_v34 = vmul.f32 %v8649_v59, %v8640_v24 }
0x412b   : > { %8702 = vrot.lane.b32.xlu0 %v12951_v33, %s13378_s12  ;;  %v8653_v11 = vmul.f32 %v8649_v59, %v8641_v1  ;;  %v8724_v33 = vmul.f32 %v8723_v3, %v8638_v42  ;;  %s9302_s30 = sshll.u32 %s13405_s0, 7 }
0x412d   : > { %8664 = vrot.lane.b32.xlu1 %v8653_v11, %s13370_s8 }
0x412f   : > { %8690 = vrot.lane.b32.xlu0 %v13069_v8, %s13378_s12  ;;  %v8727_v8 = vmul.f32 %v8723_v3, %v8641_v1 }
0x4131   : > { %8662 = vrot.lane.b32.xlu1 %v8652_v34, %s13370_s8 }
0x4133   : > { %8706 = vrot.lane.b32.xlu0 %v12959_v37, %s13378_s12  ;;  %v8726_v37 = vmul.f32 %v8723_v3, %v8640_v24 }
0x4135   : > { %8688 = vrot.lane.b32.xlu1 %v13071_v56, %s13378_s12 }
0x4137   : > { %8734 = vrot.lane.b32.xlu0 %v8725_v48, %s13370_s8 }
0x4139   : > { %8704 = vrot.lane.b32.xlu1 %v12961_v62, %s13378_s12  ;;  %v8501_v62 = vpop.xlane.xlu0 %8500 }
0x413a   : > { %v8509_v63 = vmul.f32 0.125, %v8501_v62 }
0x413b   : > { %8758 = vrot.lane.b32.xlu0 %v13075_v46, %s13378_s12 }
0x413c   : > { %v8513_v58 = vadd.f32 1e-05, %v8509_v63 }
0x413d   : > { %8732 = vrot.lane.b32.xlu1 %v8724_v33, %s13370_s8  ;;  %v8530_v56 = vpop.permute.xlu0 %8529 }
0x413f   : > { %8760 = vrot.lane.b32.xlu0 %v13073_v35, %s13378_s12 }
0x4141   : > { %8738 = vrot.lane.b32.xlu1 %v8727_v8, %s13370_s8  ;;  %v8685_v12 = vpop.permute.xlu0 %8684 }
0x4145   : > { %8762 = vrot.lane.b32.xlu1 %v13080_v53, %s13378_s12 }
0x4149   : > { %8736 = vrot.lane.b32.xlu1 %v8726_v37, %s13370_s8  ;;  %v8498_v46 = vpop.xlane.xlu1 %8497  ;;  %s9293_s8 = sld [smem:[#allocation2 + $0x302]] }
0x414a   : > { %v8508_v10 = vmul.f32 0.125, %v8498_v46 }
0x414c   : > { %v8512_v35 = vadd.f32 1e-05, %v8508_v10 }
0x414d   : > { %8764 = vrot.lane.b32.xlu1 %v13078_v5, %s13378_s12  ;;  %v8507_v55 = vpop.xlane.xlu1 %8506  ;;  %s9291_s12 = sld [smem:[#allocation2 + $0x300]] }
0x414e   : > { %v8511_v61 = vmul.f32 0.125, %v8507_v55  ;;  %10910 = vrsqrt.f32 %v8512_v35 }
0x414f   : > { %10912 = vrsqrt.f32 %v8513_v58  ;;  %v8675_v34 = vstv %s9293_s8  ;;  %s848_s8 = sand.u32 1, %s13404_s7   ;;  %s10950_s7 = sshll.u32 %s11025_s5, 4  ;;  %s10951_s7 = int_to_ptr.vmem [resolvable:$false] %s10950_s7 }
0x4150   : > { %v8515_v53 = vadd.f32 1e-05, %v8511_v61  ;;  %s9028_s26 = sshll.u32 %s848_s8, 3  ;;  %s10952_s0 = scalar_lea.vmem %s10951_s7, 256 }
0x4151   : > { %v8504_v2 = vpop.xlane.xlu0 %8503  ;;  %v8542_v51 = vpop.permute.xlu1 %8541 }
0x4152   : > { %v8510_v50 = vmul.f32 0.125, %v8504_v2  ;;  %10914 = vrsqrt.f32 %v8515_v53 }
0x4153   : > { %v8643_v43 = vstv %s9291_s12 }
0x4154   : > { %v8514_v38 = vadd.f32 1e-05, %v8510_v50 }
0x4155   : > { %v8687_v42 = vpop.permute.xlu0 %8686  ;;  %v8701_v39 = vpop.permute.xlu1 %8700 }
0x4156   : > { %10916 = vrsqrt.f32 %v8514_v38 }
0x4158   : > { %v10911_v15 = vpop.eup %10910 }
0x4159   : > { %v10913_v5 = vpop.eup %10912  ;;  %v8520_v54 = vmul.f32 %v10911_v15, %v13036_v0  ;;  %v9190_v0 = vld [vmem:[%s13403_s2 + $0x10] sm:$0xff] }
0x415a   : > { %v8521_v52 = vmul.f32 %v10913_v5, %v13033_v21  ;;  %v9191_v21 = vld [vmem:[%s13403_s2 + $0x18] sm:$0xff]  ;;  %s850_s2 = scalar_lea.vmem [#allocation5], %s9028_s26 }
0x415b   : > { %v8532_v59 = vmul.f32 %v8530_v56, %v8520_v54  ;;  %s8951_s13 = sshll.u32 %s850_s2, 4  ;;  %s13214_s13 = int_to_ptr.vmem [resolvable:$true] %s8951_s13 }
0x415c   : > { %v10915_v36 = vpop.eup %10914  ;;  %v8533_v22 = vmul.f32 %v8530_v56, %v8521_v52  ;;  %s10946_s9 = scalar_lea.vmem %s13214_s13, 128  ;;  %p10953_p13 = scmp.lt.s32.totalorder %s13214_s13, %s10951_s7 }
0x415d   : > { %v8523_v23 = vmul.f32 %v10915_v36, %v13048_v26  ;;  %v13127_v18 = vadd.f32 %v8542_v51, %v8532_v59  ;;  %v10462_v26 = vpack.c.bf16 %v9191_v21, %v9190_v0  ;;  %p10947_p10 = scmp.ne.s32.totalorder %s13214_s13, %s10946_s9  ;;  %p10954_p0 = scmp.lt.s32.totalorder %s10952_s0, %s10946_s9 }
0x415e   : > { %v13125_v49 = vadd.f32 %v8542_v51, %v8533_v22 }
0x415f   : > { %v8535_v14 = vmul.f32 %v8530_v56, %v8523_v23  ;;  %10463 = vmatprep.subr.bf16.mxu0 %v10462_v26  ;;  %v8644_v11 = vmul.f32 %v8643_v43, %v13127_v18  ;;  %p10948_p11 = pnand %p10947_p10, %p11209_p5  ;;  %p10955_p1 = por %p10954_p0, %p10953_p13 }
0x4160   : > { %v10917_v28 = vpop.eup %10916  ;;  %v8645_v1 = vmul.f32 %v8643_v43, %v13125_v49  ;;  %10465 = vmatpush3.bf16.msra.mxu0 %v10462_v26 }
0x4161   : > { %v8522_v17 = vmul.f32 %v10917_v28, %v13056_v27  ;;  %v13138_v33 = vadd.f32 %v8542_v51, %v8535_v14  ;;  %v13148_v28 = vld [vmem:[%s13380_s4 + $0x8] sm:$0x3f]  ;;  %p10949_p12 = pneg %p10948_p11 }
0x4163   : > { %v8534_v8 = vmul.f32 %v8530_v56, %v8522_v17  ;;  %v8647_v27 = vmul.f32 %v8643_v43, %v13138_v33  ;;  %p10956_p2 = pnand %p10955_p1, %p10949_p12 }
0x4165   : > { %v8546_v63 = vadd.f32 %v8542_v51, %v8534_v8 }
0x4167   : > { %v8646_v38 = vmul.f32 %v8643_v43, %v8546_v63 }
0x4199   : > { %v8661_v24 = vpop.permute.xlu0 %8660 }
0x419a   : > { %v8671_v3 = vadd.f32 %v8661_v24, %v8645_v1  ;;  %v8659_v48 = vpop.permute.xlu1 %8658 }
0x419b   : > { %v8670_v37 = vadd.f32 %v8659_v48, %v8644_v11 }
0x419c   : > { %v8677_v62 = vadd.f32 %v8675_v34, %v8671_v3  ;;  %v8749_v3 = vstv %s9296_s3  ;;  %s8938_s3 = scalar_lea.sflag [#allocation3], %s848_s8 }
0x419d   : > { %v8676_v46 = vadd.f32 %v8675_v34, %v8670_v37  ;;  %v8703_v10 = vpop.permute.xlu0 %8702 }
0x419e   : > { %v8697_v2 = vadd.f32 %v8687_v42, %v8677_v62  ;;  %v6507_v42 = vrot.slane %v13148_v28, %v11430_v9 }
0x419f   : > { %v8696_v55 = vadd.f32 %v8685_v12, %v8676_v46  ;;  %v8665_v35 = vpop.permute.xlu1 %8664 }
0x41a0   : > { %v8673_v58 = vadd.f32 %v8665_v35, %v8647_v27  ;;  %v8713_v56 = vmul.f32 %v8703_v10, %v8697_v2  ;;  %v6592_v43 = vadd.f32 %v12669_v47, %v6507_v42  ;;  %v6597_v21 = vadd.f32 %v12675_v40, %v6507_v42 }
0x41a1   : > { %v8712_v61 = vmul.f32 %v8701_v39, %v8696_v55  ;;  %v8691_v53 = vpop.permute.xlu0 %8690  ;;  %v6587_v39 = vadd.f32 %v12671_v19, %v6507_v42  ;;  %v6602_v1 = vadd.f32 %v12673_v31, %v6507_v42 }
0x41a2   : > { %v8679_v50 = vadd.f32 %v8675_v34, %v8673_v58  ;;  %v6606_v0 = vadd.f32 %v6592_v43, %v12595_v44  ;;  %v13157_v14 = vadd.f32 %v6597_v21, %v12607_v4 }
0x41a3   : > { %v8663_v15 = vpop.permute.xlu1 %8662  ;;  %8782 = vrot.lane.b32.xlu0 %v8712_v61, %s13372_s28  ;;  %v13161_v26 = vadd.f32 %v6587_v39, %v12593_v16  ;;  %v13167_v44 = vadd.f32 %v6602_v1, %v12612_v60 }
0x41a4   : > { %v8672_v5 = vadd.f32 %v8663_v15, %v8646_v38  ;;  %v8699_v54 = vadd.f32 %v8691_v53, %v8679_v50  ;;  %v6612_v17 = vsel %vm997_vm2, %v6606_v0, 0.0  ;;  %v6615_v9 = vsel %vm997_vm2, %v13157_v14, 0.0 }
0x41a5   : > { %v8707_v52 = vpop.permute.xlu0 %8706  ;;  %v6609_v47 = vsel %vm997_vm2, %v13161_v26, 0.0  ;;  %v6618_v4 = vsel %vm997_vm2, %v13167_v44, 0.0 }
0x41a6   : > { %v8678_v36 = vadd.f32 %v8675_v34, %v8672_v5  ;;  %v8715_v51 = vmul.f32 %v8707_v52, %v8699_v54 }
0x41a7   : > { %v8689_v59 = vpop.permute.xlu1 %8688  ;;  %8784 = vrot.lane.b32.xlu0 %v8713_v56, %s13372_s28 }
0x41a8   : > { %v8698_v12 = vadd.f32 %v8689_v59, %v8678_v36 }
0x41a9   : > { %v8735_v40 = vpop.permute.xlu0 %8734 }
0x41ab   : > { %v8705_v22 = vpop.permute.xlu1 %8704  ;;  %8788 = vrot.lane.b32.xlu0 %v8715_v51, %s13372_s28 }
0x41ac   : > { %v8714_v23 = vmul.f32 %v8705_v22, %v8698_v12 }
0x41ad   : > { %v8759_v60 = vpop.permute.xlu0 %8758 }
0x41ae   : > { %8786 = vrot.lane.b32.xlu1 %v8714_v23, %s13372_s28  ;;  %s9294_s28 = sld [smem:[#allocation2 + $0x380]] }
0x41af   : > { %v8733_v16 = vpop.permute.xlu1 %8732 }
0x41b1   : > { %v8761_v10 = vpop.permute.xlu0 %8760 }
0x41b3   : > { %v8739_v19 = vpop.permute.xlu1 %8738 }
0x41b4   : > { %v8717_v31 = vstv %s9294_s28  ;;  %s13212_s28 = scalar_lea.hbm %s13407_s29, %s9302_s30 }
0x41b5   : > { %v8718_v24 = vmul.f32 %v8717_v31, %v13127_v18  ;;  %v8719_v48 = vmul.f32 %v8717_v31, %v13125_v49  ;;  %v8720_v27 = vmul.f32 %v8717_v31, %v8546_v63  ;;  %v8721_v61 = vmul.f32 %v8717_v31, %v13138_v33 }
0x41b7   : > { %v8744_v11 = vadd.f32 %v8733_v16, %v8718_v24  ;;  %v8763_v34 = vpop.permute.xlu1 %8762  ;;  %v8745_v37 = vadd.f32 %v8735_v40, %v8719_v48  ;;  %v8747_v53 = vadd.f32 %v8739_v19, %v8721_v61 }
0x41b9   : > { %v8750_v8 = vadd.f32 %v8749_v3, %v8744_v11  ;;  %v8751_v55 = vadd.f32 %v8749_v3, %v8745_v37  ;;  %v8753_v56 = vadd.f32 %v8749_v3, %v8747_v53 }
0x41bb   : > { %v8770_v62 = vadd.f32 %v8759_v60, %v8750_v8  ;;  %v8737_v46 = vpop.permute.xlu1 %8736  ;;  %v8771_v58 = vadd.f32 %v8761_v10, %v8751_v55 }
0x41bc   : > { %v8746_v35 = vadd.f32 %v8737_v46, %v8720_v27 }
0x41bd   : > { %v8774_v2 = vmul.f32 %v8770_v62, %v12982_v41  ;;  %v8775_v49 = vmul.f32 %v8771_v58, %v12984_v57 }
0x41be   : > { %v8752_v38 = vadd.f32 %v8749_v3, %v8746_v35 }
0x41bf   : > { %v8765_v15 = vpop.permute.xlu1 %8764 }
0x41c0   : > { %v8772_v54 = vadd.f32 %v8763_v34, %v8752_v38  ;;  %v8773_v33 = vadd.f32 %v8765_v15, %v8753_v56  ;;  %v6664_v56 = vrot.slane %v13148_v28, %v11438_v29 }
0x41c2   : > { %v8776_v41 = vmul.f32 %v8772_v54, %v12992_v32  ;;  %v8777_v36 = vmul.f32 %v8773_v33, %v12990_v25  ;;  %v6672_v33 = vrot.slane %v13148_v28, %v11441_v30 }
0x41ca   : > { %6613 = vadd.xlane.f32.xlu0 %v6612_v17 }
0x41ce   : > { %6616 = vadd.xlane.f32.xlu0 %v6615_v9 }
0x41d2   : > { %6610 = vadd.xlane.f32.xlu1 %v6609_v47 }
0x41d6   : > { %6619 = vadd.xlane.f32.xlu1 %v6618_v4 }
0x4215   : > { %v8783_v18 = vpop.permute.xlu0 %8782 }
0x4216   : > { %v8794_v50 = vsel %vm997_vm2, %v8783_v18, %v8774_v2 }
0x4217   : > { %10188 = vmatprep.mubr.msk.f32.mxu0 %vm1335_vm3, %v8794_v50 }
0x4219   : > { %v8785_v5 = vpop.permute.xlu0 %8784 }
0x421a   : > { %v8795_v63 = vsel %vm997_vm2, %v8785_v5, %v8775_v49 }
0x421b   : > { %10189 = vmatmul.mubr.msk.f32.vlgmr.msra.gmra.mrb[86].mxu0 %vm1335_vm3, %v8795_v63 }
0x421d   : > { %v8789_v52 = vpop.permute.xlu0 %8788 }
0x421e   : > { %v8797_v12 = vsel %vm997_vm2, %v8789_v52, %v8777_v36 }
0x4220   : > { %v8787_v59 = vpop.permute.xlu1 %8786 }
0x4221   : > { %v8796_v51 = vsel %vm997_vm2, %v8787_v59, %v8776_v41 }
0x4222   : > { %10191 = vmatprep.mubr.msk.f32.mxu0 %vm1335_vm3, %v8796_v51 }
0x4223   : > { %10192 = vmatmul.mubr.msk.f32.gmra.mrb[88].mxu0 %vm1335_vm3, %v8797_v12 }
0x4257   : > { %v6614_v57 = vpop.xlane.xlu0 %6613 }
0x4258   : > { %v6622_v22 = vmul.f32 0.125, %v6614_v57 }
0x425a   : > { %v6626_v23 = vsub.f32 %v6606_v0, %v6622_v22 }
0x425b   : > { %v6617_v42 = vpop.xlane.xlu0 %6616 }
0x425c   : > { %v6630_v43 = vmul.f32 %v6626_v23, %v6626_v23  ;;  %v6623_v21 = vmul.f32 0.125, %v6617_v42 }
0x425e   : > { %v6636_v39 = vsel %vm997_vm2, %v6630_v43, 0.0  ;;  %v6627_v17 = vsub.f32 %v13157_v14, %v6623_v21  ;;  %v10930_v14 = vld [vmem:[%s13280_s25 + $0x4] sm:$0x7] }
0x425f   : > { %v6611_v32 = vpop.xlane.xlu1 %6610  ;;  %6637 = vadd.xlane.f32.xlu1 %v6636_v39 }
0x4260   : > { %v6621_v25 = vmul.f32 0.125, %v6611_v32  ;;  %v6631_v0 = vmul.f32 %v6627_v17, %v6627_v17 }
0x4262   : > { %v6625_v1 = vsub.f32 %v13161_v26, %v6621_v25  ;;  %v6639_v24 = vsel %vm997_vm2, %v6631_v0, 0.0  ;;  %v8801_v26 = vrot.slane %v10930_v14, %v11359_v20 }
0x4263   : > { %v6620_v9 = vpop.xlane.xlu1 %6619 }
0x4264   : > { %v6624_v47 = vmul.f32 0.125, %v6620_v9  ;;  %v6629_v4 = vmul.f32 %v6625_v1, %v6625_v1 }
0x4266   : > { %v6628_v16 = vsub.f32 %v13167_v44, %v6624_v47  ;;  %v6633_v19 = vsel %vm997_vm2, %v6629_v4, 0.0 }
0x4267   : > { %6634 = vadd.xlane.f32.xlu0 %v6633_v19 }
0x4268   : > { %v6632_v31 = vmul.f32 %v6628_v16, %v6628_v16 }
0x426a   : > { %v6642_v40 = vsel %vm997_vm2, %v6632_v31, 0.0 }
0x426b   : > { %6643 = vadd.xlane.f32.xlu1 %v6642_v40  ;;  %6640 = vadd.xlane.f32.xlu0 %v6639_v24 }
0x42ec   : > { %v6638_v11 = vpop.xlane.xlu1 %6637 }
0x42ed   : > { %v6646_v44 = vmul.f32 0.125, %v6638_v11 }
0x42ee   : > { %v10190_v34 = vpop.f32.mrb[86].mxu0 }
0x42ef   : > { %v8880_v60 = vpop.f32.mrb[87].mxu0  ;;  %v8886_v48 = vadd.f32 %v10190_v34, %v8801_v26  ;;  %v6650_v37 = vadd.f32 1e-05, %v6646_v44 }
0x42f0   : > { %v8881_v3 = vadd.f32 %v8880_v60, %v8801_v26 }
0x42f1   : > { %v8900_v10 = vadd.f32 %v8886_v48, %v12780_v7  ;;  %10918 = vrsqrt.f32 %v6650_v37 }
0x42f2   : > { %v8899_v8 = vadd.f32 %v8881_v3, %v12776_v6 }
0x42f4   : > { %v6635_v62 = vpop.xlane.xlu0 %6634  ;;  %8903 = vxpose.xlu1.b32.start [1/4] (short) (narrow) %v8899_v8, 8 }
0x42f5   : > { %v6645_v46 = vmul.f32 0.125, %v6635_v62 }
0x42f6   : > { %v10193_v27 = vpop.f32.mrb[88].mxu0 }
0x42f7   : > { %v6649_v55 = vadd.f32 1e-05, %v6645_v46  ;;  %v8890_v35 = vpop.f32.mrb[89].mxu0  ;;  %v8896_v53 = vadd.f32 %v10193_v27, %v8801_v26 }
0x42f8   : > { %v8891_v58 = vadd.f32 %v8890_v35, %v8801_v26  ;;  %v6644_v61 = vpop.xlane.xlu1 %6643  ;;  %v6641_v20 = vpop.xlane.xlu0 %6640  ;;  %8904 = vxpose.xlu1.b32.cont [2/4] (short) (narrow) %v8900_v10, 8 }
0x42f9   : > { %10920 = vrsqrt.f32 %v6649_v55  ;;  %v6648_v2 = vmul.f32 0.125, %v6644_v61  ;;  %v6647_v18 = vmul.f32 0.125, %v6641_v20  ;;  %v8902_v49 = vadd.f32 %v8896_v53, %v12788_v13 }
0x42fa   : > { %v8901_v6 = vadd.f32 %v8891_v58, %v12784_v45 }
0x42fb   : > { %v6652_v50 = vadd.f32 1e-05, %v6648_v2  ;;  %v6651_v38 = vadd.f32 1e-05, %v6647_v18  ;;  %v10919_v7 = vpop.eup %10918 }
0x42fc   : > { %8905 = vxpose.xlu1.b32.cont [3/4] (short) (narrow) %v8901_v6, 8  ;;  %v6658_v63 = vmul.f32 %v10919_v7, %v6626_v23 }
0x42fd   : > { %10922 = vrsqrt.f32 %v6651_v38 }
0x42fe   : > { %10924 = vrsqrt.f32 %v6652_v50  ;;  %v6666_v41 = vmul.f32 %v6664_v56, %v6658_v63 }
0x4300   : > { %8906 = vxpose.xlu1.b32.end [4/4] (short) (narrow) %v8902_v49, 8  ;;  %v6674_v59 = vadd.f32 %v6672_v33, %v6666_v41 }
0x4303   : > { %v10921_v15 = vpop.eup %10920 }
0x4304   : > { %v6657_v5 = vmul.f32 %v10921_v15, %v6625_v1 }
0x4306   : > { %v6665_v54 = vmul.f32 %v6664_v56, %v6657_v5 }
0x4307   : > { %v10923_v45 = vpop.eup %10922 }
0x4308   : > { %v6673_v52 = vadd.f32 %v6672_v33, %v6665_v54  ;;  %v10925_v13 = vpop.eup %10924  ;;  %v6659_v36 = vmul.f32 %v10923_v45, %v6627_v17 }
0x4309   : > { %v6660_v12 = vmul.f32 %v10925_v13, %v6628_v16 }
0x430a   : > { %6677 = vxpose.xlu0.b32.start [1/4] (short) (narrow) %v6673_v52, 8  ;;  %v6667_v51 = vmul.f32 %v6664_v56, %v6659_v36 }
0x430b   : > { %v6668_v22 = vmul.f32 %v6664_v56, %v6660_v12 }
0x430c   : > { %v6675_v57 = vadd.f32 %v6672_v33, %v6667_v51 }
0x430d   : > { %v6676_v29 = vadd.f32 %v6672_v33, %v6668_v22 }
0x430e   : > { %6678 = vxpose.xlu0.b32.cont [2/4] (short) (narrow) %v6674_v59, 8 }
0x4312   : > { %6679 = vxpose.xlu0.b32.cont [3/4] (short) (narrow) %v6675_v57, 8 }
0x4316   : > { %6680 = vxpose.xlu0.b32.end [4/4] (short) (narrow) %v6676_v29, 8 }
0x4374   : > { %v8919_v30 = vpop.trf.xlu1 }
0x438a   : > { %v6693_v28 = vpop.trf.xlu0 }
0x438b   : > { %v8935_v23 = vmul.f32 %v8919_v30, %v6693_v28 }
0x438d   : > { %8936 = vst.msk [vmem:[%s850_s2] sm:$0xff] %vm920_vm1, %v8935_v23 }
0x438e   : > { %10959 = shalt.err (!%p10956_p2)
}
0x438f   : > { %s10960_s8 = scalar_lea.hbm %s13212_s28, 128  ;;  %s10964_s2 = scalar_lea.hbm %s13407_s29, 256 }
0x4390   : > { %p10961_p3 = scmp.ne.s32.totalorder %s13212_s28, %s10960_s8  ;;  %p10965_p8 = scmp.lt.u32.totalorder %s13212_s28, %s13407_s29 }
0x4391   : > { %p10966_p9 = scmp.lt.u32.totalorder %s10964_s2, %s10960_s8  ;;  %p10968_p11 = scmp.lt.u32.totalorder %s10960_s8, %s13212_s28 }
0x4392   : > { %p10962_p4 = pnand %p10961_p3, %p11209_p5 }
0x4393   : > { %p10967_p10 = por %p10966_p9, %p10965_p8 }
0x4394   : > { %p10963_p7 = pneg %p10962_p4 }
0x4395   : > { %p10969_p12 = por %p10968_p11, %p10967_p10 }
0x4397   : > { %p10970_p13 = pnand %p10969_p12, %p10963_p7 }
0x4399   : > { %10973 = shalt.err (!%p10970_p13)
}
0x439a   : > { %10470 = dma.vmem_to_hbm [thread:$0]  (%p11209_p5), %s13214_s13, 128, %s13212_s28, %s8938_s3  }
0x439b PF: > { %s13408_s9 = sld [smem:[#allocation11_spill]]  ;;  %s13409_s5 = sld [smem:[#allocation8_spill]] }
0x43a1   : > { %p10482_p0 = scmp.ge.s32.totalorder %s13408_s9, 2  ;;  %s8963_s0 = sand.u32 1, %s13409_s5  }
0x43a2   : > { %s8964_s26 = scalar_lea.sflag [#allocation3], %s8963_s0 }
0x43a3   : > { %p10477_p1 = pnand %p10482_p0, %p11213_p6 }
0x43a5   : > { %10995 = dma.done.wait (!%p10477_p1), %s8964_s26, 128  }
0x43a6   : > { %10997 = vsyncadd (!%p10477_p1), %s8964_s26, 4294967168  ;;  %s13411_s30 = sld [smem:[#allocation13_spill]]  ;;  %s13412_s8 = sld [smem:[#allocation9_spill]] }
0x43a7   : > { %s13413_s5 = sld [smem:[#allocation10_spill]]  ;;  %s13414_s9 = sld [smem:[#allocation14_spill]] }
0x43ac   : > { %p39_p2 = scmp.ge.s32.totalorder %s13411_s30, 4  }
0x43ae   :  { %41 = sbr.rel (!%p39_p2) target bundleno = 24 (0x18), region = 198 }
0x43b5   :  { %8969 = vsyncpa [#allocation3], 1 }
0x43b6   :  { %8971 = vsyncpa [#allocation3 + $0x1], 1 }
0x43b7   :  { %8972 = vsyncpa [#allocation4], 1 }
0x43b8   :  { %8974 = vsyncpa [#allocation4 + $0x1], 1 }

</bundles_post_ra>
